<compile_context>
chip_gen: v7x
topology: tpu7x:2x2x1
jax: 0.10.0
libtpu: 0.0.40
codegen_flags: <defaults>
</compile_context>

<pallas_src>
import functools

import jax
import jax.numpy as jnp
from jax import lax
from jax.experimental import pallas as pl
from jax.experimental.pallas import tpu as pltpu


# ----------------------------------------------------------------------------
# Conv1d + BatchNorm(eval, folded) + ReLU + MaxPool1d(2), whole batch per call.
# ----------------------------------------------------------------------------
def conv_bn_relu_pool_kernel(xp_ref, w_ref, b_ref, se_ref, o_ref, *,
                             cin_is_one):
    # xp_ref : (NB, Cin, L + 2*pad + 1)  zero-padded input slab (f32)
    # w_ref  : (K, Cout, Cin)            BN-folded conv weights (f32 if Cin==1
    #                                    for the VPU path, else bf16)
    # b_ref  : (Cout, 1)                 BN-folded bias (f32)
    # se_ref : (L, L//2)                 0/1 even-position selection (f32)
    # o_ref  : (NB, Cout, L//2)          pooled output (f32)
    NB = xp_ref.shape[0]
    K = w_ref.shape[0]
    Cout = w_ref.shape[1]
    L, Lh = se_ref.shape
    L1 = L + 1                      # extra column -> "shifted by one" neighbour

    bias = b_ref[...]               # (Cout, 1), tiny

    # TODO(synk): per the review this could fold the batch into the matmul
    # columns (or one im2col matmul) instead of per-sample depth-Cin matmuls;
    # conv is a few percent of total runtime, so that restructure (channels-
    # last layout + sublane pooling) is deliberately not taken here.
    @pl.loop(0, NB)
    def _(n):
        xp = xp_ref[n]                                   # (Cin, Lp) f32
        acc = jnp.zeros((Cout, L1), jnp.float32)
        if cin_is_one:
            # Contraction depth 1: skip the MXU, do a VPU broadcast-MAC.
            for k in range(K):                           # unrolled taps
                acc = acc + w_ref[k] * xp[:, k:k + L1]   # (Cout,1)*(1,L1)
        else:
            xpb = xp.astype(jnp.bfloat16)                # cast slab once
            for k in range(K):                           # unrolled taps
                acc = acc + jnp.dot(w_ref[k], xpb[:, k:k + L1],
                                    preferred_element_type=jnp.float32)

        y = jnp.maximum(acc + bias, 0.0)                 # (Cout, L+1)
        # MaxPool1d(2): m[:, l] = max(y[:, l], y[:, l+1]); keep even l with a
        # single 0/1 selection matmul, now in f32 so the selection is exact
        # (the extra column L of y only ever pairs with the discarded odd
        # column L-1).
        m = jnp.maximum(y[:, :L], y[:, 1:])              # (Cout, L)
        o_ref[n] = jnp.dot(m, se_ref[...],
                           preferred_element_type=jnp.float32)   # (Cout, Lh)


def conv_bn_relu_pool(x, w, b, gamma, beta, mean, var, pad, eps=1e-5):
    # x: (N, Cin, L) f32 ; w: (Cout, Cin, K) ; b/gamma/beta/mean/var: (Cout,)
    N, Cin, L = x.shape
    Cout, _, K = w.shape
    Lp = L + 2 * pad + 1            # +1 extra zero on the right (pooling shift)
    Lh = L // 2

    # Fold eval-mode BatchNorm into the convolution.
    scale = gamma / jnp.sqrt(var + eps)
    w_fold = (w * scale[:, None, None]).transpose(2, 0, 1)     # (K, Cout, Cin)
    b_fold = ((b - mean) * scale + beta).reshape(Cout, 1).astype(jnp.float32)
    if Cin == 1:
        w_fold = w_fold.astype(jnp.float32)      # VPU broadcast-MAC path
    else:
        w_fold = w_fold.astype(jnp.bfloat16)     # bf16 MXU operand

    x_pad = jnp.pad(x.astype(jnp.float32), ((0, 0), (0, 0), (pad, pad + 1)))

    li = jnp.arange(L)[:, None]
    jj = jnp.arange(Lh)[None, :]
    s_even = (li == 2 * jj).astype(jnp.float32)                 # (L, Lh)

    nb = 2 if N % 2 == 0 else 1     # 2 "parallel" grid steps (megacore on v7x)
    nblk = N // nb

    kernel = functools.partial(conv_bn_relu_pool_kernel,
                               cin_is_one=(Cin == 1))
    return pl.pallas_call(
        kernel,
        out_shape=jax.ShapeDtypeStruct((N, Cout, Lh), jnp.float32),
        grid=(nb,),
        in_specs=[
            pl.BlockSpec((nblk, Cin, Lp), lambda g: (g, 0, 0)),
            pl.BlockSpec((K, Cout, Cin), lambda g: (0, 0, 0)),
            pl.BlockSpec((Cout, 1), lambda g: (0, 0)),
            pl.BlockSpec((L, Lh), lambda g: (0, 0)),
        ],
        out_specs=pl.BlockSpec((nblk, Cout, Lh), lambda g: (g, 0, 0)),
        compiler_params=pltpu.CompilerParams(
            dimension_semantics=("parallel",)),
    )(x_pad, w_fold, b_fold, s_even)


# ----------------------------------------------------------------------------
# LSTM (input_size=1, hidden=64) over T steps + Linear(64,10) + LogSoftmax,
# in the lane-dense (batch, features) layout with a single-tanh gate pass.
# ----------------------------------------------------------------------------
LSTM_UNROLL = 12                     # micro-steps per fori_loop iteration


def lstm_logsoftmax_kernel(seq_ref, wih_ref, whhT_ref, b_ref,
                           woT_ref, bo_ref, o_ref):
    # seq_ref : (T//B, N, B)  blocked sequence, batch on sublanes (f32)
    # wih_ref : (1, 4H) f32   LSTM input weights as a row, i/f/o cols * 0.5
    # whhT_ref: (H, 4H) bf16  recurrent weights^T (stationary RHS), i/f/o * 0.5
    # b_ref   : (1, 4H) f32   b_ih + b_hh, i/f/o cols * 0.5
    # woT_ref : (H, C)  f32   output weights, transposed
    # bo_ref  : (1, C)  f32
    # o_ref   : (N, C)  f32   log-probabilities
    TB, N, B = seq_ref.shape
    H, H4 = whhT_ref.shape

    whhT = whhT_ref[...]                                  # (H, 4H) bf16
    # Hoist the sublane broadcasts of the loop-invariant x-path row operands
    # (JAX does not CSE broadcast_in_dim, so in-loop use would re-broadcast).
    wih_b = jnp.broadcast_to(wih_ref[...], (N, H4))       # (N, 4H) f32
    b_b = jnp.broadcast_to(b_ref[...], (N, H4))           # (N, 4H) f32

    def cell(xg, h, c):
        # xg: (N, 4H) f32  precomputed x_t * w_ih + b (off the recurrent chain)
        # h, c: (N, H) f32
        # TODO(synk): hold whhT weight-stationary in the MXU via
        # pltpu.matmul_push_rhs/matmul_acc_lhs/matmul_pop once validated on HW.
        gates = jnp.dot(h.astype(jnp.bfloat16), whhT,
                        preferred_element_type=jnp.float32) + xg   # (N, 4H)
        # Single EUP pass over the whole lane-dense gate slab.  The i/f/o
        # columns were pre-scaled by 0.5 host-side, so for those groups
        # sigmoid(z) == 0.5 * tanh(z/2) + 0.5; the g group is tanh(z) directly.
        t = jnp.tanh(gates)                               # (N, 4H)
        i = 0.5 * t[:, 0 * H:1 * H] + 0.5
        f = 0.5 * t[:, 1 * H:2 * H] + 0.5
        g = t[:, 2 * H:3 * H]
        o = 0.5 * t[:, 3 * H:4 * H] + 0.5
        c_new = f * c + i * g
        h_new = o * jnp.tanh(c_new)
        return h_new, c_new

    def outer(j, carry):
        h, c = carry
        blk = seq_ref[j]                                  # (N, B) f32, 1 read
        for k in range(B):                                # unrolled micro-steps
            # x-path is independent of h/c -> schedulable off the serial chain.
            xg = blk[:, k:k + 1] * wih_b + b_b            # (N, 4H)
            h, c = cell(xg, h, c)
        return (h, c)

    h0 = jnp.zeros((N, H), jnp.float32)
    c0 = jnp.zeros((N, H), jnp.float32)
    h, _ = lax.fori_loop(0, TB, outer, (h0, c0))

    logits = jnp.dot(h, woT_ref[...],
                     preferred_element_type=jnp.float32) + bo_ref[...]  # (N, C)
    m = jnp.max(logits, axis=1, keepdims=True)
    lse = m + jnp.log(jnp.sum(jnp.exp(logits - m), axis=1, keepdims=True))
    o_ref[...] = logits - lse


def lstm_last_logsoftmax(seq_blocks, w_ih, w_hh, b_ih, b_hh, w_out, b_out):
    # seq_blocks: (T//B, N, B) f32
    TB, N, B = seq_blocks.shape
    H4, H = w_hh.shape
    C = w_out.shape[0]

    # sigmoid(z) = 0.5 * tanh(z / 2) + 0.5  ->  pre-scale the i/f/o gate groups
    # (PyTorch LSTM gate order along 4H is i, f, g, o) by 0.5 so the kernel
    # needs only one tanh pass over the whole gate slab.
    gate_scale = jnp.concatenate([
        jnp.full((H,), 0.5, jnp.float32),    # i
        jnp.full((H,), 0.5, jnp.float32),    # f
        jnp.full((H,), 1.0, jnp.float32),    # g (stays tanh)
        jnp.full((H,), 0.5, jnp.float32),    # o
    ])
    wih_row = (w_ih.reshape(H4) * gate_scale).reshape(1, H4).astype(jnp.float32)
    whhT = (w_hh * gate_scale[:, None]).T.astype(jnp.bfloat16)        # (H, 4H)
    b_row = ((b_ih + b_hh) * gate_scale).reshape(1, H4).astype(jnp.float32)

    return pl.pallas_call(
        lstm_logsoftmax_kernel,
        out_shape=jax.ShapeDtypeStruct((N, C), jnp.float32),
    )(seq_blocks.astype(jnp.float32),
      wih_row,
      whhT,
      b_row,
      w_out.T.astype(jnp.float32),
      b_out.reshape(1, C).astype(jnp.float32))


# ----------------------------------------------------------------------------
# Full forward pass (matches CNN_RNN.forward)
# ----------------------------------------------------------------------------
def cnn_rnn_forward(x, params):
    # x: (18, 1, 400) f32 -> conv stack -> (18, 30, 50) -> reshape(18, 1500, 1)
    h = conv_bn_relu_pool(x, pad=4, **params["conv1"])   # (18, 32, 200)
    h = conv_bn_relu_pool(h, pad=4, **params["conv2"])   # (18, 64, 100)
    h = conv_bn_relu_pool(h, pad=4, **params["conv3"])   # (18, 30, 50)

    N = h.shape[0]
    flat = h.reshape(N, -1)          # Flatten -> (18, 1500) == reshape(18,1500,1)
    T = flat.shape[1]
    B = LSTM_UNROLL
    assert T % B == 0, (T, B)
    # (N, T) -> (T//B, N, B): one small (108 KB) XLA transpose outside kernels.
    # TODO(synk): could be eliminated by writing conv3's output directly in the
    # blocked layout (review: essentially-free few-microsecond win).
    seq_blocks = flat.reshape(N, T // B, B).transpose(1, 0, 2)
    return lstm_last_logsoftmax(seq_blocks, params["w_ih"], params["w_hh"],
                                params["b_ih"], params["b_hh"],
                                params["w_out"], params["b_out"])  # (18, 10)


# ----------------------------------------------------------------------------
# Deterministic parameter init (shapes from CNN_RNN.__init__)
# ----------------------------------------------------------------------------
def init_params(key):
    keys = iter(jax.random.split(key, 32))

    def nrm(shape, s=0.1):
        return (jax.random.normal(next(keys), shape) * s).astype(jnp.float32)

    def conv_bn(cout, cin, ksz):
        return dict(
            w=nrm((cout, cin, ksz)),
            b=nrm((cout,)),
            gamma=(1.0 + nrm((cout,))).astype(jnp.float32),
            beta=nrm((cout,)),
            mean=nrm((cout,)),
            var=jax.random.uniform(next(keys), (cout,), minval=0.5,
                                   maxval=1.5).astype(jnp.float32),
        )

    params = {
        "conv1": conv_bn(32, 1, 9),
        "conv2": conv_bn(64, 32, 9),
        "conv3": conv_bn(30, 64, 9),
        "w_ih": nrm((256, 1)),     # LSTM: 4*hidden x input_size
        "w_hh": nrm((256, 64)),    # LSTM: 4*hidden x hidden
        "b_ih": nrm((256,)),
        "b_hh": nrm((256,)),
        "w_out": nrm((10, 64)),    # Linear(64, 10)
        "b_out": nrm((10,)),
    }
    return params


if __name__ == "__main__":
    key = jax.random.PRNGKey(0)
    pkey, xkey = jax.random.split(key)
    params = init_params(pkey)

    # Input length 400 so that the conv stack yields 18*30*50 = 27000 elements,
    # satisfying the hard-coded reshape(18, 1500, 1) in forward().
    x = jax.random.normal(xkey, (18, 1, 400), dtype=jnp.float32)

    fwd = jax.jit(lambda xx: cnn_rnn_forward(xx, params))
    out = jax.block_until_ready(fwd(x))

    assert out.shape == (18, 10), out.shape
    assert bool(jnp.all(jnp.isfinite(out)))
    # log-softmax rows must (approximately) sum to 1 in prob space
    assert bool(jnp.all(jnp.abs(jnp.sum(jnp.exp(out), axis=1) - 1.0) < 1e-4))
    print("KERNEL_OK")
</pallas_src>

<mosaic_0001>
module attributes {stable_mosaic.version = 11 : i64} {
  func.func @conv_bn_relu_pool_kernel(%arg0: i32, %arg1: memref<9x1x409xf32, #tpu.memory_space<vmem>>, %arg2: memref<9x32x1xf32, #tpu.memory_space<vmem>>, %arg3: memref<32x1xf32, #tpu.memory_space<vmem>>, %arg4: memref<400x200xf32, #tpu.memory_space<vmem>>, %arg5: memref<9x32x200xf32, #tpu.memory_space<vmem>>) attributes {dimension_semantics = [#tpu.dimension_semantics<parallel>], iteration_bounds = array<i64: 2>, scalar_prefetch = 0 : i64, scratch_operands = 0 : i64, tpu.core_type = #tpu.core_type<tc>, window_params = [{transform_indices = @transform_0, window_bounds = array<i64: 9, 1, 409>}, {pipeline_mode = #tpu.pipeline_mode<synchronous>, transform_indices = @transform_1, window_bounds = array<i64: 9, 32, 1>}, {pipeline_mode = #tpu.pipeline_mode<synchronous>, transform_indices = @transform_2, window_bounds = array<i64: 32, 1>}, {pipeline_mode = #tpu.pipeline_mode<synchronous>, transform_indices = @transform_3, window_bounds = array<i64: 400, 200>}, {transform_indices = @transform_4, window_bounds = array<i64: 9, 32, 200>}]} {
    %c0 = arith.constant 0 : index
    %c0_0 = arith.constant 0 : index
    %0 = vector.load %arg3[%c0, %c0_0] : memref<32x1xf32, #tpu.memory_space<vmem>>, vector<32x1xf32>
    %c0_i32 = arith.constant 0 : i32
    %c9_i32 = arith.constant 9 : i32
    %1 = arith.addi %c0_i32, %c9_i32 : i32
    %c1_i32 = arith.constant 1 : i32
    scf.for %arg6 = %c0_i32 to %1 step %c1_i32  : i32 {
      %c1_i32_2 = arith.constant 1 : i32
      %2 = arith.muli %arg6, %c1_i32_2 : i32
      %c0_i32_3 = arith.constant 0 : i32
      %3 = arith.addi %c0_i32_3, %2 : i32
      %4 = arith.index_cast %3 : i32 to index
      %c0_4 = arith.constant 0 : index
      %c0_5 = arith.constant 0 : index
      %5 = vector.load %arg1[%4, %c0_4, %c0_5] : memref<9x1x409xf32, #tpu.memory_space<vmem>>, vector<1x1x409xf32>
      %6 = vector.shape_cast %5 : vector<1x1x409xf32> to vector<1x409xf32>
      %cst = arith.constant 0.000000e+00 : f32
      %7 = vector.broadcast %cst : f32 to vector<32x401xf32>
      %c0_6 = arith.constant 0 : index
      %c0_7 = arith.constant 0 : index
      %c0_8 = arith.constant 0 : index
      %8 = vector.load %arg2[%c0_6, %c0_7, %c0_8] : memref<9x32x1xf32, #tpu.memory_space<vmem>>, vector<1x32x1xf32>
      %9 = vector.shape_cast %8 : vector<1x32x1xf32> to vector<32x1xf32>
      %10 = vector.extract_strided_slice %6 {offsets = [0, 0], sizes = [1, 401], strides = [1, 1]} : vector<1x409xf32> to vector<1x401xf32>
      %11 = vector.broadcast %9 : vector<32x1xf32> to vector<32x401xf32>
      %12 = vector.broadcast %10 : vector<1x401xf32> to vector<32x401xf32>
      %13 = arith.mulf %11, %12 : vector<32x401xf32>
      %14 = arith.addf %7, %13 : vector<32x401xf32>
      %c1 = arith.constant 1 : index
      %c0_9 = arith.constant 0 : index
      %c0_10 = arith.constant 0 : index
      %15 = vector.load %arg2[%c1, %c0_9, %c0_10] : memref<9x32x1xf32, #tpu.memory_space<vmem>>, vector<1x32x1xf32>
      %16 = vector.shape_cast %15 : vector<1x32x1xf32> to vector<32x1xf32>
      %17 = vector.extract_strided_slice %6 {offsets = [0, 1], sizes = [1, 401], strides = [1, 1]} : vector<1x409xf32> to vector<1x401xf32>
      %18 = vector.broadcast %16 : vector<32x1xf32> to vector<32x401xf32>
      %19 = vector.broadcast %17 : vector<1x401xf32> to vector<32x401xf32>
      %20 = arith.mulf %18, %19 : vector<32x401xf32>
      %21 = arith.addf %14, %20 : vector<32x401xf32>
      %c2 = arith.constant 2 : index
      %c0_11 = arith.constant 0 : index
      %c0_12 = arith.constant 0 : index
      %22 = vector.load %arg2[%c2, %c0_11, %c0_12] : memref<9x32x1xf32, #tpu.memory_space<vmem>>, vector<1x32x1xf32>
      %23 = vector.shape_cast %22 : vector<1x32x1xf32> to vector<32x1xf32>
      %24 = vector.extract_strided_slice %6 {offsets = [0, 2], sizes = [1, 401], strides = [1, 1]} : vector<1x409xf32> to vector<1x401xf32>
      %25 = vector.broadcast %23 : vector<32x1xf32> to vector<32x401xf32>
      %26 = vector.broadcast %24 : vector<1x401xf32> to vector<32x401xf32>
      %27 = arith.mulf %25, %26 : vector<32x401xf32>
      %28 = arith.addf %21, %27 : vector<32x401xf32>
      %c3 = arith.constant 3 : index
      %c0_13 = arith.constant 0 : index
      %c0_14 = arith.constant 0 : index
      %29 = vector.load %arg2[%c3, %c0_13, %c0_14] : memref<9x32x1xf32, #tpu.memory_space<vmem>>, vector<1x32x1xf32>
      %30 = vector.shape_cast %29 : vector<1x32x1xf32> to vector<32x1xf32>
      %31 = vector.extract_strided_slice %6 {offsets = [0, 3], sizes = [1, 401], strides = [1, 1]} : vector<1x409xf32> to vector<1x401xf32>
      %32 = vector.broadcast %30 : vector<32x1xf32> to vector<32x401xf32>
      %33 = vector.broadcast %31 : vector<1x401xf32> to vector<32x401xf32>
      %34 = arith.mulf %32, %33 : vector<32x401xf32>
      %35 = arith.addf %28, %34 : vector<32x401xf32>
      %c4 = arith.constant 4 : index
      %c0_15 = arith.constant 0 : index
      %c0_16 = arith.constant 0 : index
      %36 = vector.load %arg2[%c4, %c0_15, %c0_16] : memref<9x32x1xf32, #tpu.memory_space<vmem>>, vector<1x32x1xf32>
      %37 = vector.shape_cast %36 : vector<1x32x1xf32> to vector<32x1xf32>
      %38 = vector.extract_strided_slice %6 {offsets = [0, 4], sizes = [1, 401], strides = [1, 1]} : vector<1x409xf32> to vector<1x401xf32>
      %39 = vector.broadcast %37 : vector<32x1xf32> to vector<32x401xf32>
      %40 = vector.broadcast %38 : vector<1x401xf32> to vector<32x401xf32>
      %41 = arith.mulf %39, %40 : vector<32x401xf32>
      %42 = arith.addf %35, %41 : vector<32x401xf32>
      %c5 = arith.constant 5 : index
      %c0_17 = arith.constant 0 : index
      %c0_18 = arith.constant 0 : index
      %43 = vector.load %arg2[%c5, %c0_17, %c0_18] : memref<9x32x1xf32, #tpu.memory_space<vmem>>, vector<1x32x1xf32>
      %44 = vector.shape_cast %43 : vector<1x32x1xf32> to vector<32x1xf32>
      %45 = vector.extract_strided_slice %6 {offsets = [0, 5], sizes = [1, 401], strides = [1, 1]} : vector<1x409xf32> to vector<1x401xf32>
      %46 = vector.broadcast %44 : vector<32x1xf32> to vector<32x401xf32>
      %47 = vector.broadcast %45 : vector<1x401xf32> to vector<32x401xf32>
      %48 = arith.mulf %46, %47 : vector<32x401xf32>
      %49 = arith.addf %42, %48 : vector<32x401xf32>
      %c6 = arith.constant 6 : index
      %c0_19 = arith.constant 0 : index
      %c0_20 = arith.constant 0 : index
      %50 = vector.load %arg2[%c6, %c0_19, %c0_20] : memref<9x32x1xf32, #tpu.memory_space<vmem>>, vector<1x32x1xf32>
      %51 = vector.shape_cast %50 : vector<1x32x1xf32> to vector<32x1xf32>
      %52 = vector.extract_strided_slice %6 {offsets = [0, 6], sizes = [1, 401], strides = [1, 1]} : vector<1x409xf32> to vector<1x401xf32>
      %53 = vector.broadcast %51 : vector<32x1xf32> to vector<32x401xf32>
      %54 = vector.broadcast %52 : vector<1x401xf32> to vector<32x401xf32>
      %55 = arith.mulf %53, %54 : vector<32x401xf32>
      %56 = arith.addf %49, %55 : vector<32x401xf32>
      %c7 = arith.constant 7 : index
      %c0_21 = arith.constant 0 : index
      %c0_22 = arith.constant 0 : index
      %57 = vector.load %arg2[%c7, %c0_21, %c0_22] : memref<9x32x1xf32, #tpu.memory_space<vmem>>, vector<1x32x1xf32>
      %58 = vector.shape_cast %57 : vector<1x32x1xf32> to vector<32x1xf32>
      %59 = vector.extract_strided_slice %6 {offsets = [0, 7], sizes = [1, 401], strides = [1, 1]} : vector<1x409xf32> to vector<1x401xf32>
      %60 = vector.broadcast %58 : vector<32x1xf32> to vector<32x401xf32>
      %61 = vector.broadcast %59 : vector<1x401xf32> to vector<32x401xf32>
      %62 = arith.mulf %60, %61 : vector<32x401xf32>
      %63 = arith.addf %56, %62 : vector<32x401xf32>
      %c8 = arith.constant 8 : index
      %c0_23 = arith.constant 0 : index
      %c0_24 = arith.constant 0 : index
      %64 = vector.load %arg2[%c8, %c0_23, %c0_24] : memref<9x32x1xf32, #tpu.memory_space<vmem>>, vector<1x32x1xf32>
      %65 = vector.shape_cast %64 : vector<1x32x1xf32> to vector<32x1xf32>
      %66 = vector.extract_strided_slice %6 {offsets = [0, 8], sizes = [1, 401], strides = [1, 1]} : vector<1x409xf32> to vector<1x401xf32>
      %67 = vector.broadcast %65 : vector<32x1xf32> to vector<32x401xf32>
      %68 = vector.broadcast %66 : vector<1x401xf32> to vector<32x401xf32>
      %69 = arith.mulf %67, %68 : vector<32x401xf32>
      %70 = arith.addf %63, %69 : vector<32x401xf32>
      %71 = vector.broadcast %0 : vector<32x1xf32> to vector<32x401xf32>
      %72 = arith.addf %70, %71 : vector<32x401xf32>
      %cst_25 = arith.constant 0.000000e+00 : f32
      %73 = vector.broadcast %cst_25 : f32 to vector<32x401xf32>
      %74 = arith.maximumf %72, %73 : vector<32x401xf32>
      %75 = vector.extract_strided_slice %74 {offsets = [0, 0], sizes = [32, 400], strides = [1, 1]} : vector<32x401xf32> to vector<32x400xf32>
      %76 = vector.extract_strided_slice %74 {offsets = [0, 1], sizes = [32, 400], strides = [1, 1]} : vector<32x401xf32> to vector<32x400xf32>
      %77 = arith.maximumf %75, %76 : vector<32x400xf32>
      %c0_26 = arith.constant 0 : index
      %c0_27 = arith.constant 0 : index
      %78 = vector.load %arg4[%c0_26, %c0_27] : memref<400x200xf32, #tpu.memory_space<vmem>>, vector<400x200xf32>
      %cst_28 = arith.constant dense<0.000000e+00> : vector<32x200xf32>
      %79 = tpu.matmul %77, %78, %cst_28 {dimension_numbers = #tpu.dot_dimension_numbers<[1], [0], [0], [1], [0, 0, 1, 1], [], []>} : vector<32x400xf32>, vector<400x200xf32>, vector<32x200xf32> -> vector<32x200xf32>
      %80 = arith.index_cast %3 : i32 to index
      %c0_29 = arith.constant 0 : index
      %c0_30 = arith.constant 0 : index
      %81 = vector.load %arg5[%80, %c0_29, %c0_30] : memref<9x32x200xf32, #tpu.memory_space<vmem>>, vector<1x32x200xf32>
      %82 = vector.shape_cast %81 : vector<1x32x200xf32> to vector<32x200xf32>
      %83 = vector.shape_cast %79 : vector<32x200xf32> to vector<1x32x200xf32>
      tpu.vector_store %arg5[%80, %c0_29, %c0_30], %83 {strides = array<i32>} : memref<9x32x200xf32, #tpu.memory_space<vmem>>, vector<1x32x200xf32>,
    }
    %c9_i32_1 = arith.constant 9 : i32
    return
  }
  func.func @transform_0(%arg0: i32) -> (i32, i32, i32) {
    %c0_i32 = arith.constant 0 : i32
    %c0_i32_0 = arith.constant 0 : i32
    %c0_i32_1 = arith.constant 0 : i32
    return %arg0, %c0_i32, %c0_i32_0 : i32, i32, i32
  }
  func.func @transform_1(%arg0: i32) -> (i32, i32, i32) {
    %c0_i32 = arith.constant 0 : i32
    %c0_i32_0 = arith.constant 0 : i32
    %c0_i32_1 = arith.constant 0 : i32
    %c0_i32_2 = arith.constant 0 : i32
    return %c0_i32, %c0_i32_0, %c0_i32_1 : i32, i32, i32
  }
  func.func @transform_2(%arg0: i32) -> (i32, i32) {
    %c0_i32 = arith.constant 0 : i32
    %c0_i32_0 = arith.constant 0 : i32
    %c0_i32_1 = arith.constant 0 : i32
    return %c0_i32, %c0_i32_0 : i32, i32
  }
  func.func @transform_3(%arg0: i32) -> (i32, i32) {
    %c0_i32 = arith.constant 0 : i32
    %c0_i32_0 = arith.constant 0 : i32
    %c0_i32_1 = arith.constant 0 : i32
    return %c0_i32, %c0_i32_0 : i32, i32
  }
  func.func @transform_4(%arg0: i32) -> (i32, i32, i32) {
    %c0_i32 = arith.constant 0 : i32
    %c0_i32_0 = arith.constant 0 : i32
    %c0_i32_1 = arith.constant 0 : i32
    return %arg0, %c0_i32, %c0_i32_0 : i32, i32, i32
  }
}

module attributes {stable_mosaic.version = 11 : i64} {
  func.func @conv_bn_relu_pool_kernel(%arg0: i32, %arg1: memref<9x32x209xf32, #tpu.memory_space<vmem>>, %arg2: memref<9x64x32xbf16, #tpu.memory_space<vmem>>, %arg3: memref<64x1xf32, #tpu.memory_space<vmem>>, %arg4: memref<200x100xf32, #tpu.memory_space<vmem>>, %arg5: memref<9x64x100xf32, #tpu.memory_space<vmem>>) attributes {dimension_semantics = [#tpu.dimension_semantics<parallel>], iteration_bounds = array<i64: 2>, scalar_prefetch = 0 : i64, scratch_operands = 0 : i64, tpu.core_type = #tpu.core_type<tc>, window_params = [{transform_indices = @transform_0, window_bounds = array<i64: 9, 32, 209>}, {pipeline_mode = #tpu.pipeline_mode<synchronous>, transform_indices = @transform_1, window_bounds = array<i64: 9, 64, 32>}, {pipeline_mode = #tpu.pipeline_mode<synchronous>, transform_indices = @transform_2, window_bounds = array<i64: 64, 1>}, {pipeline_mode = #tpu.pipeline_mode<synchronous>, transform_indices = @transform_3, window_bounds = array<i64: 200, 100>}, {transform_indices = @transform_4, window_bounds = array<i64: 9, 64, 100>}]} {
    %c0 = arith.constant 0 : index
    %c0_0 = arith.constant 0 : index
    %0 = vector.load %arg3[%c0, %c0_0] : memref<64x1xf32, #tpu.memory_space<vmem>>, vector<64x1xf32>
    %c0_i32 = arith.constant 0 : i32
    %c9_i32 = arith.constant 9 : i32
    %1 = arith.addi %c0_i32, %c9_i32 : i32
    %c1_i32 = arith.constant 1 : i32
    scf.for %arg6 = %c0_i32 to %1 step %c1_i32  : i32 {
      %c1_i32_2 = arith.constant 1 : i32
      %2 = arith.muli %arg6, %c1_i32_2 : i32
      %c0_i32_3 = arith.constant 0 : i32
      %3 = arith.addi %c0_i32_3, %2 : i32
      %4 = arith.index_cast %3 : i32 to index
      %c0_4 = arith.constant 0 : index
      %c0_5 = arith.constant 0 : index
      %5 = vector.load %arg1[%4, %c0_4, %c0_5] : memref<9x32x209xf32, #tpu.memory_space<vmem>>, vector<1x32x209xf32>
      %6 = vector.shape_cast %5 : vector<1x32x209xf32> to vector<32x209xf32>
      %cst = arith.constant 0.000000e+00 : f32
      %7 = vector.broadcast %cst : f32 to vector<64x201xf32>
      %8 = arith.truncf %6 : vector<32x209xf32> to vector<32x209xbf16>
      %c0_6 = arith.constant 0 : index
      %c0_7 = arith.constant 0 : index
      %c0_8 = arith.constant 0 : index
      %9 = vector.load %arg2[%c0_6, %c0_7, %c0_8] : memref<9x64x32xbf16, #tpu.memory_space<vmem>>, vector<1x64x32xbf16>
      %10 = vector.shape_cast %9 : vector<1x64x32xbf16> to vector<64x32xbf16>
      %11 = vector.extract_strided_slice %8 {offsets = [0, 0], sizes = [32, 201], strides = [1, 1]} : vector<32x209xbf16> to vector<32x201xbf16>
      %cst_9 = arith.constant dense<0.000000e+00> : vector<64x201xf32>
      %12 = tpu.matmul %10, %11, %cst_9 {dimension_numbers = #tpu.dot_dimension_numbers<[1], [0], [0], [1], [0, 0, 1, 1], [], []>} : vector<64x32xbf16>, vector<32x201xbf16>, vector<64x201xf32> -> vector<64x201xf32>
      %13 = arith.addf %7, %12 : vector<64x201xf32>
      %c1 = arith.constant 1 : index
      %c0_10 = arith.constant 0 : index
      %c0_11 = arith.constant 0 : index
      %14 = vector.load %arg2[%c1, %c0_10, %c0_11] : memref<9x64x32xbf16, #tpu.memory_space<vmem>>, vector<1x64x32xbf16>
      %15 = vector.shape_cast %14 : vector<1x64x32xbf16> to vector<64x32xbf16>
      %16 = vector.extract_strided_slice %8 {offsets = [0, 1], sizes = [32, 201], strides = [1, 1]} : vector<32x209xbf16> to vector<32x201xbf16>
      %cst_12 = arith.constant dense<0.000000e+00> : vector<64x201xf32>
      %17 = tpu.matmul %15, %16, %cst_12 {dimension_numbers = #tpu.dot_dimension_numbers<[1], [0], [0], [1], [0, 0, 1, 1], [], []>} : vector<64x32xbf16>, vector<32x201xbf16>, vector<64x201xf32> -> vector<64x201xf32>
      %18 = arith.addf %13, %17 : vector<64x201xf32>
      %c2 = arith.constant 2 : index
      %c0_13 = arith.constant 0 : index
      %c0_14 = arith.constant 0 : index
      %19 = vector.load %arg2[%c2, %c0_13, %c0_14] : memref<9x64x32xbf16, #tpu.memory_space<vmem>>, vector<1x64x32xbf16>
      %20 = vector.shape_cast %19 : vector<1x64x32xbf16> to vector<64x32xbf16>
      %21 = vector.extract_strided_slice %8 {offsets = [0, 2], sizes = [32, 201], strides = [1, 1]} : vector<32x209xbf16> to vector<32x201xbf16>
      %cst_15 = arith.constant dense<0.000000e+00> : vector<64x201xf32>
      %22 = tpu.matmul %20, %21, %cst_15 {dimension_numbers = #tpu.dot_dimension_numbers<[1], [0], [0], [1], [0, 0, 1, 1], [], []>} : vector<64x32xbf16>, vector<32x201xbf16>, vector<64x201xf32> -> vector<64x201xf32>
      %23 = arith.addf %18, %22 : vector<64x201xf32>
      %c3 = arith.constant 3 : index
      %c0_16 = arith.constant 0 : index
      %c0_17 = arith.constant 0 : index
      %24 = vector.load %arg2[%c3, %c0_16, %c0_17] : memref<9x64x32xbf16, #tpu.memory_space<vmem>>, vector<1x64x32xbf16>
      %25 = vector.shape_cast %24 : vector<1x64x32xbf16> to vector<64x32xbf16>
      %26 = vector.extract_strided_slice %8 {offsets = [0, 3], sizes = [32, 201], strides = [1, 1]} : vector<32x209xbf16> to vector<32x201xbf16>
      %cst_18 = arith.constant dense<0.000000e+00> : vector<64x201xf32>
      %27 = tpu.matmul %25, %26, %cst_18 {dimension_numbers = #tpu.dot_dimension_numbers<[1], [0], [0], [1], [0, 0, 1, 1], [], []>} : vector<64x32xbf16>, vector<32x201xbf16>, vector<64x201xf32> -> vector<64x201xf32>
      %28 = arith.addf %23, %27 : vector<64x201xf32>
      %c4 = arith.constant 4 : index
      %c0_19 = arith.constant 0 : index
      %c0_20 = arith.constant 0 : index
      %29 = vector.load %arg2[%c4, %c0_19, %c0_20] : memref<9x64x32xbf16, #tpu.memory_space<vmem>>, vector<1x64x32xbf16>
      %30 = vector.shape_cast %29 : vector<1x64x32xbf16> to vector<64x32xbf16>
      %31 = vector.extract_strided_slice %8 {offsets = [0, 4], sizes = [32, 201], strides = [1, 1]} : vector<32x209xbf16> to vector<32x201xbf16>
      %cst_21 = arith.constant dense<0.000000e+00> : vector<64x201xf32>
      %32 = tpu.matmul %30, %31, %cst_21 {dimension_numbers = #tpu.dot_dimension_numbers<[1], [0], [0], [1], [0, 0, 1, 1], [], []>} : vector<64x32xbf16>, vector<32x201xbf16>, vector<64x201xf32> -> vector<64x201xf32>
      %33 = arith.addf %28, %32 : vector<64x201xf32>
      %c5 = arith.constant 5 : index
      %c0_22 = arith.constant 0 : index
      %c0_23 = arith.constant 0 : index
      %34 = vector.load %arg2[%c5, %c0_22, %c0_23] : memref<9x64x32xbf16, #tpu.memory_space<vmem>>, vector<1x64x32xbf16>
      %35 = vector.shape_cast %34 : vector<1x64x32xbf16> to vector<64x32xbf16>
      %36 = vector.extract_strided_slice %8 {offsets = [0, 5], sizes = [32, 201], strides = [1, 1]} : vector<32x209xbf16> to vector<32x201xbf16>
      %cst_24 = arith.constant dense<0.000000e+00> : vector<64x201xf32>
      %37 = tpu.matmul %35, %36, %cst_24 {dimension_numbers = #tpu.dot_dimension_numbers<[1], [0], [0], [1], [0, 0, 1, 1], [], []>} : vector<64x32xbf16>, vector<32x201xbf16>, vector<64x201xf32> -> vector<64x201xf32>
      %38 = arith.addf %33, %37 : vector<64x201xf32>
      %c6 = arith.constant 6 : index
      %c0_25 = arith.constant 0 : index
      %c0_26 = arith.constant 0 : index
      %39 = vector.load %arg2[%c6, %c0_25, %c0_26] : memref<9x64x32xbf16, #tpu.memory_space<vmem>>, vector<1x64x32xbf16>
      %40 = vector.shape_cast %39 : vector<1x64x32xbf16> to vector<64x32xbf16>
      %41 = vector.extract_strided_slice %8 {offsets = [0, 6], sizes = [32, 201], strides = [1, 1]} : vector<32x209xbf16> to vector<32x201xbf16>
      %cst_27 = arith.constant dense<0.000000e+00> : vector<64x201xf32>
      %42 = tpu.matmul %40, %41, %cst_27 {dimension_numbers = #tpu.dot_dimension_numbers<[1], [0], [0], [1], [0, 0, 1, 1], [], []>} : vector<64x32xbf16>, vector<32x201xbf16>, vector<64x201xf32> -> vector<64x201xf32>
      %43 = arith.addf %38, %42 : vector<64x201xf32>
      %c7 = arith.constant 7 : index
      %c0_28 = arith.constant 0 : index
      %c0_29 = arith.constant 0 : index
      %44 = vector.load %arg2[%c7, %c0_28, %c0_29] : memref<9x64x32xbf16, #tpu.memory_space<vmem>>, vector<1x64x32xbf16>
      %45 = vector.shape_cast %44 : vector<1x64x32xbf16> to vector<64x32xbf16>
      %46 = vector.extract_strided_slice %8 {offsets = [0, 7], sizes = [32, 201], strides = [1, 1]} : vector<32x209xbf16> to vector<32x201xbf16>
      %cst_30 = arith.constant dense<0.000000e+00> : vector<64x201xf32>
      %47 = tpu.matmul %45, %46, %cst_30 {dimension_numbers = #tpu.dot_dimension_numbers<[1], [0], [0], [1], [0, 0, 1, 1], [], []>} : vector<64x32xbf16>, vector<32x201xbf16>, vector<64x201xf32> -> vector<64x201xf32>
      %48 = arith.addf %43, %47 : vector<64x201xf32>
      %c8 = arith.constant 8 : index
      %c0_31 = arith.constant 0 : index
      %c0_32 = arith.constant 0 : index
      %49 = vector.load %arg2[%c8, %c0_31, %c0_32] : memref<9x64x32xbf16, #tpu.memory_space<vmem>>, vector<1x64x32xbf16>
      %50 = vector.shape_cast %49 : vector<1x64x32xbf16> to vector<64x32xbf16>
      %51 = vector.extract_strided_slice %8 {offsets = [0, 8], sizes = [32, 201], strides = [1, 1]} : vector<32x209xbf16> to vector<32x201xbf16>
      %cst_33 = arith.constant dense<0.000000e+00> : vector<64x201xf32>
      %52 = tpu.matmul %50, %51, %cst_33 {dimension_numbers = #tpu.dot_dimension_numbers<[1], [0], [0], [1], [0, 0, 1, 1], [], []>} : vector<64x32xbf16>, vector<32x201xbf16>, vector<64x201xf32> -> vector<64x201xf32>
      %53 = arith.addf %48, %52 : vector<64x201xf32>
      %54 = vector.broadcast %0 : vector<64x1xf32> to vector<64x201xf32>
      %55 = arith.addf %53, %54 : vector<64x201xf32>
      %cst_34 = arith.constant 0.000000e+00 : f32
      %56 = vector.broadcast %cst_34 : f32 to vector<64x201xf32>
      %57 = arith.maximumf %55, %56 : vector<64x201xf32>
      %58 = vector.extract_strided_slice %57 {offsets = [0, 0], sizes = [64, 200], strides = [1, 1]} : vector<64x201xf32> to vector<64x200xf32>
      %59 = vector.extract_strided_slice %57 {offsets = [0, 1], sizes = [64, 200], strides = [1, 1]} : vector<64x201xf32> to vector<64x200xf32>
      %60 = arith.maximumf %58, %59 : vector<64x200xf32>
      %c0_35 = arith.constant 0 : index
      %c0_36 = arith.constant 0 : index
      %61 = vector.load %arg4[%c0_35, %c0_36] : memref<200x100xf32, #tpu.memory_space<vmem>>, vector<200x100xf32>
      %cst_37 = arith.constant dense<0.000000e+00> : vector<64x100xf32>
      %62 = tpu.matmul %60, %61, %cst_37 {dimension_numbers = #tpu.dot_dimension_numbers<[1], [0], [0], [1], [0, 0, 1, 1], [], []>} : vector<64x200xf32>, vector<200x100xf32>, vector<64x100xf32> -> vector<64x100xf32>
      %63 = arith.index_cast %3 : i32 to index
      %c0_38 = arith.constant 0 : index
      %c0_39 = arith.constant 0 : index
      %64 = vector.load %arg5[%63, %c0_38, %c0_39] : memref<9x64x100xf32, #tpu.memory_space<vmem>>, vector<1x64x100xf32>
      %65 = vector.shape_cast %64 : vector<1x64x100xf32> to vector<64x100xf32>
      %66 = vector.shape_cast %62 : vector<64x100xf32> to vector<1x64x100xf32>
      tpu.vector_store %arg5[%63, %c0_38, %c0_39], %66 {strides = array<i32>} : memref<9x64x100xf32, #tpu.memory_space<vmem>>, vector<1x64x100xf32>,
    }
    %c9_i32_1 = arith.constant 9 : i32
    return
  }
  func.func @transform_0(%arg0: i32) -> (i32, i32, i32) {
    %c0_i32 = arith.constant 0 : i32
    %c0_i32_0 = arith.constant 0 : i32
    %c0_i32_1 = arith.constant 0 : i32
    return %arg0, %c0_i32, %c0_i32_0 : i32, i32, i32
  }
  func.func @transform_1(%arg0: i32) -> (i32, i32, i32) {
    %c0_i32 = arith.constant 0 : i32
    %c0_i32_0 = arith.constant 0 : i32
    %c0_i32_1 = arith.constant 0 : i32
    %c0_i32_2 = arith.constant 0 : i32
    return %c0_i32, %c0_i32_0, %c0_i32_1 : i32, i32, i32
  }
  func.func @transform_2(%arg0: i32) -> (i32, i32) {
    %c0_i32 = arith.constant 0 : i32
    %c0_i32_0 = arith.constant 0 : i32
    %c0_i32_1 = arith.constant 0 : i32
    return %c0_i32, %c0_i32_0 : i32, i32
  }
  func.func @transform_3(%arg0: i32) -> (i32, i32) {
    %c0_i32 = arith.constant 0 : i32
    %c0_i32_0 = arith.constant 0 : i32
    %c0_i32_1 = arith.constant 0 : i32
    return %c0_i32, %c0_i32_0 : i32, i32
  }
  func.func @transform_4(%arg0: i32) -> (i32, i32, i32) {
    %c0_i32 = arith.constant 0 : i32
    %c0_i32_0 = arith.constant 0 : i32
    %c0_i32_1 = arith.constant 0 : i32
    return %arg0, %c0_i32, %c0_i32_0 : i32, i32, i32
  }
}

module attributes {stable_mosaic.version = 11 : i64} {
  func.func @conv_bn_relu_pool_kernel(%arg0: i32, %arg1: memref<9x64x109xf32, #tpu.memory_space<vmem>>, %arg2: memref<9x30x64xbf16, #tpu.memory_space<vmem>>, %arg3: memref<30x1xf32, #tpu.memory_space<vmem>>, %arg4: memref<100x50xf32, #tpu.memory_space<vmem>>, %arg5: memref<9x30x50xf32, #tpu.memory_space<vmem>>) attributes {dimension_semantics = [#tpu.dimension_semantics<parallel>], iteration_bounds = array<i64: 2>, scalar_prefetch = 0 : i64, scratch_operands = 0 : i64, tpu.core_type = #tpu.core_type<tc>, window_params = [{transform_indices = @transform_0, window_bounds = array<i64: 9, 64, 109>}, {pipeline_mode = #tpu.pipeline_mode<synchronous>, transform_indices = @transform_1, window_bounds = array<i64: 9, 30, 64>}, {pipeline_mode = #tpu.pipeline_mode<synchronous>, transform_indices = @transform_2, window_bounds = array<i64: 30, 1>}, {pipeline_mode = #tpu.pipeline_mode<synchronous>, transform_indices = @transform_3, window_bounds = array<i64: 100, 50>}, {transform_indices = @transform_4, window_bounds = array<i64: 9, 30, 50>}]} {
    %c0 = arith.constant 0 : index
    %c0_0 = arith.constant 0 : index
    %0 = vector.load %arg3[%c0, %c0_0] : memref<30x1xf32, #tpu.memory_space<vmem>>, vector<30x1xf32>
    %c0_i32 = arith.constant 0 : i32
    %c9_i32 = arith.constant 9 : i32
    %1 = arith.addi %c0_i32, %c9_i32 : i32
    %c1_i32 = arith.constant 1 : i32
    scf.for %arg6 = %c0_i32 to %1 step %c1_i32  : i32 {
      %c1_i32_2 = arith.constant 1 : i32
      %2 = arith.muli %arg6, %c1_i32_2 : i32
      %c0_i32_3 = arith.constant 0 : i32
      %3 = arith.addi %c0_i32_3, %2 : i32
      %4 = arith.index_cast %3 : i32 to index
      %c0_4 = arith.constant 0 : index
      %c0_5 = arith.constant 0 : index
      %5 = vector.load %arg1[%4, %c0_4, %c0_5] : memref<9x64x109xf32, #tpu.memory_space<vmem>>, vector<1x64x109xf32>
      %6 = vector.shape_cast %5 : vector<1x64x109xf32> to vector<64x109xf32>
      %cst = arith.constant 0.000000e+00 : f32
      %7 = vector.broadcast %cst : f32 to vector<30x101xf32>
      %8 = arith.truncf %6 : vector<64x109xf32> to vector<64x109xbf16>
      %c0_6 = arith.constant 0 : index
      %c0_7 = arith.constant 0 : index
      %c0_8 = arith.constant 0 : index
      %9 = vector.load %arg2[%c0_6, %c0_7, %c0_8] : memref<9x30x64xbf16, #tpu.memory_space<vmem>>, vector<1x30x64xbf16>
      %10 = vector.shape_cast %9 : vector<1x30x64xbf16> to vector<30x64xbf16>
      %11 = vector.extract_strided_slice %8 {offsets = [0, 0], sizes = [64, 101], strides = [1, 1]} : vector<64x109xbf16> to vector<64x101xbf16>
      %cst_9 = arith.constant dense<0.000000e+00> : vector<30x101xf32>
      %12 = tpu.matmul %10, %11, %cst_9 {dimension_numbers = #tpu.dot_dimension_numbers<[1], [0], [0], [1], [0, 0, 1, 1], [], []>} : vector<30x64xbf16>, vector<64x101xbf16>, vector<30x101xf32> -> vector<30x101xf32>
      %13 = arith.addf %7, %12 : vector<30x101xf32>
      %c1 = arith.constant 1 : index
      %c0_10 = arith.constant 0 : index
      %c0_11 = arith.constant 0 : index
      %14 = vector.load %arg2[%c1, %c0_10, %c0_11] : memref<9x30x64xbf16, #tpu.memory_space<vmem>>, vector<1x30x64xbf16>
      %15 = vector.shape_cast %14 : vector<1x30x64xbf16> to vector<30x64xbf16>
      %16 = vector.extract_strided_slice %8 {offsets = [0, 1], sizes = [64, 101], strides = [1, 1]} : vector<64x109xbf16> to vector<64x101xbf16>
      %cst_12 = arith.constant dense<0.000000e+00> : vector<30x101xf32>
      %17 = tpu.matmul %15, %16, %cst_12 {dimension_numbers = #tpu.dot_dimension_numbers<[1], [0], [0], [1], [0, 0, 1, 1], [], []>} : vector<30x64xbf16>, vector<64x101xbf16>, vector<30x101xf32> -> vector<30x101xf32>
      %18 = arith.addf %13, %17 : vector<30x101xf32>
      %c2 = arith.constant 2 : index
      %c0_13 = arith.constant 0 : index
      %c0_14 = arith.constant 0 : index
      %19 = vector.load %arg2[%c2, %c0_13, %c0_14] : memref<9x30x64xbf16, #tpu.memory_space<vmem>>, vector<1x30x64xbf16>
      %20 = vector.shape_cast %19 : vector<1x30x64xbf16> to vector<30x64xbf16>
      %21 = vector.extract_strided_slice %8 {offsets = [0, 2], sizes = [64, 101], strides = [1, 1]} : vector<64x109xbf16> to vector<64x101xbf16>
      %cst_15 = arith.constant dense<0.000000e+00> : vector<30x101xf32>
      %22 = tpu.matmul %20, %21, %cst_15 {dimension_numbers = #tpu.dot_dimension_numbers<[1], [0], [0], [1], [0, 0, 1, 1], [], []>} : vector<30x64xbf16>, vector<64x101xbf16>, vector<30x101xf32> -> vector<30x101xf32>
      %23 = arith.addf %18, %22 : vector<30x101xf32>
      %c3 = arith.constant 3 : index
      %c0_16 = arith.constant 0 : index
      %c0_17 = arith.constant 0 : index
      %24 = vector.load %arg2[%c3, %c0_16, %c0_17] : memref<9x30x64xbf16, #tpu.memory_space<vmem>>, vector<1x30x64xbf16>
      %25 = vector.shape_cast %24 : vector<1x30x64xbf16> to vector<30x64xbf16>
      %26 = vector.extract_strided_slice %8 {offsets = [0, 3], sizes = [64, 101], strides = [1, 1]} : vector<64x109xbf16> to vector<64x101xbf16>
      %cst_18 = arith.constant dense<0.000000e+00> : vector<30x101xf32>
      %27 = tpu.matmul %25, %26, %cst_18 {dimension_numbers = #tpu.dot_dimension_numbers<[1], [0], [0], [1], [0, 0, 1, 1], [], []>} : vector<30x64xbf16>, vector<64x101xbf16>, vector<30x101xf32> -> vector<30x101xf32>
      %28 = arith.addf %23, %27 : vector<30x101xf32>
      %c4 = arith.constant 4 : index
      %c0_19 = arith.constant 0 : index
      %c0_20 = arith.constant 0 : index
      %29 = vector.load %arg2[%c4, %c0_19, %c0_20] : memref<9x30x64xbf16, #tpu.memory_space<vmem>>, vector<1x30x64xbf16>
      %30 = vector.shape_cast %29 : vector<1x30x64xbf16> to vector<30x64xbf16>
      %31 = vector.extract_strided_slice %8 {offsets = [0, 4], sizes = [64, 101], strides = [1, 1]} : vector<64x109xbf16> to vector<64x101xbf16>
      %cst_21 = arith.constant dense<0.000000e+00> : vector<30x101xf32>
      %32 = tpu.matmul %30, %31, %cst_21 {dimension_numbers = #tpu.dot_dimension_numbers<[1], [0], [0], [1], [0, 0, 1, 1], [], []>} : vector<30x64xbf16>, vector<64x101xbf16>, vector<30x101xf32> -> vector<30x101xf32>
      %33 = arith.addf %28, %32 : vector<30x101xf32>
      %c5 = arith.constant 5 : index
      %c0_22 = arith.constant 0 : index
      %c0_23 = arith.constant 0 : index
      %34 = vector.load %arg2[%c5, %c0_22, %c0_23] : memref<9x30x64xbf16, #tpu.memory_space<vmem>>, vector<1x30x64xbf16>
      %35 = vector.shape_cast %34 : vector<1x30x64xbf16> to vector<30x64xbf16>
      %36 = vector.extract_strided_slice %8 {offsets = [0, 5], sizes = [64, 101], strides = [1, 1]} : vector<64x109xbf16> to vector<64x101xbf16>
      %cst_24 = arith.constant dense<0.000000e+00> : vector<30x101xf32>
      %37 = tpu.matmul %35, %36, %cst_24 {dimension_numbers = #tpu.dot_dimension_numbers<[1], [0], [0], [1], [0, 0, 1, 1], [], []>} : vector<30x64xbf16>, vector<64x101xbf16>, vector<30x101xf32> -> vector<30x101xf32>
      %38 = arith.addf %33, %37 : vector<30x101xf32>
      %c6 = arith.constant 6 : index
      %c0_25 = arith.constant 0 : index
      %c0_26 = arith.constant 0 : index
      %39 = vector.load %arg2[%c6, %c0_25, %c0_26] : memref<9x30x64xbf16, #tpu.memory_space<vmem>>, vector<1x30x64xbf16>
      %40 = vector.shape_cast %39 : vector<1x30x64xbf16> to vector<30x64xbf16>
      %41 = vector.extract_strided_slice %8 {offsets = [0, 6], sizes = [64, 101], strides = [1, 1]} : vector<64x109xbf16> to vector<64x101xbf16>
      %cst_27 = arith.constant dense<0.000000e+00> : vector<30x101xf32>
      %42 = tpu.matmul %40, %41, %cst_27 {dimension_numbers = #tpu.dot_dimension_numbers<[1], [0], [0], [1], [0, 0, 1, 1], [], []>} : vector<30x64xbf16>, vector<64x101xbf16>, vector<30x101xf32> -> vector<30x101xf32>
      %43 = arith.addf %38, %42 : vector<30x101xf32>
      %c7 = arith.constant 7 : index
      %c0_28 = arith.constant 0 : index
      %c0_29 = arith.constant 0 : index
      %44 = vector.load %arg2[%c7, %c0_28, %c0_29] : memref<9x30x64xbf16, #tpu.memory_space<vmem>>, vector<1x30x64xbf16>
      %45 = vector.shape_cast %44 : vector<1x30x64xbf16> to vector<30x64xbf16>
      %46 = vector.extract_strided_slice %8 {offsets = [0, 7], sizes = [64, 101], strides = [1, 1]} : vector<64x109xbf16> to vector<64x101xbf16>
      %cst_30 = arith.constant dense<0.000000e+00> : vector<30x101xf32>
      %47 = tpu.matmul %45, %46, %cst_30 {dimension_numbers = #tpu.dot_dimension_numbers<[1], [0], [0], [1], [0, 0, 1, 1], [], []>} : vector<30x64xbf16>, vector<64x101xbf16>, vector<30x101xf32> -> vector<30x101xf32>
      %48 = arith.addf %43, %47 : vector<30x101xf32>
      %c8 = arith.constant 8 : index
      %c0_31 = arith.constant 0 : index
      %c0_32 = arith.constant 0 : index
      %49 = vector.load %arg2[%c8, %c0_31, %c0_32] : memref<9x30x64xbf16, #tpu.memory_space<vmem>>, vector<1x30x64xbf16>
      %50 = vector.shape_cast %49 : vector<1x30x64xbf16> to vector<30x64xbf16>
      %51 = vector.extract_strided_slice %8 {offsets = [0, 8], sizes = [64, 101], strides = [1, 1]} : vector<64x109xbf16> to vector<64x101xbf16>
      %cst_33 = arith.constant dense<0.000000e+00> : vector<30x101xf32>
      %52 = tpu.matmul %50, %51, %cst_33 {dimension_numbers = #tpu.dot_dimension_numbers<[1], [0], [0], [1], [0, 0, 1, 1], [], []>} : vector<30x64xbf16>, vector<64x101xbf16>, vector<30x101xf32> -> vector<30x101xf32>
      %53 = arith.addf %48, %52 : vector<30x101xf32>
      %54 = vector.broadcast %0 : vector<30x1xf32> to vector<30x101xf32>
      %55 = arith.addf %53, %54 : vector<30x101xf32>
      %cst_34 = arith.constant 0.000000e+00 : f32
      %56 = vector.broadcast %cst_34 : f32 to vector<30x101xf32>
      %57 = arith.maximumf %55, %56 : vector<30x101xf32>
      %58 = vector.extract_strided_slice %57 {offsets = [0, 0], sizes = [30, 100], strides = [1, 1]} : vector<30x101xf32> to vector<30x100xf32>
      %59 = vector.extract_strided_slice %57 {offsets = [0, 1], sizes = [30, 100], strides = [1, 1]} : vector<30x101xf32> to vector<30x100xf32>
      %60 = arith.maximumf %58, %59 : vector<30x100xf32>
      %c0_35 = arith.constant 0 : index
      %c0_36 = arith.constant 0 : index
      %61 = vector.load %arg4[%c0_35, %c0_36] : memref<100x50xf32, #tpu.memory_space<vmem>>, vector<100x50xf32>
      %cst_37 = arith.constant dense<0.000000e+00> : vector<30x50xf32>
      %62 = tpu.matmul %60, %61, %cst_37 {dimension_numbers = #tpu.dot_dimension_numbers<[1], [0], [0], [1], [0, 0, 1, 1], [], []>} : vector<30x100xf32>, vector<100x50xf32>, vector<30x50xf32> -> vector<30x50xf32>
      %63 = arith.index_cast %3 : i32 to index
      %c0_38 = arith.constant 0 : index
      %c0_39 = arith.constant 0 : index
      %64 = vector.load %arg5[%63, %c0_38, %c0_39] : memref<9x30x50xf32, #tpu.memory_space<vmem>>, vector<1x30x50xf32>
      %65 = vector.shape_cast %64 : vector<1x30x50xf32> to vector<30x50xf32>
      %66 = vector.shape_cast %62 : vector<30x50xf32> to vector<1x30x50xf32>
      tpu.vector_store %arg5[%63, %c0_38, %c0_39], %66 {strides = array<i32>} : memref<9x30x50xf32, #tpu.memory_space<vmem>>, vector<1x30x50xf32>,
    }
    %c9_i32_1 = arith.constant 9 : i32
    return
  }
  func.func @transform_0(%arg0: i32) -> (i32, i32, i32) {
    %c0_i32 = arith.constant 0 : i32
    %c0_i32_0 = arith.constant 0 : i32
    %c0_i32_1 = arith.constant 0 : i32
    return %arg0, %c0_i32, %c0_i32_0 : i32, i32, i32
  }
  func.func @transform_1(%arg0: i32) -> (i32, i32, i32) {
    %c0_i32 = arith.constant 0 : i32
    %c0_i32_0 = arith.constant 0 : i32
    %c0_i32_1 = arith.constant 0 : i32
    %c0_i32_2 = arith.constant 0 : i32
    return %c0_i32, %c0_i32_0, %c0_i32_1 : i32, i32, i32
  }
  func.func @transform_2(%arg0: i32) -> (i32, i32) {
    %c0_i32 = arith.constant 0 : i32
    %c0_i32_0 = arith.constant 0 : i32
    %c0_i32_1 = arith.constant 0 : i32
    return %c0_i32, %c0_i32_0 : i32, i32
  }
  func.func @transform_3(%arg0: i32) -> (i32, i32) {
    %c0_i32 = arith.constant 0 : i32
    %c0_i32_0 = arith.constant 0 : i32
    %c0_i32_1 = arith.constant 0 : i32
    return %c0_i32, %c0_i32_0 : i32, i32
  }
  func.func @transform_4(%arg0: i32) -> (i32, i32, i32) {
    %c0_i32 = arith.constant 0 : i32
    %c0_i32_0 = arith.constant 0 : i32
    %c0_i32_1 = arith.constant 0 : i32
    return %arg0, %c0_i32, %c0_i32_0 : i32, i32, i32
  }
}

module attributes {stable_mosaic.version = 11 : i64} {
  func.func @lstm_logsoftmax_kernel(%arg0: memref<125x18x12xf32, #tpu.memory_space<vmem>>, %arg1: memref<1x256xf32, #tpu.memory_space<vmem>>, %arg2: memref<64x256xbf16, #tpu.memory_space<vmem>>, %arg3: memref<1x256xf32, #tpu.memory_space<vmem>>, %arg4: memref<64x10xf32, #tpu.memory_space<vmem>>, %arg5: memref<1x10xf32, #tpu.memory_space<vmem>>, %arg6: memref<18x10xf32, #tpu.memory_space<vmem>>) attributes {dimension_semantics = [], scalar_prefetch = 0 : i64, scratch_operands = 0 : i64, tpu.core_type = #tpu.core_type<tc>} {
    %c0 = arith.constant 0 : index
    %c0_0 = arith.constant 0 : index
    %0 = vector.load %arg2[%c0, %c0_0] : memref<64x256xbf16, #tpu.memory_space<vmem>>, vector<64x256xbf16>
    %c0_1 = arith.constant 0 : index
    %c0_2 = arith.constant 0 : index
    %1 = vector.load %arg1[%c0_1, %c0_2] : memref<1x256xf32, #tpu.memory_space<vmem>>, vector<1x256xf32>
    %2 = vector.shape_cast %1 : vector<1x256xf32> to vector<1x256xf32>
    %3 = vector.broadcast %2 : vector<1x256xf32> to vector<18x256xf32>
    %c0_3 = arith.constant 0 : index
    %c0_4 = arith.constant 0 : index
    %4 = vector.load %arg3[%c0_3, %c0_4] : memref<1x256xf32, #tpu.memory_space<vmem>>, vector<1x256xf32>
    %5 = vector.shape_cast %4 : vector<1x256xf32> to vector<1x256xf32>
    %6 = vector.broadcast %5 : vector<1x256xf32> to vector<18x256xf32>
    %cst = arith.constant 0.000000e+00 : f32
    %7 = vector.broadcast %cst : f32 to vector<18x64xf32>
    %cst_5 = arith.constant 0.000000e+00 : f32
    %8 = vector.broadcast %cst_5 : f32 to vector<18x64xf32>
    %c0_i32 = arith.constant 0 : i32
    %c125_i32 = arith.constant 125 : i32
    %9 = arith.addi %c0_i32, %c125_i32 : i32
    %c1_i32 = arith.constant 1 : i32
    %10:2 = scf.for %arg7 = %c0_i32 to %9 step %c1_i32 iter_args(%arg8 = %7, %arg9 = %8) -> (vector<18x64xf32>, vector<18x64xf32>)  : i32 {
      %28 = arith.index_cast %arg7 : i32 to index
      %c0_16 = arith.constant 0 : index
      %c0_17 = arith.constant 0 : index
      %29 = vector.load %arg0[%28, %c0_16, %c0_17] : memref<125x18x12xf32, #tpu.memory_space<vmem>>, vector<1x18x12xf32>
      %30 = vector.shape_cast %29 : vector<1x18x12xf32> to vector<18x12xf32>
      %31 = vector.extract_strided_slice %30 {offsets = [0, 0], sizes = [18, 1], strides = [1, 1]} : vector<18x12xf32> to vector<18x1xf32>
      %32 = vector.broadcast %31 : vector<18x1xf32> to vector<18x256xf32>
      %33 = arith.mulf %32, %3 : vector<18x256xf32>
      %34 = arith.addf %33, %6 : vector<18x256xf32>
      %35 = arith.truncf %arg8 : vector<18x64xf32> to vector<18x64xbf16>
      %cst_18 = arith.constant dense<0.000000e+00> : vector<18x256xf32>
      %36 = tpu.matmul %35, %0, %cst_18 {dimension_numbers = #tpu.dot_dimension_numbers<[1], [0], [0], [1], [0, 0, 1, 1], [], []>} : vector<18x64xbf16>, vector<64x256xbf16>, vector<18x256xf32> -> vector<18x256xf32>
      %37 = arith.addf %36, %34 : vector<18x256xf32>
      %38 = math.tanh %37 : vector<18x256xf32>
      %39 = vector.extract_strided_slice %38 {offsets = [0, 0], sizes = [18, 64], strides = [1, 1]} : vector<18x256xf32> to vector<18x64xf32>
      %cst_19 = arith.constant 5.000000e-01 : f32
      %40 = vector.broadcast %cst_19 : f32 to vector<18x64xf32>
      %41 = arith.mulf %40, %39 : vector<18x64xf32>
      %cst_20 = arith.constant 5.000000e-01 : f32
      %42 = vector.broadcast %cst_20 : f32 to vector<18x64xf32>
      %43 = arith.addf %41, %42 : vector<18x64xf32>
      %44 = vector.extract_strided_slice %38 {offsets = [0, 64], sizes = [18, 64], strides = [1, 1]} : vector<18x256xf32> to vector<18x64xf32>
      %cst_21 = arith.constant 5.000000e-01 : f32
      %45 = vector.broadcast %cst_21 : f32 to vector<18x64xf32>
      %46 = arith.mulf %45, %44 : vector<18x64xf32>
      %cst_22 = arith.constant 5.000000e-01 : f32
      %47 = vector.broadcast %cst_22 : f32 to vector<18x64xf32>
      %48 = arith.addf %46, %47 : vector<18x64xf32>
      %49 = vector.extract_strided_slice %38 {offsets = [0, 128], sizes = [18, 64], strides = [1, 1]} : vector<18x256xf32> to vector<18x64xf32>
      %50 = vector.extract_strided_slice %38 {offsets = [0, 192], sizes = [18, 64], strides = [1, 1]} : vector<18x256xf32> to vector<18x64xf32>
      %cst_23 = arith.constant 5.000000e-01 : f32
      %51 = vector.broadcast %cst_23 : f32 to vector<18x64xf32>
      %52 = arith.mulf %51, %50 : vector<18x64xf32>
      %cst_24 = arith.constant 5.000000e-01 : f32
      %53 = vector.broadcast %cst_24 : f32 to vector<18x64xf32>
      %54 = arith.addf %52, %53 : vector<18x64xf32>
      %55 = arith.mulf %48, %arg9 : vector<18x64xf32>
      %56 = arith.mulf %43, %49 : vector<18x64xf32>
      %57 = arith.addf %55, %56 : vector<18x64xf32>
      %58 = math.tanh %57 : vector<18x64xf32>
      %59 = arith.mulf %54, %58 : vector<18x64xf32>
      %60 = vector.extract_strided_slice %30 {offsets = [0, 1], sizes = [18, 1], strides = [1, 1]} : vector<18x12xf32> to vector<18x1xf32>
      %61 = vector.broadcast %60 : vector<18x1xf32> to vector<18x256xf32>
      %62 = arith.mulf %61, %3 : vector<18x256xf32>
      %63 = arith.addf %62, %6 : vector<18x256xf32>
      %64 = arith.truncf %59 : vector<18x64xf32> to vector<18x64xbf16>
      %cst_25 = arith.constant dense<0.000000e+00> : vector<18x256xf32>
      %65 = tpu.matmul %64, %0, %cst_25 {dimension_numbers = #tpu.dot_dimension_numbers<[1], [0], [0], [1], [0, 0, 1, 1], [], []>} : vector<18x64xbf16>, vector<64x256xbf16>, vector<18x256xf32> -> vector<18x256xf32>
      %66 = arith.addf %65, %63 : vector<18x256xf32>
      %67 = math.tanh %66 : vector<18x256xf32>
      %68 = vector.extract_strided_slice %67 {offsets = [0, 0], sizes = [18, 64], strides = [1, 1]} : vector<18x256xf32> to vector<18x64xf32>
      %cst_26 = arith.constant 5.000000e-01 : f32
      %69 = vector.broadcast %cst_26 : f32 to vector<18x64xf32>
      %70 = arith.mulf %69, %68 : vector<18x64xf32>
      %cst_27 = arith.constant 5.000000e-01 : f32
      %71 = vector.broadcast %cst_27 : f32 to vector<18x64xf32>
      %72 = arith.addf %70, %71 : vector<18x64xf32>
      %73 = vector.extract_strided_slice %67 {offsets = [0, 64], sizes = [18, 64], strides = [1, 1]} : vector<18x256xf32> to vector<18x64xf32>
      %cst_28 = arith.constant 5.000000e-01 : f32
      %74 = vector.broadcast %cst_28 : f32 to vector<18x64xf32>
      %75 = arith.mulf %74, %73 : vector<18x64xf32>
      %cst_29 = arith.constant 5.000000e-01 : f32
      %76 = vector.broadcast %cst_29 : f32 to vector<18x64xf32>
      %77 = arith.addf %75, %76 : vector<18x64xf32>
      %78 = vector.extract_strided_slice %67 {offsets = [0, 128], sizes = [18, 64], strides = [1, 1]} : vector<18x256xf32> to vector<18x64xf32>
      %79 = vector.extract_strided_slice %67 {offsets = [0, 192], sizes = [18, 64], strides = [1, 1]} : vector<18x256xf32> to vector<18x64xf32>
      %cst_30 = arith.constant 5.000000e-01 : f32
      %80 = vector.broadcast %cst_30 : f32 to vector<18x64xf32>
      %81 = arith.mulf %80, %79 : vector<18x64xf32>
      %cst_31 = arith.constant 5.000000e-01 : f32
      %82 = vector.broadcast %cst_31 : f32 to vector<18x64xf32>
      %83 = arith.addf %81, %82 : vector<18x64xf32>
      %84 = arith.mulf %77, %57 : vector<18x64xf32>
      %85 = arith.mulf %72, %78 : vector<18x64xf32>
      %86 = arith.addf %84, %85 : vector<18x64xf32>
      %87 = math.tanh %86 : vector<18x64xf32>
      %88 = arith.mulf %83, %87 : vector<18x64xf32>
      %89 = vector.extract_strided_slice %30 {offsets = [0, 2], sizes = [18, 1], strides = [1, 1]} : vector<18x12xf32> to vector<18x1xf32>
      %90 = vector.broadcast %89 : vector<18x1xf32> to vector<18x256xf32>
      %91 = arith.mulf %90, %3 : vector<18x256xf32>
      %92 = arith.addf %91, %6 : vector<18x256xf32>
      %93 = arith.truncf %88 : vector<18x64xf32> to vector<18x64xbf16>
      %cst_32 = arith.constant dense<0.000000e+00> : vector<18x256xf32>
      %94 = tpu.matmul %93, %0, %cst_32 {dimension_numbers = #tpu.dot_dimension_numbers<[1], [0], [0], [1], [0, 0, 1, 1], [], []>} : vector<18x64xbf16>, vector<64x256xbf16>, vector<18x256xf32> -> vector<18x256xf32>
      %95 = arith.addf %94, %92 : vector<18x256xf32>
      %96 = math.tanh %95 : vector<18x256xf32>
      %97 = vector.extract_strided_slice %96 {offsets = [0, 0], sizes = [18, 64], strides = [1, 1]} : vector<18x256xf32> to vector<18x64xf32>
      %cst_33 = arith.constant 5.000000e-01 : f32
      %98 = vector.broadcast %cst_33 : f32 to vector<18x64xf32>
      %99 = arith.mulf %98, %97 : vector<18x64xf32>
      %cst_34 = arith.constant 5.000000e-01 : f32
      %100 = vector.broadcast %cst_34 : f32 to vector<18x64xf32>
      %101 = arith.addf %99, %100 : vector<18x64xf32>
      %102 = vector.extract_strided_slice %96 {offsets = [0, 64], sizes = [18, 64], strides = [1, 1]} : vector<18x256xf32> to vector<18x64xf32>
      %cst_35 = arith.constant 5.000000e-01 : f32
      %103 = vector.broadcast %cst_35 : f32 to vector<18x64xf32>
      %104 = arith.mulf %103, %102 : vector<18x64xf32>
      %cst_36 = arith.constant 5.000000e-01 : f32
      %105 = vector.broadcast %cst_36 : f32 to vector<18x64xf32>
      %106 = arith.addf %104, %105 : vector<18x64xf32>
      %107 = vector.extract_strided_slice %96 {offsets = [0, 128], sizes = [18, 64], strides = [1, 1]} : vector<18x256xf32> to vector<18x64xf32>
      %108 = vector.extract_strided_slice %96 {offsets = [0, 192], sizes = [18, 64], strides = [1, 1]} : vector<18x256xf32> to vector<18x64xf32>
      %cst_37 = arith.constant 5.000000e-01 : f32
      %109 = vector.broadcast %cst_37 : f32 to vector<18x64xf32>
      %110 = arith.mulf %109, %108 : vector<18x64xf32>
      %cst_38 = arith.constant 5.000000e-01 : f32
      %111 = vector.broadcast %cst_38 : f32 to vector<18x64xf32>
      %112 = arith.addf %110, %111 : vector<18x64xf32>
      %113 = arith.mulf %106, %86 : vector<18x64xf32>
      %114 = arith.mulf %101, %107 : vector<18x64xf32>
      %115 = arith.addf %113, %114 : vector<18x64xf32>
      %116 = math.tanh %115 : vector<18x64xf32>
      %117 = arith.mulf %112, %116 : vector<18x64xf32>
      %118 = vector.extract_strided_slice %30 {offsets = [0, 3], sizes = [18, 1], strides = [1, 1]} : vector<18x12xf32> to vector<18x1xf32>
      %119 = vector.broadcast %118 : vector<18x1xf32> to vector<18x256xf32>
      %120 = arith.mulf %119, %3 : vector<18x256xf32>
      %121 = arith.addf %120, %6 : vector<18x256xf32>
      %122 = arith.truncf %117 : vector<18x64xf32> to vector<18x64xbf16>
      %cst_39 = arith.constant dense<0.000000e+00> : vector<18x256xf32>
      %123 = tpu.matmul %122, %0, %cst_39 {dimension_numbers = #tpu.dot_dimension_numbers<[1], [0], [0], [1], [0, 0, 1, 1], [], []>} : vector<18x64xbf16>, vector<64x256xbf16>, vector<18x256xf32> -> vector<18x256xf32>
      %124 = arith.addf %123, %121 : vector<18x256xf32>
      %125 = math.tanh %124 : vector<18x256xf32>
      %126 = vector.extract_strided_slice %125 {offsets = [0, 0], sizes = [18, 64], strides = [1, 1]} : vector<18x256xf32> to vector<18x64xf32>
      %cst_40 = arith.constant 5.000000e-01 : f32
      %127 = vector.broadcast %cst_40 : f32 to vector<18x64xf32>
      %128 = arith.mulf %127, %126 : vector<18x64xf32>
      %cst_41 = arith.constant 5.000000e-01 : f32
      %129 = vector.broadcast %cst_41 : f32 to vector<18x64xf32>
      %130 = arith.addf %128, %129 : vector<18x64xf32>
      %131 = vector.extract_strided_slice %125 {offsets = [0, 64], sizes = [18, 64], strides = [1, 1]} : vector<18x256xf32> to vector<18x64xf32>
      %cst_42 = arith.constant 5.000000e-01 : f32
      %132 = vector.broadcast %cst_42 : f32 to vector<18x64xf32>
      %133 = arith.mulf %132, %131 : vector<18x64xf32>
      %cst_43 = arith.constant 5.000000e-01 : f32
      %134 = vector.broadcast %cst_43 : f32 to vector<18x64xf32>
      %135 = arith.addf %133, %134 : vector<18x64xf32>
      %136 = vector.extract_strided_slice %125 {offsets = [0, 128], sizes = [18, 64], strides = [1, 1]} : vector<18x256xf32> to vector<18x64xf32>
      %137 = vector.extract_strided_slice %125 {offsets = [0, 192], sizes = [18, 64], strides = [1, 1]} : vector<18x256xf32> to vector<18x64xf32>
      %cst_44 = arith.constant 5.000000e-01 : f32
      %138 = vector.broadcast %cst_44 : f32 to vector<18x64xf32>
      %139 = arith.mulf %138, %137 : vector<18x64xf32>
      %cst_45 = arith.constant 5.000000e-01 : f32
      %140 = vector.broadcast %cst_45 : f32 to vector<18x64xf32>
      %141 = arith.addf %139, %140 : vector<18x64xf32>
      %142 = arith.mulf %135, %115 : vector<18x64xf32>
      %143 = arith.mulf %130, %136 : vector<18x64xf32>
      %144 = arith.addf %142, %143 : vector<18x64xf32>
      %145 = math.tanh %144 : vector<18x64xf32>
      %146 = arith.mulf %141, %145 : vector<18x64xf32>
      %147 = vector.extract_strided_slice %30 {offsets = [0, 4], sizes = [18, 1], strides = [1, 1]} : vector<18x12xf32> to vector<18x1xf32>
      %148 = vector.broadcast %147 : vector<18x1xf32> to vector<18x256xf32>
      %149 = arith.mulf %148, %3 : vector<18x256xf32>
      %150 = arith.addf %149, %6 : vector<18x256xf32>
      %151 = arith.truncf %146 : vector<18x64xf32> to vector<18x64xbf16>
      %cst_46 = arith.constant dense<0.000000e+00> : vector<18x256xf32>
      %152 = tpu.matmul %151, %0, %cst_46 {dimension_numbers = #tpu.dot_dimension_numbers<[1], [0], [0], [1], [0, 0, 1, 1], [], []>} : vector<18x64xbf16>, vector<64x256xbf16>, vector<18x256xf32> -> vector<18x256xf32>
      %153 = arith.addf %152, %150 : vector<18x256xf32>
      %154 = math.tanh %153 : vector<18x256xf32>
      %155 = vector.extract_strided_slice %154 {offsets = [0, 0], sizes = [18, 64], strides = [1, 1]} : vector<18x256xf32> to vector<18x64xf32>
      %cst_47 = arith.constant 5.000000e-01 : f32
      %156 = vector.broadcast %cst_47 : f32 to vector<18x64xf32>
      %157 = arith.mulf %156, %155 : vector<18x64xf32>
      %cst_48 = arith.constant 5.000000e-01 : f32
      %158 = vector.broadcast %cst_48 : f32 to vector<18x64xf32>
      %159 = arith.addf %157, %158 : vector<18x64xf32>
      %160 = vector.extract_strided_slice %154 {offsets = [0, 64], sizes = [18, 64], strides = [1, 1]} : vector<18x256xf32> to vector<18x64xf32>
      %cst_49 = arith.constant 5.000000e-01 : f32
      %161 = vector.broadcast %cst_49 : f32 to vector<18x64xf32>
      %162 = arith.mulf %161, %160 : vector<18x64xf32>
      %cst_50 = arith.constant 5.000000e-01 : f32
      %163 = vector.broadcast %cst_50 : f32 to vector<18x64xf32>
      %164 = arith.addf %162, %163 : vector<18x64xf32>
      %165 = vector.extract_strided_slice %154 {offsets = [0, 128], sizes = [18, 64], strides = [1, 1]} : vector<18x256xf32> to vector<18x64xf32>
      %166 = vector.extract_strided_slice %154 {offsets = [0, 192], sizes = [18, 64], strides = [1, 1]} : vector<18x256xf32> to vector<18x64xf32>
      %cst_51 = arith.constant 5.000000e-01 : f32
      %167 = vector.broadcast %cst_51 : f32 to vector<18x64xf32>
      %168 = arith.mulf %167, %166 : vector<18x64xf32>
      %cst_52 = arith.constant 5.000000e-01 : f32
      %169 = vector.broadcast %cst_52 : f32 to vector<18x64xf32>
      %170 = arith.addf %168, %169 : vector<18x64xf32>
      %171 = arith.mulf %164, %144 : vector<18x64xf32>
      %172 = arith.mulf %159, %165 : vector<18x64xf32>
      %173 = arith.addf %171, %172 : vector<18x64xf32>
      %174 = math.tanh %173 : vector<18x64xf32>
      %175 = arith.mulf %170, %174 : vector<18x64xf32>
      %176 = vector.extract_strided_slice %30 {offsets = [0, 5], sizes = [18, 1], strides = [1, 1]} : vector<18x12xf32> to vector<18x1xf32>
      %177 = vector.broadcast %176 : vector<18x1xf32> to vector<18x256xf32>
      %178 = arith.mulf %177, %3 : vector<18x256xf32>
      %179 = arith.addf %178, %6 : vector<18x256xf32>
      %180 = arith.truncf %175 : vector<18x64xf32> to vector<18x64xbf16>
      %cst_53 = arith.constant dense<0.000000e+00> : vector<18x256xf32>
      %181 = tpu.matmul %180, %0, %cst_53 {dimension_numbers = #tpu.dot_dimension_numbers<[1], [0], [0], [1], [0, 0, 1, 1], [], []>} : vector<18x64xbf16>, vector<64x256xbf16>, vector<18x256xf32> -> vector<18x256xf32>
      %182 = arith.addf %181, %179 : vector<18x256xf32>
      %183 = math.tanh %182 : vector<18x256xf32>
      %184 = vector.extract_strided_slice %183 {offsets = [0, 0], sizes = [18, 64], strides = [1, 1]} : vector<18x256xf32> to vector<18x64xf32>
      %cst_54 = arith.constant 5.000000e-01 : f32
      %185 = vector.broadcast %cst_54 : f32 to vector<18x64xf32>
      %186 = arith.mulf %185, %184 : vector<18x64xf32>
      %cst_55 = arith.constant 5.000000e-01 : f32
      %187 = vector.broadcast %cst_55 : f32 to vector<18x64xf32>
      %188 = arith.addf %186, %187 : vector<18x64xf32>
      %189 = vector.extract_strided_slice %183 {offsets = [0, 64], sizes = [18, 64], strides = [1, 1]} : vector<18x256xf32> to vector<18x64xf32>
      %cst_56 = arith.constant 5.000000e-01 : f32
      %190 = vector.broadcast %cst_56 : f32 to vector<18x64xf32>
      %191 = arith.mulf %190, %189 : vector<18x64xf32>
      %cst_57 = arith.constant 5.000000e-01 : f32
      %192 = vector.broadcast %cst_57 : f32 to vector<18x64xf32>
      %193 = arith.addf %191, %192 : vector<18x64xf32>
      %194 = vector.extract_strided_slice %183 {offsets = [0, 128], sizes = [18, 64], strides = [1, 1]} : vector<18x256xf32> to vector<18x64xf32>
      %195 = vector.extract_strided_slice %183 {offsets = [0, 192], sizes = [18, 64], strides = [1, 1]} : vector<18x256xf32> to vector<18x64xf32>
      %cst_58 = arith.constant 5.000000e-01 : f32
      %196 = vector.broadcast %cst_58 : f32 to vector<18x64xf32>
      %197 = arith.mulf %196, %195 : vector<18x64xf32>
      %cst_59 = arith.constant 5.000000e-01 : f32
      %198 = vector.broadcast %cst_59 : f32 to vector<18x64xf32>
      %199 = arith.addf %197, %198 : vector<18x64xf32>
      %200 = arith.mulf %193, %173 : vector<18x64xf32>
      %201 = arith.mulf %188, %194 : vector<18x64xf32>
      %202 = arith.addf %200, %201 : vector<18x64xf32>
      %203 = math.tanh %202 : vector<18x64xf32>
      %204 = arith.mulf %199, %203 : vector<18x64xf32>
      %205 = vector.extract_strided_slice %30 {offsets = [0, 6], sizes = [18, 1], strides = [1, 1]} : vector<18x12xf32> to vector<18x1xf32>
      %206 = vector.broadcast %205 : vector<18x1xf32> to vector<18x256xf32>
      %207 = arith.mulf %206, %3 : vector<18x256xf32>
      %208 = arith.addf %207, %6 : vector<18x256xf32>
      %209 = arith.truncf %204 : vector<18x64xf32> to vector<18x64xbf16>
      %cst_60 = arith.constant dense<0.000000e+00> : vector<18x256xf32>
      %210 = tpu.matmul %209, %0, %cst_60 {dimension_numbers = #tpu.dot_dimension_numbers<[1], [0], [0], [1], [0, 0, 1, 1], [], []>} : vector<18x64xbf16>, vector<64x256xbf16>, vector<18x256xf32> -> vector<18x256xf32>
      %211 = arith.addf %210, %208 : vector<18x256xf32>
      %212 = math.tanh %211 : vector<18x256xf32>
      %213 = vector.extract_strided_slice %212 {offsets = [0, 0], sizes = [18, 64], strides = [1, 1]} : vector<18x256xf32> to vector<18x64xf32>
      %cst_61 = arith.constant 5.000000e-01 : f32
      %214 = vector.broadcast %cst_61 : f32 to vector<18x64xf32>
      %215 = arith.mulf %214, %213 : vector<18x64xf32>
      %cst_62 = arith.constant 5.000000e-01 : f32
      %216 = vector.broadcast %cst_62 : f32 to vector<18x64xf32>
      %217 = arith.addf %215, %216 : vector<18x64xf32>
      %218 = vector.extract_strided_slice %212 {offsets = [0, 64], sizes = [18, 64], strides = [1, 1]} : vector<18x256xf32> to vector<18x64xf32>
      %cst_63 = arith.constant 5.000000e-01 : f32
      %219 = vector.broadcast %cst_63 : f32 to vector<18x64xf32>
      %220 = arith.mulf %219, %218 : vector<18x64xf32>
      %cst_64 = arith.constant 5.000000e-01 : f32
      %221 = vector.broadcast %cst_64 : f32 to vector<18x64xf32>
      %222 = arith.addf %220, %221 : vector<18x64xf32>
      %223 = vector.extract_strided_slice %212 {offsets = [0, 128], sizes = [18, 64], strides = [1, 1]} : vector<18x256xf32> to vector<18x64xf32>
      %224 = vector.extract_strided_slice %212 {offsets = [0, 192], sizes = [18, 64], strides = [1, 1]} : vector<18x256xf32> to vector<18x64xf32>
      %cst_65 = arith.constant 5.000000e-01 : f32
      %225 = vector.broadcast %cst_65 : f32 to vector<18x64xf32>
      %226 = arith.mulf %225, %224 : vector<18x64xf32>
      %cst_66 = arith.constant 5.000000e-01 : f32
      %227 = vector.broadcast %cst_66 : f32 to vector<18x64xf32>
      %228 = arith.addf %226, %227 : vector<18x64xf32>
      %229 = arith.mulf %222, %202 : vector<18x64xf32>
      %230 = arith.mulf %217, %223 : vector<18x64xf32>
      %231 = arith.addf %229, %230 : vector<18x64xf32>
      %232 = math.tanh %231 : vector<18x64xf32>
      %233 = arith.mulf %228, %232 : vector<18x64xf32>
      %234 = vector.extract_strided_slice %30 {offsets = [0, 7], sizes = [18, 1], strides = [1, 1]} : vector<18x12xf32> to vector<18x1xf32>
      %235 = vector.broadcast %234 : vector<18x1xf32> to vector<18x256xf32>
      %236 = arith.mulf %235, %3 : vector<18x256xf32>
      %237 = arith.addf %236, %6 : vector<18x256xf32>
      %238 = arith.truncf %233 : vector<18x64xf32> to vector<18x64xbf16>
      %cst_67 = arith.constant dense<0.000000e+00> : vector<18x256xf32>
      %239 = tpu.matmul %238, %0, %cst_67 {dimension_numbers = #tpu.dot_dimension_numbers<[1], [0], [0], [1], [0, 0, 1, 1], [], []>} : vector<18x64xbf16>, vector<64x256xbf16>, vector<18x256xf32> -> vector<18x256xf32>
      %240 = arith.addf %239, %237 : vector<18x256xf32>
      %241 = math.tanh %240 : vector<18x256xf32>
      %242 = vector.extract_strided_slice %241 {offsets = [0, 0], sizes = [18, 64], strides = [1, 1]} : vector<18x256xf32> to vector<18x64xf32>
      %cst_68 = arith.constant 5.000000e-01 : f32
      %243 = vector.broadcast %cst_68 : f32 to vector<18x64xf32>
      %244 = arith.mulf %243, %242 : vector<18x64xf32>
      %cst_69 = arith.constant 5.000000e-01 : f32
      %245 = vector.broadcast %cst_69 : f32 to vector<18x64xf32>
      %246 = arith.addf %244, %245 : vector<18x64xf32>
      %247 = vector.extract_strided_slice %241 {offsets = [0, 64], sizes = [18, 64], strides = [1, 1]} : vector<18x256xf32> to vector<18x64xf32>
      %cst_70 = arith.constant 5.000000e-01 : f32
      %248 = vector.broadcast %cst_70 : f32 to vector<18x64xf32>
      %249 = arith.mulf %248, %247 : vector<18x64xf32>
      %cst_71 = arith.constant 5.000000e-01 : f32
      %250 = vector.broadcast %cst_71 : f32 to vector<18x64xf32>
      %251 = arith.addf %249, %250 : vector<18x64xf32>
      %252 = vector.extract_strided_slice %241 {offsets = [0, 128], sizes = [18, 64], strides = [1, 1]} : vector<18x256xf32> to vector<18x64xf32>
      %253 = vector.extract_strided_slice %241 {offsets = [0, 192], sizes = [18, 64], strides = [1, 1]} : vector<18x256xf32> to vector<18x64xf32>
      %cst_72 = arith.constant 5.000000e-01 : f32
      %254 = vector.broadcast %cst_72 : f32 to vector<18x64xf32>
      %255 = arith.mulf %254, %253 : vector<18x64xf32>
      %cst_73 = arith.constant 5.000000e-01 : f32
      %256 = vector.broadcast %cst_73 : f32 to vector<18x64xf32>
      %257 = arith.addf %255, %256 : vector<18x64xf32>
      %258 = arith.mulf %251, %231 : vector<18x64xf32>
      %259 = arith.mulf %246, %252 : vector<18x64xf32>
      %260 = arith.addf %258, %259 : vector<18x64xf32>
      %261 = math.tanh %260 : vector<18x64xf32>
      %262 = arith.mulf %257, %261 : vector<18x64xf32>
      %263 = vector.extract_strided_slice %30 {offsets = [0, 8], sizes = [18, 1], strides = [1, 1]} : vector<18x12xf32> to vector<18x1xf32>
      %264 = vector.broadcast %263 : vector<18x1xf32> to vector<18x256xf32>
      %265 = arith.mulf %264, %3 : vector<18x256xf32>
      %266 = arith.addf %265, %6 : vector<18x256xf32>
      %267 = arith.truncf %262 : vector<18x64xf32> to vector<18x64xbf16>
      %cst_74 = arith.constant dense<0.000000e+00> : vector<18x256xf32>
      %268 = tpu.matmul %267, %0, %cst_74 {dimension_numbers = #tpu.dot_dimension_numbers<[1], [0], [0], [1], [0, 0, 1, 1], [], []>} : vector<18x64xbf16>, vector<64x256xbf16>, vector<18x256xf32> -> vector<18x256xf32>
      %269 = arith.addf %268, %266 : vector<18x256xf32>
      %270 = math.tanh %269 : vector<18x256xf32>
      %271 = vector.extract_strided_slice %270 {offsets = [0, 0], sizes = [18, 64], strides = [1, 1]} : vector<18x256xf32> to vector<18x64xf32>
      %cst_75 = arith.constant 5.000000e-01 : f32
      %272 = vector.broadcast %cst_75 : f32 to vector<18x64xf32>
      %273 = arith.mulf %272, %271 : vector<18x64xf32>
      %cst_76 = arith.constant 5.000000e-01 : f32
      %274 = vector.broadcast %cst_76 : f32 to vector<18x64xf32>
      %275 = arith.addf %273, %274 : vector<18x64xf32>
      %276 = vector.extract_strided_slice %270 {offsets = [0, 64], sizes = [18, 64], strides = [1, 1]} : vector<18x256xf32> to vector<18x64xf32>
      %cst_77 = arith.constant 5.000000e-01 : f32
      %277 = vector.broadcast %cst_77 : f32 to vector<18x64xf32>
      %278 = arith.mulf %277, %276 : vector<18x64xf32>
      %cst_78 = arith.constant 5.000000e-01 : f32
      %279 = vector.broadcast %cst_78 : f32 to vector<18x64xf32>
      %280 = arith.addf %278, %279 : vector<18x64xf32>
      %281 = vector.extract_strided_slice %270 {offsets = [0, 128], sizes = [18, 64], strides = [1, 1]} : vector<18x256xf32> to vector<18x64xf32>
      %282 = vector.extract_strided_slice %270 {offsets = [0, 192], sizes = [18, 64], strides = [1, 1]} : vector<18x256xf32> to vector<18x64xf32>
      %cst_79 = arith.constant 5.000000e-01 : f32
      %283 = vector.broadcast %cst_79 : f32 to vector<18x64xf32>
      %284 = arith.mulf %283, %282 : vector<18x64xf32>
      %cst_80 = arith.constant 5.000000e-01 : f32
      %285 = vector.broadcast %cst_80 : f32 to vector<18x64xf32>
      %286 = arith.addf %284, %285 : vector<18x64xf32>
      %287 = arith.mulf %280, %260 : vector<18x64xf32>
      %288 = arith.mulf %275, %281 : vector<18x64xf32>
      %289 = arith.addf %287, %288 : vector<18x64xf32>
      %290 = math.tanh %289 : vector<18x64xf32>
      %291 = arith.mulf %286, %290 : vector<18x64xf32>
      %292 = vector.extract_strided_slice %30 {offsets = [0, 9], sizes = [18, 1], strides = [1, 1]} : vector<18x12xf32> to vector<18x1xf32>
      %293 = vector.broadcast %292 : vector<18x1xf32> to vector<18x256xf32>
      %294 = arith.mulf %293, %3 : vector<18x256xf32>
      %295 = arith.addf %294, %6 : vector<18x256xf32>
      %296 = arith.truncf %291 : vector<18x64xf32> to vector<18x64xbf16>
      %cst_81 = arith.constant dense<0.000000e+00> : vector<18x256xf32>
      %297 = tpu.matmul %296, %0, %cst_81 {dimension_numbers = #tpu.dot_dimension_numbers<[1], [0], [0], [1], [0, 0, 1, 1], [], []>} : vector<18x64xbf16>, vector<64x256xbf16>, vector<18x256xf32> -> vector<18x256xf32>
      %298 = arith.addf %297, %295 : vector<18x256xf32>
      %299 = math.tanh %298 : vector<18x256xf32>
      %300 = vector.extract_strided_slice %299 {offsets = [0, 0], sizes = [18, 64], strides = [1, 1]} : vector<18x256xf32> to vector<18x64xf32>
      %cst_82 = arith.constant 5.000000e-01 : f32
      %301 = vector.broadcast %cst_82 : f32 to vector<18x64xf32>
      %302 = arith.mulf %301, %300 : vector<18x64xf32>
      %cst_83 = arith.constant 5.000000e-01 : f32
      %303 = vector.broadcast %cst_83 : f32 to vector<18x64xf32>
      %304 = arith.addf %302, %303 : vector<18x64xf32>
      %305 = vector.extract_strided_slice %299 {offsets = [0, 64], sizes = [18, 64], strides = [1, 1]} : vector<18x256xf32> to vector<18x64xf32>
      %cst_84 = arith.constant 5.000000e-01 : f32
      %306 = vector.broadcast %cst_84 : f32 to vector<18x64xf32>
      %307 = arith.mulf %306, %305 : vector<18x64xf32>
      %cst_85 = arith.constant 5.000000e-01 : f32
      %308 = vector.broadcast %cst_85 : f32 to vector<18x64xf32>
      %309 = arith.addf %307, %308 : vector<18x64xf32>
      %310 = vector.extract_strided_slice %299 {offsets = [0, 128], sizes = [18, 64], strides = [1, 1]} : vector<18x256xf32> to vector<18x64xf32>
      %311 = vector.extract_strided_slice %299 {offsets = [0, 192], sizes = [18, 64], strides = [1, 1]} : vector<18x256xf32> to vector<18x64xf32>
      %cst_86 = arith.constant 5.000000e-01 : f32
      %312 = vector.broadcast %cst_86 : f32 to vector<18x64xf32>
      %313 = arith.mulf %312, %311 : vector<18x64xf32>
      %cst_87 = arith.constant 5.000000e-01 : f32
      %314 = vector.broadcast %cst_87 : f32 to vector<18x64xf32>
      %315 = arith.addf %313, %314 : vector<18x64xf32>
      %316 = arith.mulf %309, %289 : vector<18x64xf32>
      %317 = arith.mulf %304, %310 : vector<18x64xf32>
      %318 = arith.addf %316, %317 : vector<18x64xf32>
      %319 = math.tanh %318 : vector<18x64xf32>
      %320 = arith.mulf %315, %319 : vector<18x64xf32>
      %321 = vector.extract_strided_slice %30 {offsets = [0, 10], sizes = [18, 1], strides = [1, 1]} : vector<18x12xf32> to vector<18x1xf32>
      %322 = vector.broadcast %321 : vector<18x1xf32> to vector<18x256xf32>
      %323 = arith.mulf %322, %3 : vector<18x256xf32>
      %324 = arith.addf %323, %6 : vector<18x256xf32>
      %325 = arith.truncf %320 : vector<18x64xf32> to vector<18x64xbf16>
      %cst_88 = arith.constant dense<0.000000e+00> : vector<18x256xf32>
      %326 = tpu.matmul %325, %0, %cst_88 {dimension_numbers = #tpu.dot_dimension_numbers<[1], [0], [0], [1], [0, 0, 1, 1], [], []>} : vector<18x64xbf16>, vector<64x256xbf16>, vector<18x256xf32> -> vector<18x256xf32>
      %327 = arith.addf %326, %324 : vector<18x256xf32>
      %328 = math.tanh %327 : vector<18x256xf32>
      %329 = vector.extract_strided_slice %328 {offsets = [0, 0], sizes = [18, 64], strides = [1, 1]} : vector<18x256xf32> to vector<18x64xf32>
      %cst_89 = arith.constant 5.000000e-01 : f32
      %330 = vector.broadcast %cst_89 : f32 to vector<18x64xf32>
      %331 = arith.mulf %330, %329 : vector<18x64xf32>
      %cst_90 = arith.constant 5.000000e-01 : f32
      %332 = vector.broadcast %cst_90 : f32 to vector<18x64xf32>
      %333 = arith.addf %331, %332 : vector<18x64xf32>
      %334 = vector.extract_strided_slice %328 {offsets = [0, 64], sizes = [18, 64], strides = [1, 1]} : vector<18x256xf32> to vector<18x64xf32>
      %cst_91 = arith.constant 5.000000e-01 : f32
      %335 = vector.broadcast %cst_91 : f32 to vector<18x64xf32>
      %336 = arith.mulf %335, %334 : vector<18x64xf32>
      %cst_92 = arith.constant 5.000000e-01 : f32
      %337 = vector.broadcast %cst_92 : f32 to vector<18x64xf32>
      %338 = arith.addf %336, %337 : vector<18x64xf32>
      %339 = vector.extract_strided_slice %328 {offsets = [0, 128], sizes = [18, 64], strides = [1, 1]} : vector<18x256xf32> to vector<18x64xf32>
      %340 = vector.extract_strided_slice %328 {offsets = [0, 192], sizes = [18, 64], strides = [1, 1]} : vector<18x256xf32> to vector<18x64xf32>
      %cst_93 = arith.constant 5.000000e-01 : f32
      %341 = vector.broadcast %cst_93 : f32 to vector<18x64xf32>
      %342 = arith.mulf %341, %340 : vector<18x64xf32>
      %cst_94 = arith.constant 5.000000e-01 : f32
      %343 = vector.broadcast %cst_94 : f32 to vector<18x64xf32>
      %344 = arith.addf %342, %343 : vector<18x64xf32>
      %345 = arith.mulf %338, %318 : vector<18x64xf32>
      %346 = arith.mulf %333, %339 : vector<18x64xf32>
      %347 = arith.addf %345, %346 : vector<18x64xf32>
      %348 = math.tanh %347 : vector<18x64xf32>
      %349 = arith.mulf %344, %348 : vector<18x64xf32>
      %350 = vector.extract_strided_slice %30 {offsets = [0, 11], sizes = [18, 1], strides = [1, 1]} : vector<18x12xf32> to vector<18x1xf32>
      %351 = vector.broadcast %350 : vector<18x1xf32> to vector<18x256xf32>
      %352 = arith.mulf %351, %3 : vector<18x256xf32>
      %353 = arith.addf %352, %6 : vector<18x256xf32>
      %354 = arith.truncf %349 : vector<18x64xf32> to vector<18x64xbf16>
      %cst_95 = arith.constant dense<0.000000e+00> : vector<18x256xf32>
      %355 = tpu.matmul %354, %0, %cst_95 {dimension_numbers = #tpu.dot_dimension_numbers<[1], [0], [0], [1], [0, 0, 1, 1], [], []>} : vector<18x64xbf16>, vector<64x256xbf16>, vector<18x256xf32> -> vector<18x256xf32>
      %356 = arith.addf %355, %353 : vector<18x256xf32>
      %357 = math.tanh %356 : vector<18x256xf32>
      %358 = vector.extract_strided_slice %357 {offsets = [0, 0], sizes = [18, 64], strides = [1, 1]} : vector<18x256xf32> to vector<18x64xf32>
      %cst_96 = arith.constant 5.000000e-01 : f32
      %359 = vector.broadcast %cst_96 : f32 to vector<18x64xf32>
      %360 = arith.mulf %359, %358 : vector<18x64xf32>
      %cst_97 = arith.constant 5.000000e-01 : f32
      %361 = vector.broadcast %cst_97 : f32 to vector<18x64xf32>
      %362 = arith.addf %360, %361 : vector<18x64xf32>
      %363 = vector.extract_strided_slice %357 {offsets = [0, 64], sizes = [18, 64], strides = [1, 1]} : vector<18x256xf32> to vector<18x64xf32>
      %cst_98 = arith.constant 5.000000e-01 : f32
      %364 = vector.broadcast %cst_98 : f32 to vector<18x64xf32>
      %365 = arith.mulf %364, %363 : vector<18x64xf32>
      %cst_99 = arith.constant 5.000000e-01 : f32
      %366 = vector.broadcast %cst_99 : f32 to vector<18x64xf32>
      %367 = arith.addf %365, %366 : vector<18x64xf32>
      %368 = vector.extract_strided_slice %357 {offsets = [0, 128], sizes = [18, 64], strides = [1, 1]} : vector<18x256xf32> to vector<18x64xf32>
      %369 = vector.extract_strided_slice %357 {offsets = [0, 192], sizes = [18, 64], strides = [1, 1]} : vector<18x256xf32> to vector<18x64xf32>
      %cst_100 = arith.constant 5.000000e-01 : f32
      %370 = vector.broadcast %cst_100 : f32 to vector<18x64xf32>
      %371 = arith.mulf %370, %369 : vector<18x64xf32>
      %cst_101 = arith.constant 5.000000e-01 : f32
      %372 = vector.broadcast %cst_101 : f32 to vector<18x64xf32>
      %373 = arith.addf %371, %372 : vector<18x64xf32>
      %374 = arith.mulf %367, %347 : vector<18x64xf32>
      %375 = arith.mulf %362, %368 : vector<18x64xf32>
      %376 = arith.addf %374, %375 : vector<18x64xf32>
      %377 = math.tanh %376 : vector<18x64xf32>
      %378 = arith.mulf %373, %377 : vector<18x64xf32>
      scf.yield %378, %376 : vector<18x64xf32>, vector<18x64xf32>
    }
    %c125_i32_6 = arith.constant 125 : i32
    %c0_7 = arith.constant 0 : index
    %c0_8 = arith.constant 0 : index
    %11 = vector.load %arg4[%c0_7, %c0_8] : memref<64x10xf32, #tpu.memory_space<vmem>>, vector<64x10xf32>
    %cst_9 = arith.constant dense<0.000000e+00> : vector<18x10xf32>
    %12 = tpu.matmul %10#0, %11, %cst_9 {dimension_numbers = #tpu.dot_dimension_numbers<[1], [0], [0], [1], [0, 0, 1, 1], [], []>} : vector<18x64xf32>, vector<64x10xf32>, vector<18x10xf32> -> vector<18x10xf32>
    %c0_10 = arith.constant 0 : index
    %c0_11 = arith.constant 0 : index
    %13 = vector.load %arg5[%c0_10, %c0_11] : memref<1x10xf32, #tpu.memory_space<vmem>>, vector<1x10xf32>
    %14 = vector.broadcast %13 : vector<1x10xf32> to vector<18x10xf32>
    %15 = arith.addf %12, %14 : vector<18x10xf32>
    %cst_12 = arith.constant dense<0xFF800000> : vector<18xf32>
    %16 = vector.multi_reduction <maximumf>, %15, %cst_12 [1] : vector<18x10xf32> to vector<18xf32>
    %17 = vector.shape_cast %16 : vector<18xf32> to vector<18x1xf32>
    %18 = vector.broadcast %17 : vector<18x1xf32> to vector<18x10xf32>
    %19 = arith.subf %15, %18 : vector<18x10xf32>
    %20 = math.exp %19 : vector<18x10xf32>
    %cst_13 = arith.constant dense<0.000000e+00> : vector<18xf32>
    %21 = vector.multi_reduction <add>, %20, %cst_13 [1] : vector<18x10xf32> to vector<18xf32>
    %22 = vector.shape_cast %21 : vector<18xf32> to vector<18x1xf32>
    %23 = math.log %22 : vector<18x1xf32>
    %24 = arith.addf %17, %23 : vector<18x1xf32>
    %25 = vector.broadcast %24 : vector<18x1xf32> to vector<18x10xf32>
    %26 = arith.subf %15, %25 : vector<18x10xf32>
    %c0_14 = arith.constant 0 : index
    %c0_15 = arith.constant 0 : index
    %27 = vector.load %arg6[%c0_14, %c0_15] : memref<18x10xf32, #tpu.memory_space<vmem>>, vector<18x10xf32>
    tpu.vector_store %arg6[%c0_14, %c0_15], %26 {strides = array<i32>} : memref<18x10xf32, #tpu.memory_space<vmem>>, vector<18x10xf32>,
    return
  }
}

</mosaic_0001>

<bundles_post_ra>
// kernel: _lambda_.4
= control target key start
LH: loop header
LB: loop body
LE: loop exit
PB: predicated region body
PF: predicated region fallthrough
CT: control target
= control target key end

     0   :  { %9 = vsyncpa [#allocation3], 0  ;;  %s3816_s0 = inlined_call_operand.vmem [shape: f32[18,1,409], index: 0, kind: input, shape index: {}]   ;;  %s3817_s1 = inlined_call_operand.hbm [shape: f32[9,32,1], index: 1, kind: input, shape index: {}]   ;;  %s3818_s2 = inlined_call_operand.hbm [shape: f32[32,1], index: 2, kind: input, shape index: {}]   ;;  %s3819_s3 = inlined_call_operand.vmem [shape: f32[400,200], index: 3, kind: input, shape index: {}]   ;;  %s3820_s4 = inlined_call_operand.vmem [shape: f32[18,32,200], index: 4, kind: output, shape index: {}]  }
   0x1   :  { %10 = vsyncpa [#allocation5], 0  ;;  %s2260_s15 = smov 0  }
   0x2 LB: > { %s1931_s16 = sadd.s32 4294967295, %s2216_s15   ;;  %p1933_p0 = scmp.ge.s32.totalorder %s2216_s15, 1  ;;  %s2216_s15 = sphi %s2260_s15, %s16_s15  }
   0x3   : > { %p136_p1 = scmp.lt.s32.totalorder %s2216_s15, 3  ;;  %s2222_s17 = smov [#allocation2]  }
   0x4   : > { %s148_s18 = sshll.u32 %s2222_s17, 4  ;;  %p2274_p3 = scmp.eq.s32.totalorder %s1931_s16, 0  ;;  %s149_s18 = int_to_ptr.vmem [resolvable:$true] %s148_s18 }
   0x5   : > { %p2268_p2 = pnand %p1933_p0, %p136_p1  ;;  %s2223_s21 = smov [#allocation4]  }
   0x6   : > { %s3846_s20 = scalar_select %p2274_p3, 1, 0 }
   0x7   : > { %s3845_s19 = scalar_select %p2268_p2, 1, 0 }
   0x8   : > { %p2070_p4 = pneg %p2268_p2  ;;  %s161_s22 = sshll.u32 %s2223_s21, 4  ;;  %s2286_s22 = int_to_ptr.vmem [resolvable:$true] %s161_s22 }
   0x9   : > { %s2142_s26 = scalar_lea.hbm %s3817_s1, 4608 }
   0xa   : > { %p2282_p5 = pnand %p2274_p3, %p2070_p4  ;;  %p2143_p6 = scmp.ne.s32.totalorder %s3817_s1, %s2142_s26 }
   0xb   : > { %p2149_p10 = scmp.lt.u32.totalorder %s2142_s26, %s3817_s1 }
   0xc   : > { %p2144_p7 = pneg %p2282_p5 }
   0xe   : > { %p2145_p8 = pnand %p2144_p7, %p2143_p6 }
  0x10   : > { %p2146_p9 = pneg %p2145_p8 }
  0x12   : > { %p2151_p11 = pnand %p2149_p10, %p2146_p9 }
  0x14   : > { %2154 = shalt.err (!%p2151_p11)
}
  0x15   : > { %s2155_s5 = scalar_lea.vmem %s149_s18, 4608  ;;  %p2163_p1 = scmp.lt.s32.totalorder %s149_s18, %s149_s18 }
  0x16   : > { %p2156_p12 = scmp.ne.s32.totalorder %s149_s18, %s2155_s5  ;;  %p2164_p4 = scmp.lt.s32.totalorder %s2155_s5, %s2155_s5 }
  0x18   : > { %p2158_p13 = pnand %p2156_p12, %p2144_p7  ;;  %p2165_p3 = por %p2164_p4, %p2163_p1 }
  0x1a   : > { %p2159_p0 = pneg %p2158_p13 }
  0x1c   : > { %p2166_p2 = pnand %p2165_p3, %p2159_p0 }
  0x1e   : > { %2169 = shalt.err (!%p2166_p2)
}
  0x1f   : > { %s2224_s6 = smov 128   ;;  %s2225_s7 = smov 8  }
  0x20   : > { %2073 = dma.hbm_to_vmem [thread:$0]  (!%p2282_p5), %s3817_s1, 4608, %s149_s18, [#allocation3], %s2224_s6, %s2224_s6, %s2225_s7  }
  0x21   : > { %s2170_s12 = scalar_lea.hbm %s3818_s2, 512 }
  0x22   : > { %p2171_p6 = scmp.ne.s32.totalorder %s3818_s2, %s2170_s12  ;;  %p2177_p8 = scmp.lt.u32.totalorder %s2170_s12, %s3818_s2 }
  0x24   : > { %p2173_p2 = pnand %p2171_p6, %p2144_p7 }
  0x26   : > { %p2174_p3 = pneg %p2173_p2 }
  0x28   : > { %p2179_p9 = pnand %p2177_p8, %p2174_p3 }
  0x2a   : > { %2182 = shalt.err (!%p2179_p9)
}
  0x2b   : > { %s2183_s18 = scalar_lea.vmem %s2286_s22, 512  ;;  %p2191_p13 = scmp.lt.s32.totalorder %s2286_s22, %s2286_s22 }
  0x2c   : > { %p2184_p10 = scmp.ne.s32.totalorder %s2286_s22, %s2183_s18  ;;  %p2192_p0 = scmp.lt.s32.totalorder %s2183_s18, %s2183_s18 }
  0x2e   : > { %p2186_p11 = pnand %p2184_p10, %p2144_p7  ;;  %p2193_p1 = por %p2192_p0, %p2191_p13 }
  0x30   : > { %p2187_p12 = pneg %p2186_p11 }
  0x32   : > { %p2194_p4 = pnand %p2193_p1, %p2187_p12 }
  0x34   : > { %2197 = shalt.err (!%p2194_p4)
}
  0x35   : > { %2076 = dma.hbm_to_vmem [thread:$0]  (!%p2282_p5), %s3818_s2, 512, %s2286_s22, [#allocation5], %s2224_s6, %s2224_s6, %s2225_s7  }
  0x36   : > { %p3848_p6 = scmp.ne.s32.totalorder %s3845_s19, 0 }
  0x37   : > { %p3849_p2 = scmp.ne.s32.totalorder (!%p3848_p6), %s3846_s20, 0 }
  0x38   : > { %189 = sbr.rel (%p3848_p6) target bundleno = 947 (0x3b3), region = 36 }
  0x3f   : > { %2207 = dma.done.wait (%p3849_p2), [#allocation3], 4608  }
  0x40   : > { %2209 = vsyncadd (%p3849_p2), [#allocation3], 4294962688 }
  0x41   : > { %2211 = dma.done.wait (%p3849_p2), [#allocation5], 512  }
  0x42   : > { %2213 = vsyncadd (%p3849_p2), [#allocation5], 4294966784  ;;  %s220_s23 = smul.u32 9, %s1931_s16  ;;  %v2347_v0 = vld [vmem:[#allocation4] sm:$0xff]  ;;  %v2349_v1 = vld [vmem:[#allocation4 + $0x8] sm:$0xff]  ;;  %s2365_s16 = smov 0  }
  0x43   : > { %3850 = vst [vmem:[#allocation8_spill] sm:$0xff] %v2347_v0  ;;  %3851 = vst [vmem:[#allocation9_spill] sm:$0xff] %v2349_v1  ;;  %v2351_v2 = vld [vmem:[#allocation4 + $0x10] sm:$0xff]  ;;  %v2363_v3 = vld [vmem:[#allocation4 + $0x18] sm:$0xff] }
  0x44   : > { %p221_p7 = scmp.lt.s32.totalorder %s220_s23, 17  ;;  %3852 = vst [vmem:[#allocation10_spill] sm:$0xff] %v2351_v2  ;;  %3853 = vst [vmem:[#allocation11_spill] sm:$0xff] %v2363_v3 }
  0x46   : > { %s3917_s23 = smov (!%p221_p7, %s220_s23), 17 }
  0x47   : > { %s1940_s22 = sshll.u32 %s3917_s23, 2  ;;  %s1952_s19 = sshll.u32 %s3917_s23, 6 }
  0x48   : > { %s2356_s28 = scalar_lea.vmem %s3816_s0, %s1940_s22  ;;  %s2361_s30 = scalar_lea.vmem %s3820_s4, %s1952_s19 }
  0x49 LB: >> { %v248_v4 = vld [vmem:[#allocation2 + $0x10] sm:$0xff]  ;;  %v246_v5 = vld [vmem:[#allocation2] sm:$0xff]  ;;  %v2226_v6 = vmov 0   ;;  %v249_v7 = vld [vmem:[#allocation2 + $0x18] sm:$0xff]  ;;  %v271_v41 = vlaneseq  ;;  %s1943_s5 = sshll.u32 %s2220_s16, 2  ;;  %s2227_s7 = smov 127   ;;  %s2220_s16 = sphi %s2365_s16, %s242_s16  }
  0x4a   : >> { %2111 = vset.pattern.permute.xlu1 %v2226_v6  ;;  %2110 = vset.pattern.permute.xlu0 %v2226_v6  ;;  %v247_v8 = vld [vmem:[#allocation2 + $0x8] sm:$0xff]  ;;  %v458_v9 = vld [vmem:[#allocation2 + $0x40] sm:$0xff]  ;;  %v326_v16 = vld [vmem:[#allocation2 + $0x30] sm:$0xff]  ;;  %s244_s6 = scalar_lea.vmem %s2356_s28, %s1943_s5  ;;  %s2228_s8 = smov 126   ;;  %vm412_vm0 = vcmask 1039360   ;;  %vm546_vm1 = vcmask 1031168  }
  0x4b   : >> { %262 = vperm.xlu1 %2111, %v248_v4   ;;  %252 = vperm.xlu0 %2110, %v246_v5   ;;  %v324_v10 = vld [vmem:[#allocation2 + $0x20] sm:$0xff]  ;;  %v325_v12 = vld [vmem:[#allocation2 + $0x28] sm:$0xff]  ;;  %v460_v17 = vld [vmem:[#allocation2 + $0x50] sm:$0xff]  ;;  %v272_v42 = vshrl.u32 %v271_v41, 7  ;;  %s2229_s9 = smov 125   ;;  %s2230_s10 = smov 124  }
  0x4c   : >> { %v592_v11 = vld [vmem:[#allocation2 + $0x60] sm:$0xff]  ;;  %v459_v14 = vld [vmem:[#allocation2 + $0x48] sm:$0xff]  ;;  %v594_v21 = vld [vmem:[#allocation2 + $0x70] sm:$0xff]  ;;  %s2231_s11 = smov 123   ;;  %s2232_s12 = smov 122   ;;  %vm680_vm2 = vcmask 1022976  }
  0x4d   : >> { %v726_v13 = vld [vmem:[#allocation2 + $0x80] sm:$0xff]  ;;  %v593_v15 = vld [vmem:[#allocation2 + $0x68] sm:$0xff]  ;;  %v327_v22 = vld [vmem:[#allocation2 + $0x38] sm:$0xff]  ;;  %v281_v45 = vsub.s32 2, %v272_v42  ;;  %v277_v46 = vsub.s32 1, %v272_v42  ;;  %v285_v51 = vsub.s32 3, %v272_v42 }
  0x4e   : >> { %v860_v18 = vld [vmem:[#allocation2 + $0xa0] sm:$0xff]  ;;  %v727_v20 = vld [vmem:[#allocation2 + $0x88] sm:$0xff]  ;;  %v728_v25 = vld [vmem:[#allocation2 + $0x90] sm:$0xff]  ;;  %v273_v52 = vsub.s32 0, %v272_v42  ;;  %s2233_s13 = smov 121   ;;  %s2234_s14 = smov 120  }
  0x4f   : >> { %267 = vperm.xlu1 %2111, %v249_v7   ;;  %257 = vperm.xlu0 %2110, %v247_v8   ;;  %v994_v19 = vld [vmem:[#allocation2 + $0xc0] sm:$0xff]  ;;  %v861_v24 = vld [vmem:[#allocation2 + $0xa8] sm:$0xff]  ;;  %v461_v26 = vld [vmem:[#allocation2 + $0x58] sm:$0xff]  ;;  %vm814_vm3 = vcmask 1014784   ;;  %vm948_vm4 = vcmask 1006592   ;;  %vm1082_vm5 = vcmask 998400  }
  0x50   : >> { %v1128_v23 = vld [vmem:[#allocation2 + $0xe0] sm:$0xff]  ;;  %v995_v28 = vld [vmem:[#allocation2 + $0xc8] sm:$0xff]  ;;  %v862_v29 = vld [vmem:[#allocation2 + $0xb0] sm:$0xff]  ;;  %vm1216_vm6 = vcmask 990208   ;;  %vm1350_vm7 = vcmask 982016   ;;  %vm1639_vm8 = vcmask 130048  }
  0x51   : >> { %v1262_v27 = vld [vmem:[#allocation2 + $0x100] sm:$0xff]  ;;  %v595_v30 = vld [vmem:[#allocation2 + $0x78] sm:$0xff]  ;;  %v1129_v32 = vld [vmem:[#allocation2 + $0xe8] sm:$0xff]  ;;  %vm1834_vm9 = vcmask 588800  }
  0x52   : >> { %v729_v31 = vld [vmem:[#allocation2 + $0x98] sm:$0xff]  ;;  %v1263_v33 = vld [vmem:[#allocation2 + $0x108] sm:$0xff]  ;;  %v996_v34 = vld [vmem:[#allocation2 + $0xd0] sm:$0xff] }
  0x53   : >> { %464 = vperm.xlu1 %2111, %v458_v9   ;;  %330 = vperm.xlu0 %2110, %v324_v10   ;;  %v1130_v35 = vld [vmem:[#allocation2 + $0xf0] sm:$0xff]  ;;  %v863_v36 = vld [vmem:[#allocation2 + $0xb8] sm:$0xff]  ;;  %v245_v48 = vld [vmem:[%s244_s6] sm:$0xf] }
  0x54   : >> { %v1264_v37 = vld [vmem:[#allocation2 + $0x110] sm:$0xff]  ;;  %v997_v38 = vld [vmem:[#allocation2 + $0xd8] sm:$0xff]  ;;  %v2378_v49 = vrot.slane %v245_v48, %v281_v45  ;;  %v2380_v50 = vrot.slane %v245_v48, %v277_v46  ;;  %v2388_v57 = vrot.slane %v245_v48, %v285_v51  ;;  %v2390_v58 = vrot.slane %v245_v48, %v273_v52  ;;  %v3855_v0 = vld [vmem:[#allocation8_spill] sm:$0xff] }
  0x55   : >> { %v1265_v39 = vld [vmem:[#allocation2 + $0x118] sm:$0xff]  ;;  %v3858_v1 = vld [vmem:[#allocation9_spill] sm:$0xff]  ;;  %v3871_v2 = vld [vmem:[#allocation10_spill] sm:$0xff] }
  0x56   : >> { %v1131_v40 = vld [vmem:[#allocation2 + $0xf8] sm:$0xff] }
  0x57   : >> { %598 = vperm.xlu1 %2111, %v592_v11   ;;  %335 = vperm.xlu0 %2110, %v325_v12   ;;  %v3886_v3 = vld [vmem:[#allocation11_spill] sm:$0xff] }
  0x5b   : >> { %732 = vperm.xlu1 %2111, %v726_v13   ;;  %469 = vperm.xlu0 %2110, %v459_v14  }
  0x5f   : >> { %603 = vperm.xlu1 %2111, %v593_v15   ;;  %340 = vperm.xlu0 %2110, %v326_v16  }
  0x63   : >> { %474 = vperm.xlu1 %2111, %v460_v17   ;;  %866 = vperm.xlu0 %2110, %v860_v18  }
  0x67   : >> { %1000 = vperm.xlu1 %2111, %v994_v19   ;;  %737 = vperm.xlu0 %2110, %v727_v20  }
  0x6b   : >> { %608 = vperm.xlu1 %2111, %v594_v21   ;;  %345 = vperm.xlu0 %2110, %v327_v22  }
  0x6f   : >> { %1134 = vperm.xlu1 %2111, %v1128_v23   ;;  %871 = vperm.xlu0 %2110, %v861_v24  }
  0x73   : >> { %742 = vperm.xlu1 %2111, %v728_v25   ;;  %479 = vperm.xlu0 %2110, %v461_v26  }
  0x77   : >> { %1268 = vperm.xlu1 %2111, %v1262_v27   ;;  %1005 = vperm.xlu0 %2110, %v995_v28  }
  0x7b   : >> { %876 = vperm.xlu1 %2111, %v862_v29   ;;  %613 = vperm.xlu0 %2110, %v595_v30  }
  0x7f   : >> { %747 = vperm.xlu1 %2111, %v729_v31   ;;  %1139 = vperm.xlu0 %2110, %v1129_v32  }
  0x83   : >> { %1273 = vperm.xlu1 %2111, %v1263_v33   ;;  %1010 = vperm.xlu0 %2110, %v996_v34  }
  0x87   : >> { %1144 = vperm.xlu1 %2111, %v1130_v35   ;;  %881 = vperm.xlu0 %2110, %v863_v36  }
  0x8b   : >> { %1278 = vperm.xlu1 %2111, %v1264_v37   ;;  %1015 = vperm.xlu0 %2110, %v997_v38  }
  0x8f   : >> { %1283 = vperm.xlu1 %2111, %v1265_v39   ;;  %1149 = vperm.xlu0 %2110, %v1131_v40  }
  0xca   : >> { %v2371_v43 = vpop.permute.xlu0 %252  ;;  %v2374_v44 = vpop.permute.xlu1 %262 }
  0xce   : >> { %v2376_v47 = vpop.permute.xlu0 %257  ;;  %v2382_v53 = vpop.permute.xlu1 %267 }
  0xcf   : >> { %3854 = vst [vmem:[#allocation12_spill] sm:$0xff] %v2376_v47 }
  0xd2   : >> { %v331_v54 = vpop.permute.xlu0 %330  ;;  %v465_v61 = vpop.permute.xlu1 %464 }
  0xd3   : >> { %v350_v55 = vmul.f32 %v331_v54, %v2378_v49  ;;  %v349_v56 = vmul.f32 %v331_v54, %v2380_v50  ;;  %v351_v59 = vmul.f32 %v331_v54, %v2388_v57  ;;  %v348_v60 = vmul.f32 %v331_v54, %v2390_v58 }
  0xd4   : >> { %v483_v62 = vmul.f32 %v465_v61, %v2380_v50  ;;  %v484_v63 = vmul.f32 %v465_v61, %v2378_v49  ;;  %v485_v4 = vmul.f32 %v465_v61, %v2388_v57  ;;  %v482_v5 = vmul.f32 %v465_v61, %v2390_v58 }
  0xd5   : >> { %384 = vrot.lane.b32.xlu1 %v350_v55, %s2227_s7  ;;  %382 = vrot.lane.b32.xlu0 %v349_v56, %s2227_s7 }
  0xd6   : >> { %v336_v6 = vpop.permute.xlu0 %335  ;;  %v599_v9 = vpop.permute.xlu1 %598 }
  0xd7   : >> { %v353_v7 = vmul.f32 %v336_v6, %v2380_v50  ;;  %v354_v8 = vmul.f32 %v336_v6, %v2378_v49  ;;  %v355_v10 = vmul.f32 %v336_v6, %v2388_v57  ;;  %v617_v11 = vmul.f32 %v599_v9, %v2380_v50 }
  0xd8   : >> { %v618_v12 = vmul.f32 %v599_v9, %v2378_v49  ;;  %v619_v13 = vmul.f32 %v599_v9, %v2388_v57  ;;  %v352_v14 = vmul.f32 %v336_v6, %v2390_v58  ;;  %v616_v15 = vmul.f32 %v599_v9, %v2390_v58 }
  0xd9   : >> { %386 = vrot.lane.b32.xlu0 %v351_v59, %s2227_s7  ;;  %380 = vrot.lane.b32.xlu1 %v348_v60, %s2227_s7 }
  0xda   : >> { %v470_v16 = vpop.permute.xlu0 %469  ;;  %v733_v19 = vpop.permute.xlu1 %732 }
  0xdb   : >> { %v487_v17 = vmul.f32 %v470_v16, %v2380_v50  ;;  %v488_v18 = vmul.f32 %v470_v16, %v2378_v49  ;;  %v489_v20 = vmul.f32 %v470_v16, %v2388_v57  ;;  %v751_v21 = vmul.f32 %v733_v19, %v2380_v50 }
  0xdc   : >> { %v752_v24 = vmul.f32 %v733_v19, %v2378_v49  ;;  %v753_v25 = vmul.f32 %v733_v19, %v2388_v57  ;;  %v486_v26 = vmul.f32 %v470_v16, %v2390_v58  ;;  %v750_v27 = vmul.f32 %v733_v19, %v2390_v58 }
  0xdd   : >> { %516 = vrot.lane.b32.xlu0 %v483_v62, %s2228_s8  ;;  %518 = vrot.lane.b32.xlu1 %v484_v63, %s2228_s8 }
  0xde   : >> { %v604_v22 = vpop.permute.xlu1 %603  ;;  %v341_v23 = vpop.permute.xlu0 %340 }
  0xdf   : >> { %v357_v30 = vmul.f32 %v341_v23, %v2380_v50  ;;  %v358_v31 = vmul.f32 %v341_v23, %v2378_v49  ;;  %v359_v34 = vmul.f32 %v341_v23, %v2388_v57  ;;  %v621_v35 = vmul.f32 %v604_v22, %v2380_v50 }
  0xe0   : >> { %v622_v36 = vmul.f32 %v604_v22, %v2378_v49  ;;  %v623_v37 = vmul.f32 %v604_v22, %v2388_v57  ;;  %v356_v48 = vmul.f32 %v341_v23, %v2390_v58  ;;  %v620_v51 = vmul.f32 %v604_v22, %v2390_v58 }
  0xe1   : >> { %520 = vrot.lane.b32.xlu0 %v485_v4, %s2228_s8  ;;  %514 = vrot.lane.b32.xlu1 %v482_v5, %s2228_s8 }
  0xe2   : >> { %v2434_v28 = vpop.permute.xlu1 %474  ;;  %v867_v29 = vpop.permute.xlu0 %866 }
  0xe3   : >> { %v885_v40 = vmul.f32 %v867_v29, %v2380_v50  ;;  %v886_v41 = vmul.f32 %v867_v29, %v2378_v49  ;;  %v887_v46 = vmul.f32 %v867_v29, %v2388_v57  ;;  %v884_v52 = vmul.f32 %v867_v29, %v2390_v58 }
  0xe4   : >> { %v491_v56 = vmul.f32 %v2434_v28, %v2380_v50  ;;  %v492_v59 = vmul.f32 %v2434_v28, %v2378_v49  ;;  %v493_v62 = vmul.f32 %v2434_v28, %v2388_v57 }
  0xe5   : >> { %390 = vrot.lane.b32.xlu0 %v353_v7, %s2227_s7  ;;  %392 = vrot.lane.b32.xlu1 %v354_v8, %s2227_s7 }
  0xe6   : >> { %v1001_v32 = vpop.permute.xlu1 %1000  ;;  %v738_v33 = vpop.permute.xlu0 %737 }
  0xe7   : >> { %v755_v63 = vmul.f32 %v738_v33, %v2380_v50  ;;  %v756_v4 = vmul.f32 %v738_v33, %v2378_v49  ;;  %v757_v5 = vmul.f32 %v738_v33, %v2388_v57  ;;  %v1019_v8 = vmul.f32 %v1001_v32, %v2380_v50 }
  0xe8   : >> { %v1020_v9 = vmul.f32 %v1001_v32, %v2378_v49 }
  0xe9   : >> { %394 = vrot.lane.b32.xlu0 %v355_v10, %s2227_s7  ;;  %650 = vrot.lane.b32.xlu1 %v617_v11, %s2229_s9 }
  0xea   : >> { %v2448_v38 = vpop.permute.xlu1 %608  ;;  %v2450_v39 = vpop.permute.xlu0 %345 }
  0xeb   : >> { %v363_v22 = vmul.f32 %v2450_v39, %v2388_v57  ;;  %v625_v23 = vmul.f32 %v2448_v38, %v2380_v50 }
  0xed   : >> { %652 = vrot.lane.b32.xlu0 %v618_v12, %s2229_s9  ;;  %654 = vrot.lane.b32.xlu1 %v619_v13, %s2229_s9  ;;  %v1021_v12 = vmul.f32 %v1001_v32, %v2388_v57  ;;  %v490_v13 = vmul.f32 %v2434_v28, %v2390_v58 }
  0xee   : >> { %v2458_v42 = vpop.permute.xlu1 %1134  ;;  %v2460_v45 = vpop.permute.xlu0 %871 }
  0xef   : >> { %v889_v28 = vmul.f32 %v2460_v45, %v2380_v50 }
  0xf1   : >> { %388 = vrot.lane.b32.xlu0 %v352_v14, %s2227_s7  ;;  %648 = vrot.lane.b32.xlu1 %v616_v15, %s2229_s9  ;;  %v754_v14 = vmul.f32 %v738_v33, %v2390_v58 }
  0xf2   : >> { %v2468_v54 = vpop.permute.xlu1 %742  ;;  %v2470_v55 = vpop.permute.xlu0 %479 }
  0xf5   : >> { %524 = vrot.lane.b32.xlu0 %v487_v17, %s2228_s8  ;;  %526 = vrot.lane.b32.xlu1 %v488_v18, %s2228_s8  ;;  %v1018_v17 = vmul.f32 %v1001_v32, %v2390_v58  ;;  %v361_v18 = vmul.f32 %v2450_v39, %v2380_v50  ;;  %v891_v32 = vmul.f32 %v2460_v45, %v2388_v57 }
  0xf6   : >> { %v2480_v60 = vpop.permute.xlu1 %1268  ;;  %v2482_v61 = vpop.permute.xlu0 %1005 }
  0xf9   : >> { %528 = vrot.lane.b32.xlu0 %v489_v20, %s2228_s8  ;;  %784 = vrot.lane.b32.xlu1 %v751_v21, %s2230_s10  ;;  %v362_v21 = vmul.f32 %v2450_v39, %v2378_v49 }
  0xfa   : >> { %v2491_v6 = vpop.permute.xlu1 %876  ;;  %v2493_v7 = vpop.permute.xlu0 %613 }
  0xfd   : >> { %786 = vrot.lane.b32.xlu0 %v752_v24, %s2230_s10  ;;  %788 = vrot.lane.b32.xlu1 %v753_v25, %s2230_s10  ;;  %v626_v24 = vmul.f32 %v2448_v38, %v2378_v49 }
  0xfe   : >> { %v2501_v10 = vpop.permute.xlu1 %747  ;;  %v2503_v11 = vpop.permute.xlu0 %1139 }
 0x101   : >> { %522 = vrot.lane.b32.xlu0 %v486_v26, %s2228_s8  ;;  %782 = vrot.lane.b32.xlu1 %v750_v27, %s2230_s10  ;;  %v627_v27 = vmul.f32 %v2448_v38, %v2388_v57 }
 0x102   : >> { %v2511_v15 = vpop.permute.xlu1 %1273  ;;  %v2513_v16 = vpop.permute.xlu0 %1010 }
 0x105   : >> { %398 = vrot.lane.b32.xlu0 %v357_v30, %s2227_s7  ;;  %400 = vrot.lane.b32.xlu1 %v358_v31, %s2227_s7  ;;  %v890_v31 = vmul.f32 %v2460_v45, %v2378_v49 }
 0x106   : >> { %v2522_v19 = vpop.permute.xlu1 %1144  ;;  %v2524_v20 = vpop.permute.xlu0 %881 }
 0x109   : >> { %402 = vrot.lane.b32.xlu0 %v359_v34, %s2227_s7  ;;  %658 = vrot.lane.b32.xlu1 %v621_v35, %s2229_s9  ;;  %v1153_v35 = vmul.f32 %v2458_v42, %v2380_v50 }
 0x10a   : >> { %v2536_v25 = vpop.permute.xlu1 %1278  ;;  %v2538_v26 = vpop.permute.xlu0 %1015 }
 0x10d   : >> { %660 = vrot.lane.b32.xlu0 %v622_v36, %s2229_s9  ;;  %662 = vrot.lane.b32.xlu1 %v623_v37, %s2229_s9  ;;  %v1154_v36 = vmul.f32 %v2458_v42, %v2378_v49 }
 0x10e   : >> { %v2548_v29 = vpop.permute.xlu1 %1283  ;;  %v2550_v30 = vpop.permute.xlu0 %1149 }
 0x111   : >> { %918 = vrot.lane.b32.xlu0 %v885_v40, %s2231_s11  ;;  %920 = vrot.lane.b32.xlu1 %v886_v41, %s2231_s11  ;;  %v1155_v41 = vmul.f32 %v2458_v42, %v2388_v57 }
 0x115   : >> { %922 = vrot.lane.b32.xlu0 %v887_v46, %s2231_s11  ;;  %396 = vrot.lane.b32.xlu1 %v356_v48, %s2227_s7  ;;  %v360_v46 = vmul.f32 %v2450_v39, %v2390_v58 }
 0x119   : >> { %656 = vrot.lane.b32.xlu0 %v620_v51, %s2229_s9  ;;  %916 = vrot.lane.b32.xlu1 %v884_v52, %s2231_s11  ;;  %v624_v52 = vmul.f32 %v2448_v38, %v2390_v58 }
 0x11d   : >> { %532 = vrot.lane.b32.xlu0 %v491_v56, %s2228_s8  ;;  %534 = vrot.lane.b32.xlu1 %v492_v59, %s2228_s8  ;;  %v888_v56 = vmul.f32 %v2460_v45, %v2390_v58 }
 0x121   : >> { %536 = vrot.lane.b32.xlu0 %v493_v62, %s2228_s8  ;;  %792 = vrot.lane.b32.xlu1 %v755_v63, %s2230_s10  ;;  %v1152_v62 = vmul.f32 %v2458_v42, %v2390_v58  ;;  %v495_v63 = vmul.f32 %v2470_v55, %v2380_v50 }
 0x125   : >> { %794 = vrot.lane.b32.xlu0 %v756_v4, %s2230_s10  ;;  %796 = vrot.lane.b32.xlu1 %v757_v5, %s2230_s10  ;;  %v496_v4 = vmul.f32 %v2470_v55, %v2378_v49  ;;  %v497_v5 = vmul.f32 %v2470_v55, %v2388_v57 }
 0x129   : >> { %1052 = vrot.lane.b32.xlu0 %v1019_v8, %s2232_s12  ;;  %1054 = vrot.lane.b32.xlu1 %v1020_v9, %s2232_s12  ;;  %v759_v9 = vmul.f32 %v2468_v54, %v2380_v50 }
 0x12d   : >> { %1056 = vrot.lane.b32.xlu0 %v1021_v12, %s2232_s12  ;;  %1397 = vperm.xlu1 %2111, %v3855_v0   ;;  %v760_v12 = vmul.f32 %v2468_v54, %v2378_v49 }
 0x131   : >> { %530 = vrot.lane.b32.xlu0 %v490_v13, %s2228_s8  ;;  %790 = vrot.lane.b32.xlu1 %v754_v14, %s2230_s10 }
 0x135   : >> { %1050 = vrot.lane.b32.xlu0 %v1018_v17, %s2232_s12  ;;  %406 = vrot.lane.b32.xlu1 %v361_v18, %s2227_s7  ;;  %v761_v17 = vmul.f32 %v2468_v54, %v2388_v57  ;;  %v1023_v18 = vmul.f32 %v2482_v61, %v2380_v50 }
 0x139   : >> { %408 = vrot.lane.b32.xlu0 %v362_v21, %s2227_s7  ;;  %410 = vrot.lane.b32.xlu1 %v363_v22, %s2227_s7 }
 0x13d   : >> { %666 = vrot.lane.b32.xlu0 %v625_v23, %s2229_s9  ;;  %668 = vrot.lane.b32.xlu1 %v626_v24, %s2229_s9  ;;  %v1024_v23 = vmul.f32 %v2482_v61, %v2378_v49  ;;  %v1025_v24 = vmul.f32 %v2482_v61, %v2388_v57 }
 0x141   : >> { %670 = vrot.lane.b32.xlu0 %v627_v27, %s2229_s9  ;;  %926 = vrot.lane.b32.xlu1 %v889_v28, %s2231_s11 }
 0x145   : >> { %928 = vrot.lane.b32.xlu0 %v890_v31, %s2231_s11  ;;  %930 = vrot.lane.b32.xlu1 %v891_v32, %s2231_s11  ;;  %v1287_v31 = vmul.f32 %v2480_v60, %v2380_v50  ;;  %v1288_v32 = vmul.f32 %v2480_v60, %v2378_v49 }
 0x147   : >> { %v2558_v33 = vpop.permute.xlu1 %384  ;;  %v2560_v34 = vpop.permute.xlu0 %382 }
 0x149   : >> { %1186 = vrot.lane.b32.xlu0 %v1153_v35, %s2233_s13  ;;  %1188 = vrot.lane.b32.xlu1 %v1154_v36, %s2233_s13 }
 0x14b   : >> { %v2568_v37 = vpop.permute.xlu0 %386  ;;  %v2570_v40 = vpop.permute.xlu1 %380 }
 0x14d   : >> { %1190 = vrot.lane.b32.xlu0 %v1155_v41, %s2233_s13  ;;  %404 = vrot.lane.b32.xlu1 %v360_v46, %s2227_s7  ;;  %v1289_v41 = vmul.f32 %v2480_v60, %v2388_v57 }
 0x14f   : >> { %v2578_v48 = vpop.permute.xlu0 %516  ;;  %v2580_v51 = vpop.permute.xlu1 %518 }
 0x151   : >> { %664 = vrot.lane.b32.xlu0 %v624_v52, %s2229_s9  ;;  %924 = vrot.lane.b32.xlu1 %v888_v56, %s2231_s11  ;;  %v494_v56 = vmul.f32 %v2470_v55, %v2390_v58 }
 0x153   : >> { %v2588_v59 = vpop.permute.xlu0 %520  ;;  %v2590_v39 = vpop.permute.xlu1 %514 }
 0x155   : >> { %1184 = vrot.lane.b32.xlu0 %v1152_v62, %s2233_s13  ;;  %540 = vrot.lane.b32.xlu1 %v495_v63, %s2228_s8  ;;  %v758_v62 = vmul.f32 %v2468_v54, %v2390_v58 }
 0x157   : >> { %v2598_v38 = vpop.permute.xlu0 %390  ;;  %v2600_v45 = vpop.permute.xlu1 %392 }
 0x159   : >> { %542 = vrot.lane.b32.xlu0 %v496_v4, %s2228_s8  ;;  %544 = vrot.lane.b32.xlu1 %v497_v5, %s2228_s8  ;;  %v1022_v5 = vmul.f32 %v2482_v61, %v2390_v58 }
 0x15b   : >> { %v2608_v42 = vpop.permute.xlu0 %394  ;;  %v2610_v8 = vpop.permute.xlu1 %650 }
 0x15d   : >> { %800 = vrot.lane.b32.xlu0 %v759_v9, %s2230_s10  ;;  %802 = vrot.lane.b32.xlu1 %v760_v12, %s2230_s10  ;;  %v1286_v9 = vmul.f32 %v2480_v60, %v2390_v58  ;;  %v629_v12 = vmul.f32 %v2493_v7, %v2380_v50 }
 0x15f   : >> { %v2618_v13 = vpop.permute.xlu0 %652  ;;  %v2620_v14 = vpop.permute.xlu1 %654 }
 0x161   : >> { %804 = vrot.lane.b32.xlu0 %v761_v17, %s2230_s10  ;;  %1060 = vrot.lane.b32.xlu1 %v1023_v18, %s2232_s12  ;;  %v630_v17 = vmul.f32 %v2493_v7, %v2378_v49  ;;  %v631_v18 = vmul.f32 %v2493_v7, %v2388_v57 }
 0x163   : >> { %v2628_v21 = vpop.permute.xlu0 %388  ;;  %v2630_v22 = vpop.permute.xlu1 %648 }
 0x165   : >> { %1062 = vrot.lane.b32.xlu0 %v1024_v23, %s2232_s12  ;;  %1064 = vrot.lane.b32.xlu1 %v1025_v24, %s2232_s12  ;;  %v893_v23 = vmul.f32 %v2491_v6, %v2380_v50 }
 0x167   : >> { %v2638_v27 = vpop.permute.xlu0 %524  ;;  %v2640_v28 = vpop.permute.xlu1 %526 }
 0x168   : >> { %3856 = vst [vmem:[#allocation13_spill] sm:$0xff] %v2640_v28 }
 0x169   : >> { %1320 = vrot.lane.b32.xlu0 %v1287_v31, %s2234_s14  ;;  %1322 = vrot.lane.b32.xlu1 %v1288_v32, %s2234_s14  ;;  %v894_v32 = vmul.f32 %v2491_v6, %v2378_v49 }
 0x16b   : >> { %v2648_v35 = vpop.permute.xlu0 %528  ;;  %v2650_v36 = vpop.permute.xlu1 %784 }
 0x16c   : >> { %3857 = vst [vmem:[#allocation14_spill] sm:$0xff] %v2648_v35  ;;  %v2867_v35 = vmul.f32 %v2378_v49, %v2374_v44 }
 0x16d   : >> { %1324 = vrot.lane.b32.xlu0 %v1289_v41, %s2234_s14  ;;  %1402 = vperm.xlu1 %2111, %v3858_v1   ;;  %v895_v41 = vmul.f32 %v2491_v6, %v2388_v57 }
 0x16e   : >> { %3879 = vst [vmem:[#allocation34_spill] sm:$0xff] %v2867_v35  ;;  %v299_v35 = vmul.f32 %v2390_v58, %v2374_v44 }
 0x16f   : >> { %v2656_v46 = vpop.permute.xlu0 %786  ;;  %v2658_v52 = vpop.permute.xlu1 %788 }
 0x170   : >> { %3859 = vst [vmem:[#allocation15_spill] sm:$0xff] %v2656_v46  ;;  %3860 = vst [vmem:[#allocation16_spill] sm:$0xff] %v2658_v52  ;;  %v2844_v46 = vmul.f32 %v2378_v49, %v2371_v43 }
 0x171   : >> { %538 = vrot.lane.b32.xlu0 %v494_v56, %s2228_s8  ;;  %798 = vrot.lane.b32.xlu1 %v758_v62, %s2230_s10  ;;  %v1157_v62 = vmul.f32 %v2503_v11, %v2380_v50 }
 0x173   : >> { %v2666_v63 = vpop.permute.xlu0 %522  ;;  %v2668_v4 = vpop.permute.xlu1 %782 }
 0x175   : >> { %1058 = vrot.lane.b32.xlu0 %v1022_v5, %s2232_s12  ;;  %1318 = vrot.lane.b32.xlu1 %v1286_v9, %s2234_s14  ;;  %v1158_v5 = vmul.f32 %v2503_v11, %v2378_v49 }
 0x177   : >> { %v2676_v55 = vpop.permute.xlu0 %398  ;;  %v2678_v54 = vpop.permute.xlu1 %400 }
 0x178   : >> { %3861 = vst [vmem:[#allocation17_spill] sm:$0xff] %v2678_v54  ;;  %v2863_v54 = vmul.f32 %v2380_v50, %v2374_v44 }
 0x179   : >> { %674 = vrot.lane.b32.xlu0 %v629_v12, %s2229_s9  ;;  %676 = vrot.lane.b32.xlu1 %v630_v17, %s2229_s9  ;;  %v1159_v17 = vmul.f32 %v2503_v11, %v2388_v57 }
 0x17a   : >> { %3878 = vst [vmem:[#allocation33_spill] sm:$0xff] %v2863_v54 }
 0x17b   : >> { %v2686_v61 = vpop.permute.xlu0 %402  ;;  %v2688_v60 = vpop.permute.xlu1 %658 }
 0x17d   : >> { %678 = vrot.lane.b32.xlu0 %v631_v18, %s2229_s9  ;;  %934 = vrot.lane.b32.xlu1 %v893_v23, %s2231_s11  ;;  %v628_v18 = vmul.f32 %v2493_v7, %v2390_v58  ;;  %v763_v7 = vmul.f32 %v2501_v10, %v2380_v50 }
 0x17f   : >> { %v2696_v24 = vpop.permute.xlu0 %660  ;;  %v2698_v31 = vpop.permute.xlu1 %662 }
 0x180   : >> { %3862 = vst [vmem:[#allocation18_spill] sm:$0xff] %v2696_v24  ;;  %3863 = vst [vmem:[#allocation19_spill] sm:$0xff] %v2698_v31  ;;  %v762_v31 = vmul.f32 %v2501_v10, %v2390_v58 }
 0x181   : >> { %936 = vrot.lane.b32.xlu0 %v894_v32, %s2231_s11  ;;  %938 = vrot.lane.b32.xlu1 %v895_v41, %s2231_s11  ;;  %v892_v41 = vmul.f32 %v2491_v6, %v2390_v58 }
 0x183   : >> { %v2706_v56 = vpop.permute.xlu0 %918  ;;  %v2712_v9 = vpop.permute.xlu1 %920 }
 0x184   : >> { %3864 = vst [vmem:[#allocation20_spill] sm:$0xff] %v2706_v56  ;;  %3865 = vst [vmem:[#allocation21_spill] sm:$0xff] %v2712_v9 }
 0x185   : >> { %1194 = vrot.lane.b32.xlu0 %v1157_v62, %s2233_s13  ;;  %1196 = vrot.lane.b32.xlu1 %v1158_v5, %s2233_s13  ;;  %v1156_v62 = vmul.f32 %v2503_v11, %v2390_v58  ;;  %v765_v11 = vmul.f32 %v2501_v10, %v2388_v57 }
 0x187   : >> { %v2716_v12 = vpop.permute.xlu0 %922  ;;  %v2724_v23 = vpop.permute.xlu1 %396 }
 0x188   : >> { %3866 = vst [vmem:[#allocation22_spill] sm:$0xff] %v2716_v12 }
 0x189   : >> { %1198 = vrot.lane.b32.xlu0 %v1159_v17, %s2233_s13  ;;  %672 = vrot.lane.b32.xlu1 %v628_v18, %s2229_s9  ;;  %v764_v17 = vmul.f32 %v2501_v10, %v2378_v49 }
 0x18b   : >> { %v2726_v32 = vpop.permute.xlu0 %656  ;;  %v2740_v18 = vpop.permute.xlu1 %916 }
 0x18d   : >> { %932 = vrot.lane.b32.xlu0 %v892_v41, %s2231_s11  ;;  %1192 = vrot.lane.b32.xlu1 %v1156_v62, %s2233_s13  ;;  %v1027_v41 = vmul.f32 %v2513_v16, %v2380_v50 }
 0x18f   : >> { %v2734_v5 = vpop.permute.xlu0 %532  ;;  %v2752_v62 = vpop.permute.xlu1 %534 }
 0x190   : >> { %3868 = vst [vmem:[#allocation24_spill] sm:$0xff] %v2752_v62  ;;  %v1031_v62 = vmul.f32 %v2538_v26, %v2380_v50 }
 0x191   : >> { %808 = vrot.lane.b32.xlu0 %v763_v7, %s2230_s10  ;;  %810 = vrot.lane.b32.xlu1 %v764_v17, %s2230_s10  ;;  %v1028_v7 = vmul.f32 %v2513_v16, %v2378_v49  ;;  %v1029_v17 = vmul.f32 %v2513_v16, %v2388_v57 }
 0x193   : >> { %v2744_v6 = vpop.permute.xlu0 %536  ;;  %v2768_v12 = vpop.permute.xlu1 %792 }
 0x194   : >> { %3867 = vst [vmem:[#allocation23_spill] sm:$0xff] %v2744_v6 }
 0x195   : >> { %812 = vrot.lane.b32.xlu0 %v765_v11, %s2230_s10  ;;  %1068 = vrot.lane.b32.xlu1 %v1027_v41, %s2232_s12  ;;  %v1291_v11 = vmul.f32 %v2511_v15, %v2380_v50  ;;  %v1292_v41 = vmul.f32 %v2511_v15, %v2378_v49 }
 0x197   : >> { %v2754_v0 = vpop.permute.xlu0 %794 }
 0x198   : >> { %3869 = vst [vmem:[#allocation25_spill] sm:$0xff] %v2754_v0 }
 0x199   : >> { %1070 = vrot.lane.b32.xlu0 %v1028_v7, %s2232_s12  ;;  %1072 = vrot.lane.b32.xlu1 %v1029_v17, %s2232_s12  ;;  %v1293_v7 = vmul.f32 %v2511_v15, %v2388_v57  ;;  %v2778_v17 = vpop.permute.xlu1 %796 }
 0x19a   : >> { %3872 = vst [vmem:[#allocation27_spill] sm:$0xff] %v2778_v17 }
 0x19b   : >> { %v2762_v1 = vpop.permute.xlu0 %1052 }
 0x19d   : >> { %1328 = vrot.lane.b32.xlu0 %v1291_v11, %s2234_s14  ;;  %1330 = vrot.lane.b32.xlu1 %v1292_v41, %s2234_s14  ;;  %v1026_v11 = vmul.f32 %v2513_v16, %v2390_v58  ;;  %v898_v16 = vmul.f32 %v2524_v20, %v2378_v49 }
 0x19f   : >> { %v2772_v9 = vpop.permute.xlu0 %1056 }
 0x1a0   : >> { %3870 = vst [vmem:[#allocation26_spill] sm:$0xff] %v2772_v9  ;;  %v2794_v9 = vpop.permute.xlu1 %1054 }
 0x1a1   : >> { %1332 = vrot.lane.b32.xlu0 %v1293_v7, %s2234_s14  ;;  %1407 = vperm.xlu1 %2111, %v3871_v2   ;;  %v1290_v7 = vmul.f32 %v2511_v15, %v2390_v58  ;;  %v897_v2 = vmul.f32 %v2524_v20, %v2380_v50  ;;  %3873 = vst [vmem:[#allocation28_spill] sm:$0xff] %v2794_v9 }
 0x1a3   : >> { %v2780_v0 = vpop.permute.xlu0 %530 }
 0x1a5   : >> { %806 = vrot.lane.b32.xlu0 %v762_v31, %s2230_s10  ;;  %1066 = vrot.lane.b32.xlu1 %v1026_v11, %s2232_s12  ;;  %v899_v31 = vmul.f32 %v2524_v20, %v2388_v57 }
 0x1a7   : >> { %v2788_v41 = vpop.permute.xlu0 %1050 }
 0x1a9   : >> { %1326 = vrot.lane.b32.xlu0 %v1290_v7, %s2234_s14  ;;  %942 = vrot.lane.b32.xlu1 %v897_v2, %s2231_s11  ;;  %v1161_v7 = vmul.f32 %v2522_v19, %v2380_v50  ;;  %v1162_v2 = vmul.f32 %v2522_v19, %v2378_v49 }
 0x1ab   : >> { %v409_v10 = vpop.permute.xlu0 %408 }
 0x1ac   : >> { %v2802_v11 = vpop.permute.xlu1 %1397 }
 0x1ad   : >> { %3874 = vst [vmem:[#allocation29_spill] sm:$0xff] %v2802_v11  ;;  %944 = vrot.lane.b32.xlu0 %v898_v16, %s2231_s11  ;;  %946 = vrot.lane.b32.xlu1 %v899_v31, %s2231_s11  ;;  %v1163_v16 = vmul.f32 %v2522_v19, %v2388_v57  ;;  %v896_v31 = vmul.f32 %v2524_v20, %v2390_v58 }
 0x1ae   : >> { %v2838_v20 = vmul.f32 %v2380_v50, %v2371_v43 }
 0x1af   : >> { %v2806_v15 = vpop.permute.xlu0 %666 }
 0x1b0   : >> { %v2812_v9 = vpop.permute.xlu1 %790 }
 0x1b1   : >> { %1202 = vrot.lane.b32.xlu0 %v1161_v7, %s2233_s13  ;;  %1204 = vrot.lane.b32.xlu1 %v1162_v2, %s2233_s13  ;;  %v1160_v2 = vmul.f32 %v2522_v19, %v2390_v58 }
 0x1b3   : >> { %v2816_v17 = vpop.permute.xlu0 %670 }
 0x1b4   : >> { %v2822_v11 = vpop.permute.xlu1 %406 }
 0x1b5   : >> { %v2826_v24 = vsel %vm412_vm0, %v2822_v11, %v409_v10  ;;  %1206 = vrot.lane.b32.xlu0 %v1163_v16, %s2233_s13  ;;  %940 = vrot.lane.b32.xlu1 %v896_v31, %s2231_s11  ;;  %v2848_v16 = vmul.f32 %v2388_v57, %v2371_v43  ;;  %v291_v31 = vmul.f32 %v2390_v58, %v2371_v43 }
 0x1b6   : >> { %3875 = vst [vmem:[#allocation30_spill] sm:$0xff] %v2826_v24  ;;  %v413_v24 = vsel %vm412_vm0, %v2570_v40, %v2560_v34  ;;  %v1032_v43 = vmul.f32 %v2538_v26, %v2378_v49  ;;  %v1033_v40 = vmul.f32 %v2538_v26, %v2388_v57 }
 0x1b7   : >> { %v2830_v7 = vpop.permute.xlu0 %928  ;;  %v441_v54 = vadd.f32 %v413_v24, %v291_v31  ;;  %v681_v24 = vsel %vm680_vm2, %v2630_v22, %v2610_v8  ;;  %v553_v22 = vsel %vm546_vm1, %v2780_v0, %v2734_v5  ;;  %v949_v0 = vsel %vm948_vm4, %v2740_v18, %v2706_v56 }
 0x1b8   : >> { %v2840_v52 = vpop.permute.xlu1 %410  ;;  %v1083_v18 = vsel %vm1082_vm5, %v2788_v41, %v2762_v1  ;;  %v1165_v41 = vmul.f32 %v2550_v30, %v2380_v50 }
 0x1b9   : >> { %3876 = vst [vmem:[#allocation31_spill] sm:$0xff] %v2840_v52  ;;  %v2852_v19 = vsel %vm412_vm0, %v409_v10, %v2840_v52  ;;  %1200 = vrot.lane.b32.xlu0 %v1160_v2, %s2233_s13  ;;  %1076 = vrot.lane.b32.xlu1 %v1031_v62, %s2232_s12  ;;  %v2871_v10 = vmul.f32 %v2388_v57, %v2374_v44 }
 0x1ba   : >> { %3877 = vst [vmem:[#allocation32_spill] sm:$0xff] %v2852_v19  ;;  %v547_v2 = vsel %vm546_vm1, %v2590_v39, %v2578_v48  ;;  %v2884_v19 = vmul.f32 %v2380_v50, %v2376_v47  ;;  %v2900_v39 = vmul.f32 %v2378_v49, %v2376_v47  ;;  %v295_v44 = vmul.f32 %v2390_v58, %v2376_v47 }
 0x1bb   : >> { %v2873_v62 = vpop.permute.xlu0 %1186  ;;  %v575_v31 = vadd.f32 %v547_v2, %v441_v54  ;;  %v815_v47 = vsel %vm814_vm3, %v2668_v4, %v2650_v36  ;;  %v2924_v54 = vmul.f32 %v2380_v50, %v2382_v53  ;;  %v2940_v4 = vmul.f32 %v2378_v49, %v2382_v53 }
 0x1bc   : >> { %v669_v52 = vpop.permute.xlu1 %668 }
 0x1bd   : >> { %v2890_v28 = vsel %vm680_vm2, %v2806_v15, %v669_v52  ;;  %v2894_v6 = vsel %vm680_vm2, %v669_v52, %v2816_v17  ;;  %1078 = vrot.lane.b32.xlu0 %v1032_v43, %s2232_s12  ;;  %1080 = vrot.lane.b32.xlu1 %v1033_v40, %s2232_s12  ;;  %v419_v52 = vsel %vm412_vm0, %v2724_v23, %v2676_v55 }
 0x1be   : >> { %3880 = vst [vmem:[#allocation35_spill] sm:$0xff] %v2890_v28  ;;  %3881 = vst [vmem:[#allocation36_spill] sm:$0xff] %v2894_v6  ;;  %v1295_v40 = vmul.f32 %v2536_v25, %v2380_v50  ;;  %v1296_v6 = vmul.f32 %v2536_v25, %v2378_v49  ;;  %v709_v2 = vadd.f32 %v681_v24, %v575_v31 }
 0x1bf   : >> { %v2910_v43 = vpop.permute.xlu0 %1190  ;;  %v2948_v24 = vmul.f32 %v2390_v58, %v2382_v53 }
 0x1c0   : >> { %3882 = vst [vmem:[#allocation37_spill] sm:$0xff] %v2910_v43  ;;  %v2926_v23 = vpop.permute.xlu1 %926  ;;  %v449_v43 = vadd.f32 %v419_v52, %v299_v35  ;;  %v2944_v35 = vmul.f32 %v2388_v57, %v2382_v53  ;;  %v843_v52 = vadd.f32 %v815_v47, %v709_v2  ;;  %v1030_v53 = vmul.f32 %v2538_v26, %v2390_v58 }
 0x1c1   : >> { %v2931_v28 = vsel %vm948_vm4, %v2926_v23, %v2830_v7  ;;  %1336 = vrot.lane.b32.xlu0 %v1295_v40, %s2234_s14  ;;  %1338 = vrot.lane.b32.xlu1 %v1296_v6, %s2234_s14  ;;  %v1297_v40 = vmul.f32 %v2536_v25, %v2388_v57  ;;  %v1294_v47 = vmul.f32 %v2536_v25, %v2390_v58 }
 0x1c2   : >> { %3883 = vst [vmem:[#allocation38_spill] sm:$0xff] %v2931_v28  ;;  %v583_v31 = vadd.f32 %v553_v22, %v449_v43  ;;  %v977_v43 = vadd.f32 %v949_v0, %v843_v52  ;;  %v1166_v26 = vmul.f32 %v2550_v30, %v2378_v49  ;;  %v2978_v25 = vmul.f32 %v2550_v30, %v2388_v57 }
 0x1c3   : >> { %v665_v6 = vpop.permute.xlu0 %664 }
 0x1c4   : >> { %v687_v28 = vsel %vm680_vm2, %v665_v6, %v2806_v15  ;;  %v2957_v56 = vpop.permute.xlu1 %930  ;;  %v414_v15 = vsel %vm412_vm0, %v2560_v34, %v2558_v33  ;;  %v1111_v0 = vadd.f32 %v1083_v18, %v977_v43  ;;  %v1604_v6 = vld [vmem:[%s3819_s3 + $0x208] sm:$0xff]  ;;  %v415_v34 = vsel %vm412_vm0, %v2558_v33, %v2568_v37  ;;  %v1603_v43 = vld [vmem:[%s3819_s3 + $0x200] sm:$0xff] }
 0x1c5   : >> { %3884 = vst [vmem:[#allocation39_spill] sm:$0xff] %v2957_v56  ;;  %v2963_v22 = vadd.f32 %v687_v28, %v583_v31  ;;  %v2968_v2 = vsel %vm948_vm4, %v2830_v7, %v2957_v56  ;;  %1340 = vrot.lane.b32.xlu0 %v1297_v40, %s2234_s14  ;;  %1412 = vperm.xlu1 %2111, %v3886_v3   ;;  %v1605_v3 = vld [vmem:[%s3819_s3 + $0x210] sm:$0xff] }
 0x1c6   : >> { %v2982_v28 = vmul.f32 %v2550_v30, %v2390_v58  ;;  %v416_v7 = vsel %vm412_vm0, %v2628_v21, %v2598_v38  ;;  %v2992_v31 = vmul.f32 %v2548_v29, %v2380_v50  ;;  %v1606_v30 = vld [vmem:[%s3819_s3 + $0x218] sm:$0xff]  ;;  %v3009_v50 = vmul.f32 %v2548_v29, %v2378_v49 }
 0x1c7   : >> { %3885 = vst [vmem:[#allocation40_spill] sm:$0xff] %v2963_v22  ;;  %v1185_v52 = vpop.permute.xlu0 %1184  ;;  %v2018_v18 = vpack.c.bf16 %v1606_v30, %v1604_v6  ;;  %v550_v33 = vsel %vm546_vm1, %v2666_v63, %v2638_v27  ;;  %v3026_v49 = vmul.f32 %v2548_v29, %v2388_v57  ;;  %v442_v6 = vadd.f32 %v414_v15, %v2838_v20  ;;  %v1609_v15 = vld [vmem:[%s3819_s3 + $0x230] sm:$0xff] }
 0x1c8   : >> { %v1217_v21 = vsel %vm1216_vm6, %v1185_v52, %v2873_v62  ;;  %v3005_v40 = vpop.permute.xlu1 %1188  ;;  %v445_v30 = vadd.f32 %v416_v7, %v295_v44  ;;  %v3031_v56 = vmul.f32 %v2548_v29, %v2390_v58  ;;  %v2020_v22 = vpack.c.bf16 %v1605_v3, %v1603_v43  ;;  %v1608_v58 = vld [vmem:[%s3819_s3 + $0x228] sm:$0xff]  ;;  %v1610_v3 = vld [vmem:[%s3819_s3 + $0x238] sm:$0xff] }
 0x1c9   : >> { %v3020_v52 = vadd.f32 %v1217_v21, %v1111_v0  ;;  %1074 = vrot.lane.b32.xlu0 %v1030_v53, %s2232_s12  ;;  %1334 = vrot.lane.b32.xlu1 %v1294_v47, %s2234_s14  ;;  %v443_v63 = vadd.f32 %v415_v34, %v2844_v46  ;;  %v444_v53 = vadd.f32 %v2568_v37, %v2848_v16  ;;  %v1607_v16 = vld [vmem:[%s3819_s3 + $0x220] sm:$0xff]  ;;  %v3887_v43 = vld [vmem:[#allocation23_spill] sm:$0xff] }
 0x1ca   : >> { %2019 = vmatprep.subr.bf16.mxu0 %v2018_v18  ;;  %v548_v47 = vsel %vm546_vm1, %v2578_v48, %v2580_v51  ;;  %v684_v20 = vsel %vm680_vm2, %v2726_v32, %v2688_v60  ;;  %v549_v29 = vsel %vm546_vm1, %v2580_v51, %v2588_v59  ;;  %v417_v37 = vsel %vm412_vm0, %v2598_v38, %v2600_v45 }
 0x1cb   : >> { %v3042_v44 = vpop.permute.xlu0 %542  ;;  %v579_v48 = vadd.f32 %v550_v33, %v445_v30  ;;  %2021 = vmatpush1.bf16.msra.mxu0 %v2020_v22  ;;  %v2022_v32 = vpack.c.bf16 %v1610_v3, %v1608_v58  ;;  %v818_v51 = vsel %vm814_vm3, %v2812_v9, %v2768_v12  ;;  %v2024_v38 = vpack.c.bf16 %v1609_v15, %v1607_v16  ;;  %v1611_v30 = vld [vmem:[%s3819_s3 + $0x240] sm:$0xff]  ;;  %v3891_v15 = vld [vmem:[#allocation30_spill] sm:$0xff] }
 0x1cc   : >> { %v405_v46 = vpop.permute.xlu1 %404  ;;  %v576_v22 = vadd.f32 %v548_v47, %v442_v6  ;;  %v578_v0 = vadd.f32 %v2588_v59, %v444_v53  ;;  %v452_v34 = vadd.f32 %v2686_v61, %v2871_v10  ;;  %v577_v18 = vadd.f32 %v549_v29, %v443_v63  ;;  %v1612_v59 = vld [vmem:[%s3819_s3 + $0x248] sm:$0xff]  ;;  %v1614_v10 = vld [vmem:[%s3819_s3 + $0x258] sm:$0xff]  ;;  %v1613_v63 = vld [vmem:[%s3819_s3 + $0x250] sm:$0xff] }
 0x1cd   : >> { %v3067_v7 = vsel %vm412_vm0, %v405_v46, %v2822_v11  ;;  %1210 = vrot.lane.b32.xlu0 %v1165_v41, %s2233_s13  ;;  %1212 = vrot.lane.b32.xlu1 %v1166_v26, %s2233_s13  ;;  %v713_v21 = vadd.f32 %v684_v20, %v579_v48  ;;  %v446_v9 = vadd.f32 %v417_v37, %v2884_v19  ;;  %v3888_v53 = vld [vmem:[#allocation13_spill] sm:$0xff]  ;;  %v3889_v48 = vld [vmem:[#allocation14_spill] sm:$0xff] }
 0x1ce   : >> { %2023 = vmatprep.subr.bf16.mxu0 %v2022_v32  ;;  %v418_v11 = vsel %vm412_vm0, %v2600_v45, %v2608_v42  ;;  %v682_v41 = vsel %vm680_vm2, %v2610_v8, %v2618_v13  ;;  %v683_v19 = vsel %vm680_vm2, %v2618_v13, %v2620_v14  ;;  %v586_v45 = vadd.f32 %v3887_v43, %v452_v34  ;;  %v3890_v32 = vld [vmem:[#allocation17_spill] sm:$0xff]  ;;  %v1617_v34 = vld [vmem:[%s3819_s3 + $0x270] sm:$0xff] }
 0x1cf   : >> { %v3081_v26 = vpop.permute.xlu0 %800  ;;  %v847_v33 = vadd.f32 %v818_v51, %v713_v21  ;;  %2025 = vmatpush1.bf16.msra.mxu0 %v2024_v38  ;;  %v2026_v8 = vpack.c.bf16 %v1614_v10, %v1612_v59  ;;  %v551_v47 = vsel %vm546_vm1, %v2638_v27, %v3888_v53  ;;  %v2028_v20 = vpack.c.bf16 %v1613_v63, %v1611_v30  ;;  %v1616_v27 = vld [vmem:[%s3819_s3 + $0x268] sm:$0xff]  ;;  %v1622_v30 = vld [vmem:[%s3819_s3 + $0x298] sm:$0xff]  ;;  %v3897_v63 = vld [vmem:[#allocation34_spill] sm:$0xff] }
 0x1d0   : >> { %v925_v6 = vpop.permute.xlu1 %924  ;;  %v447_v58 = vadd.f32 %v418_v11, %v2900_v39  ;;  %v712_v3 = vadd.f32 %v2620_v14, %v578_v0  ;;  %v720_v29 = vadd.f32 %v2816_v17, %v586_v45  ;;  %v552_v14 = vsel %vm546_vm1, %v3888_v53, %v3889_v48  ;;  %v1615_v0 = vld [vmem:[%s3819_s3 + $0x260] sm:$0xff]  ;;  %v3894_v10 = vld [vmem:[#allocation33_spill] sm:$0xff] }
 0x1d1   : >> { %v952_v13 = vsel %vm948_vm4, %v925_v6, %v2926_v23  ;;  %1214 = vrot.lane.b32.xlu0 %v2978_v25, %s2233_s13  ;;  %1208 = vrot.lane.b32.xlu1 %v2982_v28, %s2233_s13  ;;  %v1618_v23 = vld [vmem:[%s3819_s3 + $0x278] sm:$0xff]  ;;  %v710_v25 = vadd.f32 %v682_v41, %v576_v22  ;;  %v3119_v28 = vadd.f32 %v683_v19, %v577_v18  ;;  %v3893_v41 = vld [vmem:[#allocation16_spill] sm:$0xff] }
 0x1d2   : >> { %v3111_v37 = vadd.f32 %v952_v13, %v847_v33  ;;  %2027 = vmatprep.subr.bf16.mxu0 %v2026_v8  ;;  %v2030_v17 = vpack.c.bf16 %v1618_v23, %v1616_v27  ;;  %v580_v46 = vadd.f32 %v551_v47, %v446_v9  ;;  %v420_v16 = vsel %vm412_vm0, %v2676_v55, %v3890_v32  ;;  %v3892_v9 = vld [vmem:[#allocation15_spill] sm:$0xff]  ;;  %v3895_v45 = vld [vmem:[#allocation24_spill] sm:$0xff]  ;;  %v1620_v8 = vld [vmem:[%s3819_s3 + $0x288] sm:$0xff] }
 0x1d3   : >> { %v3124_v39 = vpop.permute.xlu0 %804  ;;  %v454_v51 = vadd.f32 %v3891_v15, %v2924_v54  ;;  %2029 = vmatpush1.bf16.msra.mxu0 %v2028_v20  ;;  %v421_v55 = vsel %vm412_vm0, %v3890_v32, %v2686_v61  ;;  %v2032_v21 = vpack.c.bf16 %v1617_v34, %v1615_v0  ;;  %v581_v18 = vadd.f32 %v552_v14, %v447_v58  ;;  %v3896_v33 = vld [vmem:[#allocation31_spill] sm:$0xff]  ;;  %v1619_v58 = vld [vmem:[%s3819_s3 + $0x280] sm:$0xff]  ;;  %v3901_v0 = vld [vmem:[#allocation25_spill] sm:$0xff] }
 0x1d4   : >> { %v3132_v38 = vadd.f32 %v3124_v39, %v720_v29  ;;  %v3134_v22 = vpop.permute.xlu1 %540  ;;  %v816_v11 = vsel %vm814_vm3, %v2650_v36, %v3892_v9  ;;  %v817_v61 = vsel %vm814_vm3, %v3892_v9, %v3893_v41  ;;  %2031 = vmatprep.subr.bf16.mxu0 %v2030_v17  ;;  %v450_v19 = vadd.f32 %v420_v16, %v3894_v10  ;;  %v1621_v29 = vld [vmem:[%s3819_s3 + $0x290] sm:$0xff]  ;;  %v3905_v9 = vld [vmem:[#allocation36_spill] sm:$0xff] }
 0x1d5   : >> { %v557_v54 = vsel %vm546_vm1, %v3134_v22, %v3042_v44  ;;  %1344 = vrot.lane.b32.xlu0 %v2992_v31, %s2234_s14  ;;  %1346 = vrot.lane.b32.xlu1 %v3009_v50, %s2234_s14  ;;  %v554_v31 = vsel %vm546_vm1, %v2734_v5, %v3895_v45  ;;  %v555_v50 = vsel %vm546_vm1, %v3895_v45, %v3887_v43  ;;  %v3898_v5 = vld [vmem:[#allocation18_spill] sm:$0xff]  ;;  %v3899_v43 = vld [vmem:[#allocation32_spill] sm:$0xff]  ;;  %v3906_v45 = vld [vmem:[#allocation27_spill] sm:$0xff] }
 0x1d6   : >> { %v3158_v59 = vadd.f32 %v557_v54, %v454_v51  ;;  %v456_v36 = vadd.f32 %v3896_v33, %v2944_v35  ;;  %v451_v53 = vadd.f32 %v421_v55, %v3897_v63  ;;  %v685_v47 = vsel %vm680_vm2, %v2688_v60, %v3898_v5  ;;  %v3900_v51 = vld [vmem:[#allocation19_spill] sm:$0xff]  ;;  %v1623_v10 = vld [vmem:[%s3819_s3 + $0x2a0] sm:$0xff] }
 0x1d7   : >> { %v3169_v6 = vpop.permute.xlu0 %1062  ;;  %v455_v13 = vadd.f32 %v3899_v43, %v2940_v4  ;;  %2033 = vmatpush1.bf16.msra.mxu0 %v2032_v21  ;;  %v2034_v20 = vpack.c.bf16 %v1622_v30, %v1620_v8  ;;  %v2036_v60 = vpack.c.bf16 %v1621_v29, %v1619_v58  ;;  %v846_v4 = vadd.f32 %v3893_v41, %v712_v3  ;;  %v1626_v3 = vld [vmem:[%s3819_s3 + $0x2b8] sm:$0xff]  ;;  %v1540_v8 = vld [vmem:[%s3819_s3 + $0x8] sm:$0xff]  ;;  %v1541_v43 = vld [vmem:[%s3819_s3 + $0x10] sm:$0xff] }
 0x1d8   : >> { %v545_v35 = vpop.permute.xlu1 %544  ;;  %v584_v14 = vadd.f32 %v554_v31, %v450_v19  ;;  %v585_v17 = vadd.f32 %v555_v50, %v451_v53  ;;  %v844_v16 = vadd.f32 %v816_v11, %v710_v25  ;;  %v714_v15 = vadd.f32 %v685_v47, %v580_v46  ;;  %v3902_v25 = vld [vmem:[#allocation21_spill] sm:$0xff]  ;;  %v3903_v46 = vld [vmem:[#allocation20_spill] sm:$0xff]  ;;  %v3904_v54 = vld [vmem:[#allocation35_spill] sm:$0xff] }
 0x1d9   : >> { %v558_v27 = vsel %vm546_vm1, %v3042_v44, %v545_v35  ;;  %v3191_v23 = vadd.f32 %v545_v35, %v456_v36  ;;  %1348 = vrot.lane.b32.xlu0 %v3026_v49, %s2234_s14  ;;  %1342 = vrot.lane.b32.xlu1 %v3031_v56, %s2234_s14  ;;  %v686_v44 = vsel %vm680_vm2, %v3898_v5, %v3900_v51  ;;  %v1624_v56 = vld [vmem:[%s3819_s3 + $0x2a8] sm:$0xff]  ;;  %v1625_v19 = vld [vmem:[%s3819_s3 + $0x2b0] sm:$0xff] }
 0x1da   : >> { %v3198_v32 = vadd.f32 %v558_v27, %v455_v13  ;;  %2035 = vmatprep.subr.bf16.mxu0 %v2034_v20  ;;  %v819_v49 = vsel %vm814_vm3, %v2768_v12, %v3901_v0  ;;  %v950_v55 = vsel %vm948_vm4, %v3903_v46, %v3902_v25  ;;  %v718_v21 = vadd.f32 %v3904_v54, %v584_v14  ;;  %v1542_v30 = vld [vmem:[%s3819_s3 + $0x18] sm:$0xff]  ;;  %v3907_v20 = vld [vmem:[#allocation22_spill] sm:$0xff]  ;;  %v3909_v54 = vld [vmem:[#allocation28_spill] sm:$0xff] }
 0x1db   : >> { %v3206_v34 = vpop.permute.xlu0 %1320  ;;  %v719_v11 = vadd.f32 %v3905_v9, %v585_v17  ;;  %2037 = vmatpush1.bf16.msra.mxu0 %v2036_v60  ;;  %v2038_v12 = vpack.c.bf16 %v1626_v3, %v1624_v56  ;;  %v820_v31 = vsel %vm814_vm3, %v3901_v0, %v3906_v45  ;;  %v2040_v36 = vpack.c.bf16 %v1625_v19, %v1623_v10  ;;  %v1628_v60 = vld [vmem:[%s3819_s3 + $0x2c8] sm:$0xff]  ;;  %v1630_v14 = vld [vmem:[%s3819_s3 + $0x2d8] sm:$0xff]  ;;  %v3910_v10 = vld [vmem:[#allocation26_spill] sm:$0xff] }
 0x1dc   : >> { %v803_v41 = vpop.permute.xlu1 %802  ;;  %v848_v63 = vadd.f32 %v819_v49, %v714_v15  ;;  %v1954_v47 = vpack.c.bf16 %v1542_v30, %v1540_v8  ;;  %v845_v13 = vadd.f32 %v817_v61, %v3119_v28  ;;  %v715_v35 = vadd.f32 %v686_v44, %v581_v18  ;;  %v3908_v15 = vld [vmem:[#allocation38_spill] sm:$0xff]  ;;  %v1627_v61 = vld [vmem:[%s3819_s3 + $0x2c0] sm:$0xff]  ;;  %v1544_v49 = vld [vmem:[%s3819_s3 + $0x28] sm:$0xff] }
 0x1dd   : >> { %v822_v50 = vsel %vm814_vm3, %v3081_v26, %v803_v41  ;;  %v823_v33 = vsel %vm814_vm3, %v803_v41, %v3124_v39  ;;  %2039 = vmatprep.subr.bf16.mxu0 %v2038_v12  ;;  %v1539_v39 = vld [vmem:[%s3819_s3] sm:$0xff]  ;;  %v951_v58 = vsel %vm948_vm4, %v3902_v25, %v3907_v20  ;;  %v978_v17 = vadd.f32 %v950_v55, %v844_v16  ;;  %v1629_v44 = vld [vmem:[%s3819_s3 + $0x2d0] sm:$0xff]  ;;  %v1546_v46 = vld [vmem:[%s3819_s3 + $0x38] sm:$0xff] }
 0x1de   : >> { %v3238_v53 = vadd.f32 %v822_v50, %v718_v21  ;;  %v3240_v5 = vadd.f32 %v823_v33, %v719_v11  ;;  %v1956_v27 = vpack.c.bf16 %v1541_v43, %v1539_v39  ;;  %v982_v0 = vadd.f32 %v3908_v15, %v848_v63  ;;  %1955 = vmatprep.subr.bf16.mxu1 %v1954_v47  ;;  %v1543_v11 = vld [vmem:[%s3819_s3 + $0x20] sm:$0xff]  ;;  %v1545_v41 = vld [vmem:[%s3819_s3 + $0x30] sm:$0xff]  ;;  %v1632_v12 = vld [vmem:[%s3819_s3 + $0x2e8] sm:$0xff] }
 0x1df   : >> { %v3252_v29 = vpop.permute.xlu0 %1324  ;;  %2041 = vmatpush1.bf16.msra.mxu0 %v2040_v36  ;;  %v2042_v18 = vpack.c.bf16 %v1630_v14, %v1628_v60  ;;  %v980_v16 = vadd.f32 %v3907_v20, %v846_v4  ;;  %v849_v56 = vadd.f32 %v820_v31, %v715_v35  ;;  %v2044_v25 = vpack.c.bf16 %v1629_v44, %v1627_v61  ;;  %v1634_v36 = vld [vmem:[%s3819_s3 + $0x2f8] sm:$0xff]  ;;  %v3911_v47 = vld [vmem:[#allocation37_spill] sm:$0xff]  ;;  %v1549_v60 = vld [vmem:[%s3819_s3 + $0x50] sm:$0xff] }
 0x1e0   : >> { %v3261_v28 = vpop.permute.xlu1 %1060  ;;  %1957 = vmatpush1.bf16.msra.mxu1 %v1956_v27  ;;  %v979_v55 = vadd.f32 %v951_v58, %v845_v13  ;;  %v1084_v21 = vsel %vm1082_vm5, %v2762_v1, %v3909_v54  ;;  %v1958_v4 = vpack.c.bf16 %v1546_v46, %v1544_v49  ;;  %v1085_v1 = vsel %vm1082_vm5, %v3909_v54, %v3910_v10  ;;  %v1548_v13 = vld [vmem:[%s3819_s3 + $0x48] sm:$0xff]  ;;  %v1550_v35 = vld [vmem:[%s3819_s3 + $0x58] sm:$0xff] }
 0x1e1   : >> { %v1087_v3 = vsel %vm1082_vm5, %v3261_v28, %v3169_v6  ;;  %2043 = vmatprep.subr.bf16.mxu0 %v2042_v18  ;;  %v983_v19 = vadd.f32 %v2968_v2, %v849_v56  ;;  %v453_v31 = vadd.f32 %v3067_v7, %v2948_v24  ;;  %v1960_v33 = vpack.c.bf16 %v1545_v41, %v1543_v11  ;;  %v1631_v24 = vld [vmem:[%s3819_s3 + $0x2e0] sm:$0xff]  ;;  %v1633_v7 = vld [vmem:[%s3819_s3 + $0x2f0] sm:$0xff]  ;;  %v1636_v14 = vld [vmem:[%s3819_s3 + $0x308] sm:$0xff] }
 0x1e2   : >> { %v3282_v9 = vadd.f32 %v1087_v3, %v982_v0  ;;  %v1218_v8 = vsel %vm1216_vm6, %v2873_v62, %v3005_v40  ;;  %1959 = vmatprep.subr.bf16.mxu1 %v1958_v4  ;;  %v2046_v2 = vpack.c.bf16 %v1634_v36, %v1632_v12  ;;  %v1219_v62 = vsel %vm1216_vm6, %v3005_v40, %v3911_v47  ;;  %v1547_v40 = vld [vmem:[%s3819_s3 + $0x40] sm:$0xff]  ;;  %v1638_v15 = vld [vmem:[%s3819_s3 + $0x318] sm:$0xff]  ;;  %v1552_v54 = vld [vmem:[%s3819_s3 + $0x68] sm:$0xff] }
 0x1e3   : >> { %v539_v50 = vpop.permute.xlu0 %538  ;;  %2045 = vmatpush1.bf16.msra.mxu0 %v2044_v25  ;;  %v2048_v43 = vpack.c.bf16 %v1633_v7, %v1631_v24  ;;  %v1112_v20 = vadd.f32 %v1084_v21, %v978_v17  ;;  %v1113_v58 = vadd.f32 %v1085_v1, %v979_v55  ;;  %v1114_v0 = vadd.f32 %v3910_v10, %v980_v16  ;;  %v1635_v3 = vld [vmem:[%s3819_s3 + $0x300] sm:$0xff]  ;;  %v1637_v25 = vld [vmem:[%s3819_s3 + $0x310] sm:$0xff]  ;;  %v1554_v21 = vld [vmem:[%s3819_s3 + $0x78] sm:$0xff] }
 0x1e4   : >> { %v556_v30 = vsel %vm546_vm1, %v539_v50, %v3134_v22  ;;  %v3307_v63 = vpop.permute.xlu1 %1064  ;;  %1961 = vmatpush1.bf16.msra.mxu1 %v1960_v33  ;;  %2047 = vmatprep.subr.bf16.mxu0 %v2046_v2  ;;  %v1964_v18 = vpack.c.bf16 %v1549_v60, %v1547_v40  ;;  %v2050_v61 = vpack.c.bf16 %v1638_v15, %v1636_v14  ;;  %v1551_v10 = vld [vmem:[%s3819_s3 + $0x60] sm:$0xff]  ;;  %v1553_v1 = vld [vmem:[%s3819_s3 + $0x70] sm:$0xff]  ;;  %v3912_v33 = vld [vmem:[#allocation29_spill] sm:$0xff] }
 0x1e5   : >> { %v3318_v39 = vadd.f32 %v556_v30, %v453_v31  ;;  %v1088_v22 = vsel %vm1082_vm5, %v3169_v6, %v3307_v63  ;;  %v1962_v6 = vpack.c.bf16 %v1550_v35, %v1548_v13  ;;  %v1246_v44 = vadd.f32 %v1218_v8, %v1112_v20  ;;  %v1556_v2 = vld [vmem:[%s3819_s3 + $0x88] sm:$0xff]  ;;  %v1558_v24 = vld [vmem:[%s3819_s3 + $0x98] sm:$0xff]  ;;  %v1559_v20 = vld [vmem:[%s3819_s3 + $0xa0] sm:$0xff] }
 0x1e6   : >> { %v3332_v27 = vadd.f32 %v1088_v22, %v983_v19  ;;  %v1247_v49 = vadd.f32 %v1219_v62, %v1113_v58  ;;  %v1248_v46 = vadd.f32 %v3911_v47, %v1114_v0  ;;  %v2052_v41 = vpack.c.bf16 %v1637_v25, %v1635_v3  ;;  %v1557_v47 = vld [vmem:[%s3819_s3 + $0x90] sm:$0xff]  ;;  %v1560_v62 = vld [vmem:[%s3819_s3 + $0xa8] sm:$0xff]  ;;  %v1562_v22 = vld [vmem:[%s3819_s3 + $0xb8] sm:$0xff] }
 0x1e7   : >> { %v3344_v17 = vpop.permute.xlu0 %1058  ;;  %2049 = vmatpush1.bf16.msra.mxu0 %v2048_v43  ;;  %1963 = vmatprep.subr.bf16.mxu1 %v1962_v6  ;;  %v1966_v12 = vpack.c.bf16 %v1554_v21, %v1552_v54  ;;  %v1968_v31 = vpack.c.bf16 %v1553_v1, %v1551_v10  ;;  %v1970_v7 = vpack.c.bf16 %v1558_v24, %v1556_v2  ;;  %v1561_v58 = vld [vmem:[%s3819_s3 + $0xb0] sm:$0xff]  ;;  %v1564_v60 = vld [vmem:[%s3819_s3 + $0xc8] sm:$0xff]  ;;  %v1566_v14 = vld [vmem:[%s3819_s3 + $0xd8] sm:$0xff] }
 0x1e8   : >> { %v1323_v56 = vpop.permute.xlu1 %1322  ;;  %1965 = vmatpush1.bf16.msra.mxu1 %v1964_v18  ;;  %2051 = vmatprep.subr.bf16.mxu0 %v2050_v61  ;;  %v1382_v50 = vadd.f32 %v3252_v29, %v1248_v46  ;;  %v1974_v40 = vpack.c.bf16 %v1562_v22, %v1560_v62  ;;  %v1978_v25 = vpack.c.bf16 %v1566_v14, %v1564_v60  ;;  %v1563_v46 = vld [vmem:[%s3819_s3 + $0xc0] sm:$0xff]  ;;  %v1569_v1 = vld [vmem:[%s3819_s3 + $0xf0] sm:$0xff] }
 0x1e9   : >> { %v1352_v16 = vsel %vm1350_vm7, %v3206_v34, %v1323_v56  ;;  %v1353_v55 = vsel %vm1350_vm7, %v1323_v56, %v3252_v29  ;;  %1967 = vmatprep.subr.bf16.mxu1 %v1966_v12  ;;  %v1555_v29 = vld [vmem:[%s3819_s3 + $0x80] sm:$0xff] }
 0x1ea   : >> { %v1380_v4 = vadd.f32 %v1352_v16, %v1246_v44  ;;  %v1381_v11 = vadd.f32 %v1353_v55, %v1247_v49  ;;  %v1972_v35 = vpack.c.bf16 %v1557_v47, %v1555_v29  ;;  %v3413_v15 = vadd.f32 %v3912_v33, %v1382_v50  ;;  %v3913_v56 = vld [vmem:[#allocation40_spill] sm:$0xff]  ;;  %v1570_v55 = vld [vmem:[%s3819_s3 + $0xf8] sm:$0xff] }
 0x1eb   : >> { %v3369_v19 = vpop.permute.xlu0 %674  ;;  %2053 = vmatpush1.bf16.msra.mxu0 %v2052_v41  ;;  %v1976_v49 = vpack.c.bf16 %v1561_v58, %v1559_v20  ;;  %v1567_v10 = vld [vmem:[%s3819_s3 + $0xe0] sm:$0xff] }
 0x1ec   : >> { %v3373_v36 = vadd.f32 %v3912_v33, %v1380_v4  ;;  %v3376_v8 = vadd.f32 %v3912_v33, %v1381_v11  ;;  %v3378_v30 = vpop.permute.xlu1 %1402  ;;  %1969 = vmatpush1.bf16.msra.mxu1 %v1968_v31  ;;  %v1434_v54 = vmax.f32 %v3413_v15, 0.0  ;;  %v1574_v31 = vld [vmem:[%s3819_s3 + $0x118] sm:$0xff]  ;;  %v1984_v29 = vpack.c.bf16 %v1569_v1, %v1567_v10  ;;  %v1571_v22 = vld [vmem:[%s3819_s3 + $0x100] sm:$0xff] }
 0x1ed   : >> { %1971 = vmatprep.subr.bf16.mxu1 %v1970_v7 }
 0x1ee   : >> { %v1432_v43 = vmax.f32 %v3373_v36, 0.0  ;;  %v1433_v13 = vmax.f32 %v3376_v8, 0.0 }
 0x1ef   : >> { %v679_v6 = vpop.permute.xlu0 %678 }
 0x1f0   : >> { %v2112_v0 = vpack.i.bf16 %v1433_v13, %v1432_v43  ;;  %v3420_v18 = vadd.f32 %v679_v6, %v3191_v23  ;;  %v799_v61 = vpop.permute.xlu1 %798  ;;  %1973 = vmatpush1.bf16.msra.mxu1 %v1972_v35  ;;  %v1565_v23 = vld [vmem:[%s3819_s3 + $0xd0] sm:$0xff] }
 0x1f1   : >> { %v821_v44 = vsel %vm814_vm3, %v799_v61, %v3081_v26  ;;  %1975 = vmatprep.subr.bf16.mxu1 %v1974_v40  ;;  %v1568_v26 = vld [vmem:[%s3819_s3 + $0xe8] sm:$0xff]  ;;  %v1980_v11 = vpack.c.bf16 %v1565_v23, %v1563_v46  ;;  %v1573_v35 = vld [vmem:[%s3819_s3 + $0x110] sm:$0xff] }
 0x1f2   : >> { %v851_v3 = vadd.f32 %v821_v44, %v3913_v56  ;;  %2113 = vrot.lane.b32.xlu0 %v2112_v0, %s2227_s7  ;;  %v1982_v12 = vpack.c.bf16 %v1570_v55, %v1568_v26  ;;  %v1575_v0 = vld [vmem:[%s3819_s3 + $0x120] sm:$0xff]  ;;  %v1577_v61 = vld [vmem:[%s3819_s3 + $0x130] sm:$0xff] }
 0x1f3   : >> { %v937_v16 = vpop.permute.xlu0 %936  ;;  %v1992_v55 = vpack.c.bf16 %v1577_v61, %v1575_v0 }
 0x1f4   : >> { %v1319_v21 = vpop.permute.xlu1 %1318  ;;  %1977 = vmatpush1.bf16.msra.mxu1 %v1976_v49  ;;  %v1580_v49 = vld [vmem:[%s3819_s3 + $0x148] sm:$0xff] }
 0x1f5   : >> { %v1351_v4 = vsel %vm1350_vm7, %v1319_v21, %v3206_v34  ;;  %1979 = vmatprep.subr.bf16.mxu1 %v1978_v25 }
 0x1f6   : >> { %v3442_v41 = vadd.f32 %v1351_v4, %v3020_v52  ;;  %1469 = vrot.lane.b32.xlu0 %v1434_v54, %s2227_s7  ;;  %v1572_v52 = vld [vmem:[%s3819_s3 + $0x108] sm:$0xff] }
 0x1f7   : >> { %v3453_v34 = vpop.permute.xlu0 %1194  ;;  %v1986_v62 = vpack.c.bf16 %v1574_v31, %v1572_v52 }
 0x1f8   : >> { %v677_v50 = vpop.permute.xlu1 %676  ;;  %1981 = vmatpush1.bf16.msra.mxu1 %v1980_v11  ;;  %v1579_v11 = vld [vmem:[%s3819_s3 + $0x140] sm:$0xff] }
 0x1f9   : >> { %v691_v2 = vsel %vm680_vm2, %v3369_v19, %v677_v50  ;;  %v692_v24 = vsel %vm680_vm2, %v677_v50, %v679_v6  ;;  %1983 = vmatprep.subr.bf16.mxu1 %v1982_v12  ;;  %v1988_v6 = vpack.c.bf16 %v1573_v35, %v1571_v22 }
 0x1fa   : >> { %v3465_v7 = vadd.f32 %v691_v2, %v3158_v59  ;;  %v3468_v47 = vadd.f32 %v692_v24, %v3198_v32  ;;  %v1576_v59 = vld [vmem:[%s3819_s3 + $0x128] sm:$0xff]  ;;  %v1578_v32 = vld [vmem:[%s3819_s3 + $0x138] sm:$0xff]  ;;  %v1583_v2 = vld [vmem:[%s3819_s3 + $0x160] sm:$0xff] }
 0x1fb   : >> { %v3476_v40 = vpop.permute.xlu0 %1198  ;;  %v1990_v14 = vpack.c.bf16 %v1578_v32, %v1576_v59  ;;  %v1585_v24 = vld [vmem:[%s3819_s3 + $0x170] sm:$0xff] }
 0x1fc   : >> { %v935_v20 = vpop.permute.xlu1 %934  ;;  %1985 = vmatpush1.bf16.msra.mxu1 %v1984_v29 }
 0x1fd   : >> { %v956_v58 = vsel %vm948_vm4, %v935_v20, %v937_v16  ;;  %1987 = vmatprep.subr.bf16.mxu1 %v1986_v62 }
 0x1fe   : >> { %v3486_v60 = vadd.f32 %v956_v58, %v3238_v53  ;;  %v1582_v53 = vld [vmem:[%s3819_s3 + $0x158] sm:$0xff] }
 0x1ff   : >> { %v933_v44 = vpop.permute.xlu0 %932  ;;  %v1994_v4 = vpack.c.bf16 %v1582_v53, %v1580_v49  ;;  %v1594_v49 = vld [vmem:[%s3819_s3 + $0x1b8] sm:$0xff]  ;;  %v1591_v53 = vld [vmem:[%s3819_s3 + $0x1a0] sm:$0xff] }
 0x200   : >> { %v955_v56 = vsel %vm948_vm4, %v933_v44, %v935_v20  ;;  %v939_v25 = vpop.permute.xlu1 %938  ;;  %1989 = vmatpush1.bf16.msra.mxu1 %v1988_v6  ;;  %v1592_v44 = vld [vmem:[%s3819_s3 + $0x1a8] sm:$0xff] }
 0x201   : >> { %v3501_v46 = vadd.f32 %v955_v56, %v851_v3  ;;  %v957_v23 = vsel %vm948_vm4, %v937_v16, %v939_v25  ;;  %v3505_v26 = vadd.f32 %v939_v25, %v3132_v38  ;;  %1991 = vmatprep.subr.bf16.mxu1 %v1990_v14  ;;  %v1581_v3 = vld [vmem:[%s3819_s3 + $0x150] sm:$0xff]  ;;  %v1584_v38 = vld [vmem:[%s3819_s3 + $0x168] sm:$0xff]  ;;  %v3914_v16 = vld [vmem:[#allocation12_spill] sm:$0xff] }
 0x202   : >> { %v3508_v21 = vadd.f32 %v957_v23, %v3240_v5  ;;  %v1586_v5 = vld [vmem:[%s3819_s3 + $0x178] sm:$0xff]  ;;  %v298_v10 = vmul.f32 %v2388_v57, %v3914_v16  ;;  %v1996_v52 = vpack.c.bf16 %v1581_v3, %v1579_v11  ;;  %v2006_v23 = vpack.c.bf16 %v1594_v49, %v1592_v44 }
 0x203   : >> { %v3516_v12 = vpop.permute.xlu0 %808  ;;  %v1998_v50 = vpack.c.bf16 %v1586_v5, %v1584_v38  ;;  %v1598_v11 = vld [vmem:[%s3819_s3 + $0x1d8] sm:$0xff] }
 0x204   : >> { %v3526_v1 = vpop.permute.xlu1 %1196  ;;  %1993 = vmatpush1.bf16.msra.mxu1 %v1992_v55  ;;  %v448_v31 = vadd.f32 %v2608_v42, %v298_v10  ;;  %v2000_v42 = vpack.c.bf16 %v1585_v24, %v1583_v2  ;;  %v1593_v55 = vld [vmem:[%s3819_s3 + $0x1b0] sm:$0xff] }
 0x205   : >> { %1995 = vmatprep.subr.bf16.mxu1 %v1994_v4  ;;  %v1596_v4 = vld [vmem:[%s3819_s3 + $0x1c8] sm:$0xff]  ;;  %v2008_v38 = vpack.c.bf16 %v1593_v55, %v1591_v53 }
 0x206   : >> { %v582_v57 = vadd.f32 %v3889_v48, %v448_v31  ;;  %v1588_v48 = vld [vmem:[%s3819_s3 + $0x188] sm:$0xff]  ;;  %v1595_v31 = vld [vmem:[%s3819_s3 + $0x1c0] sm:$0xff] }
 0x207   : >> { %v3535_v29 = vpop.permute.xlu0 %812 }
 0x208   : >> { %v673_v62 = vpop.permute.xlu1 %672  ;;  %1997 = vmatpush1.bf16.msra.mxu1 %v1996_v52  ;;  %v716_v35 = vadd.f32 %v3900_v51, %v582_v57  ;;  %v1587_v51 = vld [vmem:[%s3819_s3 + $0x180] sm:$0xff]  ;;  %v2010_v52 = vpack.c.bf16 %v1598_v11, %v1596_v4 }
 0x209   : >> { %v690_v22 = vsel %vm680_vm2, %v673_v62, %v3369_v19  ;;  %1999 = vmatprep.subr.bf16.mxu1 %v1998_v50  ;;  %v1590_v19 = vld [vmem:[%s3819_s3 + $0x198] sm:$0xff]  ;;  %v1597_v50 = vld [vmem:[%s3819_s3 + $0x1d0] sm:$0xff] }
 0x20a   : >> { %v721_v59 = vadd.f32 %v690_v22, %v3318_v39  ;;  %v850_v20 = vadd.f32 %v3906_v45, %v716_v35  ;;  %v3915_v39 = vld [vmem:[#allocation39_spill] sm:$0xff]  ;;  %v2002_v14 = vpack.c.bf16 %v1590_v19, %v1588_v48  ;;  %v1589_v45 = vld [vmem:[%s3819_s3 + $0x190] sm:$0xff] }
 0x20b   : >> { %v3542_v32 = vpop.permute.xlu0 %1070  ;;  %v2004_v61 = vpack.c.bf16 %v1589_v45, %v1587_v51 }
 0x20c   : >> { %v1193_v58 = vpop.permute.xlu1 %1192  ;;  %2001 = vmatpush1.bf16.msra.mxu1 %v2000_v42  ;;  %v984_v6 = vadd.f32 %v3915_v39, %v850_v20 }
 0x20d   : >> { %2003 = vmatprep.subr.bf16.mxu1 %v2002_v14  ;;  %v1220_v42 = vsel %vm1216_vm6, %v1193_v58, %v3453_v34  ;;  %v1600_v58 = vld [vmem:[%s3819_s3 + $0x1e8] sm:$0xff] }
 0x20e   : >> { %v1118_v56 = vadd.f32 %v3307_v63, %v984_v6 }
 0x20f   : >> { %v1329_v0 = vpop.permute.xlu0 %1328 }
 0x210   : >> { %v811_v25 = vpop.permute.xlu1 %810  ;;  %2005 = vmatpush1.bf16.msra.mxu1 %v2004_v61  ;;  %v1252_v5 = vadd.f32 %v3476_v40, %v1118_v56  ;;  %v3638_v56 = vadd.f32 %v3912_v33, %v3442_v41 }
 0x211   : >> { %v825_v3 = vsel %vm814_vm3, %v3516_v12, %v811_v25  ;;  %v826_v63 = vsel %vm814_vm3, %v811_v25, %v3535_v29  ;;  %2007 = vmatprep.subr.bf16.mxu1 %v2006_v23 }
 0x212   : >> { %v3583_v16 = vadd.f32 %v825_v3, %v3465_v7  ;;  %v3586_v10 = vadd.f32 %v826_v63, %v3468_v47  ;;  %v2012_v7 = vpack.c.bf16 %v1597_v50, %v1595_v31  ;;  %v1086_v47 = vsel %vm1082_vm5, %v3344_v17, %v3261_v28 }
 0x213   : >> { %v1333_v2 = vpop.permute.xlu0 %1332  ;;  %v1115_v19 = vadd.f32 %v1086_v47, %v3111_v37  ;;  %v1221_v28 = vsel %vm1216_vm6, %v3453_v34, %v3526_v1  ;;  %v1222_v17 = vsel %vm1216_vm6, %v3526_v1, %v3476_v40  ;;  %v1599_v37 = vld [vmem:[%s3819_s3 + $0x1e0] sm:$0xff]  ;;  %v1601_v40 = vld [vmem:[%s3819_s3 + $0x1f0] sm:$0xff]  ;;  %v1431_v11 = vmax.f32 %v3638_v56, 0.0 }
 0x214   : >> { %v1386_v24 = vadd.f32 %v1333_v2, %v1252_v5  ;;  %v3594_v57 = vpop.permute.xlu1 %1068  ;;  %2009 = vmatpush1.bf16.msra.mxu1 %v2008_v38  ;;  %v2016_v39 = vpack.c.bf16 %v1601_v40, %v1599_v37  ;;  %v1250_v6 = vadd.f32 %v1221_v28, %v3282_v9  ;;  %v1251_v14 = vadd.f32 %v1222_v17, %v3332_v27 }
 0x215   : >> { %2011 = vmatprep.subr.bf16.mxu1 %v2010_v52  ;;  %v1249_v1 = vadd.f32 %v1220_v42, %v1115_v19  ;;  %v1090_v19 = vsel %vm1082_vm5, %v3594_v57, %v3542_v32 }
 0x216   : >> { %v3600_v62 = vadd.f32 %v3378_v30, %v1386_v24 }
 0x217   : >> { %v807_v22 = vpop.permute.xlu0 %806 }
 0x218   : >> { %v1438_v35 = vmax.f32 %v3600_v62, 0.0  ;;  %v824_v20 = vsel %vm814_vm3, %v807_v22, %v3516_v12  ;;  %v1073_v48 = vpop.permute.xlu1 %1072  ;;  %2013 = vmatpush1.bf16.msra.mxu1 %v2012_v7  ;;  %v1602_v12 = vld [vmem:[%s3819_s3 + $0x1f8] sm:$0xff] }
 0x219   : >> { %v3614_v51 = vadd.f32 %v824_v20, %v721_v59  ;;  %v2014_v34 = vpack.c.bf16 %v1602_v12, %v1600_v58  ;;  %v1091_v28 = vsel %vm1082_vm5, %v3542_v32, %v1073_v48 }
 0x21a   : >> { %1477 = vrot.lane.b32.xlu0 %v1438_v35, %s2227_s7  ;;  %v1121_v40 = vadd.f32 %v1091_v28, %v3508_v21 }
 0x21b   : >> { %v1327_v59 = vpop.permute.xlu0 %1326  ;;  %2015 = vmatprep.subr.bf16.mxu1 %v2014_v34  ;;  %v1120_v34 = vadd.f32 %v1090_v19, %v3486_v60 }
 0x21c   : >> { %v1354_v45 = vsel %vm1350_vm7, %v1327_v59, %v1329_v0  ;;  %v1331_v61 = vpop.permute.xlu1 %1330  ;;  %2017 = vmatpush1.bf16.msra.mxu1 %v2016_v39  ;;  %v1122_v59 = vadd.f32 %v1073_v48, %v3505_v26 }
 0x21d   : >> { %v1383_v44 = vadd.f32 %v1354_v45, %v1249_v1  ;;  %v1355_v49 = vsel %vm1350_vm7, %v1329_v0, %v1331_v61  ;;  %v1356_v53 = vsel %vm1350_vm7, %v1331_v61, %v1333_v2 }
 0x21e   : >> { %v1384_v25 = vadd.f32 %v1355_v49, %v1250_v6  ;;  %v1385_v23 = vadd.f32 %v1356_v53, %v1251_v14 }
 0x21f   : >> { %v3640_v55 = vpop.permute.xlu0 %944  ;;  %v3643_v9 = vadd.f32 %v3378_v30, %v1383_v44 }
 0x220   : >> { %v3646_v27 = vadd.f32 %v3378_v30, %v1384_v25  ;;  %v3649_v4 = vadd.f32 %v3378_v30, %v1385_v23  ;;  %v3651_v0 = vpop.permute.xlu1 %1407  ;;  %v858_v25 = vadd.f32 %v3535_v29, %v3420_v18 }
 0x221   : >> { %v1435_v3 = vmax.f32 %v3643_v9, 0.0 }
 0x222   : >> { %v1436_v33 = vmax.f32 %v3646_v27, 0.0  ;;  %v1437_v63 = vmax.f32 %v3649_v4, 0.0 }
 0x223   : >> { %v1203_v41 = vpop.permute.xlu0 %1202 }
 0x224   : >> { %v2117_v38 = vpack.i.bf16 %v1436_v33, %v1431_v11  ;;  %v1067_v5 = vpop.permute.xlu1 %1066  ;;  %v2122_v52 = vpack.i.bf16 %v1435_v3, %v1437_v63 }
 0x225   : >> { %v1089_v28 = vsel %vm1082_vm5, %v1067_v5, %v3594_v57 }
 0x226   : >> { %2118 = vrot.lane.b32.xlu1 %v2117_v38, %s2227_s7 }
 0x227   : >> { %v1207_v30 = vpop.permute.xlu0 %1206 }
 0x228   : >> { %v3666_v31 = vpop.permute.xlu1 %942  ;;  %v1256_v61 = vadd.f32 %v1207_v30, %v1122_v59 }
 0x229   : >> { %v959_v59 = vsel %vm948_vm4, %v3666_v31, %v3640_v55 }
 0x22a   : >> { %2123 = vrot.lane.b32.xlu1 %v2122_v52, %s2227_s7 }
 0x22b   : >> { %v1201_v50 = vpop.permute.xlu0 %1200 }
 0x22c   : >> { %v947_v2 = vpop.permute.xlu1 %946 }
 0x22d   : >> { %v992_v23 = vadd.f32 %v947_v2, %v858_v25 }
 0x22f   : >> { %v1079_v24 = vpop.permute.xlu0 %1078 }
 0x230   : >> { %v1205_v7 = vpop.permute.xlu1 %1204 }
 0x231   : >> { %v1224_v12 = vsel %vm1216_vm6, %v1203_v41, %v1205_v7  ;;  %v1225_v37 = vsel %vm1216_vm6, %v1205_v7, %v1207_v30 }
 0x232   : >> { %v1254_v39 = vadd.f32 %v1224_v12, %v1120_v34  ;;  %v1255_v6 = vadd.f32 %v1225_v37, %v1121_v40 }
 0x233   : >> { %v1337_v47 = vpop.permute.xlu0 %1336 }
 0x234   : >> { %v941_v22 = vpop.permute.xlu1 %940 }
 0x237   : >> { %v1341_v42 = vpop.permute.xlu0 %1340 }
 0x238   : >> { %v1077_v20 = vpop.permute.xlu1 %1076  ;;  %v1390_v60 = vadd.f32 %v1341_v42, %v1256_v61  ;;  %v990_v61 = vadd.f32 %v959_v59, %v3583_v16 }
 0x239   : >> { %v1093_v57 = vsel %vm1082_vm5, %v1077_v20, %v1079_v24 }
 0x23a   : >> { %v3692_v7 = vadd.f32 %v3651_v0, %v1390_v60  ;;  %v1124_v25 = vadd.f32 %v1093_v57, %v990_v61 }
 0x23b   : >> { %v1075_v17 = vpop.permute.xlu0 %1074 }
 0x23c   : >> { %v1081_v58 = vpop.permute.xlu1 %1080  ;;  %v1442_v37 = vmax.f32 %v3692_v7, 0.0  ;;  %v1092_v16 = vsel %vm1082_vm5, %v1075_v17, %v1077_v20 }
 0x23d   : >> { %v1126_v19 = vadd.f32 %v1081_v58, %v992_v23  ;;  %v1094_v5 = vsel %vm1082_vm5, %v1079_v24, %v1081_v58 }
 0x23f   : >> { %v1211_v1 = vpop.permute.xlu0 %1210 }
 0x240   : >> { %v1339_v14 = vpop.permute.xlu1 %1338 }
 0x241   : >> { %v1358_v45 = vsel %vm1350_vm7, %v1337_v47, %v1339_v14  ;;  %v1359_v32 = vsel %vm1350_vm7, %v1339_v14, %v1341_v42  ;;  %v1119_v14 = vadd.f32 %v1089_v28, %v3501_v46 }
 0x242   : >> { %v1388_v44 = vadd.f32 %v1358_v45, %v1254_v39  ;;  %v1389_v49 = vadd.f32 %v1359_v32, %v1255_v6  ;;  %v1223_v39 = vsel %vm1216_vm6, %v1201_v50, %v1203_v41  ;;  %v960_v6 = vsel %vm948_vm4, %v3640_v55, %v947_v2 }
 0x243   : >> { %v1215_v53 = vpop.permute.xlu0 %1214  ;;  %v1253_v41 = vadd.f32 %v1223_v39, %v1119_v14  ;;  %v991_v50 = vadd.f32 %v960_v6, %v3586_v10  ;;  %v958_v2 = vsel %vm948_vm4, %v941_v22, %v3666_v31 }
 0x244   : >> { %v3684_v21 = vadd.f32 %v3651_v0, %v1388_v44  ;;  %v3687_v26 = vadd.f32 %v3651_v0, %v1389_v49  ;;  %v1413_v48 = vpop.permute.xlu1 %1412  ;;  %v1260_v42 = vadd.f32 %v1215_v53, %v1126_v19  ;;  %v989_v10 = vadd.f32 %v958_v2, %v3614_v51 }
 0x245   : >> { %v1125_v60 = vadd.f32 %v1094_v5, %v991_v50 }
 0x246   : >> { %v1440_v38 = vmax.f32 %v3684_v21, 0.0  ;;  %v1441_v52 = vmax.f32 %v3687_v26, 0.0  ;;  %v1123_v19 = vadd.f32 %v1092_v16, %v989_v10 }
 0x247   : >> { %v1345_v30 = vpop.permute.xlu0 %1344 }
 0x248   : >> { %v2127_v18 = vpack.i.bf16 %v1441_v52, %v1440_v38  ;;  %v1335_v29 = vpop.permute.xlu1 %1334 }
 0x249   : >> { %v1357_v32 = vsel %vm1350_vm7, %v1335_v29, %v1337_v47 }
 0x24a   : >> { %2128 = vrot.lane.b32.xlu1 %v2127_v18, %s2227_s7  ;;  %v1387_v24 = vadd.f32 %v1357_v32, %v1253_v41 }
 0x24b   : >> { %v1349_v12 = vpop.permute.xlu0 %1348 }
 0x24c   : >> { %v1394_v34 = vadd.f32 %v1349_v12, %v1260_v42  ;;  %v1213_v40 = vpop.permute.xlu1 %1212  ;;  %v3733_v18 = vadd.f32 %v3651_v0, %v1387_v24 }
 0x24d   : >> { %v1227_v44 = vsel %vm1216_vm6, %v1211_v1, %v1213_v40  ;;  %v1228_v49 = vsel %vm1216_vm6, %v1213_v40, %v1215_v53 }
 0x24e   : >> { %v3709_v45 = vadd.f32 %v1413_v48, %v1394_v34  ;;  %1485 = vrot.lane.b32.xlu1 %v1442_v37, %s2227_s7  ;;  %v1258_v47 = vadd.f32 %v1227_v44, %v1124_v25  ;;  %v1259_v58 = vadd.f32 %v1228_v49, %v1125_v60  ;;  %v1439_v17 = vmax.f32 %v3733_v18, 0.0 }
 0x250   : >> { %v1446_v55 = vmax.f32 %v3709_v45, 0.0  ;;  %v1209_v46 = vpop.permute.xlu1 %1208 }
 0x251   : >> { %v1226_v31 = vsel %vm1216_vm6, %v1209_v46, %v1211_v1 }
 0x252   : >> { %1493 = vrot.lane.b32.xlu1 %v1446_v55, %s2227_s7  ;;  %v1257_v28 = vadd.f32 %v1226_v31, %v1123_v19 }
 0x254   : >> { %v1347_v23 = vpop.permute.xlu1 %1346 }
 0x255   : >> { %v1361_v22 = vsel %vm1350_vm7, %v1345_v30, %v1347_v23  ;;  %v1362_v53 = vsel %vm1350_vm7, %v1347_v23, %v1349_v12 }
 0x256   : >> { %v1392_v29 = vadd.f32 %v1361_v22, %v1258_v47  ;;  %v1393_v42 = vadd.f32 %v1362_v53, %v1259_v58 }
 0x258   : >> { %v3735_v34 = vadd.f32 %v1413_v48, %v1392_v29  ;;  %v1343_v20 = vpop.permute.xlu1 %1342  ;;  %v3739_v40 = vadd.f32 %v1413_v48, %v1393_v42 }
 0x259   : >> { %v1360_v51 = vsel %vm1350_vm7, %v1343_v20, %v1345_v30 }
 0x25a   : >> { %v1444_v1 = vmax.f32 %v3735_v34, 0.0  ;;  %v1391_v59 = vadd.f32 %v1360_v51, %v1257_v28  ;;  %v1445_v39 = vmax.f32 %v3739_v40, 0.0 }
 0x25c   : >> { %v2132_v0 = vpack.i.bf16 %v1444_v1, %v1439_v17  ;;  %v3746_v12 = vadd.f32 %v1413_v48, %v1391_v59 }
 0x25e   : >> { %v1443_v6 = vmax.f32 %v3746_v12, 0.0  ;;  %2133 = vrot.lane.b32.xlu0 %v2132_v0, %s2227_s7 }
 0x260   : >> { %v2137_v30 = vpack.i.bf16 %v1443_v6, %v1445_v39 }
 0x262   : >> { %2138 = vrot.lane.b32.xlu0 %v2137_v30, %s2227_s7  ;;  %s1953_s7 = sshll.u32 %s2220_s16, 6  ;;  %s242_s16 = sadd.s32 1, %s2220_s16  }
 0x263   : >> { %s1832_s5 = scalar_lea.vmem %s2361_s30, %s1953_s7  ;;  %p239_p5 = scmp.ge.s32.totalorder %s242_s16, 9  }
 0x264   : >> { %v2114_v14 = vpop.permute.xlu0 %2113 }
 0x265   : >> { %v2116_v57 = vunpack.i.h.bf16 %v2114_v14  ;;  %v2115_v5 = vunpack.i.l.bf16 %v2114_v14 }
 0x267   : >> { %v1496_v32 = vsel %vm412_vm0, %v2115_v5, %v2116_v57 }
 0x268   : >> { %v1470_v48 = vpop.permute.xlu0 %1469  ;;  %v1524_v61 = vmax.f32 %v1432_v43, %v1496_v32 }
 0x269   : >> { %v1497_v41 = vsel %vm412_vm0, %v2116_v57, %v1470_v48  ;;  %v1526_v50 = vmax.f32 %v1434_v54, %v1470_v48 }
 0x26a   : >> { %v1525_v46 = vmax.f32 %v1433_v13, %v1497_v41  ;;  %1716 = vmatprep.mubr.f32.mxu1 %v1524_v61 }
 0x26b   : >> { %1944 = vmatprep.mubr.msk.f32.mxu0 %vm1639_vm8, %v1526_v50 }
 0x26c   : >> { %1806 = vmatmul.mubr.f32.vlgmr.msra.gmra.mrb[0].mxu0 %v1525_v46 }
 0x28c   : >> { %v1478_v2 = vpop.permute.xlu0 %1477 }
 0x28d   : >> { %v1530_v44 = vmax.f32 %v1438_v35, %v1478_v2 }
 0x28f   : >> { %1945 = vmatprep.mubr.msk.f32.mxu0 %vm1639_vm8, %v1530_v44 }
 0x298   : >> { %v2119_v36 = vpop.permute.xlu1 %2118 }
 0x299   : >> { %v2120_v43 = vunpack.i.l.bf16 %v2119_v36  ;;  %v2121_v8 = vunpack.i.h.bf16 %v2119_v36 }
 0x29b   : >> { %v1495_v49 = vsel %vm412_vm0, %v2120_v43, %v2115_v5 }
 0x29c   : >> { %v2124_v25 = vpop.permute.xlu1 %2123  ;;  %v1523_v15 = vmax.f32 %v1431_v11, %v1495_v49 }
 0x29d   : >> { %v2126_v13 = vunpack.i.h.bf16 %v2124_v25  ;;  %v2125_v54 = vunpack.i.l.bf16 %v2124_v25 }
 0x29e   : >> { %1717 = vmatmul.mubr.f32.vlgmr.msra.gmra.mrb[0].mxu1 %v1523_v15 }
 0x29f   : >> { %v1499_v60 = vsel %vm412_vm0, %v2121_v8, %v2125_v54  ;;  %v1500_v24 = vsel %vm412_vm0, %v2125_v54, %v1478_v2  ;;  %v1498_v62 = vsel %vm412_vm0, %v2126_v13, %v2121_v8 }
 0x2a0   : >> { %v1528_v35 = vmax.f32 %v1436_v33, %v1499_v60  ;;  %v1529_v16 = vmax.f32 %v1437_v63, %v1500_v24  ;;  %v1527_v56 = vmax.f32 %v1435_v3, %v1498_v62 }
 0x2a2   : >> { %1722 = vmatprep.mubr.f32.mxu1 %v1528_v35  ;;  %1812 = vmatmul.mubr.f32.gmra.mrb[2].mxu0 %v1529_v16 }
 0x2a3   : >> { %1723 = vmatmul.mubr.f32.gmra.mrb[2].mxu1 %v1527_v56 }
 0x2bc   : >> { %v2129_v11 = vpop.permute.xlu1 %2128 }
 0x2bd   : >> { %v2131_v10 = vunpack.i.h.bf16 %v2129_v11  ;;  %v2130_v47 = vunpack.i.l.bf16 %v2129_v11 }
 0x2bf   : >> { %v1502_v58 = vsel %vm412_vm0, %v2130_v47, %v2131_v10 }
 0x2c0   : >> { %v1486_v23 = vpop.permute.xlu1 %1485  ;;  %v1532_v31 = vmax.f32 %v1440_v38, %v1502_v58 }
 0x2c1   : >> { %v1503_v27 = vsel %vm412_vm0, %v2131_v10, %v1486_v23  ;;  %v1534_v4 = vmax.f32 %v1442_v37, %v1486_v23 }
 0x2c2   : >> { %v1533_v9 = vmax.f32 %v1441_v52, %v1503_v27  ;;  %1728 = vmatprep.mubr.f32.mxu1 %v1532_v31 }
 0x2c3   : >> { %1946 = vmatprep.mubr.msk.f32.mxu0 %vm1639_vm8, %v1534_v4 }
 0x2c4   : >> { %v1494_v33 = vpop.permute.xlu1 %1493  ;;  %1818 = vmatmul.mubr.f32.gmra.mrb[4].mxu0 %v1533_v9 }
 0x2c5   : >> { %v1538_v3 = vmax.f32 %v1446_v55, %v1494_v33 }
 0x2c7   : >> { %1947 = vmatprep.mubr.msk.f32.mxu0 %vm1639_vm8, %v1538_v3 }
 0x2d0   : >> { %v2134_v63 = vpop.permute.xlu0 %2133 }
 0x2d1   : >> { %v2135_v21 = vunpack.i.l.bf16 %v2134_v63  ;;  %v2136_v26 = vunpack.i.h.bf16 %v2134_v63 }
 0x2d3   : >> { %v1501_v38 = vsel %vm412_vm0, %v2135_v21, %v2130_v47 }
 0x2d4   : >> { %v2139_v22 = vpop.permute.xlu0 %2138  ;;  %v1531_v7 = vmax.f32 %v1439_v17, %v1501_v38 }
 0x2d5   : >> { %v2141_v52 = vunpack.i.h.bf16 %v2139_v22  ;;  %v2140_v37 = vunpack.i.l.bf16 %v2139_v22 }
 0x2d6   : >> { %1729 = vmatmul.mubr.f32.gmra.mrb[4].mxu1 %v1531_v7 }
 0x2d7   : >> { %v1505_v53 = vsel %vm412_vm0, %v2136_v26, %v2140_v37  ;;  %v1506_v45 = vsel %vm412_vm0, %v2140_v37, %v1494_v33  ;;  %v1504_v55 = vsel %vm412_vm0, %v2141_v52, %v2136_v26 }
 0x2d8   : >> { %v1536_v19 = vmax.f32 %v1444_v1, %v1505_v53  ;;  %v1537_v29 = vmax.f32 %v1445_v39, %v1506_v45  ;;  %v1535_v18 = vmax.f32 %v1443_v6, %v1504_v55 }
 0x2da   : >> { %1734 = vmatprep.mubr.f32.mxu1 %v1536_v19  ;;  %1824 = vmatmul.mubr.f32.gmra.mrb[6].mxu0 %v1537_v29 }
 0x2db   : >> { %1735 = vmatmul.mubr.f32.gmra.mrb[6].mxu1 %v1535_v18 }
 0x33f   : >> { %v1807_v42 = vpop.f32.mrb[0].mxu0 }
 0x340   : >> { %v1809_v28 = vpop.f32.mrb[1].mxu0 }
 0x371   : >> { %v1718_v20 = vpop.f32.mrb[0].mxu1 }
 0x372   : >> { %v1808_v51 = vadd.f32 %v1807_v42, %v1718_v20  ;;  %v1720_v17 = vpop.f32.mrb[1].mxu1 }
 0x373   : >> { %v1810_v59 = vadd.f32 %v1809_v28, %v1720_v17 }
 0x374   : >> { %1833 = vst [vmem:[%s1832_s5] sm:$0xff] %v1808_v51 }
 0x375   : >> { %1835 = vst.msk [vmem:[%s1832_s5 + $0x8] sm:$0xff] %vm1834_vm9, %v1810_v59  ;;  %v1813_v34 = vpop.f32.mrb[2].mxu0 }
 0x376   : >> { %v1724_v40 = vpop.f32.mrb[2].mxu1  ;;  %v1815_v1 = vpop.f32.mrb[3].mxu0 }
 0x377   : >> { %v1814_v0 = vadd.f32 %v1813_v34, %v1724_v40  ;;  %v1726_v12 = vpop.f32.mrb[3].mxu1 }
 0x378   : >> { %v1816_v39 = vadd.f32 %v1815_v1, %v1726_v12 }
 0x379   : >> { %1836 = vst [vmem:[%s1832_s5 + $0x10] sm:$0xff] %v1814_v0 }
 0x37a   : >> { %1837 = vst.msk [vmem:[%s1832_s5 + $0x18] sm:$0xff] %vm1834_vm9, %v1816_v39 }
 0x397   : >> { %v1819_v6 = vpop.f32.mrb[4].mxu0 }
 0x398   : >> { %v1821_v30 = vpop.f32.mrb[5].mxu0 }
 0x3a9   : >> { %v1730_v14 = vpop.f32.mrb[4].mxu1 }
 0x3aa   : >> { %v1820_v57 = vadd.f32 %v1819_v6, %v1730_v14  ;;  %v1732_v5 = vpop.f32.mrb[5].mxu1 }
 0x3ab   : >> { %v1822_v32 = vadd.f32 %v1821_v30, %v1732_v5 }
 0x3ac   : >> { %1838 = vst [vmem:[%s1832_s5 + $0x20] sm:$0xff] %v1820_v57  ;;  %241 = sbr.rel (!%p239_p5) target bundleno = 73 (0x49), region = 92 }
 0x3ad   : >> { %1839 = vst.msk [vmem:[%s1832_s5 + $0x28] sm:$0xff] %vm1834_vm9, %v1822_v32  ;;  %v1825_v48 = vpop.f32.mrb[6].mxu0 }
 0x3ae   : >> { %v1736_v61 = vpop.f32.mrb[6].mxu1  ;;  %v1827_v41 = vpop.f32.mrb[7].mxu0 }
 0x3af   : >> { %v1826_v50 = vadd.f32 %v1825_v48, %v1736_v61  ;;  %v1738_v46 = vpop.f32.mrb[7].mxu1 }
 0x3b0   : >> { %v1828_v2 = vadd.f32 %v1827_v41, %v1738_v46 }
 0x3b1   : >> { %1840 = vst [vmem:[%s1832_s5 + $0x30] sm:$0xff] %v1826_v50 }
 0x3b2   : >> { %1841 = vst.msk [vmem:[%s1832_s5 + $0x38] sm:$0xff] %vm1834_vm9, %v1828_v2 }
 0x3b3 PF: > { %s16_s15 = sadd.s32 1, %s2216_s15  }
 0x3b4   : > { %p13_p3 = scmp.ge.s32.totalorder %s16_s15, 4  }
 0x3b6   :  { %15 = sbr.rel (!%p13_p3) target bundleno = 2 (0x2), region = 103 }
 0x3bd   :  { %1866 = vsyncpa [#allocation3], 1 }
 0x3be   :  { %1868 = vsyncpa [#allocation3 + $0x1], 1 }
 0x3bf   :  { %1869 = vsyncpa [#allocation5], 1 }

// kernel: _lambda_.5
= control target key start
LH: loop header
LB: loop body
LE: loop exit
PB: predicated region body
PF: predicated region fallthrough
CT: control target
= control target key end

     0   :  { %s2338_s15 = smov 0   ;;  %s2893_s0 = inlined_call_operand.vmem [shape: f32[18,32,209], index: 0, kind: input, shape index: {}]   ;;  %s2894_s1 = inlined_call_operand.vmem [shape: bf16[9,64,32], index: 1, kind: input, shape index: {}]   ;;  %s2895_s2 = inlined_call_operand.vmem [shape: f32[64,1], index: 2, kind: input, shape index: {}]   ;;  %s2896_s3 = inlined_call_operand.vmem [shape: f32[200,100], index: 3, kind: input, shape index: {}]   ;;  %s2897_s4 = inlined_call_operand.vmem [shape: f32[18,64,100], index: 4, kind: output, shape index: {}]  }
   0x1 LB: > { %s1892_s16 = sadd.s32 4294967295, %s2296_s15   ;;  %p1896_p0 = scmp.ge.s32.totalorder %s2296_s15, 1  ;;  %s2296_s15 = sphi %s2338_s15, %s14_s15  }
   0x2   : > { %p164_p1 = scmp.lt.s32.totalorder %s2296_s15, 3 }
   0x4   : > { %p165_p2 = pnand %p1896_p0, %p164_p1 }
   0x5   : > { %s192_s17 = smul.u32 (!%p165_p2), 9, %s1892_s16  ;;  %v2349_v0 = vld [vmem:[%s2895_s2] sm:$0xff] (!%p165_p2)  ;;  %v2354_v1 = vld [vmem:[%s2895_s2 + $0x8] sm:$0xff] (!%p165_p2)  ;;  %v2359_v2 = vld [vmem:[%s2895_s2 + $0x10] sm:$0xff] (!%p165_p2)  ;;  %s2396_s16 = smov (!%p165_p2), 0  }
   0x6   : > { %168 = sbr.rel (%p165_p2) target bundleno = 863 (0x35f), region = 36  ;;  %v2364_v3 = vld [vmem:[%s2895_s2 + $0x18] sm:$0xff] (!%p165_p2)  ;;  %v2369_v4 = vld [vmem:[%s2895_s2 + $0x20] sm:$0xff] (!%p165_p2)  ;;  %v2374_v5 = vld [vmem:[%s2895_s2 + $0x28] sm:$0xff] (!%p165_p2) }
   0x7   : > { %p193_p3 = scmp.lt.s32.totalorder (!%p165_p2), %s192_s17, 17  ;;  %v2379_v6 = vld [vmem:[%s2895_s2 + $0x30] sm:$0xff] (!%p165_p2)  ;;  %v2384_v7 = vld [vmem:[%s2895_s2 + $0x38] sm:$0xff] (!%p165_p2) }
   0xd   : > { %s2899_s17 = smov (!%p193_p3, %s192_s17), 17 }
   0xe   : > { %s2050_s8 = sshll.u32 %s2899_s17, 6 }
   0xf   : > { %s2389_s11 = scalar_lea.vmem %s2893_s0, %s2050_s8  ;;  %s2394_s14 = scalar_lea.vmem %s2897_s4, %s2050_s8 }
  0x10 LB: >> { %s2052_s17 = sshll.u32 %s2300_s16, 6  ;;  %v2302_v15 = vmov 0   ;;  %s2303_s19 = smov 127   ;;  %vm285_vm0 = vcmask 1039360   ;;  %vm810_vm1 = vcmask 1014784   ;;  %v2250_v29 = vld [vmem:[%s2894_s1 + $0x20] sm:$0xff]   ;;  %s2300_s16 = sphi %s2396_s16, %s220_s16  }
  0x11   : >> { %s223_s18 = scalar_lea.vmem %s2389_s11, %s2052_s17  ;;  %337 = vmatprep.mubr.bf16.mxu0 %v2302_v15  ;;  %347 = vmatprep.mubr.bf16.mxu1 %v2302_v15  ;;  %s2304_s20 = smov 124   ;;  %v2251_v30 = vld [vmem:[%s2894_s1 + $0x28] sm:$0xff]   ;;  %vm292_vm2 = vcmask 261120   ;;  %vm955_vm3 = vcmask 1006592   ;;  %v2252_v37 = vld [vmem:[%s2894_s1 + $0x30] sm:$0xff]   ;;  %v2253_v38 = vld [vmem:[%s2894_s1 + $0x80] sm:$0xff]  }
  0x12   : >> { %v228_v8 = vld [vmem:[%s223_s18 + $0x20] sm:$0xff]  ;;  %v230_v9 = vld [vmem:[%s223_s18 + $0x30] sm:$0xff]  ;;  %v229_v13 = vld [vmem:[%s223_s18 + $0x28] sm:$0xff]  ;;  %2248 = vset.pattern.permute.xlu0 %v2302_v15  ;;  %2249 = vset.pattern.permute.xlu1 %v2302_v15  ;;  %s2305_s21 = smov 123   ;;  %s2306_s22 = smov 122   ;;  %vm520_vm4 = vcmask 1031168  }
  0x13   : >> { %v224_v10 = vld [vmem:[%s223_s18] sm:$0xff]  ;;  %v2405_v11 = vpack.c.bf16 %v230_v9, %v228_v8  ;;  %v226_v12 = vld [vmem:[%s223_s18 + $0x10] sm:$0xff]  ;;  %v231_v14 = vld [vmem:[%s223_s18 + $0x38] sm:$0xff]  ;;  %s2307_s23 = smov 126   ;;  %s2308_s24 = smov 121   ;;  %vm1100_vm5 = vcmask 998400  }
  0x14   : >> { %v2409_v16 = vpack.c.bf16 %v226_v12, %v224_v10  ;;  %v225_v17 = vld [vmem:[%s223_s18 + $0x8] sm:$0xff]  ;;  %v227_v18 = vld [vmem:[%s223_s18 + $0x18] sm:$0xff]  ;;  %v2415_v19 = vpack.c.bf16 %v231_v14, %v229_v13  ;;  %s2309_s25 = smov 125   ;;  %s2310_s26 = smov 120   ;;  %v2256_v51 = vld [vmem:[%s2894_s1] sm:$0xff]   ;;  %vm665_vm6 = vcmask 1022976  }
  0x15   : >> { %281 = vrot.lane.b32.xlu1 %v2405_v11, %s2303_s19  ;;  %v2419_v20 = vpack.c.bf16 %v227_v18, %v225_v17  ;;  %v2254_v45 = vld [vmem:[%s2894_s1 + $0x38] sm:$0xff]   ;;  %v2255_v46 = vld [vmem:[%s2894_s1 + $0x88] sm:$0xff]   ;;  %v2257_v52 = vld [vmem:[%s2894_s1 + $0x90] sm:$0xff]   ;;  %vm1245_vm7 = vcmask 990208   ;;  %vm1390_vm8 = vcmask 982016   ;;  %vm1684_vm9 = vcmask 588800  }
  0x16   : >> { %277 = vrot.lane.b32.xlu0 %v2409_v16, %s2303_s19  ;;  %v2258_v58 = vld [vmem:[%s2894_s1 + $0x8] sm:$0xff]   ;;  %v2259_v59 = vld [vmem:[%s2894_s1 + $0x98] sm:$0xff]   ;;  %v2260_v63 = vld [vmem:[%s2894_s1 + $0x10] sm:$0xff]   ;;  %vm1816_vm10 = vcmask 818176   ;;  %s220_s16 = sadd.s32 1, %s2300_s16  }
  0x17   : >> { %v2261_v8 = vld [vmem:[%s2894_s1 + $0xa0] sm:$0xff]   ;;  %v2262_v12 = vld [vmem:[%s2894_s1 + $0x18] sm:$0xff]   ;;  %v2263_v13 = vld [vmem:[%s2894_s1 + $0xa8] sm:$0xff]   ;;  %p217_p4 = scmp.ge.s32.totalorder %s220_s16, 9  }
  0x18   : >> { %v2264_v18 = vld [vmem:[%s2894_s1 + $0x40] sm:$0xff]  }
  0x19   : >> { %283 = vrot.lane.b32.xlu1 %v2415_v19, %s2303_s19 }
  0x1a   : >> { %279 = vrot.lane.b32.xlu0 %v2419_v20, %s2303_s19 }
  0x1d   : >> { %804 = vrot.lane.b32.xlu1 %v2419_v20, %s2304_s20 }
  0x1e   : >> { %802 = vrot.lane.b32.xlu0 %v2409_v16, %s2304_s20 }
  0x21   : >> { %808 = vrot.lane.b32.xlu1 %v2415_v19, %s2304_s20 }
  0x22   : >> { %806 = vrot.lane.b32.xlu0 %v2405_v11, %s2304_s20 }
  0x25   : >> { %949 = vrot.lane.b32.xlu1 %v2419_v20, %s2305_s21 }
  0x26   : >> { %947 = vrot.lane.b32.xlu0 %v2409_v16, %s2305_s21 }
  0x29   : >> { %953 = vrot.lane.b32.xlu1 %v2415_v19, %s2305_s21 }
  0x2a   : >> { %951 = vrot.lane.b32.xlu0 %v2405_v11, %s2305_s21 }
  0x2d   : >> { %1094 = vrot.lane.b32.xlu1 %v2419_v20, %s2306_s22 }
  0x2e   : >> { %1092 = vrot.lane.b32.xlu0 %v2409_v16, %s2306_s22 }
  0x31   : >> { %1098 = vrot.lane.b32.xlu1 %v2415_v19, %s2306_s22 }
  0x32   : >> { %1096 = vrot.lane.b32.xlu0 %v2405_v11, %s2306_s22 }
  0x35   : >> { %514 = vrot.lane.b32.xlu1 %v2419_v20, %s2307_s23 }
  0x36   : >> { %512 = vrot.lane.b32.xlu0 %v2409_v16, %s2307_s23 }
  0x39   : >> { %1239 = vrot.lane.b32.xlu1 %v2419_v20, %s2308_s24 }
  0x3a   : >> { %1237 = vrot.lane.b32.xlu0 %v2409_v16, %s2308_s24 }
  0x3d   : >> { %518 = vrot.lane.b32.xlu1 %v2415_v19, %s2307_s23 }
  0x3e   : >> { %516 = vrot.lane.b32.xlu0 %v2405_v11, %s2307_s23 }
  0x41   : >> { %1243 = vrot.lane.b32.xlu1 %v2415_v19, %s2308_s24 }
  0x42   : >> { %1241 = vrot.lane.b32.xlu0 %v2405_v11, %s2308_s24 }
  0x45   : >> { %659 = vrot.lane.b32.xlu1 %v2419_v20, %s2309_s25 }
  0x46   : >> { %657 = vrot.lane.b32.xlu0 %v2409_v16, %s2309_s25 }
  0x49   : >> { %1384 = vrot.lane.b32.xlu1 %v2419_v20, %s2310_s26 }
  0x4a   : >> { %1382 = vrot.lane.b32.xlu0 %v2409_v16, %s2310_s26 }
  0x4d   : >> { %663 = vrot.lane.b32.xlu1 %v2415_v19, %s2309_s25 }
  0x4e   : >> { %661 = vrot.lane.b32.xlu0 %v2405_v11, %s2309_s25 }
  0x51   : >> { %1388 = vrot.lane.b32.xlu1 %v2415_v19, %s2310_s26 }
  0x52   : >> { %1386 = vrot.lane.b32.xlu0 %v2405_v11, %s2310_s26 }
  0x55   : >> { %1505 = vperm.xlu1 %2249, %v2354_v1  }
  0x56   : >> { %1500 = vperm.xlu0 %2248, %v2349_v0  }
  0x59   : >> { %1510 = vperm.xlu1 %2249, %v2359_v2  }
  0x5a   : >> { %1515 = vperm.xlu0 %2248, %v2364_v3  }
  0x5d   : >> { %1520 = vperm.xlu1 %2249, %v2369_v4  }
  0x5e   : >> { %1525 = vperm.xlu0 %2248, %v2374_v5  }
  0x61   : >> { %1530 = vperm.xlu1 %2249, %v2379_v6  }
  0x62   : >> { %1535 = vperm.xlu0 %2248, %v2384_v7  }
  0x87   : >> { %v282_v21 = vpop.permute.xlu1 %281 }
  0x88   : >> { %v278_v22 = vpop.permute.xlu0 %277 }
  0x8b   : >> { %v284_v23 = vpop.permute.xlu1 %283 }
  0x8c   : >> { %v280_v24 = vpop.permute.xlu0 %279  ;;  %v287_v28 = vsel %vm285_vm0, %v282_v21, %v284_v23 }
  0x8d   : >> { %305 = vmatprep.subr.bf16.mxu0 %v280_v24  ;;  %2089 = vmatprep.subr.bf16.mxu1 %v280_v24  ;;  %v286_v25 = vsel %vm285_vm0, %v278_v22, %v280_v24  ;;  %v2266_v24 = vld [vmem:[%s2894_s1 + $0x48] sm:$0xff]  }
  0x8e   : >> { %306 = vmatpush1.bf16.msra.mxu0 %v286_v25  ;;  %2091 = vmatpush1.bf16.msra.mxu1 %v286_v25  ;;  %v2267_v25 = vld [vmem:[%s2894_s1 + $0xb8] sm:$0xff]  }
  0x8f   : >> { %307 = vmatprep.subr.bf16.mxu0 %v284_v23  ;;  %2090 = vmatprep.subr.bf16.mxu1 %v284_v23  ;;  %v805_v26 = vpop.permute.xlu1 %804 }
  0x90   : >> { %v803_v27 = vpop.permute.xlu0 %802 }
  0x91   : >> { %v811_v31 = vsel %vm810_vm1, %v803_v27, %v805_v26  ;;  %v2269_v27 = vld [vmem:[%s2894_s1 + $0xc0] sm:$0xff]  }
  0x92   : >> { %308 = vmatpush1.bf16.msra.mxu0 %v287_v28  ;;  %2092 = vmatpush1.bf16.msra.mxu1 %v287_v28 }
  0x93   : >> { %829 = vmatprep.subr.bf16.mxu0 %v805_v26  ;;  %v809_v32 = vpop.permute.xlu1 %808  ;;  %410 = vmatprep.subr.bf16.mxu1 %v2419_v20  ;;  %v2268_v26 = vld [vmem:[%s2894_s1 + $0x50] sm:$0xff]  }
  0x94   : >> { %v807_v33 = vpop.permute.xlu0 %806 }
  0x95   : >> { %1915 = vmatmul.mubr.msk.bf16.vlgmr.msra.gmra.mrb[0].mxu0 %vm292_vm2, %v2250_v29  ;;  %1916 = vmatmul.mubr.msk.bf16.vlgmr.msra.gmra.mrb[0].mxu1 %vm292_vm2, %v2251_v30  ;;  %v812_v34 = vsel %vm810_vm1, %v807_v33, %v809_v32  ;;  %v2270_v30 = vld [vmem:[%s2894_s1 + $0x58] sm:$0xff]   ;;  %v2273_v33 = vld [vmem:[%s2894_s1 + $0xd0] sm:$0xff]  }
  0x96   : >> { %830 = vmatpush1.bf16.msra.mxu0 %v811_v31  ;;  %357 = vmatprep.mubr.bf16.mxu1 %v2302_v15  ;;  %v2271_v31 = vld [vmem:[%s2894_s1 + $0xc8] sm:$0xff]  }
  0x97   : >> { %831 = vmatprep.subr.bf16.mxu0 %v809_v32  ;;  %v950_v35 = vpop.permute.xlu1 %949  ;;  %861 = vmatprep.mubr.bf16.mxu0 %v2302_v15  ;;  %v2272_v32 = vld [vmem:[%s2894_s1 + $0x60] sm:$0xff]  }
  0x98   : >> { %v948_v36 = vpop.permute.xlu0 %947  ;;  %411 = vmatpush1.bf16.msra.mxu1 %v2409_v16 }
  0x99   : >> { %412 = vmatprep.subr.bf16.mxu1 %v2415_v19  ;;  %v956_v39 = vsel %vm955_vm3, %v948_v36, %v950_v35  ;;  %v2265_v19 = vld [vmem:[%s2894_s1 + $0xb0] sm:$0xff]  }
  0x9a   : >> { %832 = vmatpush1.bf16.msra.mxu0 %v812_v34  ;;  %v2274_v34 = vld [vmem:[%s2894_s1 + $0x68] sm:$0xff]   ;;  %v2276_v36 = vld [vmem:[%s2894_s1 + $0x70] sm:$0xff]  }
  0x9b   : >> { %974 = vmatprep.subr.bf16.mxu0 %v950_v35  ;;  %v954_v40 = vpop.permute.xlu1 %953  ;;  %v2275_v35 = vld [vmem:[%s2894_s1 + $0xd8] sm:$0xff]  }
  0x9c   : >> { %413 = vmatpush1.bf16.msra.mxu1 %v2405_v11  ;;  %v952_v41 = vpop.permute.xlu0 %951 }
  0x9d   : >> { %1917 = vmatmul.mubr.msk.bf16.gmra.mrb[4].mxu1 %vm292_vm2, %v2252_v37  ;;  %1971 = vmatmul.mubr.msk.bf16.vlgmr.msra.gmra.mrb[4].mxu0 %vm292_vm2, %v2253_v38  ;;  %v957_v42 = vsel %vm955_vm3, %v952_v41, %v954_v40  ;;  %v2277_v37 = vld [vmem:[%s2894_s1 + $0xe0] sm:$0xff]  }
  0x9e   : >> { %975 = vmatpush1.bf16.msra.mxu0 %v956_v39  ;;  %367 = vmatprep.mubr.bf16.mxu1 %v2302_v15 }
  0x9f   : >> { %871 = vmatprep.mubr.bf16.mxu0 %v2302_v15  ;;  %976 = vmatprep.subr.bf16.mxu0 %v954_v40  ;;  %v1095_v43 = vpop.permute.xlu1 %1094 }
  0xa0   : >> { %v1093_v44 = vpop.permute.xlu0 %1092 }
  0xa1   : >> { %v1101_v9 = vsel %vm1100_vm5, %v1093_v44, %v1095_v43  ;;  %v2280_v44 = vld [vmem:[%s2894_s1 + $0xf0] sm:$0xff]  }
  0xa2   : >> { %977 = vmatpush1.bf16.msra.mxu0 %v957_v42  ;;  %v2278_v42 = vld [vmem:[%s2894_s1 + $0x78] sm:$0xff]  }
  0xa3   : >> { %v1099_v47 = vpop.permute.xlu1 %1098  ;;  %1119 = vmatprep.subr.bf16.mxu0 %v1095_v43  ;;  %v2279_v43 = vld [vmem:[%s2894_s1 + $0xe8] sm:$0xff]  }
  0xa4   : >> { %v1097_v48 = vpop.permute.xlu0 %1096 }
  0xa5   : >> { %1918 = vmatmul.mubr.msk.bf16.gmra.mrb[8].mxu1 %vm292_vm2, %v2254_v45  ;;  %1972 = vmatmul.mubr.msk.bf16.gmra.mrb[8].mxu0 %vm292_vm2, %v2255_v46  ;;  %v1102_v11 = vsel %vm1100_vm5, %v1097_v48, %v1099_v47  ;;  %v2281_v45 = vld [vmem:[%s2894_s1 + $0xf8] sm:$0xff]   ;;  %v2282_v46 = vld [vmem:[%s2894_s1 + $0x100] sm:$0xff]   ;;  %v2284_v48 = vld [vmem:[%s2894_s1 + $0x110] sm:$0xff]  }
  0xa6   : >> { %442 = vmatprep.mubr.bf16.mxu1 %v2302_v15  ;;  %881 = vmatprep.mubr.bf16.mxu0 %v2302_v15 }
  0xa7   : >> { %v515_v49 = vpop.permute.xlu1 %514 }
  0xa8   : >> { %v513_v50 = vpop.permute.xlu0 %512  ;;  %539 = vmatprep.subr.bf16.mxu1 %v515_v49 }
  0xa9   : >> { %v521_v54 = vsel %vm520_vm4, %v513_v50, %v515_v49  ;;  %v2285_v49 = vld [vmem:[%s2894_s1 + $0x118] sm:$0xff]  }
  0xab   : >> { %v2507_v53 = vpop.permute.xlu1 %1239 }
  0xac   : >> { %v2509_v55 = vpop.permute.xlu0 %1237 }
  0xad   : >> { %1923 = vmatmul.mubr.msk.bf16.vlgmr.msra.gmra.mrb[12].mxu1 %vm292_vm2, %v2256_v51  ;;  %1973 = vmatmul.mubr.msk.bf16.gmra.mrb[12].mxu0 %vm292_vm2, %v2257_v52  ;;  %v1246_v28 = vsel %vm1245_vm7, %v2509_v55, %v2507_v53  ;;  %v1661_v55 = vld [vmem:[%s2896_s3 + $0x10] sm:$0xff] }
  0xae   : >> { %452 = vmatprep.mubr.bf16.mxu1 %v2302_v15  ;;  %891 = vmatprep.mubr.bf16.mxu0 %v2302_v15 }
  0xaf   : >> { %540 = vmatpush1.bf16.msra.mxu1 %v521_v54  ;;  %v519_v56 = vpop.permute.xlu1 %518  ;;  %v1659_v54 = vld [vmem:[%s2896_s3] sm:$0xff] }
  0xb0   : >> { %v517_v57 = vpop.permute.xlu0 %516  ;;  %541 = vmatprep.subr.bf16.mxu1 %v519_v56 }
  0xb1   : >> { %v522_v60 = vsel %vm520_vm4, %v517_v57, %v519_v56  ;;  %v2311_v56 = vmov 0.0|0.0  }
  0xb3   : >> { %542 = vmatpush1.bf16.msra.mxu1 %v522_v60  ;;  %v1244_v61 = vpop.permute.xlu1 %1243  ;;  %v1663_v60 = vld [vmem:[%s2896_s3 + $0x20] sm:$0xff] }
  0xb4   : >> { %v1242_v10 = vpop.permute.xlu0 %1241 }
  0xb5   : >> { %1924 = vmatmul.mubr.msk.bf16.gmra.mrb[0].mxu1 %vm292_vm2, %v2258_v58  ;;  %1974 = vmatmul.mubr.msk.bf16.gmra.mrb[16].mxu0 %vm292_vm2, %v2259_v59  ;;  %v1247_v29 = vsel %vm1245_vm7, %v1242_v10, %v1244_v61  ;;  %v1662_v58 = vld [vmem:[%s2896_s3 + $0x18] sm:$0xff]  ;;  %v1667_v10 = vld [vmem:[%s2896_s3 + $0x40] sm:$0xff] }
  0xb6   : >> { %462 = vmatprep.mubr.bf16.mxu1 %v2302_v15  ;;  %1006 = vmatprep.mubr.bf16.mxu0 %v2302_v15  ;;  %v2057_v59 = vpack.c.bf16 %v1662_v58, %v1661_v55  ;;  %v2312_v55 = vmov 0.0  }
  0xb7   : >> { %v660_v62 = vpop.permute.xlu1 %659 }
  0xb8   : >> { %684 = vmatprep.subr.bf16.mxu1 %v660_v62  ;;  %v658_v14 = vpop.permute.xlu0 %657 }
  0xb9   : >> { %v666_v20 = vsel %vm665_vm6, %v658_v14, %v660_v62  ;;  %v1670_v14 = vld [vmem:[%s2896_s3 + $0x58] sm:$0xff] }
  0xbb   : >> { %v1385_v16 = vpop.permute.xlu1 %1384 }
  0xbc   : >> { %v1383_v17 = vpop.permute.xlu0 %1382 }
  0xbd   : >> { %1925 = vmatmul.mubr.msk.bf16.gmra.mrb[4].mxu1 %vm292_vm2, %v2260_v63  ;;  %1987 = vmatmul.mubr.msk.bf16.vlgmr.msra.gmra.mrb[4].mxu0 %vm292_vm2, %v2261_v8  ;;  %v1391_v38 = vsel %vm1390_vm8, %v1383_v17, %v1385_v16  ;;  %v1665_v63 = vld [vmem:[%s2896_s3 + $0x30] sm:$0xff]  ;;  %v1666_v8 = vld [vmem:[%s2896_s3 + $0x38] sm:$0xff]  ;;  %v1671_v17 = vld [vmem:[%s2896_s3 + $0x60] sm:$0xff] }
  0xbe   : >> { %1120 = vmatpush1.bf16.msra.mxu0 %v1101_v9  ;;  %472 = vmatprep.mubr.bf16.mxu1 %v2302_v15  ;;  %v2063_v9 = vpack.c.bf16 %v1666_v8, %v1665_v63 }
  0xbf   : >> { %1016 = vmatprep.mubr.bf16.mxu0 %v2302_v15  ;;  %1121 = vmatprep.subr.bf16.mxu0 %v1099_v47  ;;  %v664_v21 = vpop.permute.xlu1 %663  ;;  %v2283_v47 = vld [vmem:[%s2894_s1 + $0x108] sm:$0xff]  }
  0xc0   : >> { %v662_v22 = vpop.permute.xlu0 %661 }
  0xc1   : >> { %v667_v23 = vsel %vm665_vm6, %v662_v22, %v664_v21 }
  0xc2   : >> { %1122 = vmatpush1.bf16.msra.mxu0 %v1102_v11  ;;  %v1668_v11 = vld [vmem:[%s2896_s3 + $0x48] sm:$0xff] }
  0xc3   : >> { %1264 = vmatprep.subr.bf16.mxu0 %v2507_v53  ;;  %v1389_v39 = vpop.permute.xlu1 %1388 }
  0xc4   : >> { %v1387_v40 = vpop.permute.xlu0 %1386 }
  0xc5   : >> { %1926 = vmatmul.mubr.msk.bf16.gmra.mrb[8].mxu1 %vm292_vm2, %v2262_v12  ;;  %1988 = vmatmul.mubr.msk.bf16.gmra.mrb[8].mxu0 %vm292_vm2, %v2263_v13  ;;  %v1392_v41 = vsel %vm1390_vm8, %v1387_v40, %v1389_v39  ;;  %v2066_v12 = vpack.c.bf16 %v1668_v11, %v1667_v10  ;;  %v1669_v13 = vld [vmem:[%s2896_s3 + $0x50] sm:$0xff] }
  0xc6   : >> { %571 = vmatprep.mubr.bf16.mxu1 %v2302_v15  ;;  %1026 = vmatprep.mubr.bf16.mxu0 %v2302_v15 }
  0xcd   : >> { %1939 = vmatmul.mubr.msk.bf16.vlgmr.msra.gmra.mrb[12].mxu1 %vm292_vm2, %v2264_v18  ;;  %1989 = vmatmul.mubr.msk.bf16.gmra.mrb[12].mxu0 %vm292_vm2, %v2265_v19  ;;  %v1672_v18 = vld [vmem:[%s2896_s3 + $0x68] sm:$0xff] }
  0xce   : >> { %581 = vmatprep.mubr.bf16.mxu1 %v2302_v15  ;;  %1036 = vmatprep.mubr.bf16.mxu0 %v2302_v15  ;;  %v2072_v19 = vpack.c.bf16 %v1672_v18, %v1671_v17 }
  0xcf   : >> { %685 = vmatpush1.bf16.msra.mxu1 %v666_v20  ;;  %v1673_v20 = vld [vmem:[%s2896_s3 + $0x70] sm:$0xff] }
  0xd0   : >> { %686 = vmatprep.subr.bf16.mxu1 %v664_v21  ;;  %v1674_v21 = vld [vmem:[%s2896_s3 + $0x78] sm:$0xff] }
  0xd1   : >> { %v2075_v22 = vpack.c.bf16 %v1674_v21, %v1673_v20 }
  0xd3   : >> { %687 = vmatpush1.bf16.msra.mxu1 %v667_v23  ;;  %v1675_v23 = vld [vmem:[%s2896_s3 + $0x80] sm:$0xff] }
  0xd4   : >> { %2053 = vmatprep.subr.bf16.mxu1 %v2311_v56 }
  0xd5   : >> { %1940 = vmatmul.mubr.msk.bf16.gmra.mrb[0].mxu1 %vm292_vm2, %v2266_v24  ;;  %1990 = vmatmul.mubr.msk.bf16.gmra.mrb[16].mxu0 %vm292_vm2, %v2267_v25  ;;  %v1676_v24 = vld [vmem:[%s2896_s3 + $0x88] sm:$0xff] }
  0xd6   : >> { %591 = vmatprep.mubr.bf16.mxu1 %v2302_v15  ;;  %1151 = vmatprep.mubr.bf16.mxu0 %v2302_v15  ;;  %v2078_v25 = vpack.c.bf16 %v1676_v24, %v1675_v23 }
  0xdd   : >> { %1941 = vmatmul.mubr.msk.bf16.gmra.mrb[4].mxu1 %vm292_vm2, %v2268_v26  ;;  %2003 = vmatmul.mubr.msk.bf16.vlgmr.msra.gmra.mrb[4].mxu0 %vm292_vm2, %v2269_v27  ;;  %v1677_v26 = vld [vmem:[%s2896_s3 + $0x90] sm:$0xff]  ;;  %v1678_v27 = vld [vmem:[%s2896_s3 + $0x98] sm:$0xff] }
  0xde   : >> { %1265 = vmatpush1.bf16.msra.mxu0 %v1246_v28  ;;  %601 = vmatprep.mubr.bf16.mxu1 %v2302_v15  ;;  %v2081_v28 = vpack.c.bf16 %v1678_v27, %v1677_v26 }
  0xdf   : >> { %1161 = vmatprep.mubr.bf16.mxu0 %v2302_v15  ;;  %1266 = vmatprep.subr.bf16.mxu0 %v1244_v61  ;;  %v1664_v61 = vld [vmem:[%s2896_s3 + $0x28] sm:$0xff] }
  0xe0   : >> { %v2060_v62 = vpack.c.bf16 %v1664_v61, %v1663_v60 }
  0xe2   : >> { %1267 = vmatpush1.bf16.msra.mxu0 %v1247_v29  ;;  %v1679_v29 = vld [vmem:[%s2896_s3 + $0xa0] sm:$0xff] }
  0xe3   : >> { %1409 = vmatprep.subr.bf16.mxu0 %v1385_v16  ;;  %v2069_v16 = vpack.c.bf16 %v1670_v14, %v1669_v13 }
  0xe5   : >> { %1942 = vmatmul.mubr.msk.bf16.gmra.mrb[8].mxu1 %vm292_vm2, %v2270_v30  ;;  %2004 = vmatmul.mubr.msk.bf16.gmra.mrb[8].mxu0 %vm292_vm2, %v2271_v31  ;;  %v1680_v30 = vld [vmem:[%s2896_s3 + $0xa8] sm:$0xff] }
  0xe6   : >> { %716 = vmatprep.mubr.bf16.mxu1 %v2302_v15  ;;  %1171 = vmatprep.mubr.bf16.mxu0 %v2302_v15  ;;  %v2084_v31 = vpack.c.bf16 %v1680_v30, %v1679_v29 }
  0xed   : >> { %1955 = vmatmul.mubr.msk.bf16.vlgmr.msra.gmra.mrb[12].mxu1 %vm292_vm2, %v2272_v32  ;;  %2005 = vmatmul.mubr.msk.bf16.gmra.mrb[12].mxu0 %vm292_vm2, %v2273_v33  ;;  %v1681_v32 = vld [vmem:[%s2896_s3 + $0xb0] sm:$0xff]  ;;  %v1682_v33 = vld [vmem:[%s2896_s3 + $0xb8] sm:$0xff] }
  0xee   : >> { %726 = vmatprep.mubr.bf16.mxu1 %v2302_v15  ;;  %1181 = vmatprep.mubr.bf16.mxu0 %v2302_v15 }
  0xf5   : >> { %1956 = vmatmul.mubr.msk.bf16.gmra.mrb[0].mxu1 %vm292_vm2, %v2274_v34  ;;  %2006 = vmatmul.mubr.msk.bf16.gmra.mrb[16].mxu0 %vm292_vm2, %v2275_v35  ;;  %v2087_v34 = vpack.c.bf16 %v1682_v33, %v1681_v32 }
  0xf6   : >> { %736 = vmatprep.mubr.bf16.mxu1 %v2302_v15  ;;  %1296 = vmatprep.mubr.bf16.mxu0 %v2302_v15 }
  0xfd   : >> { %1957 = vmatmul.mubr.msk.bf16.gmra.mrb[4].mxu1 %vm292_vm2, %v2276_v36  ;;  %2019 = vmatmul.mubr.msk.bf16.vlgmr.msra.gmra.mrb[4].mxu0 %vm292_vm2, %v2277_v37 }
  0xfe   : >> { %1410 = vmatpush1.bf16.msra.mxu0 %v1391_v38  ;;  %746 = vmatprep.mubr.bf16.mxu1 %v2302_v15 }
  0xff   : >> { %1306 = vmatprep.mubr.bf16.mxu0 %v2302_v15  ;;  %1411 = vmatprep.subr.bf16.mxu0 %v1389_v39 }
 0x102   : >> { %1412 = vmatpush1.bf16.msra.mxu0 %v1392_v41 }
 0x105   : >> { %1958 = vmatmul.mubr.msk.bf16.gmra.mrb[8].mxu1 %vm292_vm2, %v2278_v42  ;;  %2020 = vmatmul.mubr.msk.bf16.gmra.mrb[8].mxu0 %vm292_vm2, %v2279_v43 }
 0x106   : >> { %1316 = vmatprep.mubr.bf16.mxu0 %v2302_v15 }
 0x10d   : >> { %2021 = vmatmul.mubr.msk.bf16.gmra.mrb[12].mxu0 %vm292_vm2, %v2280_v44 }
 0x10e   : >> { %1326 = vmatprep.mubr.bf16.mxu0 %v2302_v15 }
 0x115   : >> { %2022 = vmatmul.mubr.msk.bf16.gmra.mrb[16].mxu0 %vm292_vm2, %v2281_v45 }
 0x116   : >> { %1441 = vmatprep.mubr.bf16.mxu0 %v2302_v15 }
 0x11d   : >> { %2035 = vmatmul.mubr.msk.bf16.vlgmr.msra.gmra.mrb[4].mxu0 %vm292_vm2, %v2282_v46 }
 0x11e   : >> { %1451 = vmatprep.mubr.bf16.mxu0 %v2302_v15 }
 0x125   : >> { %2036 = vmatmul.mubr.msk.bf16.gmra.mrb[8].mxu0 %vm292_vm2, %v2283_v47 }
 0x126   : >> { %1461 = vmatprep.mubr.bf16.mxu0 %v2302_v15 }
 0x12d   : >> { %2037 = vmatmul.mubr.msk.bf16.gmra.mrb[12].mxu0 %vm292_vm2, %v2284_v48 }
 0x12e   : >> { %1471 = vmatprep.mubr.bf16.mxu0 %v2302_v15  ;;  %v1660_v15 = vld [vmem:[%s2896_s3 + $0x8] sm:$0xff] }
 0x12f   : >> { %v2054_v57 = vpack.c.bf16 %v1660_v15, %v1659_v54 }
 0x131   : >> { %2055 = vmatpush1.bf16.msra.mxu1 %v2054_v57 }
 0x132   : >> { %2056 = vmatprep.subr.bf16.mxu1 %v2311_v56 }
 0x135   : >> { %2038 = vmatmul.mubr.msk.bf16.gmra.mrb[16].mxu0 %vm292_vm2, %v2285_v49  ;;  %2058 = vmatpush1.bf16.msra.mxu1 %v2057_v59  ;;  %v1501_v59 = vpop.permute.xlu0 %1500 }
 0x136   : >> { %2059 = vmatprep.subr.bf16.mxu1 %v2311_v56 }
 0x139   : >> { %2061 = vmatpush1.bf16.msra.mxu1 %v2060_v62 }
 0x13a   : >> { %2062 = vmatprep.subr.bf16.mxu1 %v2311_v56 }
 0x13d   : >> { %2064 = vmatpush1.bf16.msra.mxu1 %v2063_v9  ;;  %v1506_v9 = vpop.permute.xlu1 %1505 }
 0x13e   : >> { %2065 = vmatprep.subr.bf16.mxu1 %v2311_v56 }
 0x141   : >> { %2067 = vmatpush1.bf16.msra.mxu1 %v2066_v12  ;;  %v1511_v21 = vpop.permute.xlu1 %1510 }
 0x142   : >> { %2068 = vmatprep.subr.bf16.mxu1 %v2311_v56 }
 0x145   : >> { %2070 = vmatpush1.bf16.msra.mxu1 %v2069_v16 }
 0x146   : >> { %2071 = vmatprep.subr.bf16.mxu1 %v2311_v56 }
 0x149   : >> { %2073 = vmatpush1.bf16.msra.mxu1 %v2072_v19 }
 0x14a   : >> { %2074 = vmatprep.subr.bf16.mxu1 %v2311_v56 }
 0x14d   : >> { %2076 = vmatpush1.bf16.msra.mxu1 %v2075_v22 }
 0x14e   : >> { %2077 = vmatprep.subr.bf16.mxu1 %v2311_v56 }
 0x151   : >> { %2079 = vmatpush1.bf16.msra.mxu1 %v2078_v25 }
 0x152   : >> { %2080 = vmatprep.subr.bf16.mxu1 %v2311_v56 }
 0x155   : >> { %2082 = vmatpush1.bf16.msra.mxu1 %v2081_v28  ;;  %v1516_v28 = vpop.permute.xlu0 %1515 }
 0x156   : >> { %2083 = vmatprep.subr.bf16.mxu1 %v2311_v56 }
 0x159   : >> { %2085 = vmatpush1.bf16.msra.mxu1 %v2084_v31 }
 0x15a   : >> { %2086 = vmatprep.subr.bf16.mxu1 %v2311_v56 }
 0x15d   : >> { %2088 = vmatpush1.bf16.msra.mxu1 %v2087_v34 }
 0x15e   : >> { %1757 = vmatprep.subr.mxu1 %v2312_v55 }
 0x168   : >> { %v2656_v50 = vpop.f32.mrb[0].mxu0 }
 0x169   : >> { %v2658_v51 = vpop.f32.mrb[1].mxu0 }
 0x16a   : >> { %v2660_v52 = vpop.f32.mrb[2].mxu0 }
 0x16b   : >> { %v2662_v53 = vpop.f32.mrb[3].mxu0 }
 0x1c0   : >> { %v718_v35 = vpop.f32.mrb[12].mxu1 }
 0x1c1   : >> { %v2093_v36 = vadd.f32 %v718_v35, %v2656_v50  ;;  %v720_v37 = vpop.f32.mrb[13].mxu1 }
 0x1c2   : >> { %v2095_v38 = vadd.f32 %v720_v37, %v2658_v51  ;;  %v722_v39 = vpop.f32.mrb[14].mxu1 }
 0x1c3   : >> { %v2097_v40 = vadd.f32 %v722_v39, %v2660_v52  ;;  %v724_v41 = vpop.f32.mrb[15].mxu1  ;;  %v1521_v39 = vpop.permute.xlu1 %1520 }
 0x1c4   : >> { %v2099_v42 = vadd.f32 %v724_v41, %v2662_v53  ;;  %v1683_v53 = vld [vmem:[%s2896_s3 + $0xc0] sm:$0xff] }
 0x1c5   : >> { %1758 = vmatpush1.msra.mxu1 %v1683_v53 }
 0x1c8   : >> { %v728_v43 = vpop.f32.mrb[0].mxu1 }
 0x1c9   : >> { %v730_v44 = vpop.f32.mrb[1].mxu1 }
 0x1ca   : >> { %v732_v45 = vpop.f32.mrb[2].mxu1 }
 0x1cb   : >> { %v734_v46 = vpop.f32.mrb[3].mxu1 }
 0x1d0   : >> { %v738_v47 = vpop.f32.mrb[4].mxu1 }
 0x1d1   : >> { %v740_v48 = vpop.f32.mrb[5].mxu1 }
 0x1d2   : >> { %v742_v49 = vpop.f32.mrb[6].mxu1 }
 0x1d3   : >> { %v2740_v54 = vpop.f32.mrb[7].mxu1 }
 0x1d8   : >> { %v2742_v50 = vpop.f32.mrb[8].mxu1 }
 0x1d9   : >> { %v2744_v15 = vpop.f32.mrb[9].mxu1 }
 0x1da   : >> { %v2746_v51 = vpop.f32.mrb[10].mxu1 }
 0x1db   : >> { %v2748_v52 = vpop.f32.mrb[11].mxu1 }
 0x1f0   : >> { %v1443_v56 = vpop.f32.mrb[4].mxu0 }
 0x1f1   : >> { %v2094_v57 = vadd.f32 %v2093_v36, %v1443_v56  ;;  %v1445_v58 = vpop.f32.mrb[5].mxu0 }
 0x1f2   : >> { %v2096_v60 = vadd.f32 %v2095_v38, %v1445_v58  ;;  %v1447_v61 = vpop.f32.mrb[6].mxu0 }
 0x1f3   : >> { %v2753_v62 = vadd.f32 %v2094_v57, %v1501_v59  ;;  %v2098_v63 = vadd.f32 %v2097_v40, %v1447_v61  ;;  %v1449_v8 = vpop.f32.mrb[7].mxu0 }
 0x1f4   : >> { %v2755_v10 = vadd.f32 %v2096_v60, %v1501_v59  ;;  %v2100_v11 = vadd.f32 %v2099_v42, %v1449_v8  ;;  %v1531_v60 = vpop.permute.xlu1 %1530 }
 0x1f5   : >> { %v1554_v12 = vmax.f32 %v2753_v62, 0.0  ;;  %v2758_v13 = vadd.f32 %v2098_v63, %v1506_v9 }
 0x1f6   : >> { %v1555_v14 = vmax.f32 %v2755_v10, 0.0  ;;  %v2761_v16 = vadd.f32 %v2100_v11, %v1506_v9 }
 0x1f7   : >> { %1586 = vrot.lane.b32.xlu1 %v1554_v12, %s2303_s19  ;;  %v1556_v18 = vmax.f32 %v2758_v13, 0.0 }
 0x1f8   : >> { %v1453_v17 = vpop.f32.mrb[8].mxu0  ;;  %1588 = vrot.lane.b32.xlu0 %v1555_v14, %s2303_s19  ;;  %v1557_v22 = vmax.f32 %v2761_v16, 0.0 }
 0x1f9   : >> { %v2101_v19 = vadd.f32 %v1453_v17, %v728_v43  ;;  %v1455_v20 = vpop.f32.mrb[9].mxu0 }
 0x1fa   : >> { %v2102_v23 = vadd.f32 %v1455_v20, %v730_v44  ;;  %v1457_v24 = vpop.f32.mrb[10].mxu0 }
 0x1fb   : >> { %v2771_v25 = vadd.f32 %v2101_v19, %v1511_v21  ;;  %v2103_v26 = vadd.f32 %v1457_v24, %v732_v45  ;;  %v1459_v27 = vpop.f32.mrb[11].mxu0  ;;  %1590 = vrot.lane.b32.xlu1 %v1556_v18, %s2303_s19 }
 0x1fc   : >> { %v2776_v29 = vadd.f32 %v2102_v23, %v1511_v21  ;;  %v2104_v30 = vadd.f32 %v1459_v27, %v734_v46  ;;  %1592 = vrot.lane.b32.xlu0 %v1557_v22, %s2303_s19  ;;  %v1526_v46 = vpop.permute.xlu0 %1525 }
 0x1fd   : >> { %v1558_v31 = vmax.f32 %v2771_v25, 0.0  ;;  %v2782_v32 = vadd.f32 %v2103_v26, %v1516_v28 }
 0x1fe   : >> { %v1559_v33 = vmax.f32 %v2776_v29, 0.0  ;;  %v2785_v34 = vadd.f32 %v2104_v30, %v1516_v28 }
 0x1ff   : >> { %1594 = vrot.lane.b32.xlu1 %v1558_v31, %s2303_s19  ;;  %v1560_v36 = vmax.f32 %v2782_v32, 0.0 }
 0x200   : >> { %v1463_v35 = vpop.f32.mrb[12].mxu0  ;;  %1596 = vrot.lane.b32.xlu0 %v1559_v33, %s2303_s19  ;;  %v1561_v40 = vmax.f32 %v2785_v34, 0.0  ;;  %v1536_v19 = vpop.permute.xlu0 %1535 }
 0x201   : >> { %v2105_v37 = vadd.f32 %v1463_v35, %v738_v47  ;;  %v1465_v38 = vpop.f32.mrb[13].mxu0 }
 0x202   : >> { %v2106_v41 = vadd.f32 %v1465_v38, %v740_v48  ;;  %v1467_v42 = vpop.f32.mrb[14].mxu0 }
 0x203   : >> { %v2795_v43 = vadd.f32 %v2105_v37, %v1521_v39  ;;  %v2107_v44 = vadd.f32 %v1467_v42, %v742_v49  ;;  %v1469_v45 = vpop.f32.mrb[15].mxu0  ;;  %1598 = vrot.lane.b32.xlu1 %v1560_v36, %s2303_s19 }
 0x204   : >> { %v2800_v55 = vadd.f32 %v2106_v41, %v1521_v39  ;;  %v2108_v53 = vadd.f32 %v1469_v45, %v2740_v54  ;;  %1600 = vrot.lane.b32.xlu0 %v1561_v40, %s2303_s19 }
 0x205   : >> { %v1562_v47 = vmax.f32 %v2795_v43, 0.0  ;;  %v2807_v48 = vadd.f32 %v2107_v44, %v1526_v46 }
 0x206   : >> { %v1563_v49 = vmax.f32 %v2800_v55, 0.0  ;;  %v2810_v56 = vadd.f32 %v2108_v53, %v1526_v46 }
 0x207   : >> { %1602 = vrot.lane.b32.xlu1 %v1562_v47, %s2303_s19  ;;  %v1564_v54 = vmax.f32 %v2807_v48, 0.0 }
 0x208   : >> { %v1473_v57 = vpop.f32.mrb[16].mxu0  ;;  %1604 = vrot.lane.b32.xlu0 %v1563_v49, %s2303_s19  ;;  %v1565_v61 = vmax.f32 %v2810_v56, 0.0 }
 0x209   : >> { %v2109_v58 = vadd.f32 %v1473_v57, %v2742_v50  ;;  %v1475_v59 = vpop.f32.mrb[17].mxu0 }
 0x20a   : >> { %v2110_v63 = vadd.f32 %v1475_v59, %v2744_v15  ;;  %v1477_v8 = vpop.f32.mrb[18].mxu0 }
 0x20b   : >> { %v2822_v9 = vadd.f32 %v2109_v58, %v1531_v60  ;;  %v2111_v11 = vadd.f32 %v1477_v8, %v2746_v51  ;;  %v1479_v17 = vpop.f32.mrb[19].mxu0  ;;  %1606 = vrot.lane.b32.xlu1 %v1564_v54, %s2303_s19 }
 0x20c   : >> { %v1551_v20 = vadd.f32 %v2110_v63, %v1531_v60  ;;  %v2112_v50 = vadd.f32 %v1479_v17, %v2748_v52  ;;  %1608 = vrot.lane.b32.xlu0 %v1565_v61, %s2303_s19 }
 0x20d   : >> { %v1566_v21 = vmax.f32 %v2822_v9, 0.0  ;;  %v2831_v23 = vadd.f32 %v2111_v11, %v1536_v19 }
 0x20e   : >> { %v1567_v15 = vmax.f32 %v1551_v20, 0.0  ;;  %v1553_v24 = vadd.f32 %v2112_v50, %v1536_v19 }
 0x20f   : >> { %1610 = vrot.lane.b32.xlu1 %v1566_v21, %s2303_s19  ;;  %v1568_v51 = vmax.f32 %v2831_v23, 0.0 }
 0x210   : >> { %1612 = vrot.lane.b32.xlu0 %v1567_v15, %s2303_s19  ;;  %v1569_v26 = vmax.f32 %v1553_v24, 0.0 }
 0x213   : >> { %1614 = vrot.lane.b32.xlu1 %v1568_v51, %s2303_s19 }
 0x214   : >> { %1616 = vrot.lane.b32.xlu0 %v1569_v26, %s2303_s19  ;;  %s1815_s19 = scalar_lea.vmem %s2394_s14, %s2052_s17 }
 0x269   : >> { %v1587_v52 = vpop.permute.xlu1 %1586 }
 0x26a   : >> { %v1589_v27 = vpop.permute.xlu0 %1588 }
 0x26b   : >> { %v1619_v28 = vsel %vm285_vm0, %v1587_v52, %v1589_v27  ;;  %v1644_v30 = vmax.f32 %v1555_v14, %v1589_v27 }
 0x26c   : >> { %v1643_v35 = vmax.f32 %v1554_v12, %v1619_v28 }
 0x26d   : >> { %v1591_v37 = vpop.permute.xlu1 %1590  ;;  %2039 = vmatprep.mubr.msk.f32.mxu1 %vm1684_vm9, %v1644_v30 }
 0x26e   : >> { %1774 = vmatmul.mubr.f32.vlgmr.msra.gmra.mrb[16].mxu1 %v1643_v35  ;;  %v1593_v38 = vpop.permute.xlu0 %1592 }
 0x26f   : >> { %v1620_v39 = vsel %vm285_vm0, %v1591_v37, %v1593_v38  ;;  %v1646_v41 = vmax.f32 %v1557_v22, %v1593_v38 }
 0x270   : >> { %v1645_v42 = vmax.f32 %v1556_v18, %v1620_v39 }
 0x271   : >> { %v1595_v44 = vpop.permute.xlu1 %1594  ;;  %2040 = vmatprep.mubr.msk.f32.mxu1 %vm1684_vm9, %v1646_v41 }
 0x272   : >> { %1779 = vmatmul.mubr.f32.gmra.mrb[18].mxu1 %v1645_v42  ;;  %v1597_v10 = vpop.permute.xlu0 %1596 }
 0x273   : >> { %v1621_v62 = vsel %vm285_vm0, %v1595_v44, %v1597_v10  ;;  %v1648_v12 = vmax.f32 %v1559_v33, %v1597_v10 }
 0x274   : >> { %v1647_v14 = vmax.f32 %v1558_v31, %v1621_v62 }
 0x275   : >> { %v1599_v45 = vpop.permute.xlu1 %1598  ;;  %2041 = vmatprep.mubr.msk.f32.mxu1 %vm1684_vm9, %v1648_v12 }
 0x276   : >> { %1784 = vmatmul.mubr.f32.gmra.mrb[20].mxu1 %v1647_v14  ;;  %v1601_v16 = vpop.permute.xlu0 %1600 }
 0x277   : >> { %v1622_v13 = vsel %vm285_vm0, %v1599_v45, %v1601_v16  ;;  %v1650_v18 = vmax.f32 %v1561_v40, %v1601_v16 }
 0x278   : >> { %v1649_v22 = vmax.f32 %v1560_v36, %v1622_v13 }
 0x279   : >> { %v1603_v46 = vpop.permute.xlu1 %1602  ;;  %2042 = vmatprep.mubr.msk.f32.mxu1 %vm1684_vm9, %v1650_v18 }
 0x27a   : >> { %1789 = vmatmul.mubr.f32.gmra.mrb[22].mxu1 %v1649_v22  ;;  %v1605_v29 = vpop.permute.xlu0 %1604 }
 0x27b   : >> { %v1623_v25 = vsel %vm285_vm0, %v1603_v46, %v1605_v29  ;;  %v1652_v31 = vmax.f32 %v1563_v49, %v1605_v29 }
 0x27c   : >> { %v1651_v33 = vmax.f32 %v1562_v47, %v1623_v25 }
 0x27d   : >> { %v1607_v53 = vpop.permute.xlu1 %1606  ;;  %2043 = vmatprep.mubr.msk.f32.mxu1 %vm1684_vm9, %v1652_v31 }
 0x27e   : >> { %1794 = vmatmul.mubr.f32.gmra.mrb[24].mxu1 %v1651_v33  ;;  %v1609_v34 = vpop.permute.xlu0 %1608 }
 0x27f   : >> { %v1624_v32 = vsel %vm285_vm0, %v1607_v53, %v1609_v34  ;;  %v1654_v36 = vmax.f32 %v1565_v61, %v1609_v34 }
 0x280   : >> { %v1653_v40 = vmax.f32 %v1564_v54, %v1624_v32 }
 0x281   : >> { %v1611_v56 = vpop.permute.xlu1 %1610  ;;  %2044 = vmatprep.mubr.msk.f32.mxu1 %vm1684_vm9, %v1654_v36 }
 0x282   : >> { %1799 = vmatmul.mubr.f32.gmra.mrb[26].mxu1 %v1653_v40  ;;  %v1613_v55 = vpop.permute.xlu0 %1612 }
 0x283   : >> { %v1625_v43 = vsel %vm285_vm0, %v1611_v56, %v1613_v55  ;;  %v1656_v47 = vmax.f32 %v1567_v15, %v1613_v55 }
 0x284   : >> { %v1655_v49 = vmax.f32 %v1566_v21, %v1625_v43 }
 0x285   : >> { %v1615_v57 = vpop.permute.xlu1 %1614  ;;  %2045 = vmatprep.mubr.msk.f32.mxu1 %vm1684_vm9, %v1656_v47 }
 0x286   : >> { %1804 = vmatmul.mubr.f32.gmra.mrb[28].mxu1 %v1655_v49  ;;  %v1617_v58 = vpop.permute.xlu0 %1616 }
 0x287   : >> { %v1626_v59 = vsel %vm285_vm0, %v1615_v57, %v1617_v58  ;;  %v1658_v48 = vmax.f32 %v1569_v26, %v1617_v58 }
 0x288   : >> { %v1657_v54 = vmax.f32 %v1568_v51, %v1626_v59 }
 0x289   : >> { %2046 = vmatprep.mubr.msk.f32.mxu1 %vm1684_vm9, %v1658_v48 }
 0x28a   : >> { %1809 = vmatmul.mubr.f32.gmra.mrb[30].mxu1 %v1657_v54 }
 0x341   : >> { %v1775_v60 = vpop.f32.mrb[16].mxu1 }
 0x342   : >> { %1817 = vst.msk [vmem:[%s1815_s19] sm:$0xff] %vm1816_vm10, %v1775_v60  ;;  %v1777_v61 = vpop.f32.mrb[17].mxu1 }
 0x345   : >> { %v1780_v63 = vpop.f32.mrb[18].mxu1 }
 0x346   : >> { %1818 = vst.msk [vmem:[%s1815_s19 + $0x8] sm:$0xff] %vm1816_vm10, %v1780_v63  ;;  %v1782_v8 = vpop.f32.mrb[19].mxu1 }
 0x349   : >> { %v1785_v9 = vpop.f32.mrb[20].mxu1 }
 0x34a   : >> { %1819 = vst.msk [vmem:[%s1815_s19 + $0x10] sm:$0xff] %vm1816_vm10, %v1785_v9  ;;  %v1787_v11 = vpop.f32.mrb[21].mxu1 }
 0x34d   : >> { %v1790_v17 = vpop.f32.mrb[22].mxu1 }
 0x34e   : >> { %1820 = vst.msk [vmem:[%s1815_s19 + $0x18] sm:$0xff] %vm1816_vm10, %v1790_v17  ;;  %v1792_v19 = vpop.f32.mrb[23].mxu1 }
 0x351   : >> { %v1795_v20 = vpop.f32.mrb[24].mxu1 }
 0x352   : >> { %1821 = vst.msk [vmem:[%s1815_s19 + $0x20] sm:$0xff] %vm1816_vm10, %v1795_v20  ;;  %v1797_v50 = vpop.f32.mrb[25].mxu1 }
 0x355   : >> { %v1800_v21 = vpop.f32.mrb[26].mxu1 }
 0x356   : >> { %1822 = vst.msk [vmem:[%s1815_s19 + $0x28] sm:$0xff] %vm1816_vm10, %v1800_v21  ;;  %v1802_v23 = vpop.f32.mrb[27].mxu1 }
 0x358   : > { %219 = sbr.rel (!%p217_p4) target bundleno = 16 (0x10), region = 83 }
 0x359   : >> { %v1805_v15 = vpop.f32.mrb[28].mxu1 }
 0x35a   : >> { %1823 = vst.msk [vmem:[%s1815_s19 + $0x30] sm:$0xff] %vm1816_vm10, %v1805_v15  ;;  %v1807_v24 = vpop.f32.mrb[29].mxu1 }
 0x35d   : >> { %v1810_v51 = vpop.f32.mrb[30].mxu1 }
 0x35e   : >> { %1824 = vst.msk [vmem:[%s1815_s19 + $0x38] sm:$0xff] %vm1816_vm10, %v1810_v51  ;;  %v1812_v26 = vpop.f32.mrb[31].mxu1 }
 0x35f PF: > { %s14_s15 = sadd.s32 1, %s2296_s15  }
 0x360   : > { %p11_p5 = scmp.ge.s32.totalorder %s14_s15, 4  }
 0x362   :  { %13 = sbr.rel (!%p11_p5) target bundleno = 1 (0x1), region = 94 }

// kernel: _lambda_.6
= control target key start
LH: loop header
LB: loop body
LE: loop exit
PB: predicated region body
PF: predicated region fallthrough
CT: control target
= control target key end

     0   :  { %s1677_s15 = smov 0   ;;  %s1901_s0 = inlined_call_operand.vmem [shape: f32[18,64,109], index: 0, kind: input, shape index: {}]   ;;  %s1902_s1 = inlined_call_operand.vmem [shape: bf16[9,30,64], index: 1, kind: input, shape index: {}]   ;;  %s1903_s2 = inlined_call_operand.vmem [shape: f32[30,1], index: 2, kind: input, shape index: {}]   ;;  %s1904_s3 = inlined_call_operand.vmem [shape: f32[100,50], index: 3, kind: input, shape index: {}]   ;;  %s1905_s4 = inlined_call_operand.vmem [shape: f32[18,30,50], index: 4, kind: output, shape index: {}]  }
   0x1 LB: > { %s1227_s16 = sadd.s32 4294967295, %s1637_s15   ;;  %p1231_p0 = scmp.ge.s32.totalorder %s1637_s15, 1  ;;  %s1637_s15 = sphi %s1677_s15, %s14_s15  }
   0x2   : > { %p164_p1 = scmp.lt.s32.totalorder %s1637_s15, 3 }
   0x4   : > { %p165_p2 = pnand %p1231_p0, %p164_p1 }
   0x5   : > { %s192_s17 = smul.u32 (!%p165_p2), 9, %s1227_s16  ;;  %v1688_v0 = vld [vmem:[%s1903_s2] sm:$0xff] (!%p165_p2)  ;;  %v1693_v1 = vld [vmem:[%s1903_s2 + $0x8] sm:$0xff] (!%p165_p2)  ;;  %v1698_v2 = vld [vmem:[%s1903_s2 + $0x10] sm:$0xff] (!%p165_p2)  ;;  %s1715_s8 = smov (!%p165_p2), 0  }
   0x6   : > { %168 = sbr.rel (%p165_p2) target bundleno = 772 (0x304), region = 36  ;;  %v1703_v3 = vld [vmem:[%s1903_s2 + $0x18] sm:$0x3f] (!%p165_p2) }
   0x7   : > { %p193_p3 = scmp.lt.s32.totalorder (!%p165_p2), %s192_s17, 17 }
   0xd   : > { %s1907_s17 = smov (!%p193_p3, %s192_s17), 17 }
   0xe   : > { %s1313_s26 = sshll.u32 %s1907_s17, 6  ;;  %s1314_s27 = sshll.u32 %s1907_s17, 5 }
   0xf   : > { %s1708_s30 = scalar_lea.vmem %s1901_s0, %s1313_s26  ;;  %s1713_s7 = scalar_lea.vmem %s1905_s4, %s1314_s27 }
  0x10 LB: >> { %s1236_s9 = sshll.u32 %s1641_s8, 6  ;;  %s1643_s11 = smov 124   ;;  %v1609_v16 = vld [vmem:[%s1902_s1 + $0x40] sm:$0xff]   ;;  %vm266_vm0 = vcmask 523264   ;;  %v1611_v17 = vld [vmem:[%s1902_s1 + $0x10] sm:$0xff]   ;;  %v1651_v18 = vmov 0   ;;  %s1641_s8 = sphi %s1715_s8, %s216_s8  }
  0x11   : >> { %s218_s10 = scalar_lea.vmem %s1708_s30, %s1236_s9  ;;  %1442 = vmatprep.mubr.msk.bf16.mxu0 %vm266_vm0, %v1609_v16  ;;  %s1644_s14 = smov 127   ;;  %1394 = vmatprep.mubr.msk.bf16.mxu1 %vm266_vm0, %v1611_v17  ;;  %v1610_v26 = vld [vmem:[%s1902_s1 + $0x48] sm:$0x7f]   ;;  %v1613_v28 = vld [vmem:[%s1902_s1 + $0x50] sm:$0xff]   ;;  %v1612_v32 = vld [vmem:[%s1902_s1 + $0x18] sm:$0x7f]  }
  0x12   : >> { %v219_v4 = vld [vmem:[%s218_s10] sm:$0xff]  ;;  %v220_v5 = vld [vmem:[%s218_s10 + $0x8] sm:$0xff]  ;;  %v221_v6 = vld [vmem:[%s218_s10 + $0x10] sm:$0xff]  ;;  %s1645_s18 = smov 123   ;;  %s1646_s19 = smov 122   ;;  %1608 = vset.pattern.permute.xlu1 %v1651_v18  ;;  %1607 = vset.pattern.permute.xlu0 %v1651_v18  ;;  %vm1063_vm1 = vcmask 1043456  }
  0x13   : >> { %v1722_v7 = vpack.c.bf16 %v220_v5, %v219_v4  ;;  %v222_v8 = vld [vmem:[%s218_s10 + $0x18] sm:$0xff]  ;;  %v223_v9 = vld [vmem:[%s218_s10 + $0x20] sm:$0xff]  ;;  %v224_v10 = vld [vmem:[%s218_s10 + $0x28] sm:$0xff]  ;;  %s1647_s20 = smov 126   ;;  %s1648_s21 = smov 121   ;;  %vm1050_vm2 = vcmask 818176  }
  0x14   : >> { %v1724_v11 = vpack.c.bf16 %v224_v10, %v223_v9  ;;  %v225_v12 = vld [vmem:[%s218_s10 + $0x30] sm:$0xff]  ;;  %v226_v13 = vld [vmem:[%s218_s10 + $0x38] sm:$0xff]  ;;  %v1727_v14 = vpack.c.bf16 %v222_v8, %v221_v6  ;;  %s1649_s22 = smov 125   ;;  %s1650_s23 = smov 120   ;;  %v1615_v35 = vld [vmem:[%s1902_s1] sm:$0xff]   ;;  %vm1154_vm3 = vcmask 408576  }
  0x15   : >> { %574 = vrot.lane.b32.xlu0 %v1722_v7, %s1643_s11  ;;  %v1730_v15 = vpack.c.bf16 %v226_v13, %v225_v12  ;;  %v1614_v38 = vld [vmem:[%s1902_s1 + $0x58] sm:$0x7f]   ;;  %v1617_v41 = vld [vmem:[%s1902_s1 + $0x60] sm:$0xff]   ;;  %v1616_v44 = vld [vmem:[%s1902_s1 + $0x8] sm:$0x7f]   ;;  %vm1158_vm4 = vcmask 406528  }
  0x16   : >> { %578 = vrot.lane.b32.xlu1 %v1724_v11, %s1643_s11  ;;  %v1619_v47 = vld [vmem:[%s1902_s1 + $0x20] sm:$0xff]   ;;  %v1618_v50 = vld [vmem:[%s1902_s1 + $0x68] sm:$0x7f]   ;;  %v1621_v53 = vld [vmem:[%s1902_s1 + $0x70] sm:$0xff]  }
  0x17   : >> { %v1620_v55 = vld [vmem:[%s1902_s1 + $0x28] sm:$0x7f]   ;;  %v1623_v57 = vld [vmem:[%s1902_s1 + $0x30] sm:$0xff]   ;;  %v1622_v60 = vld [vmem:[%s1902_s1 + $0x78] sm:$0x7f]  }
  0x18   : >> { %v1625_v62 = vld [vmem:[%s1902_s1 + $0x80] sm:$0xff]   ;;  %v1624_v4 = vld [vmem:[%s1902_s1 + $0x38] sm:$0x7f]   ;;  %v1626_v6 = vld [vmem:[%s1902_s1 + $0x88] sm:$0x7f]  }
  0x19   : >> { %576 = vrot.lane.b32.xlu0 %v1727_v14, %s1643_s11  ;;  %v1038_v8 = vld [vmem:[%s1904_s3 + $0x8] sm:$0xff]  ;;  %v1039_v9 = vld [vmem:[%s1904_s3 + $0x10] sm:$0xff]  ;;  %v1041_v13 = vld [vmem:[%s1904_s3 + $0x20] sm:$0xff] }
  0x1a   : >> { %580 = vrot.lane.b32.xlu1 %v1730_v15, %s1643_s11  ;;  %v1043_v16 = vld [vmem:[%s1904_s3 + $0x30] sm:$0xff]  ;;  %v1044_v17 = vld [vmem:[%s1904_s3 + $0x38] sm:$0xff] }
  0x1b   : >> { %v1538_v18 = vpack.c.bf16 %v1044_v17, %v1043_v16 }
  0x1d   : >> { %254 = vrot.lane.b32.xlu0 %v1722_v7, %s1644_s14 }
  0x1e   : >> { %660 = vrot.lane.b32.xlu1 %v1722_v7, %s1645_s18 }
  0x21   : >> { %256 = vrot.lane.b32.xlu0 %v1727_v14, %s1644_s14 }
  0x22   : >> { %662 = vrot.lane.b32.xlu1 %v1727_v14, %s1645_s18 }
  0x25   : >> { %258 = vrot.lane.b32.xlu0 %v1724_v11, %s1644_s14 }
  0x26   : >> { %664 = vrot.lane.b32.xlu1 %v1724_v11, %s1645_s18 }
  0x29   : >> { %260 = vrot.lane.b32.xlu0 %v1730_v15, %s1644_s14 }
  0x2a   : >> { %666 = vrot.lane.b32.xlu1 %v1730_v15, %s1645_s18 }
  0x2d   : >> { %746 = vrot.lane.b32.xlu0 %v1722_v7, %s1646_s19 }
  0x2e   : >> { %748 = vrot.lane.b32.xlu1 %v1727_v14, %s1646_s19 }
  0x31   : >> { %750 = vrot.lane.b32.xlu0 %v1724_v11, %s1646_s19 }
  0x32   : >> { %752 = vrot.lane.b32.xlu1 %v1730_v15, %s1646_s19  ;;  %s1310_s19 = sshll.u32 %s1641_s8, 5  ;;  %s216_s8 = sadd.s32 1, %s1641_s8  }
  0x33   : >> { %p213_p4 = scmp.ge.s32.totalorder %s216_s8, 9  }
  0x35   : >> { %402 = vrot.lane.b32.xlu0 %v1722_v7, %s1647_s20 }
  0x36   : >> { %832 = vrot.lane.b32.xlu1 %v1722_v7, %s1648_s21 }
  0x39   : >> { %404 = vrot.lane.b32.xlu0 %v1727_v14, %s1647_s20 }
  0x3a   : >> { %834 = vrot.lane.b32.xlu1 %v1727_v14, %s1648_s21 }
  0x3d   : >> { %406 = vrot.lane.b32.xlu0 %v1724_v11, %s1647_s20 }
  0x3e   : >> { %836 = vrot.lane.b32.xlu1 %v1724_v11, %s1648_s21 }
  0x41   : >> { %408 = vrot.lane.b32.xlu0 %v1730_v15, %s1647_s20  ;;  %s1153_s20 = scalar_lea.vmem %s1713_s7, %s1310_s19 }
  0x42   : >> { %838 = vrot.lane.b32.xlu1 %v1730_v15, %s1648_s21 }
  0x45   : >> { %488 = vrot.lane.b32.xlu0 %v1722_v7, %s1649_s22 }
  0x46   : >> { %918 = vrot.lane.b32.xlu1 %v1722_v7, %s1650_s23 }
  0x49   : >> { %490 = vrot.lane.b32.xlu0 %v1727_v14, %s1649_s22 }
  0x4a   : >> { %920 = vrot.lane.b32.xlu1 %v1727_v14, %s1650_s23 }
  0x4d   : >> { %492 = vrot.lane.b32.xlu0 %v1724_v11, %s1649_s22 }
  0x4e   : >> { %922 = vrot.lane.b32.xlu1 %v1724_v11, %s1650_s23 }
  0x51   : >> { %494 = vrot.lane.b32.xlu0 %v1730_v15, %s1649_s22 }
  0x52   : >> { %924 = vrot.lane.b32.xlu1 %v1730_v15, %s1650_s23 }
  0x55   : >> { %991 = vperm.xlu0 %1607, %v1688_v0  }
  0x56   : >> { %996 = vperm.xlu1 %1608, %v1693_v1  }
  0x59   : >> { %1006 = vperm.xlu0 %1607, %v1703_v3  }
  0x5a   : >> { %1001 = vperm.xlu1 %1608, %v1698_v2  }
  0x87   : >> { %v575_v19 = vpop.permute.xlu0 %574 }
  0x88   : >> { %1434 = vmatprep.subr.bf16.mxu0 %v575_v19  ;;  %v579_v20 = vpop.permute.xlu1 %578 }
  0x89   : >> { %1435 = vmatpush3.bf16.msra.mxu0 %v575_v19  ;;  %v1045_v19 = vld [vmem:[%s1904_s3 + $0x40] sm:$0xff] }
  0x8b   : >> { %v577_v21 = vpop.permute.xlu0 %576 }
  0x8c   : >> { %1436 = vmatprep.subr.bf16.mxu0 %v577_v21  ;;  %v581_v22 = vpop.permute.xlu1 %580 }
  0x8d   : >> { %1437 = vmatpush3.bf16.msra.mxu0 %v577_v21 }
  0x8e   : >> { %1438 = vmatprep.subr.bf16.mxu0 %v579_v20 }
  0x8f   : >> { %v255_v23 = vpop.permute.xlu0 %254 }
  0x90   : >> { %1386 = vmatprep.subr.bf16.mxu1 %v255_v23  ;;  %v661_v24 = vpop.permute.xlu1 %660 }
  0x91   : >> { %1387 = vmatpush3.bf16.msra.mxu1 %v255_v23  ;;  %1439 = vmatpush3.bf16.msra.mxu0 %v579_v20  ;;  %v1046_v20 = vld [vmem:[%s1904_s3 + $0x48] sm:$0xff]  ;;  %v1048_v23 = vld [vmem:[%s1904_s3 + $0x58] sm:$0xff] }
  0x92   : >> { %1440 = vmatprep.subr.bf16.mxu0 %v581_v22  ;;  %v1542_v21 = vpack.c.bf16 %v1046_v20, %v1045_v19 }
  0x93   : >> { %v257_v25 = vpop.permute.xlu0 %256 }
  0x94   : >> { %1388 = vmatprep.subr.bf16.mxu1 %v257_v25  ;;  %v663_v27 = vpop.permute.xlu1 %662 }
  0x95   : >> { %1389 = vmatpush3.bf16.msra.mxu1 %v257_v25  ;;  %1441 = vmatpush3.bf16.msra.mxu0 %v581_v22  ;;  %v1047_v22 = vld [vmem:[%s1904_s3 + $0x50] sm:$0xff] }
  0x96   : >> { %1446 = vmatprep.subr.bf16.mxu0 %v661_v24 }
  0x97   : >> { %v259_v29 = vpop.permute.xlu0 %258 }
  0x98   : >> { %1390 = vmatprep.subr.bf16.mxu1 %v259_v29  ;;  %1443 = vmatmul.mubr.msk.bf16.vlgmr.msra.gmra.mrb[0].mxu0 %vm266_vm0, %v1610_v26  ;;  %v665_v30 = vpop.permute.xlu1 %664 }
  0x99   : >> { %1391 = vmatpush3.bf16.msra.mxu1 %v259_v29  ;;  %1447 = vmatpush3.bf16.msra.mxu0 %v661_v24  ;;  %v1546_v24 = vpack.c.bf16 %v1048_v23, %v1047_v22  ;;  %v1049_v29 = vld [vmem:[%s1904_s3 + $0x60] sm:$0xf] }
  0x9a   : >> { %1448 = vmatprep.subr.bf16.mxu0 %v663_v27  ;;  %1454 = vmatprep.mubr.msk.bf16.mxu0 %vm266_vm0, %v1613_v28 }
  0x9b   : >> { %v261_v31 = vpop.permute.xlu0 %260 }
  0x9c   : >> { %1392 = vmatprep.subr.bf16.mxu1 %v261_v31  ;;  %v667_v33 = vpop.permute.xlu1 %666 }
  0x9d   : >> { %1393 = vmatpush3.bf16.msra.mxu1 %v261_v31  ;;  %1449 = vmatpush3.bf16.msra.mxu0 %v663_v27 }
  0x9e   : >> { %1398 = vmatprep.subr.bf16.mxu1 %v1722_v7  ;;  %1450 = vmatprep.subr.bf16.mxu0 %v665_v30 }
  0x9f   : >> { %v747_v34 = vpop.permute.xlu0 %746 }
  0xa0   : >> { %1395 = vmatmul.mubr.msk.bf16.vlgmr.msra.gmra.mrb[0].mxu1 %vm266_vm0, %v1612_v32  ;;  %v749_v36 = vpop.permute.xlu1 %748 }
  0xa1   : >> { %1399 = vmatpush3.bf16.msra.mxu1 %v1722_v7  ;;  %1451 = vmatpush3.bf16.msra.mxu0 %v665_v30  ;;  %v1037_v7 = vld [vmem:[%s1904_s3] sm:$0xff] }
  0xa2   : >> { %1400 = vmatprep.subr.bf16.mxu1 %v1727_v14  ;;  %1452 = vmatprep.subr.bf16.mxu0 %v667_v33  ;;  %v1526_v10 = vpack.c.bf16 %v1038_v8, %v1037_v7 }
  0xa3   : >> { %v751_v37 = vpop.permute.xlu0 %750  ;;  %1406 = vmatprep.mubr.msk.bf16.mxu1 %vm266_vm0, %v1615_v35 }
  0xa4   : >> { %v753_v39 = vpop.permute.xlu1 %752 }
  0xa5   : >> { %1401 = vmatpush3.bf16.msra.mxu1 %v1727_v14  ;;  %1453 = vmatpush3.bf16.msra.mxu0 %v667_v33  ;;  %v1042_v14 = vld [vmem:[%s1904_s3 + $0x28] sm:$0xff] }
  0xa6   : >> { %1402 = vmatprep.subr.bf16.mxu1 %v1724_v11  ;;  %1458 = vmatprep.subr.bf16.mxu0 %v747_v34 }
  0xa7   : >> { %v403_v40 = vpop.permute.xlu0 %402 }
  0xa8   : >> { %1455 = vmatmul.mubr.msk.bf16.vlgmr.msra.gmra.mrb[0].mxu0 %vm266_vm0, %v1614_v38  ;;  %v833_v42 = vpop.permute.xlu1 %832 }
  0xa9   : >> { %1403 = vmatpush3.bf16.msra.mxu1 %v1724_v11  ;;  %1459 = vmatpush3.bf16.msra.mxu0 %v747_v34  ;;  %v1040_v11 = vld [vmem:[%s1904_s3 + $0x18] sm:$0xff] }
  0xaa   : >> { %1404 = vmatprep.subr.bf16.mxu1 %v1730_v15  ;;  %1460 = vmatprep.subr.bf16.mxu0 %v749_v36  ;;  %v1530_v12 = vpack.c.bf16 %v1040_v11, %v1039_v9 }
  0xab   : >> { %v405_v43 = vpop.permute.xlu0 %404  ;;  %1466 = vmatprep.mubr.msk.bf16.mxu0 %vm266_vm0, %v1617_v41 }
  0xac   : >> { %v835_v45 = vpop.permute.xlu1 %834 }
  0xad   : >> { %1405 = vmatpush3.bf16.msra.mxu1 %v1730_v15  ;;  %1461 = vmatpush3.bf16.msra.mxu0 %v749_v36  ;;  %v1534_v15 = vpack.c.bf16 %v1042_v14, %v1041_v13 }
  0xae   : >> { %1410 = vmatprep.subr.bf16.mxu1 %v403_v40  ;;  %1462 = vmatprep.subr.bf16.mxu0 %v751_v37 }
  0xaf   : >> { %v407_v46 = vpop.permute.xlu0 %406 }
  0xb0   : >> { %1407 = vmatmul.mubr.msk.bf16.vlgmr.msra.gmra.mrb[0].mxu1 %vm266_vm0, %v1616_v44  ;;  %v837_v48 = vpop.permute.xlu1 %836 }
  0xb1   : >> { %1411 = vmatpush3.bf16.msra.mxu1 %v403_v40  ;;  %1463 = vmatpush3.bf16.msra.mxu0 %v751_v37 }
  0xb2   : >> { %1412 = vmatprep.subr.bf16.mxu1 %v405_v43  ;;  %1464 = vmatprep.subr.bf16.mxu0 %v753_v39 }
  0xb3   : >> { %v409_v49 = vpop.permute.xlu0 %408  ;;  %1418 = vmatprep.mubr.msk.bf16.mxu1 %vm266_vm0, %v1619_v47 }
  0xb4   : >> { %v839_v52 = vpop.permute.xlu1 %838 }
  0xb5   : >> { %1413 = vmatpush3.bf16.msra.mxu1 %v405_v43  ;;  %1465 = vmatpush3.bf16.msra.mxu0 %v753_v39 }
  0xb6   : >> { %1414 = vmatprep.subr.bf16.mxu1 %v407_v46  ;;  %1470 = vmatprep.subr.bf16.mxu0 %v833_v42 }
  0xb7   : >> { %v489_v51 = vpop.permute.xlu0 %488 }
  0xb8   : >> { %1467 = vmatmul.mubr.msk.bf16.vlgmr.msra.gmra.mrb[0].mxu0 %vm266_vm0, %v1618_v50  ;;  %v919_v56 = vpop.permute.xlu1 %918 }
  0xb9   : >> { %1415 = vmatpush3.bf16.msra.mxu1 %v407_v46  ;;  %1471 = vmatpush3.bf16.msra.mxu0 %v833_v42 }
  0xba   : >> { %1416 = vmatprep.subr.bf16.mxu1 %v409_v49  ;;  %1472 = vmatprep.subr.bf16.mxu0 %v835_v45 }
  0xbb   : >> { %v491_v54 = vpop.permute.xlu0 %490  ;;  %1478 = vmatprep.mubr.msk.bf16.mxu0 %vm266_vm0, %v1621_v53 }
  0xbc   : >> { %v921_v59 = vpop.permute.xlu1 %920 }
  0xbd   : >> { %1417 = vmatpush3.bf16.msra.mxu1 %v409_v49  ;;  %1473 = vmatpush3.bf16.msra.mxu0 %v835_v45 }
  0xbe   : >> { %1422 = vmatprep.subr.bf16.mxu1 %v489_v51  ;;  %1474 = vmatprep.subr.bf16.mxu0 %v837_v48 }
  0xbf   : >> { %v493_v58 = vpop.permute.xlu0 %492 }
  0xc0   : >> { %1419 = vmatmul.mubr.msk.bf16.vlgmr.msra.gmra.mrb[0].mxu1 %vm266_vm0, %v1620_v55  ;;  %v923_v63 = vpop.permute.xlu1 %922 }
  0xc1   : >> { %1423 = vmatpush3.bf16.msra.mxu1 %v489_v51  ;;  %1475 = vmatpush3.bf16.msra.mxu0 %v837_v48 }
  0xc2   : >> { %1424 = vmatprep.subr.bf16.mxu1 %v491_v54  ;;  %1476 = vmatprep.subr.bf16.mxu0 %v839_v52 }
  0xc3   : >> { %1430 = vmatprep.mubr.msk.bf16.mxu1 %vm266_vm0, %v1623_v57  ;;  %v495_v61 = vpop.permute.xlu0 %494 }
  0xc4   : >> { %v925_v5 = vpop.permute.xlu1 %924 }
  0xc5   : >> { %1425 = vmatpush3.bf16.msra.mxu1 %v491_v54  ;;  %1477 = vmatpush3.bf16.msra.mxu0 %v839_v52 }
  0xc6   : >> { %1426 = vmatprep.subr.bf16.mxu1 %v493_v58  ;;  %1482 = vmatprep.subr.bf16.mxu0 %v919_v56 }
  0xc8   : >> { %1479 = vmatmul.mubr.msk.bf16.vlgmr.msra.gmra.mrb[0].mxu0 %vm266_vm0, %v1622_v60 }
  0xc9   : >> { %1427 = vmatpush3.bf16.msra.mxu1 %v493_v58  ;;  %1483 = vmatpush3.bf16.msra.mxu0 %v919_v56 }
  0xca   : >> { %1428 = vmatprep.subr.bf16.mxu1 %v495_v61  ;;  %1484 = vmatprep.subr.bf16.mxu0 %v921_v59 }
  0xcb   : >> { %1490 = vmatprep.mubr.msk.bf16.mxu0 %vm266_vm0, %v1625_v62 }
  0xcd   : >> { %1429 = vmatpush3.bf16.msra.mxu1 %v495_v61  ;;  %1485 = vmatpush3.bf16.msra.mxu0 %v921_v59 }
  0xce   : >> { %1486 = vmatprep.subr.bf16.mxu0 %v923_v63  ;;  %1527 = vmatprep.subr.bf16.mxu1 %v1526_v10 }
  0xd0   : >> { %1431 = vmatmul.mubr.msk.bf16.vlgmr.msra.gmra.mrb[0].mxu1 %vm266_vm0, %v1624_v4 }
  0xd1   : >> { %1487 = vmatpush3.bf16.msra.mxu0 %v923_v63  ;;  %1529 = vmatpush3.bf16.msra.mxu1 %v1526_v10 }
  0xd2   : >> { %1488 = vmatprep.subr.bf16.mxu0 %v925_v5  ;;  %1531 = vmatprep.subr.bf16.mxu1 %v1530_v12 }
  0xd4   : >> { %v992_v31 = vpop.permute.xlu0 %991 }
  0xd5   : >> { %1489 = vmatpush3.bf16.msra.mxu0 %v925_v5  ;;  %1533 = vmatpush3.bf16.msra.mxu1 %v1530_v12  ;;  %v997_v30 = vpop.permute.xlu1 %996 }
  0xd6   : >> { %1535 = vmatprep.subr.bf16.mxu1 %v1534_v15 }
  0xd8   : >> { %1491 = vmatmul.mubr.msk.bf16.vlgmr.msra.gmra.mrb[0].mxu0 %vm266_vm0, %v1626_v6  ;;  %v1007_v42 = vpop.permute.xlu0 %1006 }
  0xd9   : >> { %1537 = vmatpush3.bf16.msra.mxu1 %v1534_v15  ;;  %v1002_v37 = vpop.permute.xlu1 %1001 }
  0xda   : >> { %1539 = vmatprep.subr.bf16.mxu1 %v1538_v18 }
  0xdd   : >> { %1541 = vmatpush3.bf16.msra.mxu1 %v1538_v18 }
  0xde   : >> { %1543 = vmatprep.subr.bf16.mxu1 %v1542_v21 }
  0xe1   : >> { %1545 = vmatpush3.bf16.msra.mxu1 %v1542_v21 }
  0xe2   : >> { %1547 = vmatprep.subr.bf16.mxu1 %v1546_v24 }
  0xe5   : >> { %1549 = vmatpush3.bf16.msra.mxu1 %v1546_v24 }
  0xe6   : >> { %1518 = vmatprep.subr.msk.mxu1 %vm1063_vm1, %v1049_v29 }
  0xe9   : >> { %1519 = vmatpush3.msk.msra.mxu1 %vm1063_vm1, %v1049_v29 }
 0x1a3   : >> { %v1432_v25 = vpop.f32.mrb[0].mxu1 }
 0x1a4   : >> { %v540_v26 = vpop.f32.mrb[1].mxu1 }
 0x1a5   : >> { %v1433_v27 = vpop.f32.mrb[2].mxu1 }
 0x1a6   : >> { %v543_v28 = vpop.f32.mrb[3].mxu1 }
 0x1ab   : >> { %v1492_v32 = vpop.f32.mrb[0].mxu0 }
 0x1ac   : >> { %v1550_v33 = vadd.f32 %v1492_v32, %v1432_v25  ;;  %v970_v34 = vpop.f32.mrb[1].mxu0 }
 0x1ad   : >> { %v1551_v35 = vadd.f32 %v970_v34, %v540_v26  ;;  %v1493_v36 = vpop.f32.mrb[2].mxu0 }
 0x1ae   : >> { %v1552_v38 = vadd.f32 %v1493_v36, %v1433_v27  ;;  %v973_v39 = vpop.f32.mrb[3].mxu0  ;;  %v1011_v44 = vadd.f32 %v1550_v33, %v1002_v37 }
 0x1af   : >> { %v1009_v40 = vadd.f32 %v1551_v35, %v992_v31  ;;  %v1553_v41 = vadd.f32 %v973_v39, %v543_v28 }
 0x1b0   : >> { %v1012_v47 = vadd.f32 %v1552_v38, %v1007_v42  ;;  %v1015_v48 = vmax.f32 %v1011_v44, 0.0 }
 0x1b1   : >> { %v1013_v43 = vmax.f32 %v1009_v40, 0.0  ;;  %v1010_v45 = vadd.f32 %v1553_v41, %v997_v30 }
 0x1b2   : >> { %v1016_v49 = vmax.f32 %v1012_v47, 0.0 }
 0x1b3   : >> { %v1014_v46 = vmax.f32 %v1010_v45, 0.0  ;;  %1021 = vrot.lane.b32.xlu1 %v1013_v43, %s1644_s14 }
 0x1b5   : >> { %1023 = vrot.lane.b32.xlu0 %v1014_v46, %s1644_s14 }
 0x1b7   : >> { %1025 = vrot.lane.b32.xlu1 %v1015_v48, %s1644_s14 }
 0x1b9   : >> { %1027 = vrot.lane.b32.xlu0 %v1016_v49, %s1644_s14 }
 0x225   : >> { %v1022_v50 = vpop.permute.xlu1 %1021 }
 0x226   : >> { %v1033_v51 = vmax.f32 %v1013_v43, %v1022_v50 }
 0x227   : >> { %v1024_v52 = vpop.permute.xlu0 %1023 }
 0x228   : >> { %v1034_v53 = vmax.f32 %v1014_v46, %v1024_v52  ;;  %1520 = vmatprep.mubr.msk.f32.mxu1 %vm1050_vm2, %v1033_v51 }
 0x229   : >> { %v1026_v54 = vpop.permute.xlu1 %1025 }
 0x22a   : >> { %v1035_v55 = vmax.f32 %v1015_v48, %v1026_v54  ;;  %1521 = vmatmul.mubr.msk.f32.vlgmr.msra.gmra.mrb[4].mxu1 %vm1050_vm2, %v1034_v53 }
 0x22b   : >> { %v1028_v56 = vpop.permute.xlu0 %1027 }
 0x22c   : >> { %v1036_v57 = vmax.f32 %v1016_v49, %v1028_v56  ;;  %1523 = vmatprep.mubr.msk.f32.mxu1 %vm1050_vm2, %v1035_v55 }
 0x22e   : >> { %1524 = vmatmul.mubr.msk.f32.gmra.mrb[6].mxu1 %vm1050_vm2, %v1036_v57 }
 0x2fd   : >> { %v1522_v58 = vpop.f32.mrb[4].mxu1  ;;  %215 = sbr.rel (!%p213_p4) target bundleno = 16 (0x10), region = 83 }
 0x2fe   : >> { %1156 = vst.msk [vmem:[%s1153_s20 + $0x8] sm:$0xff] %vm1154_vm3, %v1522_v58  ;;  %v1133_v59 = vpop.f32.mrb[5].mxu1 }
 0x2ff   : >> { %1155 = vst.msk [vmem:[%s1153_s20] sm:$0xff] %vm1154_vm3, %v1133_v59 }
 0x301   : >> { %v1525_v60 = vpop.f32.mrb[6].mxu1 }
 0x302   : >> { %1159 = vst.msk [vmem:[%s1153_s20 + $0x18] sm:$0x3f] %vm1158_vm4, %v1525_v60  ;;  %v1143_v61 = vpop.f32.mrb[7].mxu1 }
 0x303   : >> { %1157 = vst.msk [vmem:[%s1153_s20 + $0x10] sm:$0xff] %vm1154_vm3, %v1143_v61 }
 0x304 PF: > { %s14_s15 = sadd.s32 1, %s1637_s15  }
 0x305   : > { %p11_p5 = scmp.ge.s32.totalorder %s14_s15, 4  }
 0x307   :  { %13 = sbr.rel (!%p11_p5) target bundleno = 1 (0x1), region = 94 }

// kernel: _lambda_.7
= control target key start
LH: loop header
LB: loop body
LE: loop exit
PB: predicated region body
PF: predicated region fallthrough
CT: control target
= control target key end

     0   :  { %v34_v0 = vlaneseq  ;;  %v2494_v18 = vmov 0.0   ;;  %v2496_v19 = vmov 0.0   ;;  %v2498_v20 = vmov 0.0   ;;  %s3166_s0 = inlined_call_operand.vmem [shape: f32[125,18,12], index: 0, kind: input, shape index: {}]   ;;  %s3167_s1 = inlined_call_operand.vmem [shape: f32[1,256], index: 1, kind: input, shape index: {}]   ;;  %s3168_s2 = inlined_call_operand.vmem [shape: bf16[64,256], index: 2, kind: input, shape index: {}]   ;;  %s3169_s4 = inlined_call_operand.vmem [shape: f32[64,10], index: 4, kind: input, shape index: {}]   ;;  %s3170_s5 = inlined_call_operand.vmem [shape: f32[1,10], index: 5, kind: input, shape index: {}]   ;;  %s3171_s6 = inlined_call_operand.vmem [shape: f32[18,10], index: 6, kind: output, shape index: {}]   ;;  %s3172_s3 = inlined_call_operand.vmem [shape: f32[1,256], index: 3, kind: input, shape index: {}]  }
   0x1   :  { %v2443_v1 = vld [vmem:[%s3168_s2] sm:$0xff]  ;;  %v2448_v2 = vld [vmem:[%s3168_s2 + $0x8] sm:$0xff]  ;;  %v2453_v3 = vld [vmem:[%s3168_s2 + $0x10] sm:$0xff]  ;;  %v2500_v21 = vmov 0.0   ;;  %v2502_v22 = vmov 0.0   ;;  %v2504_v23 = vmov 0.0  }
   0x2   :  { %v2458_v4 = vld [vmem:[%s3168_s2 + $0x18] sm:$0xff]  ;;  %v2463_v5 = vld [vmem:[%s3168_s2 + $0x20] sm:$0xff]  ;;  %v2468_v6 = vld [vmem:[%s3168_s2 + $0x28] sm:$0xff]  ;;  %v35_v7 = vshrl.u32 %v34_v0, 7 }
   0x3   :  { %v2473_v8 = vld [vmem:[%s3168_s2 + $0x30] sm:$0xff]  ;;  %v2478_v9 = vld [vmem:[%s3168_s2 + $0x38] sm:$0xff]  ;;  %v32_v10 = vld [vmem:[%s3167_s1] sm:$0x3]  ;;  %s2506_s1 = smov 0  }
   0x4   :  { %v36_v11 = vsub.s32 0, %v35_v7  ;;  %v40_v12 = vsub.s32 1, %v35_v7  ;;  %v44_v13 = vld [vmem:[%s3172_s3] sm:$0x3] }
   0x6   :  { %v2486_v14 = vrot.slane %v32_v10, %v36_v11  ;;  %v2488_v15 = vrot.slane %v32_v10, %v40_v12  ;;  %v2490_v16 = vrot.slane %v44_v13, %v36_v11  ;;  %v2492_v17 = vrot.slane %v44_v13, %v40_v12 }
   0x7 LB: > { %v2525_v24 = vcombine.high %v2443_v1, %v2448_v2  ;;  %v2529_v25 = vcombine.low %v2443_v1, %v2448_v2  ;;  %v100_v26 = vpack.c.bf16 %v2378_v22, %v2382_v23  ;;  %v2534_v27 = vcombine.high %v2453_v3, %v2458_v4  ;;  %s68_s2 = smul.u32 24, %s2386_s1  ;;  %s2388_s3 = smov 64   ;;  %s2386_s1 = sphi %s2506_s1, %s61_s1   ;;  %v2382_v23 = vphi %v2504_v23, %v3176_v23   ;;  %v2378_v22 = vphi %v2502_v22, %v3175_v22   ;;  %v2374_v21 = vphi %v2500_v21, %v3174_v21   ;;  %v2370_v20 = vphi %v2498_v20, %v1716_v20   ;;  %v2366_v19 = vphi %v2496_v19, %v3173_v19   ;;  %v2362_v18 = vphi %v2494_v18, %v1718_v18  }
   0x8   : > { %v2540_v28 = vcombine.low %v2453_v3, %v2458_v4  ;;  %v101_v29 = vpack.c.bf16 %v2374_v21, %v2374_v21  ;;  %v2546_v30 = vcombine.high %v2463_v5, %v2468_v6  ;;  %v2389_v31 = vmov 0   ;;  %s61_s1 = sadd.s32 1, %s2386_s1  }
   0x9   : > { %155 = vmatprep.subr.bf16.mxu0 %v2525_v24  ;;  %104 = vrot.lane.b32.xlu0 %v100_v26, %s2388_s3  ;;  %s2551_s19 = scalar_lea.vmem %s3166_s0, %s68_s2  ;;  %v2563_v33 = vcombine.low %v2463_v5, %v2468_v6  ;;  %v2573_v35 = vcombine.high %v2473_v8, %v2478_v9  ;;  %v2585_v37 = vcombine.low %v2473_v8, %v2478_v9  ;;  %vm148_vm0 = vcmask 523264   ;;  %p58_p0 = scmp.ge.s32.totalorder %s61_s1, 125  }
   0xa   : > { %156 = vmatpush1.bf16.msra.mxu0 %v2529_v25  ;;  %187 = vmatprep.mubr.bf16.mxu0 %v2389_v31  ;;  %v2556_v32 = vld [vmem:[%s2551_s19] sm:$0xff]  ;;  %v2566_v34 = vld [vmem:[%s2551_s19 + $0x8] sm:$0xff]  ;;  %v2576_v36 = vld [vmem:[%s2551_s19 + $0x10] sm:$0x3]  ;;  %s2401_s26 = smov (%p58_p0), 64   ;;  %v2402_v1 = vmov (%p58_p0), 0.0|0.0  }
   0xb   : > { %157 = vmatprep.subr.bf16.mxu0 %v2534_v27  ;;  %2074 = vset.pattern.permute.xlu1 %v2389_v31  ;;  %v1729_v3 = vld [vmem:[%s3169_s4 + $0x20] sm:$0xff] (%p58_p0)  ;;  %v1730_v4 = vld [vmem:[%s3169_s4 + $0x28] sm:$0xff] (%p58_p0)  ;;  %vm2403_vm1 = vmmov (%p58_p0), 0   ;;  %v2404_v5 = vmov (%p58_p0), 0.0   ;;  %v1731_v8 = vld [vmem:[%s3169_s4 + $0x30] sm:$0xff] (%p58_p0)  ;;  %vm1836_vm2 = vcmask (%p58_p0), 80896  }
   0xc   : > { %75 = vperm.xlu1 %2074, %v2556_v32   ;;  %2075 = vset.pattern.permute.xlu0 %v2389_v31  ;;  %v1988_v6 = vpack.c.bf16 (%p58_p0), %v1730_v4, %v1729_v3  ;;  %v1732_v9 = vld [vmem:[%s3169_s4 + $0x38] sm:$0xff] (%p58_p0)  ;;  %vm1843_vm3 = vcmask (%p58_p0), 74752  }
   0xd   : > { %289 = vmatprep.subr.bf16.mxu1 %v2525_v24  ;;  %106 = vrot.lane.b32.xlu0 %v101_v29, %s2388_s3 }
   0xe   : > { %158 = vmatpush1.bf16.msra.mxu0 %v2540_v28  ;;  %290 = vmatpush1.bf16.msra.mxu1 %v2529_v25 }
   0xf   : > { %159 = vmatprep.subr.bf16.mxu0 %v2546_v30  ;;  %321 = vmatprep.mubr.bf16.mxu1 %v2389_v31 }
  0x10   : > { %80 = vperm.xlu1 %2074, %v2566_v34   ;;  %291 = vmatprep.subr.bf16.mxu1 %v2534_v27 }
  0x11   : > { %85 = vperm.xlu0 %2075, %v2576_v36  }
  0x12   : > { %160 = vmatpush1.bf16.msra.mxu0 %v2563_v33  ;;  %292 = vmatpush1.bf16.msra.mxu1 %v2540_v28 }
  0x13   : > { %161 = vmatprep.subr.bf16.mxu0 %v2573_v35  ;;  %293 = vmatprep.subr.bf16.mxu1 %v2546_v30 }
  0x16   : > { %162 = vmatpush1.bf16.msra.mxu0 %v2585_v37  ;;  %294 = vmatpush1.bf16.msra.mxu1 %v2563_v33 }
  0x17   : > { %423 = vmatprep.subr.bf16.mxu0 %v2525_v24  ;;  %295 = vmatprep.subr.bf16.mxu1 %v2573_v35 }
  0x1a   : > { %296 = vmatpush1.bf16.msra.mxu1 %v2585_v37 }
  0x1b   : > { %557 = vmatprep.subr.bf16.mxu1 %v2525_v24 }
  0x7b   : > { %v105_v38 = vpop.permute.xlu0 %104 }
  0x7c   : > { %1917 = vmatmul.mubr.msk.bf16.vlgmr.msra.gmra.mrb[0].mxu0 %vm148_vm0, %v105_v38 }
  0x7d   : > { %197 = vmatprep.mubr.bf16.mxu0 %v2389_v31  ;;  %424 = vmatpush1.bf16.msra.mxu0 %v2529_v25 }
  0x7e   : > { %425 = vmatprep.subr.bf16.mxu0 %v2534_v27 }
  0x7f   : > { %v107_v39 = vpop.permute.xlu0 %106 }
  0x81   : > { %426 = vmatpush1.bf16.msra.mxu0 %v2540_v28 }
  0x82   : > { %427 = vmatprep.subr.bf16.mxu0 %v2546_v30 }
  0x84   : > { %1918 = vmatmul.mubr.msk.bf16.gmra.mrb[4].mxu0 %vm148_vm0, %v107_v39 }
  0x85   : > { %428 = vmatpush1.bf16.msra.mxu0 %v2563_v33  ;;  %455 = vmatprep.mubr.bf16.mxu0 %v2389_v31 }
  0x86   : > { %429 = vmatprep.subr.bf16.mxu0 %v2573_v35 }
  0x89   : > { %430 = vmatpush1.bf16.msra.mxu0 %v2585_v37 }
  0x8a   : > { %691 = vmatprep.subr.bf16.mxu0 %v2525_v24 }
  0x8b   : > { %v76_v40 = vpop.permute.xlu1 %75 }
  0x8c   : > { %v88_v41 = vmul.f32 %v76_v40, %v2486_v14  ;;  %v89_v43 = vmul.f32 %v76_v40, %v2488_v15 }
  0x8e   : > { %v94_v44 = vadd.f32 %v88_v41, %v2490_v16  ;;  %v95_v47 = vadd.f32 %v89_v43, %v2492_v17 }
  0x8f   : > { %v81_v42 = vpop.permute.xlu1 %80 }
  0x90   : > { %v90_v45 = vmul.f32 %v81_v42, %v2486_v14  ;;  %v86_v46 = vpop.permute.xlu0 %85  ;;  %v91_v48 = vmul.f32 %v81_v42, %v2488_v15 }
  0x91   : > { %v92_v53 = vmul.f32 %v86_v46, %v2486_v14  ;;  %v93_v55 = vmul.f32 %v86_v46, %v2488_v15 }
  0x92   : > { %v96_v52 = vadd.f32 %v90_v45, %v2490_v16  ;;  %v97_v58 = vadd.f32 %v91_v48, %v2492_v17 }
  0x93   : > { %v98_v61 = vadd.f32 %v92_v53, %v2490_v16  ;;  %v99_v62 = vadd.f32 %v93_v55, %v2492_v17 }
 0x14f   : > { %v189_v49 = vpop.f32.mrb[0].mxu0 }
 0x150   : > { %v190_v50 = vadd.f32 %v189_v49, %v94_v44  ;;  %v191_v51 = vpop.f32.mrb[1].mxu0 }
 0x151   : > { %v193_v54 = vpop.f32.mrb[2].mxu0  ;;  %v192_v56 = vadd.f32 %v191_v51, %v95_v47 }
 0x152   : > { %2098 = vtanh.f32 %v190_v50  ;;  %v194_v57 = vadd.f32 %v193_v54, %v96_v52  ;;  %v195_v59 = vpop.f32.mrb[3].mxu0 }
 0x153   : > { %v196_v60 = vadd.f32 %v195_v59, %v97_v58 }
 0x154   : > { %2100 = vtanh.f32 %v194_v57 }
 0x155   : > { %2102 = vtanh.f32 %v192_v56 }
 0x156   : > { %2104 = vtanh.f32 %v196_v60 }
 0x157   : > { %v199_v63 = vpop.f32.mrb[4].mxu0 }
 0x158   : > { %v200_v0 = vadd.f32 %v199_v63, %v98_v61  ;;  %v201_v7 = vpop.f32.mrb[5].mxu0  ;;  %v2390_v63 = vmov 1  }
 0x159   : > { %v202_v10 = vadd.f32 %v201_v7, %v99_v62  ;;  %v203_v11 = vpop.f32.mrb[6].mxu0  ;;  %2076 = vset.pattern.permute.xlu1 %v2390_v63  ;;  %2077 = vset.pattern.permute.xlu0 %v2390_v63 }
 0x15a   : > { %2106 = vtanh.f32 %v200_v0  ;;  %v204_v12 = vpop.f32.mrb[7].mxu0 }
 0x15b   : > { %2108 = vtanh.f32 %v202_v10 }
 0x15c   : > { %v2099_v13 = vpop.eup %2098 }
 0x15d   : > { %v212_v21 = vmul.f32 0.5, %v2099_v13 }
 0x15e   : > { %v2101_v22 = vpop.eup %2100 }
 0x15f   : > { %v215_v23 = vadd.f32 0.5, %v212_v21  ;;  %v213_v26 = vmul.f32 0.5, %v2101_v22  ;;  %v2103_v29 = vpop.eup %2102 }
 0x160   : > { %v2105_v40 = vpop.eup %2104 }
 0x161   : > { %v216_v38 = vadd.f32 0.5, %v213_v26  ;;  %v227_v39 = vmul.f32 %v2103_v29, %v215_v23  ;;  %v224_v47 = vmul.f32 %v2370_v20, %v215_v23  ;;  %v218_v20 = vmul.f32 0.5, %v2103_v29 }
 0x162   : > { %v219_v56 = vmul.f32 0.5, %v2105_v40 }
 0x163   : > { %233 = vrot.lane.b32.xlu1 %v227_v39, %s2388_s3  ;;  %v228_v41 = vmul.f32 %v2105_v40, %v216_v38  ;;  %v225_v50 = vmul.f32 %v2366_v19, %v216_v38  ;;  %v221_v58 = vadd.f32 0.5, %v218_v20 }
 0x164   : > { %v2107_v42 = vpop.eup %2106  ;;  %v222_v59 = vadd.f32 0.5, %v219_v56 }
 0x165   : > { %v214_v43 = vmul.f32 0.5, %v2107_v42  ;;  %v2109_v44 = vpop.eup %2108 }
 0x166   : > { %v220_v19 = vmul.f32 0.5, %v2109_v44 }
 0x167   : > { %v217_v45 = vadd.f32 0.5, %v214_v43  ;;  %235 = vrot.lane.b32.xlu1 %v228_v41, %s2388_s3 }
 0x168   : > { %v223_v7 = vadd.f32 0.5, %v220_v19 }
 0x169   : > { %v229_v46 = vmul.f32 %v2109_v44, %v217_v45  ;;  %v226_v53 = vmul.f32 %v2362_v18, %v217_v45 }
 0x16b   : > { %237 = vrot.lane.b32.xlu0 %v229_v46, %s2388_s3 }
 0x1d5   : > { %v234_v48 = vpop.permute.xlu1 %233 }
 0x1d6   : > { %v2625_v49 = vadd.f32 %v234_v48, %v224_v47 }
 0x1d8   : > { %2110 = vtanh.f32 %v2625_v49 }
 0x1d9   : > { %v236_v51 = vpop.permute.xlu1 %235 }
 0x1da   : > { %v2629_v52 = vadd.f32 %v236_v51, %v225_v50 }
 0x1dc   : > { %2112 = vtanh.f32 %v2629_v52 }
 0x1dd   : > { %v238_v54 = vpop.permute.xlu0 %237 }
 0x1de   : > { %v2633_v55 = vadd.f32 %v238_v54, %v226_v53 }
 0x1e0   : > { %2114 = vtanh.f32 %v2633_v55 }
 0x1e2   : > { %v2111_v57 = vpop.eup %2110 }
 0x1e3   : > { %v248_v61 = vmul.f32 %v2111_v57, %v221_v58 }
 0x1e6   : > { %v2113_v60 = vpop.eup %2112 }
 0x1e7   : > { %v249_v62 = vmul.f32 %v2113_v60, %v222_v59 }
 0x1e9   : > { %v275_v0 = vpack.c.bf16 %v249_v62, %v248_v61 }
 0x1ea   : > { %v2115_v18 = vpop.eup %2114 }
 0x1eb   : > { %279 = vrot.lane.b32.xlu1 %v275_v0, %s2388_s3  ;;  %v250_v10 = vmul.f32 %v2115_v18, %v223_v7 }
 0x1ed   : > { %v276_v11 = vpack.c.bf16 %v250_v10, %v250_v10 }
 0x1ef   : > { %281 = vrot.lane.b32.xlu0 %v276_v11, %s2388_s3  ;;  %252 = vperm.xlu1 %2076, %v2556_v32  }
 0x1f3   : > { %260 = vperm.xlu1 %2076, %v2576_v36   ;;  %256 = vperm.xlu0 %2077, %v2566_v34  }
 0x25d   : > { %v280_v12 = vpop.permute.xlu1 %279 }
 0x25e   : > { %1919 = vmatmul.mubr.msk.bf16.vlgmr.msra.gmra.mrb[0].mxu1 %vm148_vm0, %v280_v12 }
 0x25f   : > { %331 = vmatprep.mubr.bf16.mxu1 %v2389_v31  ;;  %558 = vmatpush1.bf16.msra.mxu1 %v2529_v25 }
 0x260   : > { %559 = vmatprep.subr.bf16.mxu1 %v2534_v27 }
 0x261   : > { %v282_v13 = vpop.permute.xlu0 %281 }
 0x263   : > { %560 = vmatpush1.bf16.msra.mxu1 %v2540_v28 }
 0x264   : > { %561 = vmatprep.subr.bf16.mxu1 %v2546_v30 }
 0x266   : > { %1920 = vmatmul.mubr.msk.bf16.gmra.mrb[4].mxu1 %vm148_vm0, %v282_v13 }
 0x267   : > { %562 = vmatpush1.bf16.msra.mxu1 %v2563_v33  ;;  %589 = vmatprep.mubr.bf16.mxu1 %v2389_v31 }
 0x268   : > { %563 = vmatprep.subr.bf16.mxu1 %v2573_v35 }
 0x26b   : > { %564 = vmatpush1.bf16.msra.mxu1 %v2585_v37 }
 0x26c   : > { %825 = vmatprep.subr.bf16.mxu1 %v2525_v24 }
 0x26e   : > { %v253_v21 = vpop.permute.xlu1 %252 }
 0x26f   : > { %v263_v23 = vmul.f32 %v253_v21, %v2486_v14  ;;  %v264_v26 = vmul.f32 %v253_v21, %v2488_v15 }
 0x271   : > { %v269_v38 = vadd.f32 %v263_v23, %v2490_v16  ;;  %v270_v40 = vadd.f32 %v264_v26, %v2492_v17 }
 0x272   : > { %v257_v22 = vpop.permute.xlu0 %256  ;;  %v261_v42 = vpop.permute.xlu1 %260 }
 0x273   : > { %v265_v29 = vmul.f32 %v257_v22, %v2486_v14  ;;  %v266_v39 = vmul.f32 %v257_v22, %v2488_v15  ;;  %v267_v48 = vmul.f32 %v261_v42, %v2486_v14  ;;  %v268_v54 = vmul.f32 %v261_v42, %v2488_v15 }
 0x275   : > { %v271_v41 = vadd.f32 %v265_v29, %v2490_v16  ;;  %v272_v44 = vadd.f32 %v266_v39, %v2492_v17  ;;  %v273_v56 = vadd.f32 %v267_v48, %v2490_v16  ;;  %v274_v58 = vadd.f32 %v268_v54, %v2492_v17 }
 0x331   : > { %v323_v43 = vpop.f32.mrb[0].mxu1 }
 0x332   : > { %v324_v45 = vadd.f32 %v323_v43, %v269_v38  ;;  %v325_v46 = vpop.f32.mrb[1].mxu1 }
 0x333   : > { %v327_v47 = vpop.f32.mrb[2].mxu1  ;;  %v326_v50 = vadd.f32 %v325_v46, %v270_v40 }
 0x334   : > { %2116 = vtanh.f32 %v324_v45  ;;  %v328_v51 = vadd.f32 %v327_v47, %v271_v41  ;;  %v329_v53 = vpop.f32.mrb[3].mxu1 }
 0x335   : > { %v330_v20 = vadd.f32 %v329_v53, %v272_v44 }
 0x336   : > { %2118 = vtanh.f32 %v328_v51 }
 0x337   : > { %2120 = vtanh.f32 %v326_v50 }
 0x338   : > { %2122 = vtanh.f32 %v330_v20 }
 0x339   : > { %v333_v57 = vpop.f32.mrb[4].mxu1 }
 0x33a   : > { %v334_v59 = vadd.f32 %v333_v57, %v273_v56  ;;  %v335_v19 = vpop.f32.mrb[5].mxu1 }
 0x33b   : > { %v337_v60 = vpop.f32.mrb[6].mxu1  ;;  %v336_v61 = vadd.f32 %v335_v19, %v274_v58  ;;  %v2391_v58 = vmov 2  }
 0x33c   : > { %2124 = vtanh.f32 %v334_v59  ;;  %v338_v62 = vpop.f32.mrb[7].mxu1  ;;  %2079 = vset.pattern.permute.xlu1 %v2391_v58  ;;  %2078 = vset.pattern.permute.xlu0 %v2391_v58 }
 0x33d   : > { %2126 = vtanh.f32 %v336_v61 }
 0x33e   : > { %v2117_v63 = vpop.eup %2116 }
 0x33f   : > { %v346_v0 = vmul.f32 0.5, %v2117_v63 }
 0x340   : > { %v2119_v7 = vpop.eup %2118 }
 0x341   : > { %v349_v18 = vadd.f32 0.5, %v346_v0  ;;  %v347_v10 = vmul.f32 0.5, %v2119_v7  ;;  %v2121_v11 = vpop.eup %2120 }
 0x342   : > { %v2123_v21 = vpop.eup %2122  ;;  %v352_v50 = vmul.f32 0.5, %v2121_v11 }
 0x343   : > { %v350_v12 = vadd.f32 0.5, %v347_v10  ;;  %v361_v13 = vmul.f32 %v2121_v11, %v349_v18  ;;  %v358_v40 = vmul.f32 %v349_v18, %v2625_v49  ;;  %v353_v51 = vmul.f32 0.5, %v2123_v21 }
 0x344   : > { %v355_v53 = vadd.f32 0.5, %v352_v50 }
 0x345   : > { %367 = vrot.lane.b32.xlu1 %v361_v13, %s2388_s3  ;;  %v362_v22 = vmul.f32 %v2123_v21, %v350_v12  ;;  %v359_v43 = vmul.f32 %v350_v12, %v2629_v52  ;;  %v356_v54 = vadd.f32 0.5, %v353_v51 }
 0x346   : > { %v2125_v23 = vpop.eup %2124 }
 0x347   : > { %v348_v26 = vmul.f32 0.5, %v2125_v23  ;;  %369 = vrot.lane.b32.xlu0 %v362_v22, %s2388_s3  ;;  %v2127_v38 = vpop.eup %2126 }
 0x348   : > { %v354_v57 = vmul.f32 0.5, %v2127_v38 }
 0x349   : > { %v351_v29 = vadd.f32 0.5, %v348_v26 }
 0x34b   : > { %v363_v39 = vmul.f32 %v2127_v38, %v351_v29  ;;  %v360_v46 = vmul.f32 %v351_v29, %v2633_v55  ;;  %v357_v55 = vadd.f32 0.5, %v354_v57 }
 0x34d   : > { %371 = vrot.lane.b32.xlu1 %v363_v39, %s2388_s3 }
 0x3b7   : > { %v368_v41 = vpop.permute.xlu1 %367 }
 0x3b8   : > { %v2669_v42 = vadd.f32 %v368_v41, %v358_v40 }
 0x3b9   : > { %v370_v44 = vpop.permute.xlu0 %369 }
 0x3ba   : > { %2128 = vtanh.f32 %v2669_v42  ;;  %v2673_v45 = vadd.f32 %v370_v44, %v359_v43 }
 0x3bc   : > { %2130 = vtanh.f32 %v2673_v45 }
 0x3bf   : > { %v372_v47 = vpop.permute.xlu1 %371 }
 0x3c0   : > { %v2677_v48 = vadd.f32 %v372_v47, %v360_v46 }
 0x3c2   : > { %2132 = vtanh.f32 %v2677_v48 }
 0x3c4   : > { %v2129_v49 = vpop.eup %2128 }
 0x3c5   : > { %v382_v20 = vmul.f32 %v2129_v49, %v355_v53 }
 0x3c6   : > { %v2131_v52 = vpop.eup %2130 }
 0x3c7   : > { %v383_v56 = vmul.f32 %v2131_v52, %v356_v54 }
 0x3c9   : > { %v409_v59 = vpack.c.bf16 %v383_v56, %v382_v20 }
 0x3cb   : > { %413 = vrot.lane.b32.xlu0 %v409_v59, %s2388_s3 }
 0x3cc   : > { %v2133_v19 = vpop.eup %2132 }
 0x3cd   : > { %v384_v60 = vmul.f32 %v2133_v19, %v357_v55 }
 0x3cf   : > { %v410_v61 = vpack.c.bf16 %v384_v60, %v384_v60  ;;  %386 = vperm.xlu0 %2078, %v2556_v32  }
 0x3d1   : > { %415 = vrot.lane.b32.xlu1 %v410_v61, %s2388_s3 }
 0x3d5   : > { %390 = vperm.xlu1 %2079, %v2566_v34  }
 0x3d9   : > { %394 = vperm.xlu1 %2079, %v2576_v36  }
 0x43d   : > { %v414_v62 = vpop.permute.xlu0 %413 }
 0x43e   : > { %1921 = vmatmul.mubr.msk.bf16.vlgmr.msra.gmra.mrb[8].mxu0 %vm148_vm0, %v414_v62 }
 0x43f   : > { %465 = vmatprep.mubr.bf16.mxu0 %v2389_v31  ;;  %692 = vmatpush1.bf16.msra.mxu0 %v2529_v25 }
 0x440   : > { %693 = vmatprep.subr.bf16.mxu0 %v2534_v27 }
 0x443   : > { %694 = vmatpush1.bf16.msra.mxu0 %v2540_v28  ;;  %v416_v63 = vpop.permute.xlu1 %415 }
 0x444   : > { %695 = vmatprep.subr.bf16.mxu0 %v2546_v30 }
 0x446   : > { %1922 = vmatmul.mubr.msk.bf16.gmra.mrb[12].mxu0 %vm148_vm0, %v416_v63 }
 0x447   : > { %696 = vmatpush1.bf16.msra.mxu0 %v2563_v33  ;;  %723 = vmatprep.mubr.bf16.mxu0 %v2389_v31 }
 0x448   : > { %697 = vmatprep.subr.bf16.mxu0 %v2573_v35 }
 0x44b   : > { %698 = vmatpush1.bf16.msra.mxu0 %v2585_v37 }
 0x44c   : > { %959 = vmatprep.subr.bf16.mxu0 %v2525_v24 }
 0x44e   : > { %v387_v0 = vpop.permute.xlu0 %386 }
 0x44f   : > { %v397_v7 = vmul.f32 %v387_v0, %v2486_v14  ;;  %v398_v11 = vmul.f32 %v387_v0, %v2488_v15 }
 0x451   : > { %v403_v13 = vadd.f32 %v397_v7, %v2490_v16  ;;  %v404_v22 = vadd.f32 %v398_v11, %v2492_v17 }
 0x454   : > { %v391_v18 = vpop.permute.xlu1 %390 }
 0x455   : > { %v399_v10 = vmul.f32 %v391_v18, %v2486_v14  ;;  %v400_v12 = vmul.f32 %v391_v18, %v2488_v15 }
 0x457   : > { %v405_v21 = vadd.f32 %v399_v10, %v2490_v16  ;;  %v406_v29 = vadd.f32 %v400_v12, %v2492_v17 }
 0x458   : > { %v395_v23 = vpop.permute.xlu1 %394 }
 0x459   : > { %v401_v41 = vmul.f32 %v395_v23, %v2486_v14  ;;  %v402_v47 = vmul.f32 %v395_v23, %v2488_v15 }
 0x45b   : > { %v407_v51 = vadd.f32 %v401_v41, %v2490_v16  ;;  %v408_v53 = vadd.f32 %v402_v47, %v2492_v17 }
 0x511   : > { %v457_v26 = vpop.f32.mrb[8].mxu0 }
 0x512   : > { %v458_v38 = vadd.f32 %v457_v26, %v403_v13  ;;  %v459_v39 = vpop.f32.mrb[9].mxu0 }
 0x513   : > { %v461_v40 = vpop.f32.mrb[10].mxu0  ;;  %v460_v43 = vadd.f32 %v459_v39, %v404_v22 }
 0x514   : > { %2134 = vtanh.f32 %v458_v38  ;;  %v462_v44 = vadd.f32 %v461_v40, %v405_v21  ;;  %v463_v46 = vpop.f32.mrb[11].mxu0 }
 0x515   : > { %v464_v50 = vadd.f32 %v463_v46, %v406_v29 }
 0x516   : > { %2136 = vtanh.f32 %v462_v44 }
 0x517   : > { %2138 = vtanh.f32 %v460_v43 }
 0x518   : > { %2140 = vtanh.f32 %v464_v50 }
 0x519   : > { %v467_v49 = vpop.f32.mrb[12].mxu0 }
 0x51a   : > { %v468_v54 = vadd.f32 %v467_v49, %v407_v51  ;;  %v469_v52 = vpop.f32.mrb[13].mxu0 }
 0x51b   : > { %v471_v20 = vpop.f32.mrb[14].mxu0  ;;  %v470_v56 = vadd.f32 %v469_v52, %v408_v53  ;;  %v2392_v53 = vmov 3  }
 0x51c   : > { %2142 = vtanh.f32 %v468_v54  ;;  %v472_v57 = vpop.f32.mrb[15].mxu0  ;;  %2080 = vset.pattern.permute.xlu1 %v2392_v53  ;;  %2081 = vset.pattern.permute.xlu0 %v2392_v53 }
 0x51d   : > { %2144 = vtanh.f32 %v470_v56 }
 0x51e   : > { %v2135_v58 = vpop.eup %2134 }
 0x51f   : > { %v480_v59 = vmul.f32 0.5, %v2135_v58 }
 0x520   : > { %v2137_v55 = vpop.eup %2136 }
 0x521   : > { %v483_v19 = vadd.f32 0.5, %v480_v59  ;;  %v481_v60 = vmul.f32 0.5, %v2137_v55  ;;  %v2139_v61 = vpop.eup %2138 }
 0x522   : > { %v2141_v0 = vpop.eup %2140  ;;  %v486_v43 = vmul.f32 0.5, %v2139_v61 }
 0x523   : > { %v484_v62 = vadd.f32 0.5, %v481_v60  ;;  %v495_v63 = vmul.f32 %v2139_v61, %v483_v19  ;;  %v492_v21 = vmul.f32 %v483_v19, %v2669_v42  ;;  %v487_v44 = vmul.f32 0.5, %v2141_v0 }
 0x524   : > { %v489_v46 = vadd.f32 0.5, %v486_v43 }
 0x525   : > { %501 = vrot.lane.b32.xlu0 %v495_v63, %s2388_s3  ;;  %v496_v7 = vmul.f32 %v2141_v0, %v484_v62  ;;  %v493_v26 = vmul.f32 %v484_v62, %v2673_v45  ;;  %v490_v47 = vadd.f32 0.5, %v487_v44 }
 0x526   : > { %v2143_v18 = vpop.eup %2142 }
 0x527   : > { %v482_v10 = vmul.f32 0.5, %v2143_v18  ;;  %503 = vrot.lane.b32.xlu1 %v496_v7, %s2388_s3  ;;  %v2145_v12 = vpop.eup %2144 }
 0x528   : > { %v488_v49 = vmul.f32 0.5, %v2145_v12 }
 0x529   : > { %v485_v11 = vadd.f32 0.5, %v482_v10 }
 0x52b   : > { %v497_v13 = vmul.f32 %v2145_v12, %v485_v11  ;;  %v494_v39 = vmul.f32 %v485_v11, %v2677_v48  ;;  %v491_v48 = vadd.f32 0.5, %v488_v49 }
 0x52d   : > { %505 = vrot.lane.b32.xlu0 %v497_v13, %s2388_s3 }
 0x597   : > { %v502_v22 = vpop.permute.xlu0 %501 }
 0x598   : > { %v2713_v23 = vadd.f32 %v502_v22, %v492_v21 }
 0x599   : > { %v504_v29 = vpop.permute.xlu1 %503 }
 0x59a   : > { %2146 = vtanh.f32 %v2713_v23  ;;  %v2717_v38 = vadd.f32 %v504_v29, %v493_v26 }
 0x59c   : > { %2148 = vtanh.f32 %v2717_v38 }
 0x59f   : > { %v506_v40 = vpop.permute.xlu0 %505 }
 0x5a0   : > { %v2721_v41 = vadd.f32 %v506_v40, %v494_v39 }
 0x5a2   : > { %2150 = vtanh.f32 %v2721_v41 }
 0x5a4   : > { %v2147_v42 = vpop.eup %2146 }
 0x5a5   : > { %v516_v50 = vmul.f32 %v2147_v42, %v489_v46 }
 0x5a6   : > { %v2149_v45 = vpop.eup %2148 }
 0x5a7   : > { %v517_v51 = vmul.f32 %v2149_v45, %v490_v47 }
 0x5a9   : > { %v543_v54 = vpack.c.bf16 %v517_v51, %v516_v50 }
 0x5ab   : > { %547 = vrot.lane.b32.xlu1 %v543_v54, %s2388_s3 }
 0x5ac   : > { %v2151_v52 = vpop.eup %2150 }
 0x5ad   : > { %v518_v20 = vmul.f32 %v2151_v52, %v491_v48 }
 0x5af   : > { %v544_v56 = vpack.c.bf16 %v518_v20, %v518_v20  ;;  %520 = vperm.xlu1 %2080, %v2556_v32  }
 0x5b1   : > { %549 = vrot.lane.b32.xlu0 %v544_v56, %s2388_s3 }
 0x5b3   : > { %528 = vperm.xlu1 %2080, %v2576_v36  }
 0x5b5   : > { %524 = vperm.xlu0 %2081, %v2566_v34  }
 0x61d   : > { %v548_v57 = vpop.permute.xlu1 %547 }
 0x61e   : > { %1923 = vmatmul.mubr.msk.bf16.vlgmr.msra.gmra.mrb[8].mxu1 %vm148_vm0, %v548_v57 }
 0x61f   : > { %599 = vmatprep.mubr.bf16.mxu1 %v2389_v31  ;;  %826 = vmatpush1.bf16.msra.mxu1 %v2529_v25 }
 0x620   : > { %827 = vmatprep.subr.bf16.mxu1 %v2534_v27 }
 0x623   : > { %828 = vmatpush1.bf16.msra.mxu1 %v2540_v28  ;;  %v550_v58 = vpop.permute.xlu0 %549 }
 0x624   : > { %829 = vmatprep.subr.bf16.mxu1 %v2546_v30 }
 0x626   : > { %1924 = vmatmul.mubr.msk.bf16.gmra.mrb[12].mxu1 %vm148_vm0, %v550_v58 }
 0x627   : > { %830 = vmatpush1.bf16.msra.mxu1 %v2563_v33  ;;  %857 = vmatprep.mubr.bf16.mxu1 %v2389_v31 }
 0x628   : > { %831 = vmatprep.subr.bf16.mxu1 %v2573_v35 }
 0x62b   : > { %832 = vmatpush1.bf16.msra.mxu1 %v2585_v37 }
 0x62c   : > { %1093 = vmatprep.subr.bf16.mxu1 %v2525_v24 }
 0x62e   : > { %v521_v59 = vpop.permute.xlu1 %520 }
 0x62f   : > { %v531_v19 = vmul.f32 %v521_v59, %v2486_v14  ;;  %v532_v60 = vmul.f32 %v521_v59, %v2488_v15 }
 0x631   : > { %v537_v62 = vadd.f32 %v531_v19, %v2490_v16  ;;  %v538_v0 = vadd.f32 %v532_v60, %v2492_v17 }
 0x632   : > { %v529_v18 = vpop.permute.xlu1 %528 }
 0x633   : > { %v535_v22 = vmul.f32 %v529_v18, %v2486_v14  ;;  %v536_v40 = vmul.f32 %v529_v18, %v2488_v15 }
 0x634   : > { %v525_v55 = vpop.permute.xlu0 %524 }
 0x635   : > { %v533_v61 = vmul.f32 %v525_v55, %v2486_v14  ;;  %v534_v63 = vmul.f32 %v525_v55, %v2488_v15  ;;  %v541_v44 = vadd.f32 %v535_v22, %v2490_v16  ;;  %v542_v46 = vadd.f32 %v536_v40, %v2492_v17 }
 0x637   : > { %v539_v7 = vadd.f32 %v533_v61, %v2490_v16  ;;  %v540_v11 = vadd.f32 %v534_v63, %v2492_v17 }
 0x6f1   : > { %v591_v10 = vpop.f32.mrb[8].mxu1 }
 0x6f2   : > { %v592_v12 = vadd.f32 %v591_v10, %v537_v62  ;;  %v593_v13 = vpop.f32.mrb[9].mxu1 }
 0x6f3   : > { %v595_v21 = vpop.f32.mrb[10].mxu1  ;;  %v594_v26 = vadd.f32 %v593_v13, %v538_v0 }
 0x6f4   : > { %2152 = vtanh.f32 %v592_v12  ;;  %v596_v29 = vadd.f32 %v595_v21, %v539_v7  ;;  %v597_v39 = vpop.f32.mrb[11].mxu1 }
 0x6f5   : > { %v598_v43 = vadd.f32 %v597_v39, %v540_v11 }
 0x6f6   : > { %2154 = vtanh.f32 %v596_v29 }
 0x6f7   : > { %2156 = vtanh.f32 %v594_v26 }
 0x6f8   : > { %2158 = vtanh.f32 %v598_v43 }
 0x6f9   : > { %v601_v42 = vpop.f32.mrb[12].mxu1 }
 0x6fa   : > { %v602_v47 = vadd.f32 %v601_v42, %v541_v44  ;;  %v603_v45 = vpop.f32.mrb[13].mxu1 }
 0x6fb   : > { %v605_v50 = vpop.f32.mrb[14].mxu1  ;;  %v604_v51 = vadd.f32 %v603_v45, %v542_v46  ;;  %v2393_v46 = vmov 4  }
 0x6fc   : > { %2160 = vtanh.f32 %v602_v47  ;;  %v606_v49 = vpop.f32.mrb[15].mxu1  ;;  %2083 = vset.pattern.permute.xlu1 %v2393_v46  ;;  %2082 = vset.pattern.permute.xlu0 %v2393_v46 }
 0x6fd   : > { %2162 = vtanh.f32 %v604_v51 }
 0x6fe   : > { %v2153_v53 = vpop.eup %2152 }
 0x6ff   : > { %v614_v54 = vmul.f32 0.5, %v2153_v53 }
 0x700   : > { %v2155_v48 = vpop.eup %2154 }
 0x701   : > { %v617_v52 = vadd.f32 0.5, %v614_v54  ;;  %v615_v20 = vmul.f32 0.5, %v2155_v48  ;;  %v2157_v56 = vpop.eup %2156 }
 0x702   : > { %v2159_v59 = vpop.eup %2158  ;;  %v620_v26 = vmul.f32 0.5, %v2157_v56 }
 0x703   : > { %v618_v57 = vadd.f32 0.5, %v615_v20  ;;  %v629_v58 = vmul.f32 %v2157_v56, %v617_v52  ;;  %v626_v0 = vmul.f32 %v617_v52, %v2713_v23  ;;  %v621_v29 = vmul.f32 0.5, %v2159_v59 }
 0x704   : > { %v623_v39 = vadd.f32 0.5, %v620_v26 }
 0x705   : > { %635 = vrot.lane.b32.xlu1 %v629_v58, %s2388_s3  ;;  %v630_v55 = vmul.f32 %v2159_v59, %v618_v57  ;;  %v627_v10 = vmul.f32 %v618_v57, %v2717_v38  ;;  %v624_v40 = vadd.f32 0.5, %v621_v29 }
 0x706   : > { %v2161_v19 = vpop.eup %2160 }
 0x707   : > { %v616_v60 = vmul.f32 0.5, %v2161_v19  ;;  %637 = vrot.lane.b32.xlu0 %v630_v55, %s2388_s3  ;;  %v2163_v62 = vpop.eup %2162 }
 0x708   : > { %v622_v42 = vmul.f32 0.5, %v2163_v62 }
 0x709   : > { %v619_v61 = vadd.f32 0.5, %v616_v60 }
 0x70b   : > { %v631_v63 = vmul.f32 %v2163_v62, %v619_v61  ;;  %v628_v13 = vmul.f32 %v619_v61, %v2721_v41  ;;  %v625_v41 = vadd.f32 0.5, %v622_v42 }
 0x70d   : > { %639 = vrot.lane.b32.xlu1 %v631_v63, %s2388_s3 }
 0x777   : > { %v636_v7 = vpop.permute.xlu1 %635 }
 0x778   : > { %v2757_v18 = vadd.f32 %v636_v7, %v626_v0 }
 0x779   : > { %v638_v11 = vpop.permute.xlu0 %637 }
 0x77a   : > { %2164 = vtanh.f32 %v2757_v18  ;;  %v2761_v12 = vadd.f32 %v638_v11, %v627_v10 }
 0x77c   : > { %2166 = vtanh.f32 %v2761_v12 }
 0x77f   : > { %v640_v21 = vpop.permute.xlu1 %639 }
 0x780   : > { %v2765_v22 = vadd.f32 %v640_v21, %v628_v13 }
 0x782   : > { %2168 = vtanh.f32 %v2765_v22 }
 0x784   : > { %v2165_v23 = vpop.eup %2164 }
 0x785   : > { %v650_v43 = vmul.f32 %v2165_v23, %v623_v39 }
 0x786   : > { %v2167_v38 = vpop.eup %2166 }
 0x787   : > { %v651_v44 = vmul.f32 %v2167_v38, %v624_v40 }
 0x789   : > { %v677_v47 = vpack.c.bf16 %v651_v44, %v650_v43 }
 0x78b   : > { %681 = vrot.lane.b32.xlu0 %v677_v47, %s2388_s3 }
 0x78c   : > { %v2169_v45 = vpop.eup %2168 }
 0x78d   : > { %v652_v50 = vmul.f32 %v2169_v45, %v625_v41 }
 0x78f   : > { %v678_v51 = vpack.c.bf16 %v652_v50, %v652_v50  ;;  %654 = vperm.xlu0 %2082, %v2556_v32  }
 0x791   : > { %683 = vrot.lane.b32.xlu1 %v678_v51, %s2388_s3 }
 0x795   : > { %658 = vperm.xlu1 %2083, %v2566_v34  }
 0x799   : > { %662 = vperm.xlu1 %2083, %v2576_v36  }
 0x7fd   : > { %v682_v49 = vpop.permute.xlu0 %681 }
 0x7fe   : > { %1925 = vmatmul.mubr.msk.bf16.vlgmr.msra.gmra.mrb[16].mxu0 %vm148_vm0, %v682_v49 }
 0x7ff   : > { %733 = vmatprep.mubr.bf16.mxu0 %v2389_v31  ;;  %960 = vmatpush1.bf16.msra.mxu0 %v2529_v25 }
 0x800   : > { %961 = vmatprep.subr.bf16.mxu0 %v2534_v27 }
 0x803   : > { %962 = vmatpush1.bf16.msra.mxu0 %v2540_v28  ;;  %v684_v32 = vpop.permute.xlu1 %683 }
 0x804   : > { %963 = vmatprep.subr.bf16.mxu0 %v2546_v30 }
 0x806   : > { %1926 = vmatmul.mubr.msk.bf16.gmra.mrb[20].mxu0 %vm148_vm0, %v684_v32 }
 0x807   : > { %964 = vmatpush1.bf16.msra.mxu0 %v2563_v33  ;;  %991 = vmatprep.mubr.bf16.mxu0 %v2389_v31 }
 0x808   : > { %965 = vmatprep.subr.bf16.mxu0 %v2573_v35 }
 0x80b   : > { %966 = vmatpush1.bf16.msra.mxu0 %v2585_v37 }
 0x80c   : > { %1227 = vmatprep.subr.bf16.mxu0 %v2525_v24 }
 0x80e   : > { %v655_v34 = vpop.permute.xlu0 %654 }
 0x80f   : > { %v665_v36 = vmul.f32 %v655_v34, %v2486_v14  ;;  %v666_v48 = vmul.f32 %v655_v34, %v2488_v15 }
 0x811   : > { %v671_v20 = vadd.f32 %v665_v36, %v2490_v16  ;;  %v672_v57 = vadd.f32 %v666_v48, %v2492_v17 }
 0x814   : > { %v659_v53 = vpop.permute.xlu1 %658 }
 0x815   : > { %v667_v54 = vmul.f32 %v659_v53, %v2486_v14  ;;  %v668_v52 = vmul.f32 %v659_v53, %v2488_v15 }
 0x817   : > { %v673_v56 = vadd.f32 %v667_v54, %v2490_v16  ;;  %v674_v55 = vadd.f32 %v668_v52, %v2492_v17 }
 0x818   : > { %v663_v58 = vpop.permute.xlu1 %662 }
 0x819   : > { %v669_v62 = vmul.f32 %v663_v58, %v2486_v14  ;;  %v670_v10 = vmul.f32 %v663_v58, %v2488_v15 }
 0x81b   : > { %v675_v13 = vadd.f32 %v669_v62, %v2490_v16  ;;  %v676_v26 = vadd.f32 %v670_v10, %v2492_v17 }
 0x8d1   : > { %v725_v59 = vpop.f32.mrb[16].mxu0 }
 0x8d2   : > { %v726_v19 = vadd.f32 %v725_v59, %v671_v20  ;;  %v727_v60 = vpop.f32.mrb[17].mxu0 }
 0x8d3   : > { %v729_v61 = vpop.f32.mrb[18].mxu0  ;;  %v728_v63 = vadd.f32 %v727_v60, %v672_v57 }
 0x8d4   : > { %2170 = vtanh.f32 %v726_v19  ;;  %v730_v0 = vadd.f32 %v729_v61, %v673_v56  ;;  %v731_v7 = vpop.f32.mrb[19].mxu0 }
 0x8d5   : > { %v732_v11 = vadd.f32 %v731_v7, %v674_v55 }
 0x8d6   : > { %2172 = vtanh.f32 %v730_v0 }
 0x8d7   : > { %2174 = vtanh.f32 %v728_v63 }
 0x8d8   : > { %2176 = vtanh.f32 %v732_v11  ;;  %v2394_v11 = vmov 5  }
 0x8d9   : > { %v735_v21 = vpop.f32.mrb[20].mxu0  ;;  %2084 = vset.pattern.permute.xlu1 %v2394_v11  ;;  %2085 = vset.pattern.permute.xlu0 %v2394_v11 }
 0x8da   : > { %v736_v29 = vadd.f32 %v735_v21, %v675_v13  ;;  %v737_v23 = vpop.f32.mrb[21].mxu0 }
 0x8db   : > { %v739_v39 = vpop.f32.mrb[22].mxu0  ;;  %v738_v40 = vadd.f32 %v737_v23, %v676_v26  ;;  %v2814_v23 = vld [vmem:[%s2551_s19] sm:$0xff] }
 0x8dc   : > { %2178 = vtanh.f32 %v736_v29  ;;  %v740_v38 = vpop.f32.mrb[23].mxu0  ;;  %v2819_v39 = vld [vmem:[%s2551_s19 + $0x10] sm:$0x3] }
 0x8dd   : > { %2180 = vtanh.f32 %v738_v40  ;;  %v2823_v40 = vld [vmem:[%s2551_s19 + $0x8] sm:$0xff] }
 0x8de   : > { %v2171_v43 = vpop.eup %2170 }
 0x8df   : > { %v748_v44 = vmul.f32 0.5, %v2171_v43 }
 0x8e0   : > { %v2173_v42 = vpop.eup %2172 }
 0x8e1   : > { %v751_v46 = vadd.f32 0.5, %v748_v44  ;;  %v749_v47 = vmul.f32 0.5, %v2173_v42  ;;  %v2175_v41 = vpop.eup %2174 }
 0x8e2   : > { %v2177_v51 = vpop.eup %2176  ;;  %v754_v60 = vmul.f32 0.5, %v2175_v41 }
 0x8e3   : > { %v752_v45 = vadd.f32 0.5, %v749_v47  ;;  %v763_v50 = vmul.f32 %v2175_v41, %v751_v46  ;;  %v760_v48 = vmul.f32 %v751_v46, %v2757_v18  ;;  %v755_v61 = vmul.f32 0.5, %v2177_v51 }
 0x8e4   : > { %v757_v62 = vadd.f32 0.5, %v754_v60 }
 0x8e5   : > { %769 = vrot.lane.b32.xlu0 %v763_v50, %s2388_s3  ;;  %v764_v49 = vmul.f32 %v2177_v51, %v752_v45  ;;  %v761_v56 = vmul.f32 %v752_v45, %v2761_v12  ;;  %v758_v12 = vadd.f32 0.5, %v755_v61 }
 0x8e6   : > { %v2179_v32 = vpop.eup %2178 }
 0x8e7   : > { %v750_v34 = vmul.f32 0.5, %v2179_v32  ;;  %771 = vrot.lane.b32.xlu1 %v764_v49, %s2388_s3  ;;  %v2181_v53 = vpop.eup %2180 }
 0x8e8   : > { %v756_v10 = vmul.f32 0.5, %v2181_v53 }
 0x8e9   : > { %v753_v36 = vadd.f32 0.5, %v750_v34 }
 0x8ea   : > { %v759_v13 = vadd.f32 0.5, %v756_v10 }
 0x8eb   : > { %v765_v54 = vmul.f32 %v2181_v53, %v753_v36  ;;  %v762_v59 = vmul.f32 %v753_v36, %v2765_v22 }
 0x8ed   : > { %773 = vrot.lane.b32.xlu0 %v765_v54, %s2388_s3 }
 0x957   : > { %v770_v52 = vpop.permute.xlu0 %769 }
 0x958   : > { %v2801_v20 = vadd.f32 %v770_v52, %v760_v48 }
 0x959   : > { %v772_v57 = vpop.permute.xlu1 %771 }
 0x95a   : > { %2182 = vtanh.f32 %v2801_v20  ;;  %v2805_v58 = vadd.f32 %v772_v57, %v761_v56 }
 0x95c   : > { %2184 = vtanh.f32 %v2805_v58 }
 0x95f   : > { %v774_v55 = vpop.permute.xlu0 %773 }
 0x960   : > { %v2809_v19 = vadd.f32 %v774_v55, %v762_v59 }
 0x962   : > { %2186 = vtanh.f32 %v2809_v19 }
 0x964   : > { %v2183_v18 = vpop.eup %2182 }
 0x965   : > { %v784_v0 = vmul.f32 %v2183_v18, %v757_v62 }
 0x966   : > { %v2185_v63 = vpop.eup %2184 }
 0x967   : > { %v785_v7 = vmul.f32 %v2185_v63, %v758_v12 }
 0x969   : > { %v811_v22 = vpack.c.bf16 %v785_v7, %v784_v0 }
 0x96b   : > { %815 = vrot.lane.b32.xlu1 %v811_v22, %s2388_s3 }
 0x96c   : > { %v2187_v21 = vpop.eup %2186 }
 0x96d   : > { %v786_v26 = vmul.f32 %v2187_v21, %v759_v13 }
 0x96f   : > { %v812_v29 = vpack.c.bf16 %v786_v26, %v786_v26  ;;  %788 = vperm.xlu1 %2084, %v2814_v23  }
 0x971   : > { %817 = vrot.lane.b32.xlu0 %v812_v29, %s2388_s3 }
 0x973   : > { %796 = vperm.xlu1 %2084, %v2819_v39  }
 0x975   : > { %792 = vperm.xlu0 %2085, %v2823_v40  }
 0x9dd   : > { %v816_v38 = vpop.permute.xlu1 %815 }
 0x9de   : > { %1927 = vmatmul.mubr.msk.bf16.vlgmr.msra.gmra.mrb[16].mxu1 %vm148_vm0, %v816_v38 }
 0x9df   : > { %867 = vmatprep.mubr.bf16.mxu1 %v2389_v31  ;;  %1094 = vmatpush1.bf16.msra.mxu1 %v2529_v25 }
 0x9e0   : > { %1095 = vmatprep.subr.bf16.mxu1 %v2534_v27 }
 0x9e3   : > { %1096 = vmatpush1.bf16.msra.mxu1 %v2540_v28  ;;  %v818_v43 = vpop.permute.xlu0 %817 }
 0x9e4   : > { %1097 = vmatprep.subr.bf16.mxu1 %v2546_v30 }
 0x9e6   : > { %1928 = vmatmul.mubr.msk.bf16.gmra.mrb[20].mxu1 %vm148_vm0, %v818_v43 }
 0x9e7   : > { %1098 = vmatpush1.bf16.msra.mxu1 %v2563_v33  ;;  %1125 = vmatprep.mubr.bf16.mxu1 %v2389_v31 }
 0x9e8   : > { %1099 = vmatprep.subr.bf16.mxu1 %v2573_v35 }
 0x9eb   : > { %1100 = vmatpush1.bf16.msra.mxu1 %v2585_v37 }
 0x9ec   : > { %1361 = vmatprep.subr.bf16.mxu1 %v2525_v24 }
 0x9ee   : > { %v789_v44 = vpop.permute.xlu1 %788 }
 0x9ef   : > { %v799_v46 = vmul.f32 %v789_v44, %v2486_v14  ;;  %v800_v47 = vmul.f32 %v789_v44, %v2488_v15 }
 0x9f1   : > { %v805_v45 = vadd.f32 %v799_v46, %v2490_v16  ;;  %v806_v51 = vadd.f32 %v800_v47, %v2492_v17 }
 0x9f2   : > { %v797_v32 = vpop.permute.xlu1 %796 }
 0x9f3   : > { %v803_v52 = vmul.f32 %v797_v32, %v2486_v14  ;;  %v804_v55 = vmul.f32 %v797_v32, %v2488_v15 }
 0x9f4   : > { %v793_v42 = vpop.permute.xlu0 %792 }
 0x9f5   : > { %v801_v41 = vmul.f32 %v793_v42, %v2486_v14  ;;  %v802_v50 = vmul.f32 %v793_v42, %v2488_v15  ;;  %v809_v61 = vadd.f32 %v803_v52, %v2490_v16  ;;  %v810_v62 = vadd.f32 %v804_v55, %v2492_v17 }
 0x9f7   : > { %v807_v49 = vadd.f32 %v801_v41, %v2490_v16  ;;  %v808_v36 = vadd.f32 %v802_v50, %v2492_v17 }
 0xab1   : > { %v859_v34 = vpop.f32.mrb[16].mxu1 }
 0xab2   : > { %v860_v53 = vadd.f32 %v859_v34, %v805_v45  ;;  %v861_v54 = vpop.f32.mrb[17].mxu1 }
 0xab3   : > { %v863_v48 = vpop.f32.mrb[18].mxu1  ;;  %v862_v56 = vadd.f32 %v861_v54, %v806_v51 }
 0xab4   : > { %2188 = vtanh.f32 %v860_v53  ;;  %v864_v57 = vadd.f32 %v863_v48, %v807_v49  ;;  %v865_v59 = vpop.f32.mrb[19].mxu1 }
 0xab5   : > { %v866_v60 = vadd.f32 %v865_v59, %v808_v36 }
 0xab6   : > { %2190 = vtanh.f32 %v864_v57 }
 0xab7   : > { %2192 = vtanh.f32 %v862_v56 }
 0xab8   : > { %2194 = vtanh.f32 %v866_v60 }
 0xab9   : > { %v869_v18 = vpop.f32.mrb[20].mxu1 }
 0xaba   : > { %v870_v12 = vadd.f32 %v869_v18, %v809_v61  ;;  %v871_v63 = vpop.f32.mrb[21].mxu1 }
 0xabb   : > { %v873_v0 = vpop.f32.mrb[22].mxu1  ;;  %v872_v7 = vadd.f32 %v871_v63, %v810_v62  ;;  %v2395_v62 = vmov 6  }
 0xabc   : > { %2196 = vtanh.f32 %v870_v12  ;;  %v874_v10 = vpop.f32.mrb[23].mxu1  ;;  %2087 = vset.pattern.permute.xlu1 %v2395_v62  ;;  %2086 = vset.pattern.permute.xlu0 %v2395_v62 }
 0xabd   : > { %2198 = vtanh.f32 %v872_v7 }
 0xabe   : > { %v2189_v11 = vpop.eup %2188 }
 0xabf   : > { %v882_v22 = vmul.f32 0.5, %v2189_v11 }
 0xac0   : > { %v2191_v13 = vpop.eup %2190 }
 0xac1   : > { %v885_v21 = vadd.f32 0.5, %v882_v22  ;;  %v883_v26 = vmul.f32 0.5, %v2191_v13  ;;  %v2193_v29 = vpop.eup %2192 }
 0xac2   : > { %v2195_v44 = vpop.eup %2194  ;;  %v888_v56 = vmul.f32 0.5, %v2193_v29 }
 0xac3   : > { %v886_v38 = vadd.f32 0.5, %v883_v26  ;;  %v897_v43 = vmul.f32 %v2193_v29, %v885_v21  ;;  %v894_v51 = vmul.f32 %v885_v21, %v2801_v20  ;;  %v889_v57 = vmul.f32 0.5, %v2195_v44 }
 0xac4   : > { %v891_v59 = vadd.f32 0.5, %v888_v56 }
 0xac5   : > { %903 = vrot.lane.b32.xlu1 %v897_v43, %s2388_s3  ;;  %v898_v42 = vmul.f32 %v2195_v44, %v886_v38  ;;  %v895_v34 = vmul.f32 %v886_v38, %v2805_v58  ;;  %v892_v55 = vadd.f32 0.5, %v889_v57 }
 0xac6   : > { %v2197_v46 = vpop.eup %2196 }
 0xac7   : > { %v884_v47 = vmul.f32 0.5, %v2197_v46  ;;  %905 = vrot.lane.b32.xlu0 %v898_v42, %s2388_s3  ;;  %v2199_v45 = vpop.eup %2198 }
 0xac8   : > { %v890_v18 = vmul.f32 0.5, %v2199_v45 }
 0xac9   : > { %v887_v41 = vadd.f32 0.5, %v884_v47 }
 0xacb   : > { %v899_v50 = vmul.f32 %v2199_v45, %v887_v41  ;;  %v896_v54 = vmul.f32 %v887_v41, %v2809_v19  ;;  %v893_v19 = vadd.f32 0.5, %v890_v18 }
 0xacd   : > { %907 = vrot.lane.b32.xlu1 %v899_v50, %s2388_s3 }
 0xb37   : > { %v904_v49 = vpop.permute.xlu1 %903 }
 0xb38   : > { %v2854_v32 = vadd.f32 %v904_v49, %v894_v51 }
 0xb39   : > { %v906_v36 = vpop.permute.xlu0 %905 }
 0xb3a   : > { %2200 = vtanh.f32 %v2854_v32  ;;  %v2858_v53 = vadd.f32 %v906_v36, %v895_v34 }
 0xb3c   : > { %2202 = vtanh.f32 %v2858_v53 }
 0xb3f   : > { %v908_v48 = vpop.permute.xlu1 %907 }
 0xb40   : > { %v2862_v52 = vadd.f32 %v908_v48, %v896_v54 }
 0xb42   : > { %2204 = vtanh.f32 %v2862_v52 }
 0xb44   : > { %v2201_v20 = vpop.eup %2200 }
 0xb45   : > { %v918_v60 = vmul.f32 %v2201_v20, %v891_v59 }
 0xb46   : > { %v2203_v58 = vpop.eup %2202 }
 0xb47   : > { %v919_v61 = vmul.f32 %v2203_v58, %v892_v55 }
 0xb49   : > { %v945_v12 = vpack.c.bf16 %v919_v61, %v918_v60 }
 0xb4b   : > { %949 = vrot.lane.b32.xlu0 %v945_v12, %s2388_s3 }
 0xb4c   : > { %v2205_v63 = vpop.eup %2204 }
 0xb4d   : > { %v920_v0 = vmul.f32 %v2205_v63, %v893_v19 }
 0xb4f   : > { %v946_v7 = vpack.c.bf16 %v920_v0, %v920_v0  ;;  %922 = vperm.xlu0 %2086, %v2814_v23  }
 0xb51   : > { %951 = vrot.lane.b32.xlu1 %v946_v7, %s2388_s3 }
 0xb55   : > { %926 = vperm.xlu1 %2087, %v2823_v40  }
 0xb59   : > { %930 = vperm.xlu1 %2087, %v2819_v39  }
 0xbbd   : > { %v950_v10 = vpop.permute.xlu0 %949 }
 0xbbe   : > { %1929 = vmatmul.mubr.msk.bf16.vlgmr.msra.gmra.mrb[24].mxu0 %vm148_vm0, %v950_v10 }
 0xbbf   : > { %1001 = vmatprep.mubr.bf16.mxu0 %v2389_v31  ;;  %1228 = vmatpush1.bf16.msra.mxu0 %v2529_v25 }
 0xbc0   : > { %1229 = vmatprep.subr.bf16.mxu0 %v2534_v27 }
 0xbc3   : > { %1230 = vmatpush1.bf16.msra.mxu0 %v2540_v28  ;;  %v952_v11 = vpop.permute.xlu1 %951 }
 0xbc4   : > { %1231 = vmatprep.subr.bf16.mxu0 %v2546_v30 }
 0xbc6   : > { %1930 = vmatmul.mubr.msk.bf16.gmra.mrb[28].mxu0 %vm148_vm0, %v952_v11 }
 0xbc7   : > { %1232 = vmatpush1.bf16.msra.mxu0 %v2563_v33  ;;  %1259 = vmatprep.mubr.bf16.mxu0 %v2389_v31 }
 0xbc8   : > { %1233 = vmatprep.subr.bf16.mxu0 %v2573_v35 }
 0xbcb   : > { %1234 = vmatpush1.bf16.msra.mxu0 %v2585_v37 }
 0xbcc   : > { %1495 = vmatprep.subr.bf16.mxu0 %v2525_v24 }
 0xbce   : > { %v923_v22 = vpop.permute.xlu0 %922 }
 0xbcf   : > { %v933_v13 = vmul.f32 %v923_v22, %v2486_v14  ;;  %v934_v29 = vmul.f32 %v923_v22, %v2488_v15 }
 0xbd1   : > { %v939_v43 = vadd.f32 %v933_v13, %v2490_v16  ;;  %v940_v42 = vadd.f32 %v934_v29, %v2492_v17 }
 0xbd4   : > { %v927_v21 = vpop.permute.xlu1 %926 }
 0xbd5   : > { %v935_v26 = vmul.f32 %v927_v21, %v2486_v14  ;;  %v936_v38 = vmul.f32 %v927_v21, %v2488_v15 }
 0xbd7   : > { %v941_v44 = vadd.f32 %v935_v26, %v2490_v16  ;;  %v942_v41 = vadd.f32 %v936_v38, %v2492_v17 }
 0xbd8   : > { %v931_v46 = vpop.permute.xlu1 %930 }
 0xbd9   : > { %v937_v49 = vmul.f32 %v931_v46, %v2486_v14  ;;  %v938_v48 = vmul.f32 %v931_v46, %v2488_v15 }
 0xbdb   : > { %v943_v57 = vadd.f32 %v937_v49, %v2490_v16  ;;  %v944_v59 = vadd.f32 %v938_v48, %v2492_v17 }
 0xc91   : > { %v993_v47 = vpop.f32.mrb[24].mxu0 }
 0xc92   : > { %v994_v45 = vadd.f32 %v993_v47, %v939_v43  ;;  %v995_v50 = vpop.f32.mrb[25].mxu0 }
 0xc93   : > { %v997_v51 = vpop.f32.mrb[26].mxu0  ;;  %v996_v34 = vadd.f32 %v995_v50, %v940_v42 }
 0xc94   : > { %2206 = vtanh.f32 %v994_v45  ;;  %v998_v36 = vadd.f32 %v997_v51, %v941_v44  ;;  %v999_v54 = vpop.f32.mrb[27].mxu0 }
 0xc95   : > { %v1000_v56 = vadd.f32 %v999_v54, %v942_v41 }
 0xc96   : > { %2208 = vtanh.f32 %v998_v36 }
 0xc97   : > { %2210 = vtanh.f32 %v996_v34 }
 0xc98   : > { %2212 = vtanh.f32 %v1000_v56 }
 0xc99   : > { %v1003_v20 = vpop.f32.mrb[28].mxu0 }
 0xc9a   : > { %v1004_v55 = vadd.f32 %v1003_v20, %v943_v57  ;;  %v1005_v58 = vpop.f32.mrb[29].mxu0 }
 0xc9b   : > { %v1007_v60 = vpop.f32.mrb[30].mxu0  ;;  %v1006_v61 = vadd.f32 %v1005_v58, %v944_v59  ;;  %v2396_v59 = vmov 7  }
 0xc9c   : > { %2214 = vtanh.f32 %v1004_v55  ;;  %v1008_v18 = vpop.f32.mrb[31].mxu0  ;;  %2088 = vset.pattern.permute.xlu1 %v2396_v59  ;;  %2089 = vset.pattern.permute.xlu0 %v2396_v59 }
 0xc9d   : > { %2216 = vtanh.f32 %v1006_v61 }
 0xc9e   : > { %v2207_v62 = vpop.eup %2206 }
 0xc9f   : > { %v1016_v12 = vmul.f32 0.5, %v2207_v62 }
 0xca0   : > { %v2209_v19 = vpop.eup %2208 }
 0xca1   : > { %v1019_v63 = vadd.f32 0.5, %v1016_v12  ;;  %v1017_v0 = vmul.f32 0.5, %v2209_v19  ;;  %v2211_v7 = vpop.eup %2210 }
 0xca2   : > { %v2213_v22 = vpop.eup %2212  ;;  %v1022_v34 = vmul.f32 0.5, %v2211_v7 }
 0xca3   : > { %v1020_v10 = vadd.f32 0.5, %v1017_v0  ;;  %v1031_v11 = vmul.f32 %v2211_v7, %v1019_v63  ;;  %v1028_v44 = vmul.f32 %v1019_v63, %v2854_v32  ;;  %v1023_v36 = vmul.f32 0.5, %v2213_v22 }
 0xca4   : > { %v1025_v54 = vadd.f32 0.5, %v1022_v34 }
 0xca5   : > { %1037 = vrot.lane.b32.xlu0 %v1031_v11, %s2388_s3  ;;  %v1032_v13 = vmul.f32 %v2213_v22, %v1020_v10  ;;  %v1029_v47 = vmul.f32 %v1020_v10, %v2858_v53  ;;  %v1026_v48 = vadd.f32 0.5, %v1023_v36 }
 0xca6   : > { %v2215_v21 = vpop.eup %2214 }
 0xca7   : > { %v1018_v26 = vmul.f32 0.5, %v2215_v21  ;;  %1039 = vrot.lane.b32.xlu1 %v1032_v13, %s2388_s3  ;;  %v2217_v38 = vpop.eup %2216 }
 0xca8   : > { %v1024_v20 = vmul.f32 0.5, %v2217_v38 }
 0xca9   : > { %v1021_v29 = vadd.f32 0.5, %v1018_v26 }
 0xcab   : > { %v1033_v43 = vmul.f32 %v2217_v38, %v1021_v29  ;;  %v1030_v50 = vmul.f32 %v1021_v29, %v2862_v52  ;;  %v1027_v52 = vadd.f32 0.5, %v1024_v20 }
 0xcad   : > { %1041 = vrot.lane.b32.xlu0 %v1033_v43, %s2388_s3 }
 0xd17   : > { %v1038_v42 = vpop.permute.xlu0 %1037 }
 0xd18   : > { %v2898_v46 = vadd.f32 %v1038_v42, %v1028_v44 }
 0xd19   : > { %v1040_v41 = vpop.permute.xlu1 %1039 }
 0xd1a   : > { %2218 = vtanh.f32 %v2898_v46  ;;  %v2902_v45 = vadd.f32 %v1040_v41, %v1029_v47 }
 0xd1c   : > { %2220 = vtanh.f32 %v2902_v45 }
 0xd1f   : > { %v1042_v51 = vpop.permute.xlu0 %1041 }
 0xd20   : > { %v2906_v49 = vadd.f32 %v1042_v51, %v1030_v50 }
 0xd22   : > { %2222 = vtanh.f32 %v2906_v49 }
 0xd24   : > { %v2219_v32 = vpop.eup %2218 }
 0xd25   : > { %v1052_v56 = vmul.f32 %v2219_v32, %v1025_v54 }
 0xd26   : > { %v2221_v53 = vpop.eup %2220 }
 0xd27   : > { %v1053_v57 = vmul.f32 %v2221_v53, %v1026_v48 }
 0xd29   : > { %v1079_v55 = vpack.c.bf16 %v1053_v57, %v1052_v56 }
 0xd2b   : > { %1083 = vrot.lane.b32.xlu1 %v1079_v55, %s2388_s3 }
 0xd2c   : > { %v2223_v58 = vpop.eup %2222 }
 0xd2d   : > { %v1054_v60 = vmul.f32 %v2223_v58, %v1027_v52 }
 0xd2f   : > { %v1080_v61 = vpack.c.bf16 %v1054_v60, %v1054_v60  ;;  %1056 = vperm.xlu1 %2088, %v2814_v23  }
 0xd31   : > { %1085 = vrot.lane.b32.xlu0 %v1080_v61, %s2388_s3 }
 0xd33   : > { %1064 = vperm.xlu1 %2088, %v2819_v39  }
 0xd35   : > { %1060 = vperm.xlu0 %2089, %v2823_v40  }
 0xd9d   : > { %v1084_v18 = vpop.permute.xlu1 %1083 }
 0xd9e   : > { %1931 = vmatmul.mubr.msk.bf16.vlgmr.msra.gmra.mrb[24].mxu1 %vm148_vm0, %v1084_v18 }
 0xd9f   : > { %1135 = vmatprep.mubr.bf16.mxu1 %v2389_v31  ;;  %1362 = vmatpush1.bf16.msra.mxu1 %v2529_v25 }
 0xda0   : > { %1363 = vmatprep.subr.bf16.mxu1 %v2534_v27 }
 0xda3   : > { %1364 = vmatpush1.bf16.msra.mxu1 %v2540_v28  ;;  %v1086_v62 = vpop.permute.xlu0 %1085 }
 0xda4   : > { %1365 = vmatprep.subr.bf16.mxu1 %v2546_v30 }
 0xda6   : > { %1932 = vmatmul.mubr.msk.bf16.gmra.mrb[28].mxu1 %vm148_vm0, %v1086_v62 }
 0xda7   : > { %1366 = vmatpush1.bf16.msra.mxu1 %v2563_v33  ;;  %1393 = vmatprep.mubr.bf16.mxu1 %v2389_v31 }
 0xda8   : > { %1367 = vmatprep.subr.bf16.mxu1 %v2573_v35 }
 0xdab   : > { %1368 = vmatpush1.bf16.msra.mxu1 %v2585_v37 }
 0xdac   : > { %1629 = vmatprep.subr.bf16.mxu1 %v2525_v24 }
 0xdae   : > { %v1057_v12 = vpop.permute.xlu1 %1056 }
 0xdaf   : > { %v1067_v63 = vmul.f32 %v1057_v12, %v2486_v14  ;;  %v1068_v0 = vmul.f32 %v1057_v12, %v2488_v15 }
 0xdb1   : > { %v1073_v10 = vadd.f32 %v1067_v63, %v2490_v16  ;;  %v1074_v22 = vadd.f32 %v1068_v0, %v2492_v17 }
 0xdb2   : > { %v1065_v21 = vpop.permute.xlu1 %1064 }
 0xdb3   : > { %v1071_v44 = vmul.f32 %v1065_v21, %v2486_v14  ;;  %v1072_v50 = vmul.f32 %v1065_v21, %v2488_v15 }
 0xdb4   : > { %v1061_v19 = vpop.permute.xlu0 %1060 }
 0xdb5   : > { %v1069_v7 = vmul.f32 %v1061_v19, %v2486_v14  ;;  %v1070_v11 = vmul.f32 %v1061_v19, %v2488_v15  ;;  %v1077_v34 = vadd.f32 %v1071_v44, %v2490_v16  ;;  %v1078_v32 = vadd.f32 %v1072_v50, %v2492_v17 }
 0xdb7   : > { %v1075_v13 = vadd.f32 %v1069_v7, %v2490_v16  ;;  %v1076_v24 = vadd.f32 %v1070_v11, %v2492_v17 }
 0xe71   : > { %v1127_v26 = vpop.f32.mrb[24].mxu1 }
 0xe72   : > { %v1128_v29 = vadd.f32 %v1127_v26, %v1073_v10  ;;  %v1129_v38 = vpop.f32.mrb[25].mxu1 }
 0xe73   : > { %v1131_v43 = vpop.f32.mrb[26].mxu1  ;;  %v1130_v42 = vadd.f32 %v1129_v38, %v1074_v22 }
 0xe74   : > { %2224 = vtanh.f32 %v1128_v29  ;;  %v1132_v47 = vadd.f32 %v1131_v43, %v1075_v13  ;;  %v1133_v41 = vpop.f32.mrb[27].mxu1 }
 0xe75   : > { %v1134_v51 = vadd.f32 %v1133_v41, %v1076_v24 }
 0xe76   : > { %2226 = vtanh.f32 %v1132_v47 }
 0xe77   : > { %2228 = vtanh.f32 %v1130_v42 }
 0xe78   : > { %2230 = vtanh.f32 %v1134_v51 }
 0xe79   : > { %v1137_v36 = vpop.f32.mrb[28].mxu1 }
 0xe7a   : > { %v1138_v54 = vadd.f32 %v1137_v36, %v1077_v34  ;;  %v1139_v48 = vpop.f32.mrb[29].mxu1  ;;  %v2397_v36 = vmov 8  }
 0xe7b   : > { %v1141_v53 = vpop.f32.mrb[30].mxu1  ;;  %v1140_v56 = vadd.f32 %v1139_v48, %v1078_v32  ;;  %2091 = vset.pattern.permute.xlu1 %v2397_v36  ;;  %2090 = vset.pattern.permute.xlu0 %v2397_v36 }
 0xe7c   : > { %2232 = vtanh.f32 %v1138_v54  ;;  %v1142_v57 = vpop.f32.mrb[31].mxu1 }
 0xe7d   : > { %2234 = vtanh.f32 %v1140_v56 }
 0xe7e   : > { %v2225_v20 = vpop.eup %2224 }
 0xe7f   : > { %v1150_v59 = vmul.f32 0.5, %v2225_v20 }
 0xe80   : > { %v2227_v55 = vpop.eup %2226 }
 0xe81   : > { %v1153_v52 = vadd.f32 0.5, %v1150_v59  ;;  %v1151_v58 = vmul.f32 0.5, %v2227_v55  ;;  %v2229_v60 = vpop.eup %2228 }
 0xe82   : > { %v2231_v62 = vpop.eup %2230  ;;  %v1156_v44 = vmul.f32 0.5, %v2229_v60 }
 0xe83   : > { %v1154_v61 = vadd.f32 0.5, %v1151_v58  ;;  %v1165_v18 = vmul.f32 %v2229_v60, %v1153_v52  ;;  %v1162_v11 = vmul.f32 %v1153_v52, %v2898_v46  ;;  %v1157_v42 = vmul.f32 0.5, %v2231_v62 }
 0xe84   : > { %v1159_v47 = vadd.f32 0.5, %v1156_v44 }
 0xe85   : > { %1171 = vrot.lane.b32.xlu1 %v1165_v18, %s2388_s3  ;;  %v1166_v12 = vmul.f32 %v2231_v62, %v1154_v61  ;;  %v1163_v21 = vmul.f32 %v1154_v61, %v2902_v45  ;;  %v1160_v41 = vadd.f32 0.5, %v1157_v42 }
 0xe86   : > { %v2233_v19 = vpop.eup %2232 }
 0xe87   : > { %v1152_v63 = vmul.f32 0.5, %v2233_v19  ;;  %1173 = vrot.lane.b32.xlu0 %v1166_v12, %s2388_s3  ;;  %v2235_v7 = vpop.eup %2234 }
 0xe88   : > { %v1158_v34 = vmul.f32 0.5, %v2235_v7 }
 0xe89   : > { %v1155_v0 = vadd.f32 0.5, %v1152_v63 }
 0xe8b   : > { %v1167_v10 = vmul.f32 %v2235_v7, %v1155_v0  ;;  %v1164_v29 = vmul.f32 %v1155_v0, %v2906_v49  ;;  %v1161_v49 = vadd.f32 0.5, %v1158_v34 }
 0xe8d   : > { %1175 = vrot.lane.b32.xlu1 %v1167_v10, %s2388_s3 }
 0xef7   : > { %v1172_v22 = vpop.permute.xlu1 %1171 }
 0xef8   : > { %v2942_v13 = vadd.f32 %v1172_v22, %v1162_v11 }
 0xef9   : > { %v1174_v26 = vpop.permute.xlu0 %1173 }
 0xefa   : > { %2236 = vtanh.f32 %v2942_v13  ;;  %v2946_v24 = vadd.f32 %v1174_v26, %v1163_v21 }
 0xefc   : > { %2238 = vtanh.f32 %v2946_v24 }
 0xeff   : > { %v1176_v38 = vpop.permute.xlu1 %1175 }
 0xf00   : > { %v2950_v43 = vadd.f32 %v1176_v38, %v1164_v29 }
 0xf02   : > { %2240 = vtanh.f32 %v2950_v43 }
 0xf04   : > { %v2237_v46 = vpop.eup %2236 }
 0xf05   : > { %v1186_v50 = vmul.f32 %v2237_v46, %v1159_v47 }
 0xf06   : > { %v2239_v45 = vpop.eup %2238 }
 0xf07   : > { %v1187_v51 = vmul.f32 %v2239_v45, %v1160_v41 }
 0xf09   : > { %v1213_v32 = vpack.c.bf16 %v1187_v51, %v1186_v50 }
 0xf0b   : > { %1217 = vrot.lane.b32.xlu0 %v1213_v32, %s2388_s3 }
 0xf0c   : > { %v2241_v54 = vpop.eup %2240 }
 0xf0d   : > { %v1188_v48 = vmul.f32 %v2241_v54, %v1161_v49 }
 0xf0f   : > { %v1214_v53 = vpack.c.bf16 %v1188_v48, %v1188_v48  ;;  %1190 = vperm.xlu0 %2090, %v2814_v23  }
 0xf11   : > { %1219 = vrot.lane.b32.xlu1 %v1214_v53, %s2388_s3 }
 0xf15   : > { %1194 = vperm.xlu1 %2091, %v2823_v40  }
 0xf19   : > { %1198 = vperm.xlu1 %2091, %v2819_v39  }
 0xf7d   : > { %v1218_v56 = vpop.permute.xlu0 %1217 }
 0xf7e   : > { %1933 = vmatmul.mubr.msk.bf16.vlgmr.msra.gmra.mrb[32].mxu0 %vm148_vm0, %v1218_v56 }
 0xf7f   : > { %1269 = vmatprep.mubr.bf16.mxu0 %v2389_v31  ;;  %1496 = vmatpush1.bf16.msra.mxu0 %v2529_v25 }
 0xf80   : > { %1497 = vmatprep.subr.bf16.mxu0 %v2534_v27 }
 0xf83   : > { %1498 = vmatpush1.bf16.msra.mxu0 %v2540_v28  ;;  %v1220_v57 = vpop.permute.xlu1 %1219 }
 0xf84   : > { %1499 = vmatprep.subr.bf16.mxu0 %v2546_v30 }
 0xf86   : > { %1934 = vmatmul.mubr.msk.bf16.gmra.mrb[36].mxu0 %vm148_vm0, %v1220_v57 }
 0xf87   : > { %1500 = vmatpush1.bf16.msra.mxu0 %v2563_v33  ;;  %1527 = vmatprep.mubr.bf16.mxu0 %v2389_v31 }
 0xf88   : > { %1501 = vmatprep.subr.bf16.mxu0 %v2573_v35 }
 0xf8b   : > { %1502 = vmatpush1.bf16.msra.mxu0 %v2585_v37 }
 0xf8c   :  { %1981 = vmatprep.subr.bf16.mxu0 (%p58_p0), %v2402_v1 }
 0xf8e   : > { %v1191_v20 = vpop.permute.xlu0 %1190 }
 0xf8f   : > { %v1201_v59 = vmul.f32 %v1191_v20, %v2486_v14  ;;  %v1202_v58 = vmul.f32 %v1191_v20, %v2488_v15 }
 0xf91   : > { %v1207_v61 = vadd.f32 %v1201_v59, %v2490_v16  ;;  %v1208_v62 = vadd.f32 %v1202_v58, %v2492_v17 }
 0xf94   : > { %v1195_v55 = vpop.permute.xlu1 %1194 }
 0xf95   : > { %v1203_v52 = vmul.f32 %v1195_v55, %v2486_v14  ;;  %v1204_v60 = vmul.f32 %v1195_v55, %v2488_v15 }
 0xf97   : > { %v1209_v18 = vadd.f32 %v1203_v52, %v2490_v16  ;;  %v1210_v63 = vadd.f32 %v1204_v60, %v2492_v17 }
 0xf98   : > { %v1199_v12 = vpop.permute.xlu1 %1198 }
 0xf99   : > { %v1205_v11 = vmul.f32 %v1199_v12, %v2486_v14  ;;  %v1206_v29 = vmul.f32 %v1199_v12, %v2488_v15 }
 0xf9b   : > { %v1211_v44 = vadd.f32 %v1205_v11, %v2490_v16  ;;  %v1212_v46 = vadd.f32 %v1206_v29, %v2492_v17 }
0x1051   : > { %v1261_v19 = vpop.f32.mrb[32].mxu0 }
0x1052   : > { %v1262_v0 = vadd.f32 %v1261_v19, %v1207_v61  ;;  %v1263_v7 = vpop.f32.mrb[33].mxu0 }
0x1053   : > { %v1265_v10 = vpop.f32.mrb[34].mxu0  ;;  %v1264_v22 = vadd.f32 %v1263_v7, %v1208_v62 }
0x1054   : > { %2242 = vtanh.f32 %v1262_v0  ;;  %v1266_v21 = vadd.f32 %v1265_v10, %v1209_v18  ;;  %v1267_v26 = vpop.f32.mrb[35].mxu0 }
0x1055   : > { %v1268_v38 = vadd.f32 %v1267_v26, %v1210_v63 }
0x1056   : > { %2244 = vtanh.f32 %v1266_v21 }
0x1057   : > { %2246 = vtanh.f32 %v1264_v22 }
0x1058   : > { %2248 = vtanh.f32 %v1268_v38 }
0x1059   : > { %v1271_v42 = vpop.f32.mrb[36].mxu0 }
0x105a   : > { %v1272_v47 = vadd.f32 %v1271_v42, %v1211_v44  ;;  %v1273_v41 = vpop.f32.mrb[37].mxu0  ;;  %v2398_v42 = vmov 9  }
0x105b   : > { %v1275_v45 = vpop.f32.mrb[38].mxu0  ;;  %v1274_v50 = vadd.f32 %v1273_v41, %v1212_v46  ;;  %2092 = vset.pattern.permute.xlu1 %v2398_v42  ;;  %2093 = vset.pattern.permute.xlu0 %v2398_v42 }
0x105c   : > { %2250 = vtanh.f32 %v1272_v47  ;;  %v1276_v51 = vpop.f32.mrb[39].mxu0 }
0x105d   : > { %2252 = vtanh.f32 %v1274_v50 }
0x105e   : > { %v2243_v34 = vpop.eup %2242 }
0x105f   : > { %v1284_v36 = vmul.f32 0.5, %v2243_v34 }
0x1060   : > { %v2245_v32 = vpop.eup %2244 }
0x1061   : > { %v1287_v49 = vadd.f32 0.5, %v1284_v36  ;;  %v1285_v54 = vmul.f32 0.5, %v2245_v32  ;;  %v2247_v48 = vpop.eup %2246 }
0x1062   : > { %v2249_v57 = vpop.eup %2248  ;;  %v1290_v11 = vmul.f32 0.5, %v2247_v48 }
0x1063   : > { %v1288_v53 = vadd.f32 0.5, %v1285_v54  ;;  %v1299_v56 = vmul.f32 %v2247_v48, %v1287_v49  ;;  %v1296_v61 = vmul.f32 %v1287_v49, %v2942_v13  ;;  %v1291_v22 = vmul.f32 0.5, %v2249_v57 }
0x1064   : > { %v1293_v21 = vadd.f32 0.5, %v1290_v11 }
0x1065   : > { %1305 = vrot.lane.b32.xlu0 %v1299_v56, %s2388_s3  ;;  %v1300_v20 = vmul.f32 %v2249_v57, %v1288_v53  ;;  %v1297_v12 = vmul.f32 %v1288_v53, %v2946_v24  ;;  %v1294_v26 = vadd.f32 0.5, %v1291_v22 }
0x1066   : > { %v2251_v59 = vpop.eup %2250 }
0x1067   : > { %v1286_v55 = vmul.f32 0.5, %v2251_v59  ;;  %1307 = vrot.lane.b32.xlu1 %v1300_v20, %s2388_s3  ;;  %v2253_v58 = vpop.eup %2252 }
0x1068   : > { %v1292_v44 = vmul.f32 0.5, %v2253_v58 }
0x1069   : > { %v1289_v52 = vadd.f32 0.5, %v1286_v55 }
0x106b   : > { %v1301_v60 = vmul.f32 %v2253_v58, %v1289_v52  ;;  %v1298_v0 = vmul.f32 %v1289_v52, %v2950_v43  ;;  %v1295_v43 = vadd.f32 0.5, %v1292_v44 }
0x106d   : > { %1309 = vrot.lane.b32.xlu0 %v1301_v60, %s2388_s3 }
0x10d7   : > { %v1306_v18 = vpop.permute.xlu0 %1305 }
0x10d8   : > { %v2985_v62 = vadd.f32 %v1306_v18, %v1296_v61 }
0x10d9   : > { %v1308_v19 = vpop.permute.xlu1 %1307 }
0x10da   : > { %2254 = vtanh.f32 %v2985_v62  ;;  %v2989_v63 = vadd.f32 %v1308_v19, %v1297_v12 }
0x10dc   : > { %2256 = vtanh.f32 %v2989_v63 }
0x10df   : > { %v1310_v7 = vpop.permute.xlu0 %1309 }
0x10e0   : > { %v2993_v10 = vadd.f32 %v1310_v7, %v1298_v0 }
0x10e2   : > { %2258 = vtanh.f32 %v2993_v10 }
0x10e4   : > { %v2255_v13 = vpop.eup %2254 }
0x10e5   : > { %v1320_v29 = vmul.f32 %v2255_v13, %v1293_v21 }
0x10e6   : > { %v2257_v24 = vpop.eup %2256 }
0x10e7   : > { %v1321_v38 = vmul.f32 %v2257_v24, %v1294_v26 }
0x10e9   : > { %v1347_v46 = vpack.c.bf16 %v1321_v38, %v1320_v29 }
0x10eb   : > { %1351 = vrot.lane.b32.xlu1 %v1347_v46, %s2388_s3 }
0x10ec   : > { %v2259_v47 = vpop.eup %2258 }
0x10ed   : > { %v1322_v41 = vmul.f32 %v2259_v47, %v1295_v43 }
0x10ef   : > { %v1348_v45 = vpack.c.bf16 %v1322_v41, %v1322_v41  ;;  %1324 = vperm.xlu1 %2092, %v2814_v23  }
0x10f1   : > { %1353 = vrot.lane.b32.xlu0 %v1348_v45, %s2388_s3 }
0x10f3   : > { %1332 = vperm.xlu1 %2092, %v2819_v39  }
0x10f5   : > { %1328 = vperm.xlu0 %2093, %v2823_v40  }
0x115d   : > { %v1352_v50 = vpop.permute.xlu1 %1351 }
0x115e   : > { %1935 = vmatmul.mubr.msk.bf16.vlgmr.msra.gmra.mrb[32].mxu1 %vm148_vm0, %v1352_v50 }
0x115f   : > { %1403 = vmatprep.mubr.bf16.mxu1 %v2389_v31  ;;  %1630 = vmatpush1.bf16.msra.mxu1 %v2529_v25 }
0x1160   : > { %1631 = vmatprep.subr.bf16.mxu1 %v2534_v27 }
0x1163   : > { %1632 = vmatpush1.bf16.msra.mxu1 %v2540_v28  ;;  %v1354_v51 = vpop.permute.xlu0 %1353 }
0x1164   : > { %1633 = vmatprep.subr.bf16.mxu1 %v2546_v30 }
0x1166   : > { %1936 = vmatmul.mubr.msk.bf16.gmra.mrb[36].mxu1 %vm148_vm0, %v1354_v51 }
0x1167   : > { %1634 = vmatpush1.bf16.msra.mxu1 %v2563_v33  ;;  %1661 = vmatprep.mubr.bf16.mxu1 %v2389_v31 }
0x1168   : > { %1635 = vmatprep.subr.bf16.mxu1 %v2573_v35 }
0x116b   : > { %1636 = vmatpush1.bf16.msra.mxu1 %v2585_v37 }
0x116c   :  { %1993 = vmatprep.subr.bf16.mxu1 (%p58_p0), %v2402_v1 }
0x116e   : > { %v1325_v34 = vpop.permute.xlu1 %1324 }
0x116f   : > { %v1335_v25 = vmul.f32 %v1325_v34, %v2486_v14  ;;  %v1336_v27 = vmul.f32 %v1325_v34, %v2488_v15 }
0x1171   : > { %v1341_v30 = vadd.f32 %v1335_v25, %v2490_v16  ;;  %v1342_v33 = vadd.f32 %v1336_v27, %v2492_v17 }
0x1172   : > { %v1333_v54 = vpop.permute.xlu1 %1332 }
0x1173   : > { %v1339_v57 = vmul.f32 %v1333_v54, %v2486_v14  ;;  %v1340_v52 = vmul.f32 %v1333_v54, %v2488_v15 }
0x1174   : > { %v1329_v36 = vpop.permute.xlu0 %1328 }
0x1175   : > { %v1337_v28 = vmul.f32 %v1329_v36, %v2486_v14  ;;  %v1338_v32 = vmul.f32 %v1329_v36, %v2488_v15  ;;  %v1345_v60 = vadd.f32 %v1339_v57, %v2490_v16  ;;  %v1346_v18 = vadd.f32 %v1340_v52, %v2492_v17 }
0x1176   : > { %v2399_v57 = vmov 10  }
0x1177   : > { %v1343_v49 = vadd.f32 %v1337_v28, %v2490_v16  ;;  %v1344_v37 = vadd.f32 %v1338_v32, %v2492_v17  ;;  %2095 = vset.pattern.permute.xlu1 %v2399_v57  ;;  %2094 = vset.pattern.permute.xlu0 %v2399_v57 }
0x1231   : > { %v1395_v35 = vpop.f32.mrb[32].mxu1 }
0x1232   : > { %v1396_v48 = vadd.f32 %v1395_v35, %v1341_v30  ;;  %v1397_v53 = vpop.f32.mrb[33].mxu1 }
0x1233   : > { %v1399_v56 = vpop.f32.mrb[34].mxu1  ;;  %v1398_v20 = vadd.f32 %v1397_v53, %v1342_v33 }
0x1234   : > { %2260 = vtanh.f32 %v1396_v48  ;;  %v1400_v59 = vadd.f32 %v1399_v56, %v1343_v49  ;;  %v1401_v55 = vpop.f32.mrb[35].mxu1 }
0x1235   : > { %v1402_v58 = vadd.f32 %v1401_v55, %v1344_v37 }
0x1236   : > { %2262 = vtanh.f32 %v1400_v59 }
0x1237   : > { %2264 = vtanh.f32 %v1398_v20 }
0x1238   : > { %2266 = vtanh.f32 %v1402_v58 }
0x1239   : > { %v1405_v61 = vpop.f32.mrb[36].mxu1 }
0x123a   : > { %v1406_v12 = vadd.f32 %v1405_v61, %v1345_v60  ;;  %v1407_v19 = vpop.f32.mrb[37].mxu1 }
0x123b   : > { %v1409_v0 = vpop.f32.mrb[38].mxu1  ;;  %v1408_v7 = vadd.f32 %v1407_v19, %v1346_v18 }
0x123c   : > { %2268 = vtanh.f32 %v1406_v12  ;;  %v1410_v11 = vpop.f32.mrb[39].mxu1 }
0x123d   : > { %2270 = vtanh.f32 %v1408_v7 }
0x123e   : > { %v2261_v22 = vpop.eup %2260 }
0x123f   : > { %v1418_v13 = vmul.f32 0.5, %v2261_v22 }
0x1240   : > { %v2263_v21 = vpop.eup %2262 }
0x1241   : > { %v1421_v26 = vadd.f32 0.5, %v1418_v13  ;;  %v1419_v24 = vmul.f32 0.5, %v2263_v21  ;;  %v2265_v29 = vpop.eup %2264 }
0x1242   : > { %v2267_v42 = vpop.eup %2266  ;;  %v1424_v49 = vmul.f32 0.5, %v2265_v29 }
0x1243   : > { %v1422_v38 = vadd.f32 0.5, %v1419_v24  ;;  %v1433_v44 = vmul.f32 %v2265_v29, %v1421_v26  ;;  %v1430_v51 = vmul.f32 %v1421_v26, %v2985_v62  ;;  %v1425_v54 = vmul.f32 0.5, %v2267_v42 }
0x1244   : > { %v1427_v35 = vadd.f32 0.5, %v1424_v49 }
0x1245   : > { %1439 = vrot.lane.b32.xlu1 %v1433_v44, %s2388_s3  ;;  %v1434_v46 = vmul.f32 %v2267_v42, %v1422_v38  ;;  %v1431_v25 = vmul.f32 %v1422_v38, %v2989_v63  ;;  %v1428_v37 = vadd.f32 0.5, %v1425_v54 }
0x1246   : > { %v2269_v43 = vpop.eup %2268 }
0x1247   : > { %v1420_v47 = vmul.f32 0.5, %v2269_v43  ;;  %1441 = vrot.lane.b32.xlu0 %v1434_v46, %s2388_s3  ;;  %v2271_v45 = vpop.eup %2270 }
0x1248   : > { %v1426_v56 = vmul.f32 0.5, %v2271_v45 }
0x1249   : > { %v1423_v41 = vadd.f32 0.5, %v1420_v47 }
0x124b   : > { %v1435_v50 = vmul.f32 %v2271_v45, %v1423_v41  ;;  %v1432_v30 = vmul.f32 %v1423_v41, %v2993_v10  ;;  %v1429_v10 = vadd.f32 0.5, %v1426_v56 }
0x124d   : > { %1443 = vrot.lane.b32.xlu1 %v1435_v50, %s2388_s3 }
0x12b7   : > { %v1440_v34 = vpop.permute.xlu1 %1439 }
0x12b8   : > { %v3028_v36 = vadd.f32 %v1440_v34, %v1430_v51 }
0x12b9   : > { %v1442_v27 = vpop.permute.xlu0 %1441 }
0x12ba   : > { %2272 = vtanh.f32 %v3028_v36  ;;  %v3032_v28 = vadd.f32 %v1442_v27, %v1431_v25 }
0x12bc   : > { %2274 = vtanh.f32 %v3032_v28 }
0x12bf   : > { %v1444_v32 = vpop.permute.xlu1 %1443 }
0x12c0   : > { %v3036_v33 = vadd.f32 %v1444_v32, %v1432_v30 }
0x12c2   : > { %2276 = vtanh.f32 %v3036_v33 }
0x12c4   : > { %v2273_v62 = vpop.eup %2272 }
0x12c5   : > { %v1454_v48 = vmul.f32 %v2273_v62, %v1427_v35 }
0x12c6   : > { %v2275_v63 = vpop.eup %2274 }
0x12c7   : > { %v1455_v53 = vmul.f32 %v2275_v63, %v1428_v37 }
0x12c9   : > { %v1481_v20 = vpack.c.bf16 %v1455_v53, %v1454_v48 }
0x12cb   : > { %1485 = vrot.lane.b32.xlu0 %v1481_v20, %s2388_s3 }
0x12cc   : > { %v2277_v59 = vpop.eup %2276 }
0x12cd   : > { %v1456_v55 = vmul.f32 %v2277_v59, %v1429_v10 }
0x12cf   : > { %v1482_v52 = vpack.c.bf16 %v1456_v55, %v1456_v55  ;;  %1458 = vperm.xlu0 %2094, %v2814_v23  }
0x12d1   : > { %1487 = vrot.lane.b32.xlu1 %v1482_v52, %s2388_s3 }
0x12d5   : > { %1462 = vperm.xlu1 %2095, %v2823_v40  }
0x12d9   : > { %1466 = vperm.xlu1 %2095, %v2819_v39  }
0x133d   : > { %v1486_v58 = vpop.permute.xlu0 %1485 }
0x133e   : > { %1937 = vmatmul.mubr.msk.bf16.vlgmr.msra.gmra.mrb[40].mxu0 %vm148_vm0, %v1486_v58 }
0x133f   : > { %1537 = vmatprep.mubr.bf16.mxu0 %v2389_v31 }
0x1343   : > { %v1488_v60 = vpop.permute.xlu1 %1487 }
0x1346   : > { %1938 = vmatmul.mubr.msk.bf16.gmra.mrb[44].mxu0 %vm148_vm0, %v1488_v60 }
0x1347   :  { %1972 = vmatprep.mubr.msk.f32.mxu0 (%p58_p0), %vm2403_vm1, %v2404_v5 }
0x134e   : > { %v1459_v61 = vpop.permute.xlu0 %1458 }
0x134f   : > { %v1469_v18 = vmul.f32 %v1459_v61, %v2486_v14  ;;  %v1470_v19 = vmul.f32 %v1459_v61, %v2488_v15 }
0x1351   : > { %v1475_v39 = vadd.f32 %v1469_v18, %v2490_v16  ;;  %v1476_v7 = vadd.f32 %v1470_v19, %v2492_v17 }
0x1354   : > { %v1463_v12 = vpop.permute.xlu1 %1462 }
0x1355   : > { %v1471_v23 = vmul.f32 %v1463_v12, %v2486_v14  ;;  %v1472_v40 = vmul.f32 %v1463_v12, %v2488_v15 }
0x1357   : > { %v1477_v0 = vadd.f32 %v1471_v23, %v2490_v16  ;;  %v1478_v13 = vadd.f32 %v1472_v40, %v2492_v17 }
0x1358   : > { %v1467_v11 = vpop.permute.xlu1 %1466 }
0x1359   : > { %v1473_v29 = vmul.f32 %v1467_v11, %v2486_v14  ;;  %v1474_v46 = vmul.f32 %v1467_v11, %v2488_v15 }
0x135b   : > { %v1479_v47 = vadd.f32 %v1473_v29, %v2490_v16  ;;  %v1480_v45 = vadd.f32 %v1474_v46, %v2492_v17  ;;  %v2319_v46 = vld [vmem:[%s2551_s19 + $0x8] sm:$0xff] }
0x1411   : > { %v1529_v22 = vpop.f32.mrb[40].mxu0 }
0x1412   : > { %v1530_v21 = vadd.f32 %v1529_v22, %v1475_v39  ;;  %v1531_v26 = vpop.f32.mrb[41].mxu0 }
0x1413   : > { %v1533_v24 = vpop.f32.mrb[42].mxu0  ;;  %v1532_v38 = vadd.f32 %v1531_v26, %v1476_v7 }
0x1414   : > { %2278 = vtanh.f32 %v1530_v21  ;;  %v1534_v44 = vadd.f32 %v1533_v24, %v1477_v0  ;;  %v1535_v42 = vpop.f32.mrb[43].mxu0  ;;  %v2400_v21 = vmov 11  }
0x1415   : > { %v1536_v43 = vadd.f32 %v1535_v42, %v1478_v13  ;;  %2096 = vset.pattern.permute.xlu1 %v2400_v21  ;;  %2097 = vset.pattern.permute.xlu0 %v2400_v21  ;;  %v2318_v42 = vld [vmem:[%s2551_s19 + $0x10] sm:$0x3] }
0x1416   : > { %2280 = vtanh.f32 %v1534_v44  ;;  %v2317_v44 = vld [vmem:[%s2551_s19] sm:$0xff] }
0x1417   : > { %2282 = vtanh.f32 %v1532_v38 }
0x1418   : > { %2284 = vtanh.f32 %v1536_v43 }
0x1419   : > { %v1539_v41 = vpop.f32.mrb[44].mxu0 }
0x141a   : > { %v1540_v50 = vadd.f32 %v1539_v41, %v1479_v47  ;;  %v1541_v51 = vpop.f32.mrb[45].mxu0 }
0x141b   : > { %v1543_v34 = vpop.f32.mrb[46].mxu0  ;;  %v1542_v25 = vadd.f32 %v1541_v51, %v1480_v45 }
0x141c   : > { %2286 = vtanh.f32 %v1540_v50  ;;  %v1544_v27 = vpop.f32.mrb[47].mxu0 }
0x141d   : > { %2288 = vtanh.f32 %v1542_v25 }
0x141e   : > { %v2279_v30 = vpop.eup %2278 }
0x141f   : > { %v1552_v32 = vmul.f32 0.5, %v2279_v30 }
0x1420   : > { %v2281_v49 = vpop.eup %2280 }
0x1421   : > { %v1555_v54 = vadd.f32 0.5, %v1552_v32  ;;  %v1553_v62 = vmul.f32 0.5, %v2281_v49  ;;  %v2283_v35 = vpop.eup %2282 }
0x1422   : > { %v2285_v48 = vpop.eup %2284  ;;  %v1558_v40 = vmul.f32 0.5, %v2283_v35 }
0x1423   : > { %v1556_v37 = vadd.f32 0.5, %v1553_v62  ;;  %v1567_v63 = vmul.f32 %v2283_v35, %v1555_v54  ;;  %v1564_v55 = vmul.f32 %v1555_v54, %v3028_v36  ;;  %v1559_v39 = vmul.f32 0.5, %v2285_v48 }
0x1424   : > { %v1561_v0 = vadd.f32 0.5, %v1558_v40 }
0x1425   : > { %1573 = vrot.lane.b32.xlu0 %v1567_v63, %s2388_s3  ;;  %v1568_v53 = vmul.f32 %v2285_v48, %v1556_v37  ;;  %v1565_v60 = vmul.f32 %v1556_v37, %v3032_v28  ;;  %v1562_v28 = vadd.f32 0.5, %v1559_v39 }
0x1426   : > { %v2287_v56 = vpop.eup %2286 }
0x1427   : > { %v1554_v57 = vmul.f32 0.5, %v2287_v56  ;;  %1575 = vrot.lane.b32.xlu1 %v1568_v53, %s2388_s3  ;;  %v2289_v10 = vpop.eup %2288 }
0x1428   : > { %v1560_v13 = vmul.f32 0.5, %v2289_v10 }
0x1429   : > { %v1557_v20 = vadd.f32 0.5, %v1554_v57 }
0x142a   : > { %v1563_v26 = vadd.f32 0.5, %v1560_v13 }
0x142b   : > { %v1569_v59 = vmul.f32 %v2289_v10, %v1557_v20  ;;  %v1566_v12 = vmul.f32 %v1557_v20, %v3036_v33 }
0x142d   : > { %1577 = vrot.lane.b32.xlu0 %v1569_v59, %s2388_s3 }
0x1497   : > { %v1574_v52 = vpop.permute.xlu0 %1573 }
0x1498   : > { %v3063_v58 = vadd.f32 %v1574_v52, %v1564_v55 }
0x1499   : > { %v1576_v61 = vpop.permute.xlu1 %1575 }
0x149a   : > { %2290 = vtanh.f32 %v3063_v58  ;;  %v3067_v18 = vadd.f32 %v1576_v61, %v1565_v60 }
0x149c   : > { %2292 = vtanh.f32 %v3067_v18 }
0x149f   : > { %v1578_v23 = vpop.permute.xlu0 %1577 }
0x14a0   : > { %v3071_v19 = vadd.f32 %v1578_v23, %v1566_v12 }
0x14a2   : > { %2294 = vtanh.f32 %v3071_v19 }
0x14a4   : > { %v2291_v36 = vpop.eup %2290 }
0x14a5   : > { %v1588_v11 = vmul.f32 %v2291_v36, %v1561_v0 }
0x14a6   : > { %v2293_v7 = vpop.eup %2292 }
0x14a7   : > { %v1589_v22 = vmul.f32 %v2293_v7, %v1562_v28 }
0x14a9   : > { %v1615_v33 = vpack.c.bf16 %v1589_v22, %v1588_v11 }
0x14ab   : > { %1619 = vrot.lane.b32.xlu1 %v1615_v33, %s2388_s3 }
0x14ac   : > { %v2295_v24 = vpop.eup %2294 }
0x14ad   : > { %v1590_v29 = vmul.f32 %v2295_v24, %v1563_v26 }
0x14af   : > { %v1616_v38 = vpack.c.bf16 %v1590_v29, %v1590_v29  ;;  %1592 = vperm.xlu1 %2096, %v2317_v44  }
0x14b1   : > { %1621 = vrot.lane.b32.xlu0 %v1616_v38, %s2388_s3 }
0x14b3   : > { %1600 = vperm.xlu1 %2096, %v2318_v42  }
0x14b5   : > { %1596 = vperm.xlu0 %2097, %v2319_v46  }
0x151d   : > { %v1620_v43 = vpop.permute.xlu1 %1619 }
0x151e   : > { %1939 = vmatmul.mubr.msk.bf16.vlgmr.msra.gmra.mrb[40].mxu1 %vm148_vm0, %v1620_v43 }
0x151f   : > { %1671 = vmatprep.mubr.bf16.mxu1 %v2389_v31 }
0x1523   : > { %v1622_v47 = vpop.permute.xlu0 %1621 }
0x1526   : > { %1940 = vmatmul.mubr.msk.bf16.gmra.mrb[44].mxu1 %vm148_vm0, %v1622_v47 }
0x1527   :  { %1975 = vmatprep.mubr.msk.f32.mxu1 (%p58_p0), %vm2403_vm1, %v2404_v5 }
0x152e   : > { %v1593_v41 = vpop.permute.xlu1 %1592 }
0x152f   : > { %v1603_v50 = vmul.f32 %v1593_v41, %v2486_v14  ;;  %v1604_v51 = vmul.f32 %v1593_v41, %v2488_v15 }
0x1531   : > { %v1609_v25 = vadd.f32 %v1603_v50, %v2490_v16  ;;  %v1610_v30 = vadd.f32 %v1604_v51, %v2492_v17 }
0x1532   : > { %v1601_v49 = vpop.permute.xlu1 %1600 }
0x1533   : > { %v1607_v63 = vmul.f32 %v1601_v49, %v2486_v14  ;;  %v1608_v57 = vmul.f32 %v1601_v49, %v2488_v15 }
0x1534   : > { %v1597_v45 = vpop.permute.xlu0 %1596 }
0x1535   : > { %v1605_v34 = vmul.f32 %v1597_v45, %v2486_v14  ;;  %v1606_v27 = vmul.f32 %v1597_v45, %v2488_v15  ;;  %v1613_v10 = vadd.f32 %v1607_v63, %v2490_v16  ;;  %v1614_v55 = vadd.f32 %v1608_v57, %v2492_v17  ;;  %v1727_v63 = vld [vmem:[%s3169_s4 + $0x10] sm:$0xff] (%p58_p0) }
0x1536   :  { %v1991_v14 = vpack.c.bf16 (%p58_p0), %v1732_v9, %v1731_v8 }
0x1537   : > { %v1611_v32 = vadd.f32 %v1605_v34, %v2490_v16  ;;  %v1612_v54 = vadd.f32 %v1606_v27, %v2492_v17 }
0x15f1   : > { %v1663_v31 = vpop.f32.mrb[40].mxu1 }
0x15f2   : > { %v1664_v62 = vadd.f32 %v1663_v31, %v1609_v25  ;;  %v1665_v35 = vpop.f32.mrb[41].mxu1 }
0x15f3   : > { %v1667_v37 = vpop.f32.mrb[42].mxu1  ;;  %v1666_v48 = vadd.f32 %v1665_v35, %v1610_v30  ;;  %v1725_v35 = vld [vmem:[%s3169_s4] sm:$0xff] (%p58_p0) }
0x15f4   : > { %2296 = vtanh.f32 %v1664_v62  ;;  %v1668_v53 = vadd.f32 %v1667_v37, %v1611_v32  ;;  %v1669_v56 = vpop.f32.mrb[43].mxu1  ;;  %v1726_v37 = vld [vmem:[%s3169_s4 + $0x8] sm:$0xff] (%p58_p0) }
0x15f5   : > { %v1670_v20 = vadd.f32 %v1669_v56, %v1612_v54 }
0x15f6   : > { %2298 = vtanh.f32 %v1668_v53  ;;  %v1728_v53 = vld [vmem:[%s3169_s4 + $0x18] sm:$0xff] (%p58_p0) }
0x15f7   : > { %2300 = vtanh.f32 %v1666_v48  ;;  %v1982_v48 = vpack.c.bf16 (%p58_p0), %v1726_v37, %v1725_v35  ;;  %v1985_v2 = vpack.c.bf16 (%p58_p0), %v1728_v53, %v1727_v63 }
0x15f8   : > { %2302 = vtanh.f32 %v1670_v20 }
0x15f9   : > { %v1673_v59 = vpop.f32.mrb[44].mxu1  ;;  %1997 = vmatpush3.bf16.msra.mxu1 (%p58_p0), %v1982_v48  ;;  %1983 = vmatpush3.bf16.msra.mxu0 (%p58_p0), %v1982_v48 }
0x15fa   : > { %v1674_v52 = vadd.f32 %v1673_v59, %v1613_v10  ;;  %v1675_v60 = vpop.f32.mrb[45].mxu1  ;;  %1994 = vmatprep.subr.bf16.mxu1 (%p58_p0), %v2402_v1  ;;  %1984 = vmatprep.subr.bf16.mxu0 (%p58_p0), %v2402_v1 }
0x15fb   : > { %v1677_v61 = vpop.f32.mrb[46].mxu1  ;;  %v1676_v12 = vadd.f32 %v1675_v60, %v1614_v55 }
0x15fc   : > { %2304 = vtanh.f32 %v1674_v52  ;;  %v1678_v23 = vpop.f32.mrb[47].mxu1 }
0x15fd   : > { %2306 = vtanh.f32 %v1676_v12  ;;  %1998 = vmatpush3.bf16.msra.mxu1 (%p58_p0), %v1985_v2  ;;  %1986 = vmatpush3.bf16.msra.mxu0 (%p58_p0), %v1985_v2 }
0x15fe   : > { %v2297_v40 = vpop.eup %2296  ;;  %1995 = vmatprep.subr.bf16.mxu1 (%p58_p0), %v2402_v1  ;;  %1987 = vmatprep.subr.bf16.mxu0 (%p58_p0), %v2402_v1 }
0x15ff   : > { %v1686_v39 = vmul.f32 0.5, %v2297_v40 }
0x1600   : > { %v2299_v36 = vpop.eup %2298 }
0x1601   : > { %v1689_v0 = vadd.f32 0.5, %v1686_v39  ;;  %v1687_v28 = vmul.f32 0.5, %v2299_v36  ;;  %v2301_v7 = vpop.eup %2300  ;;  %1999 = vmatpush3.bf16.msra.mxu1 (%p58_p0), %v1988_v6  ;;  %1989 = vmatpush3.bf16.msra.mxu0 (%p58_p0), %v1988_v6 }
0x1602   : > { %v2303_v13 = vpop.eup %2302  ;;  %v1692_v45 = vmul.f32 0.5, %v2301_v7  ;;  %1996 = vmatprep.subr.bf16.mxu1 (%p58_p0), %v2402_v1  ;;  %1990 = vmatprep.subr.bf16.mxu0 (%p58_p0), %v2402_v1 }
0x1603   : > { %v1690_v11 = vadd.f32 0.5, %v1687_v28  ;;  %v1701_v22 = vmul.f32 %v2301_v7, %v1689_v0  ;;  %v1698_v44 = vmul.f32 %v1689_v0, %v3063_v58  ;;  %v1693_v51 = vmul.f32 0.5, %v2303_v13 }
0x1604   : > { %v1695_v34 = vadd.f32 0.5, %v1692_v45 }
0x1605   : > { %1707 = vrot.lane.b32.xlu1 %v1701_v22, %s2388_s3  ;;  %v1702_v21 = vmul.f32 %v2303_v13, %v1690_v11  ;;  %v1699_v46 = vmul.f32 %v1690_v11, %v3067_v18  ;;  %v1696_v27 = vadd.f32 0.5, %v1693_v51  ;;  %2000 = vmatpush3.bf16.msra.mxu1 (%p58_p0), %v1991_v14 }
0x1606   : > { %v2305_v33 = vpop.eup %2304  ;;  %1992 = vmatpush3.bf16.msra.mxu0 (%p58_p0), %v1991_v14 }
0x1607   : > { %v1688_v26 = vmul.f32 0.5, %v2305_v33  ;;  %1709 = vrot.lane.b32.xlu0 %v1702_v21, %s2388_s3  ;;  %v2307_v29 = vpop.eup %2306 }
0x1608   : > { %v1694_v32 = vmul.f32 0.5, %v2307_v29 }
0x1609   : > { %v1691_v24 = vadd.f32 0.5, %v1688_v26 }
0x160a   : > { %v1697_v49 = vadd.f32 0.5, %v1694_v32 }
0x160b   : > { %v1703_v38 = vmul.f32 %v2307_v29, %v1691_v24  ;;  %v1700_v41 = vmul.f32 %v1691_v24, %v3071_v19 }
0x160d   : > { %1711 = vrot.lane.b32.xlu1 %v1703_v38, %s2388_s3 }
0x1677   : > { %v1708_v42 = vpop.permute.xlu1 %1707 }
0x1678   : > { %v1716_v20 = vadd.f32 %v1708_v42, %v1698_v44  }
0x1679   : > { %v1710_v43 = vpop.permute.xlu0 %1709 }
0x167a   : > { %2308 = vtanh.f32 %v1716_v20  ;;  %v1717_v47 = vadd.f32 %v1710_v43, %v1699_v46  }
0x167c   : > { %2310 = vtanh.f32 %v1717_v47  ;;  %v3173_v19 = vmov %v1717_v47 }
0x167f   : > { %v1712_v50 = vpop.permute.xlu1 %1711 }
0x1680   : > { %v1718_v18 = vadd.f32 %v1712_v50, %v1700_v41  }
0x1682   : > { %2312 = vtanh.f32 %v1718_v18  ;;  %v1941_v18 = vld [vmem:[%s3170_s5] ss:$0 sm:$0xff] (%p58_p0) }
0x1684   : > { %v2309_v25 = vpop.eup %2308 }
0x1685   : > { %v1722_v30 = vmul.f32 %v2309_v25, %v1695_v34  }
0x1686   : > { %v2311_v58 = vpop.eup %2310 }
0x1687   : > { %v1723_v31 = vmul.f32 %v2311_v58, %v1696_v27   ;;  %v3176_v23 = vmov %v1722_v30 }
0x1689   : > { %v3175_v22 = vmov %v1723_v31  ;;  %60 = sbr.rel (!%p58_p0) target bundleno = 7 (0x7), region = 52  ;;  %1745 = vrot.lane.b32.xlu0 (%p58_p0), %v1723_v31, %s2401_s26 }
0x168c   : > { %v2313_v54 = vpop.eup %2312 }
0x168d   : > { %v1724_v62 = vmul.f32 %v2313_v54, %v1697_v49   ;;  %1743 = vrot.lane.b32.xlu0 (%p58_p0), %v1722_v30, %s2401_s26 }
0x168f   : > { %v3174_v21 = vmov %v1724_v62  ;;  %1747 = vrot.lane.b32.xlu1 (%p58_p0), %v1724_v62, %s2401_s26 }
0x16fb   :  { %v1746_v15 = vpop.permute.xlu0 %1745 }
0x16fc   :  { %1976 = vmatmul.mubr.msk.f32.vlgmr.msra.gmra.mrb[0].mxu1 %vm148_vm0, %v1746_v15 }
0x16fd   :  { %1978 = vmatprep.mubr.msk.f32.mxu1 %vm2403_vm1, %v2404_v5 }
0x16ff   :  { %v1744_v17 = vpop.permute.xlu0 %1743 }
0x1700   :  { %1973 = vmatmul.mubr.msk.f32.vlgmr.msra.gmra.mrb[0].mxu0 %vm148_vm0, %v1744_v17 }
0x1701   :  { %v1748_v16 = vpop.permute.xlu1 %1747 }
0x1702   :  { %1979 = vmatmul.mubr.msk.f32.gmra.mrb[2].mxu1 %vm148_vm0, %v1748_v16 }
0x17cf   :  { %v1827_v19 = vpop.f32.mrb[0].mxu1 }
0x17d0   :  { %v1828_v56 = vadd.f32 %v1941_v18, %v1827_v19  ;;  %v1977_v57 = vpop.f32.mrb[1].mxu1 }
0x17d2   :  { %v1840_v20 = vsel %vm1836_vm2, %v1828_v56, -inf }
0x17d3   :  { %1841 = vmax.xlane.f32.xlu0 %v1840_v20  ;;  %v1822_v10 = vpop.f32.mrb[0].mxu0 }
0x17d4   :  { %v1823_v55 = vadd.f32 %v1941_v18, %v1822_v10  ;;  %v1974_v60 = vpop.f32.mrb[1].mxu0 }
0x17d5   :  { %v1832_v59 = vpop.f32.mrb[2].mxu1 }
0x17d6   :  { %v1833_v52 = vadd.f32 %v1941_v18, %v1832_v59  ;;  %v1980_v61 = vpop.f32.mrb[3].mxu1  ;;  %v1837_v23 = vsel %vm1836_vm2, %v1823_v55, -inf }
0x17d7   :  { %1838 = vmax.xlane.f32.xlu1 %v1837_v23 }
0x17d8   :  { %v1844_v12 = vsel %vm1843_vm3, %v1833_v52, -inf }
0x17d9   :  { %1845 = vmax.xlane.f32.xlu0 %v1844_v12 }
0x1860   :  { %v1842_v40 = vpop.xlane.xlu0 %1841 }
0x1861   :  { %v1848_v39 = vsub.f32 %v1828_v56, %v1842_v40 }
0x1863   :  { %v1852_v36 = vmul.f32 1.442695, %v1848_v39 }
0x1864   :  { %v1839_v28 = vpop.xlane.xlu1 %1838 }
0x1865   :  { %2320 = vpow2.f32 %v1852_v36  ;;  %v1847_v11 = vsub.f32 %v1823_v55, %v1839_v28 }
0x1866   :  { %v1846_v0 = vpop.xlane.xlu0 %1845 }
0x1867   :  { %v1849_v7 = vsub.f32 %v1833_v52, %v1846_v0  ;;  %v1850_v22 = vmul.f32 1.442695, %v1847_v11 }
0x1869   :  { %v1854_v13 = vmul.f32 1.442695, %v1849_v7  ;;  %2322 = vpow2.f32 %v1850_v22 }
0x186b   :  { %2324 = vpow2.f32 %v1854_v13 }
0x186f   :  { %v2321_v21 = vpop.eup %2320 }
0x1870   :  { %v1859_v33 = vsel %vm1836_vm2, %v2321_v21, 0.0 }
0x1871   :  { %1860 = vadd.xlane.f32.xlu0 %v1859_v33 }
0x1873   :  { %v2323_v26 = vpop.eup %2322 }
0x1874   :  { %v1856_v24 = vsel %vm1836_vm2, %v2323_v26, 0.0 }
0x1875   :  { %v2325_v29 = vpop.eup %2324  ;;  %1857 = vadd.xlane.f32.xlu1 %v1856_v24 }
0x1876   :  { %v1862_v38 = vsel %vm1843_vm3, %v2325_v29, 0.0 }
0x1879   :  { %1863 = vadd.xlane.f32.xlu1 %v1862_v38 }
0x18fe   :  { %v1861_v44 = vpop.xlane.xlu0 %1860 }
0x18ff   :  { %2326 = vlog2.f32 %v1861_v44 }
0x1902   :  { %v1858_v42 = vpop.xlane.xlu1 %1857 }
0x1903   :  { %2328 = vlog2.f32 %v1858_v42 }
0x1906   :  { %v1864_v46 = vpop.xlane.xlu1 %1863 }
0x1907   :  { %2330 = vlog2.f32 %v1864_v46 }
0x1909   :  { %v2327_v43 = vpop.eup %2326 }
0x190a   :  { %v1868_v47 = vmul.f32 0.6931472, %v2327_v43 }
0x190c   :  { %v1872_v41 = vadd.f32 %v1868_v47, %v1842_v40 }
0x190d   :  { %v2329_v45 = vpop.eup %2328 }
0x190e   :  { %v1875_v50 = vsub.f32 %v1828_v56, %v1872_v41  ;;  %v1866_v51 = vmul.f32 0.6931472, %v2329_v45 }
0x1910   :  { %1878 = vst.msk [vmem:[%s3171_s6 + $0x8] sm:$0xff] %vm1836_vm2, %v1875_v50  ;;  %v1871_v34 = vadd.f32 %v1866_v51, %v1839_v28 }
0x1911   :  { %v2331_v25 = vpop.eup %2330 }
0x1912   :  { %v1874_v27 = vsub.f32 %v1823_v55, %v1871_v34  ;;  %v1870_v30 = vmul.f32 0.6931472, %v2331_v25 }
0x1914   :  { %1877 = vst.msk [vmem:[%s3171_s6] sm:$0xff] %vm1836_vm2, %v1874_v27  ;;  %v1873_v58 = vadd.f32 %v1870_v30, %v1846_v0 }
0x1916   :  { %v1876_v32 = vsub.f32 %v1833_v52, %v1873_v58 }
0x1918   :  { %1879 = vst.msk [vmem:[%s3171_s6 + $0x10] sm:$0x3] %vm1843_vm3, %v1876_v32 }

</bundles_post_ra>
